<compile_context>
chip_gen: v6e
topology: v6e:2x2x1
jax: 0.10.0
libtpu: 0.0.40
codegen_flags: <defaults>
</compile_context>

<pallas_src>
import functools

import jax
import jax.numpy as jnp
from jax import lax
from jax.experimental import pallas as pl
from jax.experimental.pallas import tpu as pltpu


LANE = 128  # TPU lane width; layer-0 Cout / layer-1 Cin are zero-padded to this.


# ----------------------------------------------------------------------------
# Pallas kernels
# ----------------------------------------------------------------------------
def _conv0_bn_relu_pool_kernel(p_ref, w_ref, shift_ref, o_ref):
    """Layer 0: im2col matmul + folded-BN shift + ReLU + fused 2x2 maxpool.

    p_ref:     (1, 4*Q, K)   bf16  patch rows ordered (pool-sibling p, ho, wo)
    w_ref:     (K, Cout)     bf16  BN scale folded in; K/Cout zero-padded
    shift_ref: (1, Cout)     f32
    o_ref:     (1, Q, Cout)  bf16  pooled activation, row = ho*Wo + wo
    """
    y = jnp.dot(p_ref[0], w_ref[...], preferred_element_type=jnp.float32)
    y = jnp.maximum(y + shift_ref[...], 0.0)                 # BN shift + ReLU (f32)
    q = o_ref.shape[1]
    pooled = jnp.maximum(jnp.maximum(y[0 * q:1 * q], y[1 * q:2 * q]),
                         jnp.maximum(y[2 * q:3 * q], y[3 * q:4 * q]))
    o_ref[0] = pooled.astype(o_ref.dtype)


def _conv3x3_tap_bn_relu_kernel(x_ref, w_ref, shift_ref, o_ref, *, H, W):
    """3x3 SAME conv on one image; the 9 taps are built in-kernel (no im2col).

    x_ref:     (1, H+2, W+2, C)  bf16  spatially zero-padded NHWC activation
    w_ref:     (9, C, Cout)      bf16  BN scale folded in
    shift_ref: (1, Cout)         f32
    o_ref:     (1, H*W, Cout)    bf16
    """
    c = x_ref.shape[-1]
    cout = w_ref.shape[-1]
    acc = jnp.zeros((H * W, cout), jnp.float32)
    for ky in range(3):
        for kx in range(3):
            tap = x_ref[0, ky:ky + H, kx:kx + W, :].reshape(H * W, c)
            acc = acc + jnp.dot(tap, w_ref[3 * ky + kx],
                                preferred_element_type=jnp.float32)
    y = jnp.maximum(acc + shift_ref[...], 0.0)
    o_ref[0] = y.astype(o_ref.dtype)


def _linear_kernel(x_ref, w_ref, b_ref, o_ref, acc_ref):
    """K-tiled classifier matmul with an f32 VMEM accumulator."""
    @pl.when(pl.program_id(0) == 0)
    def _init():
        acc_ref[...] = jnp.zeros_like(acc_ref)

    acc_ref[...] += jnp.dot(x_ref[...], w_ref[...],
                            preferred_element_type=jnp.float32)

    @pl.when(pl.program_id(0) == pl.num_programs(0) - 1)
    def _finish():
        o_ref[...] = acc_ref[...] + b_ref[...]


# ----------------------------------------------------------------------------
# Wrappers (glue: pad / patch building / reshapes stay in plain JAX)
# ----------------------------------------------------------------------------
def conv0_bn_relu_pool(x_nhwc, w_folded, shift):
    """x: (B,H,W,Cin) f32 -> pooled activation (B, (H//2)*(W//2), Cout) bf16."""
    B, H, W, Cin = x_nhwc.shape
    Ho, Wo = H // 2, W // 2
    Q = Ho * Wo
    K, Cout = w_folded.shape

    # im2col (tap order ky,kx,c) in bf16, kept spatial so pool siblings group.
    x16 = x_nhwc.astype(jnp.bfloat16)
    xp = jnp.pad(x16, ((0, 0), (1, 1), (1, 1), (0, 0)))
    cols = [xp[:, ky:ky + H, kx:kx + W, :] for ky in range(3) for kx in range(3)]
    pfull = jnp.concatenate(cols, axis=-1)                        # (B,H,W,9*Cin)
    # the 4 maxpool siblings become 4 contiguous Q-row planes: row p*Q+ho*Wo+wo
    planes = [pfull[:, hp::2, wp::2, :] for hp in (0, 1) for wp in (0, 1)]
    patches = jnp.stack(planes, axis=1).reshape(B, 4 * Q, 9 * Cin)
    patches = jnp.pad(patches, ((0, 0), (0, 0), (0, K - 9 * Cin)))  # K 27 -> 32

    return pl.pallas_call(
        _conv0_bn_relu_pool_kernel,
        out_shape=jax.ShapeDtypeStruct((B, Q, Cout), jnp.bfloat16),
        grid=(B,),
        in_specs=[
            pl.BlockSpec((1, 4 * Q, K), lambda b: (b, 0, 0)),
            pl.BlockSpec((K, Cout), lambda b: (0, 0)),
            pl.BlockSpec((1, Cout), lambda b: (0, 0)),
        ],
        out_specs=pl.BlockSpec((1, Q, Cout), lambda b: (b, 0, 0)),
        compiler_params=pltpu.CompilerParams(
            dimension_semantics=("parallel",)),
    )(patches, w_folded, shift)


def conv3x3_bn_relu(x_padded, w9, shift):
    """x_padded: (B,H+2,W+2,C) bf16, w9: (9,C,Cout) bf16 -> (B, H*W, Cout) bf16."""
    B, Hp, Wp, C = x_padded.shape
    H, W = Hp - 2, Wp - 2
    Cout = w9.shape[-1]
    kernel = functools.partial(_conv3x3_tap_bn_relu_kernel, H=H, W=W)
    return pl.pallas_call(
        kernel,
        out_shape=jax.ShapeDtypeStruct((B, H * W, Cout), jnp.bfloat16),
        grid=(B,),
        in_specs=[
            pl.BlockSpec((1, Hp, Wp, C), lambda b: (b, 0, 0, 0)),
            pl.BlockSpec((9, C, Cout), lambda b: (0, 0, 0)),
            pl.BlockSpec((1, Cout), lambda b: (0, 0)),
        ],
        out_specs=pl.BlockSpec((1, H * W, Cout), lambda b: (b, 0, 0)),
        compiler_params=pltpu.CompilerParams(
            dimension_semantics=("parallel",)),
    )(x_padded, w9, shift)


def linear(x, w, b, *, tk=8192):
    """x: (B,K) bf16, w: (K,N) bf16, b: (1,N) f32 -> (B,N) f32 (K-tiled)."""
    B, K = x.shape
    N = w.shape[1]
    tk = min(tk, K)
    assert K % tk == 0
    return pl.pallas_call(
        _linear_kernel,
        out_shape=jax.ShapeDtypeStruct((B, N), jnp.float32),
        grid=(K // tk,),
        in_specs=[
            pl.BlockSpec((B, tk), lambda k: (0, k)),
            pl.BlockSpec((tk, N), lambda k: (k, 0)),
            pl.BlockSpec((1, N), lambda k: (0, 0)),
        ],
        out_specs=pl.BlockSpec((B, N), lambda k: (0, 0)),
        scratch_shapes=[pltpu.VMEM((B, N), jnp.float32)],
        compiler_params=pltpu.CompilerParams(
            dimension_semantics=("arbitrary",)),
    )(x, w, b)


# ----------------------------------------------------------------------------
# One-time parameter preparation + DepthCNN forward (depth=2)
# ----------------------------------------------------------------------------
def fold_params(conv_params, fc_w, fc_b, eps=1e-5):
    """Fold BN(eval) into the conv weights, zero-pad channels for lane density,
    reshape for the kernels, permute fc rows to NHWC flatten order, cast matmul
    operands to bf16.  Specific to the depth=2 DepthCNN layout."""
    assert len(conv_params) == 2 and conv_params[0]["pool"] and not conv_params[1]["pool"]
    folded = []
    for p in conv_params:
        scale = p["gamma"] / jnp.sqrt(p["var"] + eps)
        folded.append((p["w"] * scale,                            # scale on Cout
                       (p["beta"] - p["mean"] * scale).astype(jnp.float32)))

    # layer 0: (3,3,Cin,64) -> (32, 128): K 27->32, Cout 64->128 (zeros)
    w0, shift0 = folded[0]
    _, _, cin0, cout0 = w0.shape
    k0 = 9 * cin0
    k0_pad = -(-k0 // 32) * 32
    w0 = jnp.pad(w0.reshape(k0, cout0), ((0, k0_pad - k0), (0, LANE - cout0)))
    shift0 = jnp.pad(shift0, (0, LANE - cout0)).reshape(1, LANE)

    # layer 1: (3,3,64,128) -> (9, 128, 128): Cin 64->128 (zeros, matching the
    # zero-padded channels produced by layer 0 -- contributes exactly 0)
    w1, shift1 = folded[1]
    _, _, cin1, cout1 = w1.shape
    w1 = jnp.pad(w1.reshape(9, cin1, cout1), ((0, 0), (0, LANE - cin1), (0, 0)))
    shift1 = shift1.reshape(1, cout1)

    # classifier: permute rows from NCHW (c,h,w) flatten to NHWC (h,w,c) flatten
    fc_in, n_cls = fc_w.shape
    ps = int(round((fc_in // cout1) ** 0.5))
    wfc = fc_w.reshape(cout1, ps, ps, n_cls).transpose(1, 2, 0, 3).reshape(fc_in, n_cls)

    return dict(
        w0=w0.astype(jnp.bfloat16), shift0=shift0,
        w1=w1.astype(jnp.bfloat16), shift1=shift1,
        wfc=wfc.astype(jnp.bfloat16),
        bfc=fc_b.reshape(1, n_cls).astype(jnp.float32),
    )


def depth_cnn_forward(x_nchw, params):
    """DepthCNN(depth=2) forward: x (B,3,32,32) f32 -> logits (B,10) f32."""
    x = jnp.transpose(x_nchw, (0, 2, 3, 1))                      # NCHW -> NHWC
    B, H, W, _ = x.shape
    Ho, Wo = H // 2, W // 2

    # layer 0: conv + BN + ReLU + 2x2 maxpool, one fused kernel
    a0 = conv0_bn_relu_pool(x, params["w0"], params["shift0"])   # (B, Ho*Wo, 128)
    a0 = a0.reshape(B, Ho, Wo, LANE)                             # free (row-major)
    a0 = jnp.pad(a0, ((0, 0), (1, 1), (1, 1), (0, 0)))           # SAME pad for layer 1

    # layer 1: conv + BN + ReLU, taps built in-kernel (no HBM im2col)
    a1 = conv3x3_bn_relu(a0, params["w1"], params["shift1"])     # (B, Ho*Wo, 128)

    # classifier (fc rows were pre-permuted to this NHWC flatten order)
    return linear(a1.reshape(B, -1), params["wfc"], params["bfc"])


def init_params(key, depth=2, in_channels=3, num_classes=10):
    filters = [64, 128, 256, 512, 512, 512]
    conv_params = []
    cin = in_channels
    for i in range(depth):
        cout = filters[i]
        key, k1, k2, k3, k4, k5 = jax.random.split(key, 6)
        conv_params.append(dict(
            w=jax.random.normal(k1, (3, 3, cin, cout), jnp.float32)
              * jnp.sqrt(2.0 / (9.0 * cin)),                      # HWIO
            gamma=jax.random.uniform(k2, (cout,), jnp.float32, 0.5, 1.5),
            beta=jax.random.normal(k3, (cout,), jnp.float32) * 0.1,
            mean=jax.random.normal(k4, (cout,), jnp.float32) * 0.1,
            var=jax.random.uniform(k5, (cout,), jnp.float32, 0.5, 1.5),
            pool=(i % 2 == 0),
        ))
        cin = cout
    pool_size = 32 // 2 ** (depth // 2)
    fc_in = filters[depth - 1] * pool_size * pool_size
    key, kw, kb = jax.random.split(key, 3)
    bound = 1.0 / jnp.sqrt(fc_in)
    fc_w = jax.random.uniform(kw, (fc_in, num_classes), jnp.float32, -bound, bound)
    fc_b = jax.random.uniform(kb, (num_classes,), jnp.float32, -bound, bound)
    return conv_params, fc_w, fc_b


# ----------------------------------------------------------------------------
# Pure-JAX f32 reference (same math, XLA ops) for a sanity check
# ----------------------------------------------------------------------------
def reference_forward(x_nchw, conv_params, fc_w, fc_b, eps=1e-5):
    x = jnp.transpose(x_nchw, (0, 2, 3, 1))
    for p in conv_params:
        y = lax.conv_general_dilated(
            x, p["w"], window_strides=(1, 1), padding="SAME",
            dimension_numbers=("NHWC", "HWIO", "NHWC"),
            precision=lax.Precision.HIGHEST)
        scale = p["gamma"] / jnp.sqrt(p["var"] + eps)
        shift = p["beta"] - p["mean"] * scale
        y = jnp.maximum(y * scale + shift, 0.0)
        if p["pool"]:
            y = lax.reduce_window(y, -jnp.inf, lax.max,
                                  (1, 2, 2, 1), (1, 2, 2, 1), "VALID")
        x = y
    B = x.shape[0]
    x_flat = jnp.transpose(x, (0, 3, 1, 2)).reshape(B, -1)
    return jnp.dot(x_flat, fc_w, precision=lax.Precision.HIGHEST) + fc_b


if __name__ == "__main__":
    key = jax.random.PRNGKey(0)
    kx, kp = jax.random.split(key)
    # Input NCHW like the PyTorch module; H=W=32 implied by fc = Linear(128*16*16, 10).
    x = jax.random.normal(kx, (2, 3, 32, 32), jnp.float32)
    conv_params, fc_w, fc_b = init_params(kp, depth=2, in_channels=3, num_classes=10)

    params = fold_params(conv_params, fc_w, fc_b)   # one-time weight preparation
    fwd = jax.jit(depth_cnn_forward)
    out = jax.block_until_ready(fwd(x, params))

    assert out.shape == (2, 10)
    assert bool(jnp.all(jnp.isfinite(out)))
    ref = reference_forward(x, conv_params, fc_w, fc_b)
    assert bool(jnp.allclose(out, ref, atol=1e-1, rtol=1e-1)), \
        float(jnp.max(jnp.abs(out - ref)))
    print("KERNEL_OK")
</pallas_src>

<mosaic_0001>
module attributes {stable_mosaic.version = 11 : i64} {
  func.func @_conv0_bn_relu_pool_kernel(%arg0: i32, %arg1: memref<1x1024x32xbf16, #tpu.memory_space<vmem>>, %arg2: memref<32x128xbf16, #tpu.memory_space<vmem>>, %arg3: memref<1x128xf32, #tpu.memory_space<vmem>>, %arg4: memref<1x256x128xbf16, #tpu.memory_space<vmem>>) attributes {dimension_semantics = [#tpu.dimension_semantics<parallel>], iteration_bounds = array<i64: 2>, scalar_prefetch = 0 : i64, scratch_operands = 0 : i64, tpu.core_type = #tpu.core_type<tc>, window_params = [{transform_indices = @transform_0, window_bounds = array<i64: 1, 1024, 32>}, {pipeline_mode = #tpu.pipeline_mode<synchronous>, transform_indices = @transform_1, window_bounds = array<i64: 32, 128>}, {pipeline_mode = #tpu.pipeline_mode<synchronous>, transform_indices = @transform_2, window_bounds = array<i64: 1, 128>}, {transform_indices = @transform_3, window_bounds = array<i64: 1, 256, 128>}]} {
    %c0 = arith.constant 0 : index
    %c0_0 = arith.constant 0 : index
    %c0_1 = arith.constant 0 : index
    %0 = vector.load %arg1[%c0, %c0_0, %c0_1] : memref<1x1024x32xbf16, #tpu.memory_space<vmem>>, vector<1x1024x32xbf16>
    %1 = vector.shape_cast %0 : vector<1x1024x32xbf16> to vector<1024x32xbf16>
    %c0_2 = arith.constant 0 : index
    %c0_3 = arith.constant 0 : index
    %2 = vector.load %arg2[%c0_2, %c0_3] : memref<32x128xbf16, #tpu.memory_space<vmem>>, vector<32x128xbf16>
    %cst = arith.constant dense<0.000000e+00> : vector<1024x128xf32>
    %3 = tpu.matmul %1, %2, %cst {dimension_numbers = #tpu.dot_dimension_numbers<[1], [0], [0], [1], [0, 0, 1, 1], [], []>} : vector<1024x32xbf16>, vector<32x128xbf16>, vector<1024x128xf32> -> vector<1024x128xf32>
    %c0_4 = arith.constant 0 : index
    %c0_5 = arith.constant 0 : index
    %4 = vector.load %arg3[%c0_4, %c0_5] : memref<1x128xf32, #tpu.memory_space<vmem>>, vector<1x128xf32>
    %5 = vector.broadcast %4 : vector<1x128xf32> to vector<1024x128xf32>
    %6 = arith.addf %3, %5 : vector<1024x128xf32>
    %cst_6 = arith.constant 0.000000e+00 : f32
    %7 = vector.broadcast %cst_6 : f32 to vector<1024x128xf32>
    %8 = arith.maximumf %6, %7 : vector<1024x128xf32>
    %9 = vector.extract_strided_slice %8 {offsets = [0, 0], sizes = [256, 128], strides = [1, 1]} : vector<1024x128xf32> to vector<256x128xf32>
    %10 = vector.extract_strided_slice %8 {offsets = [256, 0], sizes = [256, 128], strides = [1, 1]} : vector<1024x128xf32> to vector<256x128xf32>
    %11 = arith.maximumf %9, %10 : vector<256x128xf32>
    %12 = vector.extract_strided_slice %8 {offsets = [512, 0], sizes = [256, 128], strides = [1, 1]} : vector<1024x128xf32> to vector<256x128xf32>
    %13 = vector.extract_strided_slice %8 {offsets = [768, 0], sizes = [256, 128], strides = [1, 1]} : vector<1024x128xf32> to vector<256x128xf32>
    %14 = arith.maximumf %12, %13 : vector<256x128xf32>
    %15 = arith.maximumf %11, %14 : vector<256x128xf32>
    %16 = arith.truncf %15 : vector<256x128xf32> to vector<256x128xbf16>
    %c0_7 = arith.constant 0 : index
    %c0_8 = arith.constant 0 : index
    %c0_9 = arith.constant 0 : index
    %17 = vector.load %arg4[%c0_7, %c0_8, %c0_9] : memref<1x256x128xbf16, #tpu.memory_space<vmem>>, vector<1x256x128xbf16>
    %18 = vector.shape_cast %17 : vector<1x256x128xbf16> to vector<256x128xbf16>
    %19 = vector.shape_cast %16 : vector<256x128xbf16> to vector<1x256x128xbf16>
    tpu.vector_store %arg4[%c0_7, %c0_8, %c0_9], %19 {strides = array<i32>} : memref<1x256x128xbf16, #tpu.memory_space<vmem>>, vector<1x256x128xbf16>,
    return
  }
  func.func @transform_0(%arg0: i32) -> (i32, i32, i32) {
    %c0_i32 = arith.constant 0 : i32
    %c0_i32_0 = arith.constant 0 : i32
    %c0_i32_1 = arith.constant 0 : i32
    return %arg0, %c0_i32, %c0_i32_0 : i32, i32, i32
  }
  func.func @transform_1(%arg0: i32) -> (i32, i32) {
    %c0_i32 = arith.constant 0 : i32
    %c0_i32_0 = arith.constant 0 : i32
    %c0_i32_1 = arith.constant 0 : i32
    return %c0_i32, %c0_i32_0 : i32, i32
  }
  func.func @transform_2(%arg0: i32) -> (i32, i32) {
    %c0_i32 = arith.constant 0 : i32
    %c0_i32_0 = arith.constant 0 : i32
    %c0_i32_1 = arith.constant 0 : i32
    return %c0_i32, %c0_i32_0 : i32, i32
  }
  func.func @transform_3(%arg0: i32) -> (i32, i32, i32) {
    %c0_i32 = arith.constant 0 : i32
    %c0_i32_0 = arith.constant 0 : i32
    %c0_i32_1 = arith.constant 0 : i32
    return %arg0, %c0_i32, %c0_i32_0 : i32, i32, i32
  }
}

module attributes {stable_mosaic.version = 11 : i64} {
  func.func @_conv3x3_tap_bn_relu_kernel(%arg0: i32, %arg1: memref<1x18x18x128xbf16, #tpu.memory_space<vmem>>, %arg2: memref<9x128x128xbf16, #tpu.memory_space<vmem>>, %arg3: memref<1x128xf32, #tpu.memory_space<vmem>>, %arg4: memref<1x256x128xbf16, #tpu.memory_space<vmem>>) attributes {dimension_semantics = [#tpu.dimension_semantics<parallel>], iteration_bounds = array<i64: 2>, scalar_prefetch = 0 : i64, scratch_operands = 0 : i64, tpu.core_type = #tpu.core_type<tc>, window_params = [{transform_indices = @transform_0, window_bounds = array<i64: 1, 18, 18, 128>}, {pipeline_mode = #tpu.pipeline_mode<synchronous>, transform_indices = @transform_1, window_bounds = array<i64: 9, 128, 128>}, {pipeline_mode = #tpu.pipeline_mode<synchronous>, transform_indices = @transform_2, window_bounds = array<i64: 1, 128>}, {transform_indices = @transform_3, window_bounds = array<i64: 1, 256, 128>}]} {
    %cst = arith.constant 0.000000e+00 : f32
    %0 = vector.broadcast %cst : f32 to vector<256x128xf32>
    %c0 = arith.constant 0 : index
    %c0_0 = arith.constant 0 : index
    %c0_1 = arith.constant 0 : index
    %c0_2 = arith.constant 0 : index
    %1 = vector.load %arg1[%c0, %c0_0, %c0_1, %c0_2] : memref<1x18x18x128xbf16, #tpu.memory_space<vmem>>, vector<1x16x16x128xbf16>
    %2 = vector.shape_cast %1 : vector<1x16x16x128xbf16> to vector<16x16x128xbf16>
    %3 = vector.shape_cast %2 : vector<16x16x128xbf16> to vector<256x128xbf16>
    %c0_3 = arith.constant 0 : index
    %c0_4 = arith.constant 0 : index
    %c0_5 = arith.constant 0 : index
    %4 = vector.load %arg2[%c0_3, %c0_4, %c0_5] : memref<9x128x128xbf16, #tpu.memory_space<vmem>>, vector<1x128x128xbf16>
    %5 = vector.shape_cast %4 : vector<1x128x128xbf16> to vector<128x128xbf16>
    %cst_6 = arith.constant dense<0.000000e+00> : vector<256x128xf32>
    %6 = tpu.matmul %3, %5, %cst_6 {dimension_numbers = #tpu.dot_dimension_numbers<[1], [0], [0], [1], [0, 0, 1, 1], [], []>} : vector<256x128xbf16>, vector<128x128xbf16>, vector<256x128xf32> -> vector<256x128xf32>
    %7 = arith.addf %0, %6 : vector<256x128xf32>
    %c0_7 = arith.constant 0 : index
    %c0_8 = arith.constant 0 : index
    %c1 = arith.constant 1 : index
    %c0_9 = arith.constant 0 : index
    %8 = vector.load %arg1[%c0_7, %c0_8, %c1, %c0_9] : memref<1x18x18x128xbf16, #tpu.memory_space<vmem>>, vector<1x16x16x128xbf16>
    %9 = vector.shape_cast %8 : vector<1x16x16x128xbf16> to vector<16x16x128xbf16>
    %10 = vector.shape_cast %9 : vector<16x16x128xbf16> to vector<256x128xbf16>
    %c1_10 = arith.constant 1 : index
    %c0_11 = arith.constant 0 : index
    %c0_12 = arith.constant 0 : index
    %11 = vector.load %arg2[%c1_10, %c0_11, %c0_12] : memref<9x128x128xbf16, #tpu.memory_space<vmem>>, vector<1x128x128xbf16>
    %12 = vector.shape_cast %11 : vector<1x128x128xbf16> to vector<128x128xbf16>
    %cst_13 = arith.constant dense<0.000000e+00> : vector<256x128xf32>
    %13 = tpu.matmul %10, %12, %cst_13 {dimension_numbers = #tpu.dot_dimension_numbers<[1], [0], [0], [1], [0, 0, 1, 1], [], []>} : vector<256x128xbf16>, vector<128x128xbf16>, vector<256x128xf32> -> vector<256x128xf32>
    %14 = arith.addf %7, %13 : vector<256x128xf32>
    %c0_14 = arith.constant 0 : index
    %c0_15 = arith.constant 0 : index
    %c2 = arith.constant 2 : index
    %c0_16 = arith.constant 0 : index
    %15 = vector.load %arg1[%c0_14, %c0_15, %c2, %c0_16] : memref<1x18x18x128xbf16, #tpu.memory_space<vmem>>, vector<1x16x16x128xbf16>
    %16 = vector.shape_cast %15 : vector<1x16x16x128xbf16> to vector<16x16x128xbf16>
    %17 = vector.shape_cast %16 : vector<16x16x128xbf16> to vector<256x128xbf16>
    %c2_17 = arith.constant 2 : index
    %c0_18 = arith.constant 0 : index
    %c0_19 = arith.constant 0 : index
    %18 = vector.load %arg2[%c2_17, %c0_18, %c0_19] : memref<9x128x128xbf16, #tpu.memory_space<vmem>>, vector<1x128x128xbf16>
    %19 = vector.shape_cast %18 : vector<1x128x128xbf16> to vector<128x128xbf16>
    %cst_20 = arith.constant dense<0.000000e+00> : vector<256x128xf32>
    %20 = tpu.matmul %17, %19, %cst_20 {dimension_numbers = #tpu.dot_dimension_numbers<[1], [0], [0], [1], [0, 0, 1, 1], [], []>} : vector<256x128xbf16>, vector<128x128xbf16>, vector<256x128xf32> -> vector<256x128xf32>
    %21 = arith.addf %14, %20 : vector<256x128xf32>
    %c0_21 = arith.constant 0 : index
    %c1_22 = arith.constant 1 : index
    %c0_23 = arith.constant 0 : index
    %c0_24 = arith.constant 0 : index
    %22 = vector.load %arg1[%c0_21, %c1_22, %c0_23, %c0_24] : memref<1x18x18x128xbf16, #tpu.memory_space<vmem>>, vector<1x16x16x128xbf16>
    %23 = vector.shape_cast %22 : vector<1x16x16x128xbf16> to vector<16x16x128xbf16>
    %24 = vector.shape_cast %23 : vector<16x16x128xbf16> to vector<256x128xbf16>
    %c3 = arith.constant 3 : index
    %c0_25 = arith.constant 0 : index
    %c0_26 = arith.constant 0 : index
    %25 = vector.load %arg2[%c3, %c0_25, %c0_26] : memref<9x128x128xbf16, #tpu.memory_space<vmem>>, vector<1x128x128xbf16>
    %26 = vector.shape_cast %25 : vector<1x128x128xbf16> to vector<128x128xbf16>
    %cst_27 = arith.constant dense<0.000000e+00> : vector<256x128xf32>
    %27 = tpu.matmul %24, %26, %cst_27 {dimension_numbers = #tpu.dot_dimension_numbers<[1], [0], [0], [1], [0, 0, 1, 1], [], []>} : vector<256x128xbf16>, vector<128x128xbf16>, vector<256x128xf32> -> vector<256x128xf32>
    %28 = arith.addf %21, %27 : vector<256x128xf32>
    %c0_28 = arith.constant 0 : index
    %c1_29 = arith.constant 1 : index
    %c1_30 = arith.constant 1 : index
    %c0_31 = arith.constant 0 : index
    %29 = vector.load %arg1[%c0_28, %c1_29, %c1_30, %c0_31] : memref<1x18x18x128xbf16, #tpu.memory_space<vmem>>, vector<1x16x16x128xbf16>
    %30 = vector.shape_cast %29 : vector<1x16x16x128xbf16> to vector<16x16x128xbf16>
    %31 = vector.shape_cast %30 : vector<16x16x128xbf16> to vector<256x128xbf16>
    %c4 = arith.constant 4 : index
    %c0_32 = arith.constant 0 : index
    %c0_33 = arith.constant 0 : index
    %32 = vector.load %arg2[%c4, %c0_32, %c0_33] : memref<9x128x128xbf16, #tpu.memory_space<vmem>>, vector<1x128x128xbf16>
    %33 = vector.shape_cast %32 : vector<1x128x128xbf16> to vector<128x128xbf16>
    %cst_34 = arith.constant dense<0.000000e+00> : vector<256x128xf32>
    %34 = tpu.matmul %31, %33, %cst_34 {dimension_numbers = #tpu.dot_dimension_numbers<[1], [0], [0], [1], [0, 0, 1, 1], [], []>} : vector<256x128xbf16>, vector<128x128xbf16>, vector<256x128xf32> -> vector<256x128xf32>
    %35 = arith.addf %28, %34 : vector<256x128xf32>
    %c0_35 = arith.constant 0 : index
    %c1_36 = arith.constant 1 : index
    %c2_37 = arith.constant 2 : index
    %c0_38 = arith.constant 0 : index
    %36 = vector.load %arg1[%c0_35, %c1_36, %c2_37, %c0_38] : memref<1x18x18x128xbf16, #tpu.memory_space<vmem>>, vector<1x16x16x128xbf16>
    %37 = vector.shape_cast %36 : vector<1x16x16x128xbf16> to vector<16x16x128xbf16>
    %38 = vector.shape_cast %37 : vector<16x16x128xbf16> to vector<256x128xbf16>
    %c5 = arith.constant 5 : index
    %c0_39 = arith.constant 0 : index
    %c0_40 = arith.constant 0 : index
    %39 = vector.load %arg2[%c5, %c0_39, %c0_40] : memref<9x128x128xbf16, #tpu.memory_space<vmem>>, vector<1x128x128xbf16>
    %40 = vector.shape_cast %39 : vector<1x128x128xbf16> to vector<128x128xbf16>
    %cst_41 = arith.constant dense<0.000000e+00> : vector<256x128xf32>
    %41 = tpu.matmul %38, %40, %cst_41 {dimension_numbers = #tpu.dot_dimension_numbers<[1], [0], [0], [1], [0, 0, 1, 1], [], []>} : vector<256x128xbf16>, vector<128x128xbf16>, vector<256x128xf32> -> vector<256x128xf32>
    %42 = arith.addf %35, %41 : vector<256x128xf32>
    %c0_42 = arith.constant 0 : index
    %c2_43 = arith.constant 2 : index
    %c0_44 = arith.constant 0 : index
    %c0_45 = arith.constant 0 : index
    %43 = vector.load %arg1[%c0_42, %c2_43, %c0_44, %c0_45] : memref<1x18x18x128xbf16, #tpu.memory_space<vmem>>, vector<1x16x16x128xbf16>
    %44 = vector.shape_cast %43 : vector<1x16x16x128xbf16> to vector<16x16x128xbf16>
    %45 = vector.shape_cast %44 : vector<16x16x128xbf16> to vector<256x128xbf16>
    %c6 = arith.constant 6 : index
    %c0_46 = arith.constant 0 : index
    %c0_47 = arith.constant 0 : index
    %46 = vector.load %arg2[%c6, %c0_46, %c0_47] : memref<9x128x128xbf16, #tpu.memory_space<vmem>>, vector<1x128x128xbf16>
    %47 = vector.shape_cast %46 : vector<1x128x128xbf16> to vector<128x128xbf16>
    %cst_48 = arith.constant dense<0.000000e+00> : vector<256x128xf32>
    %48 = tpu.matmul %45, %47, %cst_48 {dimension_numbers = #tpu.dot_dimension_numbers<[1], [0], [0], [1], [0, 0, 1, 1], [], []>} : vector<256x128xbf16>, vector<128x128xbf16>, vector<256x128xf32> -> vector<256x128xf32>
    %49 = arith.addf %42, %48 : vector<256x128xf32>
    %c0_49 = arith.constant 0 : index
    %c2_50 = arith.constant 2 : index
    %c1_51 = arith.constant 1 : index
    %c0_52 = arith.constant 0 : index
    %50 = vector.load %arg1[%c0_49, %c2_50, %c1_51, %c0_52] : memref<1x18x18x128xbf16, #tpu.memory_space<vmem>>, vector<1x16x16x128xbf16>
    %51 = vector.shape_cast %50 : vector<1x16x16x128xbf16> to vector<16x16x128xbf16>
    %52 = vector.shape_cast %51 : vector<16x16x128xbf16> to vector<256x128xbf16>
    %c7 = arith.constant 7 : index
    %c0_53 = arith.constant 0 : index
    %c0_54 = arith.constant 0 : index
    %53 = vector.load %arg2[%c7, %c0_53, %c0_54] : memref<9x128x128xbf16, #tpu.memory_space<vmem>>, vector<1x128x128xbf16>
    %54 = vector.shape_cast %53 : vector<1x128x128xbf16> to vector<128x128xbf16>
    %cst_55 = arith.constant dense<0.000000e+00> : vector<256x128xf32>
    %55 = tpu.matmul %52, %54, %cst_55 {dimension_numbers = #tpu.dot_dimension_numbers<[1], [0], [0], [1], [0, 0, 1, 1], [], []>} : vector<256x128xbf16>, vector<128x128xbf16>, vector<256x128xf32> -> vector<256x128xf32>
    %56 = arith.addf %49, %55 : vector<256x128xf32>
    %c0_56 = arith.constant 0 : index
    %c2_57 = arith.constant 2 : index
    %c2_58 = arith.constant 2 : index
    %c0_59 = arith.constant 0 : index
    %57 = vector.load %arg1[%c0_56, %c2_57, %c2_58, %c0_59] : memref<1x18x18x128xbf16, #tpu.memory_space<vmem>>, vector<1x16x16x128xbf16>
    %58 = vector.shape_cast %57 : vector<1x16x16x128xbf16> to vector<16x16x128xbf16>
    %59 = vector.shape_cast %58 : vector<16x16x128xbf16> to vector<256x128xbf16>
    %c8 = arith.constant 8 : index
    %c0_60 = arith.constant 0 : index
    %c0_61 = arith.constant 0 : index
    %60 = vector.load %arg2[%c8, %c0_60, %c0_61] : memref<9x128x128xbf16, #tpu.memory_space<vmem>>, vector<1x128x128xbf16>
    %61 = vector.shape_cast %60 : vector<1x128x128xbf16> to vector<128x128xbf16>
    %cst_62 = arith.constant dense<0.000000e+00> : vector<256x128xf32>
    %62 = tpu.matmul %59, %61, %cst_62 {dimension_numbers = #tpu.dot_dimension_numbers<[1], [0], [0], [1], [0, 0, 1, 1], [], []>} : vector<256x128xbf16>, vector<128x128xbf16>, vector<256x128xf32> -> vector<256x128xf32>
    %63 = arith.addf %56, %62 : vector<256x128xf32>
    %c0_63 = arith.constant 0 : index
    %c0_64 = arith.constant 0 : index
    %64 = vector.load %arg3[%c0_63, %c0_64] : memref<1x128xf32, #tpu.memory_space<vmem>>, vector<1x128xf32>
    %65 = vector.broadcast %64 : vector<1x128xf32> to vector<256x128xf32>
    %66 = arith.addf %63, %65 : vector<256x128xf32>
    %cst_65 = arith.constant 0.000000e+00 : f32
    %67 = vector.broadcast %cst_65 : f32 to vector<256x128xf32>
    %68 = arith.maximumf %66, %67 : vector<256x128xf32>
    %69 = arith.truncf %68 : vector<256x128xf32> to vector<256x128xbf16>
    %c0_66 = arith.constant 0 : index
    %c0_67 = arith.constant 0 : index
    %c0_68 = arith.constant 0 : index
    %70 = vector.load %arg4[%c0_66, %c0_67, %c0_68] : memref<1x256x128xbf16, #tpu.memory_space<vmem>>, vector<1x256x128xbf16>
    %71 = vector.shape_cast %70 : vector<1x256x128xbf16> to vector<256x128xbf16>
    %72 = vector.shape_cast %69 : vector<256x128xbf16> to vector<1x256x128xbf16>
    tpu.vector_store %arg4[%c0_66, %c0_67, %c0_68], %72 {strides = array<i32>} : memref<1x256x128xbf16, #tpu.memory_space<vmem>>, vector<1x256x128xbf16>,
    return
  }
  func.func @transform_0(%arg0: i32) -> (i32, i32, i32, i32) {
    %c0_i32 = arith.constant 0 : i32
    %c0_i32_0 = arith.constant 0 : i32
    %c0_i32_1 = arith.constant 0 : i32
    %c0_i32_2 = arith.constant 0 : i32
    return %arg0, %c0_i32, %c0_i32_0, %c0_i32_1 : i32, i32, i32, i32
  }
  func.func @transform_1(%arg0: i32) -> (i32, i32, i32) {
    %c0_i32 = arith.constant 0 : i32
    %c0_i32_0 = arith.constant 0 : i32
    %c0_i32_1 = arith.constant 0 : i32
    %c0_i32_2 = arith.constant 0 : i32
    return %c0_i32, %c0_i32_0, %c0_i32_1 : i32, i32, i32
  }
  func.func @transform_2(%arg0: i32) -> (i32, i32) {
    %c0_i32 = arith.constant 0 : i32
    %c0_i32_0 = arith.constant 0 : i32
    %c0_i32_1 = arith.constant 0 : i32
    return %c0_i32, %c0_i32_0 : i32, i32
  }
  func.func @transform_3(%arg0: i32) -> (i32, i32, i32) {
    %c0_i32 = arith.constant 0 : i32
    %c0_i32_0 = arith.constant 0 : i32
    %c0_i32_1 = arith.constant 0 : i32
    return %arg0, %c0_i32, %c0_i32_0 : i32, i32, i32
  }
}

module attributes {stable_mosaic.version = 11 : i64} {
  func.func @_linear_kernel(%arg0: i32, %arg1: memref<2x8192xbf16, #tpu.memory_space<vmem>>, %arg2: memref<8192x10xbf16, #tpu.memory_space<vmem>>, %arg3: memref<1x10xf32, #tpu.memory_space<vmem>>, %arg4: memref<2x10xf32, #tpu.memory_space<vmem>>, %arg5: memref<2x10xf32, #tpu.memory_space<vmem>>) attributes {dimension_semantics = [#tpu.dimension_semantics<arbitrary>], iteration_bounds = array<i64: 4>, scalar_prefetch = 0 : i64, scratch_operands = 1 : i64, tpu.core_type = #tpu.core_type<tc>, window_params = [{transform_indices = @transform_0, window_bounds = array<i64: 2, 8192>}, {transform_indices = @transform_1, window_bounds = array<i64: 8192, 10>}, {pipeline_mode = #tpu.pipeline_mode<synchronous>, transform_indices = @transform_2, window_bounds = array<i64: 1, 10>}, {pipeline_mode = #tpu.pipeline_mode<synchronous>, transform_indices = @transform_3, window_bounds = array<i64: 2, 10>}]} {
    %c0_i32 = arith.constant 0 : i32
    %0 = arith.cmpi eq, %arg0, %c0_i32 : i32
    %1 = arith.extui %0 : i1 to i32
    %c0_i32_0 = arith.constant 0 : i32
    %2 = arith.cmpi ne, %1, %c0_i32_0 : i32
    scf.if %2 {
      %cst_9 = arith.constant 0.000000e+00 : f32
      %12 = vector.broadcast %cst_9 : f32 to vector<2x10xf32>
      %c0_10 = arith.constant 0 : index
      %c0_11 = arith.constant 0 : index
      %13 = vector.load %arg5[%c0_10, %c0_11] : memref<2x10xf32, #tpu.memory_space<vmem>>, vector<2x10xf32>
      tpu.vector_store %arg5[%c0_10, %c0_11], %12 {strides = array<i32>} : memref<2x10xf32, #tpu.memory_space<vmem>>, vector<2x10xf32>,
    } else {
    }
    %c0 = arith.constant 0 : index
    %c0_1 = arith.constant 0 : index
    %3 = vector.load %arg5[%c0, %c0_1] : memref<2x10xf32, #tpu.memory_space<vmem>>, vector<2x10xf32>
    %c0_2 = arith.constant 0 : index
    %c0_3 = arith.constant 0 : index
    %4 = vector.load %arg1[%c0_2, %c0_3] : memref<2x8192xbf16, #tpu.memory_space<vmem>>, vector<2x8192xbf16>
    %c0_4 = arith.constant 0 : index
    %c0_5 = arith.constant 0 : index
    %5 = vector.load %arg2[%c0_4, %c0_5] : memref<8192x10xbf16, #tpu.memory_space<vmem>>, vector<8192x10xbf16>
    %cst = arith.constant dense<0.000000e+00> : vector<2x10xf32>
    %6 = tpu.matmul %4, %5, %cst {dimension_numbers = #tpu.dot_dimension_numbers<[1], [0], [0], [1], [0, 0, 1, 1], [], []>} : vector<2x8192xbf16>, vector<8192x10xbf16>, vector<2x10xf32> -> vector<2x10xf32>
    %7 = arith.addf %3, %6 : vector<2x10xf32>
    %c0_6 = arith.constant 0 : index
    %c0_7 = arith.constant 0 : index
    %8 = vector.load %arg5[%c0_6, %c0_7] : memref<2x10xf32, #tpu.memory_space<vmem>>, vector<2x10xf32>
    tpu.vector_store %arg5[%c0_6, %c0_7], %7 {strides = array<i32>} : memref<2x10xf32, #tpu.memory_space<vmem>>, vector<2x10xf32>,
    %c3_i32 = arith.constant 3 : i32
    %9 = arith.cmpi eq, %arg0, %c3_i32 : i32
    %10 = arith.extui %9 : i1 to i32
    %c0_i32_8 = arith.constant 0 : i32
    %11 = arith.cmpi ne, %10, %c0_i32_8 : i32
    scf.if %11 {
      %c0_9 = arith.constant 0 : index
      %c0_10 = arith.constant 0 : index
      %12 = vector.load %arg5[%c0_9, %c0_10] : memref<2x10xf32, #tpu.memory_space<vmem>>, vector<2x10xf32>
      %c0_11 = arith.constant 0 : index
      %c0_12 = arith.constant 0 : index
      %13 = vector.load %arg3[%c0_11, %c0_12] : memref<1x10xf32, #tpu.memory_space<vmem>>, vector<1x10xf32>
      %14 = vector.broadcast %13 : vector<1x10xf32> to vector<2x10xf32>
      %15 = arith.addf %12, %14 : vector<2x10xf32>
      %c0_13 = arith.constant 0 : index
      %c0_14 = arith.constant 0 : index
      %16 = vector.load %arg4[%c0_13, %c0_14] : memref<2x10xf32, #tpu.memory_space<vmem>>, vector<2x10xf32>
      tpu.vector_store %arg4[%c0_13, %c0_14], %15 {strides = array<i32>} : memref<2x10xf32, #tpu.memory_space<vmem>>, vector<2x10xf32>,
    } else {
    }
    return
  }
  func.func @transform_0(%arg0: i32) -> (i32, i32) {
    %c0_i32 = arith.constant 0 : i32
    %c0_i32_0 = arith.constant 0 : i32
    return %c0_i32, %arg0 : i32, i32
  }
  func.func @transform_1(%arg0: i32) -> (i32, i32) {
    %c0_i32 = arith.constant 0 : i32
    %c0_i32_0 = arith.constant 0 : i32
    return %arg0, %c0_i32 : i32, i32
  }
  func.func @transform_2(%arg0: i32) -> (i32, i32) {
    %c0_i32 = arith.constant 0 : i32
    %c0_i32_0 = arith.constant 0 : i32
    %c0_i32_1 = arith.constant 0 : i32
    return %c0_i32, %c0_i32_0 : i32, i32
  }
  func.func @transform_3(%arg0: i32) -> (i32, i32) {
    %c0_i32 = arith.constant 0 : i32
    %c0_i32_0 = arith.constant 0 : i32
    %c0_i32_1 = arith.constant 0 : i32
    return %c0_i32, %c0_i32_0 : i32, i32
  }
}

</mosaic_0001>

<bundles_post_ra>
// kernel: depth_cnn_forward.3
= control target key start
LH: loop header
LB: loop body
LE: loop exit
PB: predicated region body
PF: predicated region fallthrough
CT: control target
= control target key end

     0   :  { %8 = vsyncpa [#allocation3], 0  ;;  %s3354_s0 = inlined_call_operand.vmem [shape: bf16[2,1024,32], index: 0, kind: input, shape index: {}]   ;;  %s3355_s1 = inlined_call_operand.hbm [shape: bf16[32,128], index: 1, kind: input, shape index: {}]   ;;  %s3356_s2 = inlined_call_operand.hbm [shape: f32[1,128], index: 2, kind: input, shape index: {}]   ;;  %s3357_s3 = inlined_call_operand.vmem [shape: bf16[2,256,128], index: 3, kind: output, shape index: {}]  }
   0x1   :  { %9 = vsyncpa [#allocation5], 0  ;;  %s2568_s12 = smov 0  }
   0x2 LB: > { %s2574_s13 = sadd.s32 4294967295, %s2542_s12   ;;  %p1872_p0 = scmp.ge.s32.totalorder %s2542_s12, 1  ;;  %s2542_s12 = sphi %s2568_s12, %s15_s12  }
   0x3   : > { %p114_p1 = scmp.lt.s32.totalorder %s2542_s12, 3  ;;  %s2544_s14 = smov [#allocation2]  }
   0x4   : > { %s126_s15 = sshll.u32 %s2544_s14, 4  ;;  %p2394_p3 = scmp.eq.s32.totalorder %s2574_s13, 0  ;;  %s127_s15 = int_to_ptr.vmem [resolvable:$true] %s126_s15 }
   0x5   : > { %p2578_p2 = pnand %p1872_p0, %p114_p1  ;;  %s2545_s17 = smov [#allocation4]  }
   0x6   : > { %s140_s18 = sshll.u32 %s2545_s17, 4  ;;  %s2487_s20 = scalar_lea.vmem %s127_s15, 256  ;;  %s141_s18 = int_to_ptr.vmem [resolvable:$true] %s140_s18 }
   0x7   : > { %p2387_p4 = pneg %p2578_p2  ;;  %p2488_p7 = scmp.ne.s32.totalorder %s127_s15, %s2487_s20 }
   0x8   : > { %p2495_p10 = scmp.lt.s32.totalorder %s127_s15, %s127_s15  ;;  %p2496_p11 = scmp.lt.s32.totalorder %s2487_s20, %s2487_s20 }
   0x9   : > { %p2587_p5 = pnand %p2394_p3, %p2387_p4 }
   0xa   : > { %p2497_p12 = por %p2496_p11, %p2495_p10 }
   0xb   : > { %p2478_p6 = pneg %p2587_p5 }
   0xd   : > { %p2490_p8 = pnand %p2488_p7, %p2478_p6 }
   0xf   : > { %p2491_p9 = pneg %p2490_p8 }
  0x11   : > { %p2498_p13 = pnand %p2497_p12, %p2491_p9 }
  0x13   : > { %2501 = shalt.err (!%p2498_p13)
}
  0x14   : > { %s2546_s21 = smov 64   ;;  %s2547_s22 = smov 4  }
  0x15   : > { %2390 = dma.hbm_to_vmem [thread:$0]  (!%p2587_p5), %s3355_s1, 256, %s127_s15, [#allocation3], %s2546_s21, %s2546_s21, %s2547_s22  }
  0x16   : > { %s2513_s25 = scalar_lea.vmem %s141_s18, 16  ;;  %s2520_s26 = scalar_lea.vmem %s141_s18, 32 }
  0x17   : > { %p2514_p0 = scmp.ne.s32.totalorder %s141_s18, %s2513_s25  ;;  %p2521_p7 = scmp.lt.s32.totalorder %s141_s18, %s141_s18 }
  0x18   : > { %p2522_p8 = scmp.lt.s32.totalorder %s2520_s26, %s2513_s25 }
  0x19   : > { %p2516_p1 = pnand %p2514_p0, %p2478_p6 }
  0x1a   : > { %p2523_p9 = por %p2522_p8, %p2521_p7 }
  0x1b   : > { %p2517_p4 = pneg %p2516_p1 }
  0x1d   : > { %p2524_p10 = pnand %p2523_p9, %p2517_p4 }
  0x1f   : > { %2527 = shalt.err (!%p2524_p10)
}
  0x20   : > { %2393 = dma.hbm_to_vmem [thread:$0]  (!%p2587_p5), %s3356_s2, 16, %s141_s18, [#allocation5]  }
  0x21   : > { %161 = sbr.rel (%p2578_p2) target bundleno = 394 (0x18a), region = 32 }
  0x26   : > { %2533 = dma.done.wait (%p2394_p3), [#allocation3], 256  }
  0x27   : > { %2535 = vsyncadd (%p2394_p3), [#allocation3], 4294967040 }
  0x28   : > { %2537 = dma.done.wait (%p2394_p3), [#allocation5], 16  }
  0x29   : > { %2539 = vsyncadd (%p2394_p3), [#allocation5], 4294967280  ;;  %p189_p6 = scmp.lt.s32.totalorder %s2574_s13, 1  ;;  %v2410_v0 = vld [vmem:[#allocation2 + $0x8] sm:$0xff]   ;;  %v2411_v1 = vld [vmem:[#allocation2] sm:$0xff]   ;;  %vm671_vm0 = vcmask 261120  }
  0x2a   : > { %2243 = vmatprep.subr.bf16.mxu0 %v2410_v0  ;;  %2375 = vmatprep.subr.bf16.mxu1 %v2410_v0 }
  0x2b   : > { %s3476_s13 = smov (!%p189_p6, %s2574_s13), 1  ;;  %2244 = vmatpush3.bf16.msra.mxu0 %v2410_v0  ;;  %2377 = vmatpush3.bf16.msra.mxu1 %v2410_v0 }
  0x2c   : > { %s2048_s29 = sshll.u32 %s3476_s13, 9  ;;  %2245 = vmatprep.subr.bf16.mxu0 %v2411_v1  ;;  %2376 = vmatprep.subr.bf16.mxu1 %v2411_v1  ;;  %s2049_s6 = sshll.u32 %s3476_s13, 7 }
  0x2d   : > { %s2627_s5 = scalar_lea.vmem %s3354_s0, %s2048_s29  ;;  %s3147_s9 = scalar_lea.vmem %s3357_s3, %s2049_s6 }
  0x2e   : > { %v2412_v2 = vld [vmem:[%s2627_s5] sm:$0xff]   ;;  %v2414_v4 = vld [vmem:[%s2627_s5 + $0x8] sm:$0xff]   ;;  %v2416_v6 = vld [vmem:[%s2627_s5 + $0x10] sm:$0xff]  }
  0x2f   : > { %v2413_v3 = vld [vmem:[%s2627_s5 + $0x100] sm:$0xff]   ;;  %2247 = vmatprep.mubr.msk.bf16.mxu0 %vm671_vm0, %v2412_v2  ;;  %v2415_v5 = vld [vmem:[%s2627_s5 + $0x108] sm:$0xff]   ;;  %2246 = vmatpush3.bf16.msra.mxu0 %v2411_v1  ;;  %v2417_v7 = vld [vmem:[%s2627_s5 + $0x110] sm:$0xff]  }
  0x30   : > { %2311 = vmatprep.mubr.msk.bf16.mxu1 %vm671_vm0, %v2413_v3  ;;  %2378 = vmatpush3.bf16.msra.mxu1 %v2411_v1  ;;  %v2418_v8 = vld [vmem:[%s2627_s5 + $0x18] sm:$0xff]   ;;  %v2420_v10 = vld [vmem:[%s2627_s5 + $0x20] sm:$0xff]   ;;  %v2422_v12 = vld [vmem:[%s2627_s5 + $0x28] sm:$0xff]  }
  0x31   : > { %v2419_v9 = vld [vmem:[%s2627_s5 + $0x118] sm:$0xff]   ;;  %v2421_v11 = vld [vmem:[%s2627_s5 + $0x120] sm:$0xff]   ;;  %v2423_v13 = vld [vmem:[%s2627_s5 + $0x128] sm:$0xff]  }
  0x32   : > { %2248 = vmatmul.mubr.msk.bf16.vlgmr.msra.gmra.mxu0 %vm671_vm0, %v2414_v4  ;;  %v2424_v14 = vld [vmem:[%s2627_s5 + $0x30] sm:$0xff]   ;;  %v2426_v16 = vld [vmem:[%s2627_s5 + $0x38] sm:$0xff]   ;;  %v2428_v18 = vld [vmem:[%s2627_s5 + $0x40] sm:$0xff]  }
  0x33   : > { %2312 = vmatmul.mubr.msk.bf16.vlgmr.msra.gmra.mxu1 %vm671_vm0, %v2415_v5  ;;  %2251 = vmatprep.mubr.msk.bf16.mxu0 %vm671_vm0, %v2416_v6  ;;  %v2425_v15 = vld [vmem:[%s2627_s5 + $0x130] sm:$0xff]   ;;  %v2427_v17 = vld [vmem:[%s2627_s5 + $0x138] sm:$0xff]   ;;  %v2429_v19 = vld [vmem:[%s2627_s5 + $0x140] sm:$0xff]  }
  0x34   : > { %2315 = vmatprep.mubr.msk.bf16.mxu1 %vm671_vm0, %v2417_v7  ;;  %v2430_v20 = vld [vmem:[%s2627_s5 + $0x48] sm:$0xff]   ;;  %v2432_v22 = vld [vmem:[%s2627_s5 + $0x50] sm:$0xff]   ;;  %v2434_v24 = vld [vmem:[%s2627_s5 + $0x58] sm:$0xff]  }
  0x35   : > { %v2431_v21 = vld [vmem:[%s2627_s5 + $0x148] sm:$0xff]   ;;  %v2433_v23 = vld [vmem:[%s2627_s5 + $0x150] sm:$0xff]   ;;  %v2435_v25 = vld [vmem:[%s2627_s5 + $0x158] sm:$0xff]  }
  0x36   : > { %v2436_v26 = vld [vmem:[%s2627_s5 + $0x60] sm:$0xff]   ;;  %v2438_v28 = vld [vmem:[%s2627_s5 + $0x68] sm:$0xff]   ;;  %v2440_v30 = vld [vmem:[%s2627_s5 + $0x70] sm:$0xff]  }
  0x37   : > { %v2437_v27 = vld [vmem:[%s2627_s5 + $0x160] sm:$0xff]   ;;  %v2439_v29 = vld [vmem:[%s2627_s5 + $0x168] sm:$0xff]   ;;  %v2441_v31 = vld [vmem:[%s2627_s5 + $0x170] sm:$0xff]  }
  0x38   : > { %v2442_v32 = vld [vmem:[%s2627_s5 + $0x78] sm:$0xff]   ;;  %v2444_v34 = vld [vmem:[%s2627_s5 + $0x80] sm:$0xff]   ;;  %v2446_v36 = vld [vmem:[%s2627_s5 + $0x88] sm:$0xff]  }
  0x39   : > { %v2443_v33 = vld [vmem:[%s2627_s5 + $0x178] sm:$0xff]   ;;  %v2445_v35 = vld [vmem:[%s2627_s5 + $0x180] sm:$0xff]   ;;  %v2447_v37 = vld [vmem:[%s2627_s5 + $0x188] sm:$0xff]  }
  0x3a   : > { %2252 = vmatmul.mubr.msk.bf16.gmra.mxu0 %vm671_vm0, %v2418_v8  ;;  %v2448_v38 = vld [vmem:[%s2627_s5 + $0x90] sm:$0xff]   ;;  %v2450_v40 = vld [vmem:[%s2627_s5 + $0x98] sm:$0xff]   ;;  %v2452_v42 = vld [vmem:[%s2627_s5 + $0xa0] sm:$0xff]  }
  0x3b   : > { %2316 = vmatmul.mubr.msk.bf16.gmra.mxu1 %vm671_vm0, %v2419_v9  ;;  %2255 = vmatprep.mubr.msk.bf16.mxu0 %vm671_vm0, %v2420_v10  ;;  %v2449_v39 = vld [vmem:[%s2627_s5 + $0x190] sm:$0xff]   ;;  %v2451_v41 = vld [vmem:[%s2627_s5 + $0x198] sm:$0xff]   ;;  %v2453_v43 = vld [vmem:[%s2627_s5 + $0x1a0] sm:$0xff]  }
  0x3c   : > { %2319 = vmatprep.mubr.msk.bf16.mxu1 %vm671_vm0, %v2421_v11  ;;  %v2454_v44 = vld [vmem:[%s2627_s5 + $0xa8] sm:$0xff]   ;;  %v2456_v46 = vld [vmem:[%s2627_s5 + $0xb0] sm:$0xff]   ;;  %v2458_v48 = vld [vmem:[%s2627_s5 + $0xb8] sm:$0xff]  }
  0x3d   : > { %v2455_v45 = vld [vmem:[%s2627_s5 + $0x1a8] sm:$0xff]   ;;  %v2457_v47 = vld [vmem:[%s2627_s5 + $0x1b0] sm:$0xff]   ;;  %v2459_v49 = vld [vmem:[%s2627_s5 + $0x1b8] sm:$0xff]  }
  0x3e   : > { %v2460_v50 = vld [vmem:[%s2627_s5 + $0xc0] sm:$0xff]   ;;  %v2462_v52 = vld [vmem:[%s2627_s5 + $0xc8] sm:$0xff]   ;;  %v2464_v54 = vld [vmem:[%s2627_s5 + $0xd0] sm:$0xff]  }
  0x3f   : > { %v2461_v51 = vld [vmem:[%s2627_s5 + $0x1c0] sm:$0xff]   ;;  %v2463_v53 = vld [vmem:[%s2627_s5 + $0x1c8] sm:$0xff]   ;;  %v2465_v55 = vld [vmem:[%s2627_s5 + $0x1d0] sm:$0xff]  }
  0x40   : > { %v2466_v56 = vld [vmem:[%s2627_s5 + $0xd8] sm:$0xff]   ;;  %v2468_v58 = vld [vmem:[%s2627_s5 + $0xe0] sm:$0xff]   ;;  %v2470_v60 = vld [vmem:[%s2627_s5 + $0xe8] sm:$0xff]  }
  0x41   : > { %v2467_v57 = vld [vmem:[%s2627_s5 + $0x1d8] sm:$0xff]   ;;  %v2469_v59 = vld [vmem:[%s2627_s5 + $0x1e0] sm:$0xff]   ;;  %v2471_v61 = vld [vmem:[%s2627_s5 + $0x1e8] sm:$0xff]  }
  0x42   : > { %2256 = vmatmul.mubr.msk.bf16.gmra.mxu0 %vm671_vm0, %v2422_v12  ;;  %v2472_v62 = vld [vmem:[%s2627_s5 + $0xf0] sm:$0xff]   ;;  %v2474_v0 = vld [vmem:[%s2627_s5 + $0xf8] sm:$0xff]  }
  0x43   : > { %2320 = vmatmul.mubr.msk.bf16.gmra.mxu1 %vm671_vm0, %v2423_v13  ;;  %2259 = vmatprep.mubr.msk.bf16.mxu0 %vm671_vm0, %v2424_v14  ;;  %v2473_v63 = vld [vmem:[%s2627_s5 + $0x1f0] sm:$0xff]   ;;  %v2475_v1 = vld [vmem:[%s2627_s5 + $0x1f8] sm:$0xff]  }
  0x44   : > { %2323 = vmatprep.mubr.msk.bf16.mxu1 %vm671_vm0, %v2425_v15 }
  0x4a   : > { %2260 = vmatmul.mubr.msk.bf16.gmra.mxu0 %vm671_vm0, %v2426_v16 }
  0x4b   : > { %2324 = vmatmul.mubr.msk.bf16.gmra.mxu1 %vm671_vm0, %v2427_v17  ;;  %2263 = vmatprep.mubr.msk.bf16.mxu0 %vm671_vm0, %v2428_v18 }
  0x4c   : > { %2327 = vmatprep.mubr.msk.bf16.mxu1 %vm671_vm0, %v2429_v19 }
  0x52   : > { %2264 = vmatmul.mubr.msk.bf16.gmra.mxu0 %vm671_vm0, %v2430_v20 }
  0x53   : > { %2328 = vmatmul.mubr.msk.bf16.gmra.mxu1 %vm671_vm0, %v2431_v21  ;;  %2267 = vmatprep.mubr.msk.bf16.mxu0 %vm671_vm0, %v2432_v22 }
  0x54   : > { %2331 = vmatprep.mubr.msk.bf16.mxu1 %vm671_vm0, %v2433_v23 }
  0x5a   : > { %2268 = vmatmul.mubr.msk.bf16.gmra.mxu0 %vm671_vm0, %v2434_v24 }
  0x5b   : > { %2332 = vmatmul.mubr.msk.bf16.gmra.mxu1 %vm671_vm0, %v2435_v25  ;;  %2271 = vmatprep.mubr.msk.bf16.mxu0 %vm671_vm0, %v2436_v26 }
  0x5c   : > { %2335 = vmatprep.mubr.msk.bf16.mxu1 %vm671_vm0, %v2437_v27 }
  0x62   : > { %2272 = vmatmul.mubr.msk.bf16.gmra.mxu0 %vm671_vm0, %v2438_v28 }
  0x63   : > { %2336 = vmatmul.mubr.msk.bf16.gmra.mxu1 %vm671_vm0, %v2439_v29  ;;  %2275 = vmatprep.mubr.msk.bf16.mxu0 %vm671_vm0, %v2440_v30 }
  0x64   : > { %2339 = vmatprep.mubr.msk.bf16.mxu1 %vm671_vm0, %v2441_v31 }
  0x6a   : > { %2276 = vmatmul.mubr.msk.bf16.gmra.mxu0 %vm671_vm0, %v2442_v32 }
  0x6b   : > { %2340 = vmatmul.mubr.msk.bf16.gmra.mxu1 %vm671_vm0, %v2443_v33  ;;  %2279 = vmatprep.mubr.msk.bf16.mxu0 %vm671_vm0, %v2444_v34 }
  0x6c   : > { %2343 = vmatprep.mubr.msk.bf16.mxu1 %vm671_vm0, %v2445_v35 }
  0x72   : > { %2280 = vmatmul.mubr.msk.bf16.gmra.mxu0 %vm671_vm0, %v2446_v36 }
  0x73   : > { %2344 = vmatmul.mubr.msk.bf16.gmra.mxu1 %vm671_vm0, %v2447_v37  ;;  %2283 = vmatprep.mubr.msk.bf16.mxu0 %vm671_vm0, %v2448_v38  ;;  %v2793_v38 = vld [vmem:[#allocation4] ss:$0 sm:$0xff] }
  0x74   : > { %2347 = vmatprep.mubr.msk.bf16.mxu1 %vm671_vm0, %v2449_v39 }
  0x7a   : > { %2284 = vmatmul.mubr.msk.bf16.gmra.mxu0 %vm671_vm0, %v2450_v40 }
  0x7b   : > { %2348 = vmatmul.mubr.msk.bf16.gmra.mxu1 %vm671_vm0, %v2451_v41  ;;  %2287 = vmatprep.mubr.msk.bf16.mxu0 %vm671_vm0, %v2452_v42 }
  0x7c   : > { %2351 = vmatprep.mubr.msk.bf16.mxu1 %vm671_vm0, %v2453_v43 }
  0x82   : > { %2288 = vmatmul.mubr.msk.bf16.gmra.mxu0 %vm671_vm0, %v2454_v44 }
  0x83   : > { %2352 = vmatmul.mubr.msk.bf16.gmra.mxu1 %vm671_vm0, %v2455_v45  ;;  %2291 = vmatprep.mubr.msk.bf16.mxu0 %vm671_vm0, %v2456_v46 }
  0x84   : > { %2355 = vmatprep.mubr.msk.bf16.mxu1 %vm671_vm0, %v2457_v47 }
  0x8a   : > { %2292 = vmatmul.mubr.msk.bf16.gmra.mxu0 %vm671_vm0, %v2458_v48 }
  0x8b   : > { %2356 = vmatmul.mubr.msk.bf16.gmra.mxu1 %vm671_vm0, %v2459_v49  ;;  %2295 = vmatprep.mubr.msk.bf16.mxu0 %vm671_vm0, %v2460_v50 }
  0x8c   : > { %2359 = vmatprep.mubr.msk.bf16.mxu1 %vm671_vm0, %v2461_v51 }
  0x92   : > { %2296 = vmatmul.mubr.msk.bf16.gmra.mxu0 %vm671_vm0, %v2462_v52 }
  0x93   : > { %2360 = vmatmul.mubr.msk.bf16.gmra.mxu1 %vm671_vm0, %v2463_v53  ;;  %2299 = vmatprep.mubr.msk.bf16.mxu0 %vm671_vm0, %v2464_v54 }
  0x94   : > { %2363 = vmatprep.mubr.msk.bf16.mxu1 %vm671_vm0, %v2465_v55 }
  0x9a   : > { %2300 = vmatmul.mubr.msk.bf16.gmra.mxu0 %vm671_vm0, %v2466_v56 }
  0x9b   : > { %2364 = vmatmul.mubr.msk.bf16.gmra.mxu1 %vm671_vm0, %v2467_v57  ;;  %2303 = vmatprep.mubr.msk.bf16.mxu0 %vm671_vm0, %v2468_v58 }
  0x9c   : > { %2367 = vmatprep.mubr.msk.bf16.mxu1 %vm671_vm0, %v2469_v59 }
  0xa2   : > { %2304 = vmatmul.mubr.msk.bf16.gmra.mxu0 %vm671_vm0, %v2470_v60 }
  0xa3   : > { %2368 = vmatmul.mubr.msk.bf16.gmra.mxu1 %vm671_vm0, %v2471_v61  ;;  %2307 = vmatprep.mubr.msk.bf16.mxu0 %vm671_vm0, %v2472_v62 }
  0xa4   : > { %2371 = vmatprep.mubr.msk.bf16.mxu1 %vm671_vm0, %v2473_v63 }
  0xaa   : > { %2308 = vmatmul.mubr.msk.bf16.gmra.mxu0 %vm671_vm0, %v2474_v0 }
  0xab   : > { %2372 = vmatmul.mubr.msk.bf16.gmra.mxu1 %vm671_vm0, %v2475_v1 }
  0xf2   : > { %v2249_v2 = vpop.f32.mrf.mxu0 }
  0xf3   : > { %v2313_v3 = vpop.f32.mrf.mxu1  ;;  %v2800_v41 = vadd.f32 %v2249_v2, %v2793_v38 }
  0xf4   : > { %v898_v4 = vpop.f32.mrf.mxu0  ;;  %v2803_v42 = vadd.f32 %v2313_v3, %v2793_v38 }
  0xf5   : > { %v1154_v5 = vpop.f32.mrf.mxu1  ;;  %v2810_v45 = vadd.f32 %v2793_v38, %v898_v4 }
  0xf6   : > { %v2250_v6 = vpop.f32.mrf.mxu0  ;;  %v2813_v46 = vadd.f32 %v2793_v38, %v1154_v5 }
  0xf7   : > { %v2314_v7 = vpop.f32.mrf.mxu1  ;;  %v2816_v47 = vadd.f32 %v2250_v6, %v2793_v38 }
  0xf8   : > { %v901_v8 = vpop.f32.mrf.mxu0  ;;  %v2823_v50 = vadd.f32 %v2314_v7, %v2793_v38 }
  0xf9   : > { %v1157_v9 = vpop.f32.mrf.mxu1  ;;  %v2826_v51 = vadd.f32 %v2793_v38, %v901_v8 }
  0xfa   : > { %v2253_v10 = vpop.f32.mrf.mxu0  ;;  %v2831_v54 = vadd.f32 %v2793_v38, %v1157_v9 }
  0xfb   : > { %v2317_v11 = vpop.f32.mrf.mxu1  ;;  %v2834_v55 = vadd.f32 %v2253_v10, %v2793_v38 }
  0xfc   : > { %v914_v12 = vpop.f32.mrf.mxu0  ;;  %v2841_v58 = vadd.f32 %v2317_v11, %v2793_v38 }
  0xfd   : > { %v1170_v13 = vpop.f32.mrf.mxu1  ;;  %v2844_v59 = vadd.f32 %v2793_v38, %v914_v12 }
  0xfe   : > { %v2254_v14 = vpop.f32.mrf.mxu0  ;;  %v2847_v60 = vadd.f32 %v2793_v38, %v1170_v13 }
  0xff   : > { %v2318_v15 = vpop.f32.mrf.mxu1  ;;  %v2850_v61 = vadd.f32 %v2254_v14, %v2793_v38 }
 0x100   : > { %v917_v16 = vpop.f32.mrf.mxu0  ;;  %v2856_v1 = vadd.f32 %v2318_v15, %v2793_v38 }
 0x101   : > { %v1173_v17 = vpop.f32.mrf.mxu1  ;;  %v2865_v6 = vadd.f32 %v2793_v38, %v917_v16 }
 0x102   : > { %v2257_v18 = vpop.f32.mrf.mxu0  ;;  %v2868_v7 = vadd.f32 %v2793_v38, %v1173_v17 }
 0x103   : > { %v2321_v19 = vpop.f32.mrf.mxu1  ;;  %v2873_v10 = vadd.f32 %v2257_v18, %v2793_v38 }
 0x104   : > { %v2757_v20 = vpop.f32.mrf.mxu0  ;;  %v2876_v11 = vadd.f32 %v2321_v19, %v2793_v38 }
 0x105   : > { %v2759_v21 = vpop.f32.mrf.mxu1  ;;  %v2889_v18 = vadd.f32 %v2793_v38, %v2757_v20 }
 0x106   : > { %v2761_v22 = vpop.f32.mrf.mxu0  ;;  %v2893_v19 = vadd.f32 %v2793_v38, %v2759_v21 }
 0x107   : > { %v2763_v23 = vpop.f32.mrf.mxu1  ;;  %v2897_v8 = vadd.f32 %v2761_v22, %v2793_v38 }
 0x108   : > { %v2765_v24 = vpop.f32.mrf.mxu0  ;;  %v2907_v20 = vadd.f32 %v2763_v23, %v2793_v38 }
 0x109   : > { %v2767_v25 = vpop.f32.mrf.mxu1  ;;  %v2911_v21 = vadd.f32 %v2793_v38, %v2765_v24 }
 0x10a   : > { %v2769_v26 = vpop.f32.mrf.mxu0  ;;  %v2917_v5 = vadd.f32 %v2793_v38, %v2767_v25 }
 0x10b   : > { %v2771_v27 = vpop.f32.mrf.mxu1  ;;  %v2921_v17 = vadd.f32 %v2769_v26, %v2793_v38 }
 0x10c   : > { %v2773_v28 = vpop.f32.mrf.mxu0  ;;  %v2929_v24 = vadd.f32 %v2771_v27, %v2793_v38 }
 0x10d   : > { %v2775_v29 = vpop.f32.mrf.mxu1  ;;  %3378 = vst [vmem:[#allocation8_spill] sm:$0xff] %v2921_v17  ;;  %v2933_v16 = vadd.f32 %v2793_v38, %v2773_v28 }
 0x10e   : > { %v2777_v30 = vpop.f32.mrf.mxu0  ;;  %v2937_v25 = vadd.f32 %v2793_v38, %v2775_v29 }
 0x10f   : > { %v2779_v31 = vpop.f32.mrf.mxu1  ;;  %v2941_v26 = vadd.f32 %v2777_v30, %v2793_v38 }
 0x110   : > { %v2781_v32 = vpop.f32.mrf.mxu0  ;;  %v2948_v27 = vadd.f32 %v2779_v31, %v2793_v38 }
 0x111   : > { %v2783_v33 = vpop.f32.mrf.mxu1  ;;  %v2956_v30 = vadd.f32 %v2793_v38, %v2781_v32 }
 0x112   : > { %v2785_v34 = vpop.f32.mrf.mxu0  ;;  %3379 = vst [vmem:[#allocation9_spill] sm:$0xff] %v2948_v27  ;;  %v2960_v4 = vadd.f32 %v2793_v38, %v2783_v33 }
 0x113   : > { %v2787_v35 = vpop.f32.mrf.mxu1  ;;  %3380 = vst [vmem:[#allocation10_spill] sm:$0xff] %v2956_v30  ;;  %v2966_v22 = vadd.f32 %v2785_v34, %v2793_v38 }
 0x114   : > { %v2789_v36 = vpop.f32.mrf.mxu0  ;;  %3381 = vst [vmem:[#allocation11_spill] sm:$0xff] %v2960_v4  ;;  %v2970_v29 = vadd.f32 %v2787_v35, %v2793_v38 }
 0x115   : > { %v2791_v37 = vpop.f32.mrf.mxu1  ;;  %3382 = vst [vmem:[#allocation12_spill] sm:$0xff] %v2966_v22  ;;  %v2981_v34 = vadd.f32 %v2793_v38, %v2789_v36 }
 0x116   : > { %v2795_v39 = vpop.f32.mrf.mxu0  ;;  %3383 = vst [vmem:[#allocation13_spill] sm:$0xff] %v2970_v29  ;;  %v2985_v35 = vadd.f32 %v2793_v38, %v2791_v37 }
 0x117   : > { %v2797_v40 = vpop.f32.mrf.mxu1  ;;  %v2989_v17 = vadd.f32 %v2795_v39, %v2793_v38 }
 0x118   : > { %v2805_v43 = vpop.f32.mrf.mxu0  ;;  %v2999_v36 = vadd.f32 %v2797_v40, %v2793_v38 }
 0x119   : > { %v2807_v44 = vpop.f32.mrf.mxu1  ;;  %v3003_v37 = vadd.f32 %v2793_v38, %v2805_v43 }
 0x11a   : > { %v2818_v48 = vpop.f32.mrf.mxu0  ;;  %v3009_v27 = vadd.f32 %v2793_v38, %v2807_v44 }
 0x11b   : > { %v2820_v49 = vpop.f32.mrf.mxu1  ;;  %v3013_v0 = vadd.f32 %v2818_v48, %v2793_v38 }
 0x11c   : > { %v2836_v56 = vpop.f32.mrf.mxu0  ;;  %v3021_v43 = vadd.f32 %v2820_v49, %v2793_v38 }
 0x11d   : > { %v2838_v57 = vpop.f32.mrf.mxu1  ;;  %3384 = vst [vmem:[#allocation14_spill] sm:$0xff] %v3013_v0  ;;  %v3025_v52 = vadd.f32 %v2793_v38, %v2836_v56 }
 0x11e   : > { %v2858_v2 = vpop.f32.mrf.mxu0  ;;  %v3029_v44 = vadd.f32 %v2793_v38, %v2838_v57 }
 0x11f   : > { %v2860_v3 = vpop.f32.mrf.mxu1  ;;  %3385 = vst [vmem:[#allocation15_spill] sm:$0xff] %v3025_v52  ;;  %v3033_v48 = vadd.f32 %v2858_v2, %v2793_v38  ;;  %v3401_v52 = vmax.f32 %v2810_v45, 0.0 }
 0x120   : > { %v2878_v12 = vpop.f32.mrf.mxu0  ;;  %3386 = vst [vmem:[#allocation16_spill] sm:$0xff] %v3029_v44  ;;  %v3040_v49 = vadd.f32 %v2860_v3, %v2793_v38 }
 0x121   : > { %v2880_v13 = vpop.f32.mrf.mxu1  ;;  %3387 = vst [vmem:[#allocation17_spill] sm:$0xff] %v3033_v48  ;;  %v3050_v2 = vadd.f32 %v2793_v38, %v2878_v12 }
 0x122   : > { %v2899_v14 = vpop.f32.mrf.mxu0  ;;  %3388 = vst [vmem:[#allocation18_spill] sm:$0xff] %v3040_v49  ;;  %v3054_v29 = vadd.f32 %v2793_v38, %v2880_v13 }
 0x123   : > { %v2901_v15 = vpop.f32.mrf.mxu1  ;;  %3390 = vst [vmem:[#allocation20_spill] sm:$0xff] %v3050_v2  ;;  %v3060_v39 = vadd.f32 %v2899_v14, %v2793_v38 }
 0x124   : > { %v2923_v9 = vpop.f32.mrf.mxu0  ;;  %3391 = vst [vmem:[#allocation21_spill] sm:$0xff] %v3054_v29  ;;  %v3064_v57 = vadd.f32 %v2901_v15, %v2793_v38 }
 0x125   : > { %v2925_v23 = vpop.f32.mrf.mxu1  ;;  %3392 = vst [vmem:[#allocation22_spill] sm:$0xff] %v3060_v39  ;;  %v3077_v14 = vadd.f32 %v2793_v38, %v2923_v9  ;;  %v3399_v39 = vmax.f32 %v2800_v41, 0.0 }
 0x126   : > { %v2274_v28 = vpop.f32.mrf.mxu0  ;;  %3393 = vst [vmem:[#allocation23_spill] sm:$0xff] %v3064_v57  ;;  %v3081_v15 = vadd.f32 %v2793_v38, %v2925_v23 }
 0x127   : > { %v2950_v63 = vpop.f32.mrf.mxu1  ;;  %3396 = vst [vmem:[#allocation26_spill] sm:$0xff] %v3077_v14 }
 0x128   : > { %v997_v62 = vpop.f32.mrf.mxu0  ;;  %3397 = vst [vmem:[#allocation27_spill] sm:$0xff] %v3081_v15  ;;  %v3094_v23 = vadd.f32 %v2950_v63, %v2793_v38 }
 0x129   : > { %v2972_v53 = vpop.f32.mrf.mxu1 }
 0x12a   : > { %v2991_v32 = vpop.f32.mrf.mxu0  ;;  %v3106_v63 = vadd.f32 %v2793_v38, %v2972_v53 }
 0x12b   : > { %v2993_v33 = vpop.f32.mrf.mxu1 }
 0x12c   : > { %v3015_v31 = vpop.f32.mrf.mxu0 }
 0x12d   : > { %v3017_v40 = vpop.f32.mrf.mxu1 }
 0x12e   : > { %v3042_v56 = vpop.f32.mrf.mxu0 }
 0x12f   : > { %v3044_v4 = vpop.f32.mrf.mxu1 }
 0x130   : > { %3389 = vst [vmem:[#allocation19_spill] sm:$0xff] %v3044_v4  ;;  %v3066_v30 = vpop.f32.mrf.mxu0 }
 0x131   : > { %3394 = vst [vmem:[#allocation24_spill] sm:$0xff] %v3066_v30  ;;  %v3068_v12 = vpop.f32.mrf.mxu1 }
 0x132   : > { %3395 = vst [vmem:[#allocation25_spill] sm:$0xff] %v3068_v12  ;;  %v3084_v12 = vadd.f32 %v2274_v28, %v2793_v38  ;;  %v2281_v4 = vpop.f32.mrf.mxu0  ;;  %v3097_v28 = vadd.f32 %v2793_v38, %v997_v62 }
 0x133   : > { %v2345_v30 = vpop.f32.mrf.mxu1  ;;  %v1035_v3 = vadd.f32 %v2281_v4, %v2793_v38 }
 0x134   : > { %3398 = vst [vmem:[#allocation28_spill] sm:$0xff] %v3084_v12  ;;  %v1291_v0 = vadd.f32 %v2345_v30, %v2793_v38  ;;  %v1026_v48 = vpop.f32.mrf.mxu0 }
 0x135   : > { %v1282_v44 = vpop.f32.mrf.mxu1  ;;  %v1443_v13 = vmax.f32 %v1035_v3, 0.0  ;;  %v1027_v22 = vadd.f32 %v2793_v38, %v1026_v48 }
 0x136   : > { %v1507_v2 = vmax.f32 %v1291_v0, 0.0  ;;  %v1283_v4 = vadd.f32 %v2793_v38, %v1282_v44  ;;  %v2282_v62 = vpop.f32.mrf.mxu0  ;;  %v3400_v0 = vmax.f32 %v2803_v42, 0.0  ;;  %v3402_v42 = vmax.f32 %v2813_v46, 0.0 }
 0x137   : > { %v2346_v57 = vpop.f32.mrf.mxu1  ;;  %v1539_v3 = vmax.f32 %v3399_v39, %v1443_v13  ;;  %v1441_v29 = vmax.f32 %v1027_v22, 0.0  ;;  %v1038_v49 = vadd.f32 %v2282_v62, %v2793_v38  ;;  %v3127_v46 = vadd.f32 %v2991_v32, %v2793_v38 }
 0x138   : > { %v1571_v48 = vmax.f32 %v3400_v0, %v1507_v2  ;;  %v1505_v44 = vmax.f32 %v1283_v4, 0.0  ;;  %v1294_v12 = vadd.f32 %v2346_v57, %v2793_v38  ;;  %v1029_v53 = vpop.f32.mrf.mxu0  ;;  %v1498_v2 = vmax.f32 %v3106_v63, 0.0 }
 0x139   : > { %v1285_v15 = vpop.f32.mrf.mxu1  ;;  %v1537_v41 = vmax.f32 %v3401_v52, %v1441_v29  ;;  %v1030_v22 = vadd.f32 %v2793_v38, %v1029_v53  ;;  %v1444_v13 = vmax.f32 %v1038_v49, 0.0  ;;  %v3403_v52 = vmax.f32 %v2816_v47, 0.0 }
 0x13a   : > { %v1603_v14 = vmax.f32 %v1539_v3, %v1571_v48  ;;  %v1569_v39 = vmax.f32 %v3402_v42, %v1505_v44  ;;  %v1508_v4 = vmax.f32 %v1294_v12, 0.0  ;;  %v1286_v62 = vadd.f32 %v2793_v38, %v1285_v15  ;;  %v2285_v0 = vpop.f32.mrf.mxu0 }
 0x13b   : > { %v2349_v57 = vpop.f32.mrf.mxu1  ;;  %v1442_v30 = vmax.f32 %v1030_v22, 0.0  ;;  %v1051_v3 = vadd.f32 %v2285_v0, %v2793_v38  ;;  %v1540_v29 = vmax.f32 %v3403_v52, %v1444_v13  ;;  %v3404_v49 = vmax.f32 %v2823_v50, 0.0 }
 0x13c   : > { %v1601_v9 = vmax.f32 %v1537_v41, %v1569_v39  ;;  %v1307_v45 = vadd.f32 %v2349_v57, %v2793_v38  ;;  %v1506_v15 = vmax.f32 %v1286_v62, 0.0  ;;  %v1042_v48 = vpop.f32.mrf.mxu0  ;;  %v3405_v53 = vmax.f32 %v2826_v51, 0.0 }
 0x13d   : > { %v1572_v12 = vmax.f32 %v3404_v49, %v1508_v4  ;;  %v1298_v44 = vpop.f32.mrf.mxu1  ;;  %v1447_v42 = vmax.f32 %v1051_v3, 0.0  ;;  %v1043_v22 = vadd.f32 %v2793_v38, %v1042_v48  ;;  %v3139_v32 = vadd.f32 %v2993_v33, %v2793_v38 }
 0x13e   : > { %v1538_v41 = vmax.f32 %v3405_v53, %v1442_v30  ;;  %v1511_v39 = vmax.f32 %v1307_v45, 0.0  ;;  %v3406_v13 = vmax.f32 %v2831_v54, 0.0  ;;  %v1299_v50 = vadd.f32 %v2793_v38, %v1298_v44  ;;  %v2286_v4 = vpop.f32.mrf.mxu0 }
 0x13f   : > { %v1604_v47 = vmax.f32 %v1540_v29, %v1572_v12  ;;  %v2350_v62 = vpop.f32.mrf.mxu1  ;;  %v3407_v51 = vmax.f32 %v2834_v55, 0.0  ;;  %v3408_v33 = vmax.f32 %v2841_v58, 0.0  ;;  %v1445_v3 = vmax.f32 %v1043_v22, 0.0 }
 0x140   : > { %v1570_v0 = vmax.f32 %v3406_v13, %v1506_v15  ;;  %v1054_v54 = vadd.f32 %v2286_v4, %v2793_v38  ;;  %v1509_v29 = vmax.f32 %v1299_v50, 0.0  ;;  %v1310_v49 = vadd.f32 %v2350_v62, %v2793_v38  ;;  %v1045_v12 = vpop.f32.mrf.mxu0 }
 0x141   : > { %v1543_v30 = vmax.f32 %v3407_v51, %v1447_v42  ;;  %v1575_v57 = vmax.f32 %v3408_v33, %v1511_v39  ;;  %v2090_v45 = vpack.c.bf16 %v1604_v47, %v1603_v14  ;;  %v1301_v15 = vpop.f32.mrf.mxu1  ;;  %v3409_v44 = vmax.f32 %v2844_v59, 0.0 }
 0x142   : > { %v1602_v52 = vmax.f32 %v1538_v41, %v1570_v0  ;;  %v1448_v53 = vmax.f32 %v1054_v54, 0.0  ;;  %v1046_v42 = vadd.f32 %v2793_v38, %v1045_v12  ;;  %v3410_v39 = vmax.f32 %v2847_v60, 0.0  ;;  %v2289_v47 = vpop.f32.mrf.mxu0 }
 0x143   : > { %v1607_v48 = vmax.f32 %v1543_v30, %v1575_v57  ;;  %v1541_v55 = vmax.f32 %v3409_v44, %v1445_v3  ;;  %2162 = vst [vmem:[%s3147_s9 + $0x8] sm:$0xff] %v2090_v45   ;;  %v1512_v14 = vmax.f32 %v1310_v49, 0.0  ;;  %v1302_v41 = vadd.f32 %v2793_v38, %v1301_v15  ;;  %v2353_v13 = vpop.f32.mrf.mxu1 }
 0x144   : > { %v2085_v58 = vpack.c.bf16 %v1602_v52, %v1601_v9  ;;  %v1573_v22 = vmax.f32 %v3410_v39, %v1509_v29  ;;  %v3411_v0 = vmax.f32 %v2850_v61, 0.0  ;;  %v1446_v4 = vmax.f32 %v1046_v42, 0.0  ;;  %v1058_v57 = vpop.f32.mrf.mxu0 }
 0x145   : > { %v1067_v59 = vadd.f32 %v2289_v47, %v2793_v38  ;;  %v1323_v62 = vadd.f32 %v2353_v13, %v2793_v38  ;;  %v1439_v51 = vmax.f32 %v3127_v46, 0.0  ;;  %v3412_v60 = vmax.f32 %v2856_v1, 0.0  ;;  %v1314_v3 = vpop.f32.mrf.mxu1 }
 0x146   : > { %v1544_v50 = vmax.f32 %v3411_v0, %v1448_v53  ;;  %2086 = vst [vmem:[%s3147_s9] sm:$0xff] %v2085_v58   ;;  %v1605_v9 = vmax.f32 %v1541_v55, %v1573_v22  ;;  %v1510_v33 = vmax.f32 %v1302_v41, 0.0  ;;  %v3413_v54 = vmax.f32 %v2865_v6, 0.0  ;;  %v2290_v1 = vpop.f32.mrf.mxu0 }
 0x147   : > { %v1576_v30 = vmax.f32 %v3412_v60, %v1512_v14  ;;  %v1451_v61 = vmax.f32 %v1067_v59, 0.0  ;;  %v1515_v52 = vmax.f32 %v1323_v62, 0.0  ;;  %v1059_v29 = vadd.f32 %v2793_v38, %v1058_v57  ;;  %v2354_v53 = vpop.f32.mrf.mxu1 }
 0x148   : > { %v1542_v45 = vmax.f32 %v3413_v54, %v1446_v4  ;;  %v1503_v49 = vmax.f32 %v3139_v32, 0.0  ;;  %v3414_v15 = vmax.f32 %v2868_v7, 0.0  ;;  %v1315_v55 = vadd.f32 %v2793_v38, %v1314_v3  ;;  %v1061_v0 = vpop.f32.mrf.mxu0 }
 0x149   : > { %v1608_v12 = vmax.f32 %v1544_v50, %v1576_v30  ;;  %v3415_v42 = vmax.f32 %v2873_v10, 0.0  ;;  %v3416_v6 = vmax.f32 %v2876_v11, 0.0  ;;  %v1449_v22 = vmax.f32 %v1059_v29, 0.0  ;;  %v1317_v50 = vpop.f32.mrf.mxu1 }
 0x14a   : > { %v1574_v44 = vmax.f32 %v3414_v15, %v1510_v33  ;;  %v1070_v14 = vadd.f32 %v2290_v1, %v2793_v38  ;;  %v1513_v13 = vmax.f32 %v1315_v55, 0.0  ;;  %v1326_v7 = vadd.f32 %v2354_v53, %v2793_v38  ;;  %v2293_v3 = vpop.f32.mrf.mxu0 }
 0x14b   : > { %v1547_v58 = vmax.f32 %v3415_v42, %v1451_v61  ;;  %v1579_v39 = vmax.f32 %v3416_v6, %v1515_v52  ;;  %v2100_v41 = vpack.c.bf16 %v1608_v12, %v1607_v48  ;;  %v3417_v59 = vmax.f32 %v2889_v18, 0.0  ;;  %v2357_v54 = vpop.f32.mrf.mxu1 }
 0x14c   : > { %v1606_v47 = vmax.f32 %v1542_v45, %v1574_v44  ;;  %v1452_v10 = vmax.f32 %v1070_v14, 0.0  ;;  %v1062_v60 = vadd.f32 %v2793_v38, %v1061_v0  ;;  %v3418_v30 = vmax.f32 %v2893_v19, 0.0  ;;  %v1074_v55 = vpop.f32.mrf.mxu0 }
 0x14d   : > { %v1611_v4 = vmax.f32 %v1547_v58, %v1579_v39  ;;  %v1545_v62 = vmax.f32 %v3417_v59, %v1449_v22  ;;  %2164 = vst [vmem:[%s3147_s9 + $0x18] sm:$0xff] %v2100_v41   ;;  %v1516_v48 = vmax.f32 %v1326_v7, 0.0  ;;  %v1318_v57 = vadd.f32 %v2793_v38, %v1317_v50  ;;  %v1330_v1 = vpop.f32.mrf.mxu1 }
 0x14e   : > { %v2095_v11 = vpack.c.bf16 %v1606_v47, %v1605_v9  ;;  %v1577_v33 = vmax.f32 %v3418_v30, %v1513_v13  ;;  %v3419_v45 = vmax.f32 %v2897_v8, 0.0  ;;  %v1450_v52 = vmax.f32 %v1062_v60, 0.0  ;;  %v2294_v41 = vpop.f32.mrf.mxu0  ;;  %v3423_v13 = vld [vmem:[#allocation8_spill] sm:$0xff] }
 0x14f   : > { %v1083_v18 = vadd.f32 %v2293_v3, %v2793_v38  ;;  %v1339_v29 = vadd.f32 %v2357_v54, %v2793_v38  ;;  %v3196_v12 = vadd.f32 %v2793_v38, %v3015_v31  ;;  %v3420_v9 = vmax.f32 %v2907_v20, 0.0  ;;  %v2358_v47 = vpop.f32.mrf.mxu1 }
 0x150   : > { %v1548_v61 = vmax.f32 %v3419_v45, %v1452_v10  ;;  %2163 = vst [vmem:[%s3147_s9 + $0x10] sm:$0xff] %v2095_v11   ;;  %v1609_v19 = vmax.f32 %v1545_v62, %v1577_v33  ;;  %v1514_v44 = vmax.f32 %v1318_v57, 0.0  ;;  %v3421_v8 = vmax.f32 %v2911_v21, 0.0  ;;  %v1077_v11 = vpop.f32.mrf.mxu0 }
 0x151   : > { %v1580_v15 = vmax.f32 %v3420_v9, %v1516_v48  ;;  %v1455_v42 = vmax.f32 %v1083_v18, 0.0  ;;  %v1519_v58 = vmax.f32 %v1339_v29, 0.0  ;;  %v1075_v6 = vadd.f32 %v2793_v38, %v1074_v55  ;;  %v1333_v30 = vpop.f32.mrf.mxu1 }
 0x152   : > { %v1546_v53 = vmax.f32 %v3421_v8, %v1450_v52  ;;  %v3206_v39 = vadd.f32 %v2793_v38, %v3017_v40  ;;  %v3422_v22 = vmax.f32 %v2917_v5, 0.0  ;;  %v1331_v20 = vadd.f32 %v2793_v38, %v1330_v1  ;;  %v2297_v18 = vpop.f32.mrf.mxu0  ;;  %v3429_v8 = vld [vmem:[#allocation9_spill] sm:$0xff] }
 0x153   : > { %v1612_v31 = vmax.f32 %v1548_v61, %v1580_v15  ;;  %v3424_v21 = vmax.f32 %v3423_v13, 0.0  ;;  %v3425_v0 = vmax.f32 %v2929_v24, 0.0  ;;  %v1453_v59 = vmax.f32 %v1075_v6, 0.0  ;;  %v2361_v29 = vpop.f32.mrf.mxu1 }
 0x154   : > { %v1578_v14 = vmax.f32 %v3422_v22, %v1514_v44  ;;  %v1086_v62 = vadd.f32 %v2294_v41, %v2793_v38  ;;  %v1517_v60 = vmax.f32 %v1331_v20, 0.0  ;;  %v1342_v5 = vadd.f32 %v2358_v47, %v2793_v38 }
 0x155   : > { %v1551_v7 = vmax.f32 %v3424_v21, %v1455_v42  ;;  %v1583_v50 = vmax.f32 %v3425_v0, %v1519_v58  ;;  %v2110_v40 = vpack.c.bf16 %v1612_v31, %v1611_v4  ;;  %v3426_v48 = vmax.f32 %v2933_v16, 0.0  ;;  %v1090_v58 = vpop.f32.mrf.mxu0  ;;  %v1346_v6 = vpop.f32.mrf.mxu1  ;;  %v3431_v31 = vld [vmem:[#allocation10_spill] sm:$0xff]  ;;  %v3433_v21 = vld [vmem:[#allocation11_spill] sm:$0xff] }
 0x156   : > { %v1610_v10 = vmax.f32 %v1546_v53, %v1578_v14  ;;  %v1456_v3 = vmax.f32 %v1086_v62, 0.0  ;;  %v1078_v54 = vadd.f32 %v2793_v38, %v1077_v11  ;;  %v3427_v45 = vmax.f32 %v2937_v25, 0.0 }
 0x157   : > { %v1615_v33 = vmax.f32 %v1551_v7, %v1583_v50  ;;  %v1549_v57 = vmax.f32 %v3426_v48, %v1453_v59  ;;  %2166 = vst [vmem:[%s3147_s9 + $0x28] sm:$0xff] %v2110_v40   ;;  %v1520_v4 = vmax.f32 %v1342_v5, 0.0  ;;  %v1334_v52 = vadd.f32 %v2793_v38, %v1333_v30  ;;  %v2298_v59 = vpop.f32.mrf.mxu0  ;;  %v2362_v62 = vpop.f32.mrf.mxu1  ;;  %v3435_v40 = vld [vmem:[#allocation12_spill] sm:$0xff]  ;;  %v3437_v5 = vld [vmem:[#allocation13_spill] sm:$0xff] }
 0x158   : > { %v2105_v24 = vpack.c.bf16 %v1610_v10, %v1609_v19  ;;  %v1581_v61 = vmax.f32 %v3427_v45, %v1517_v60  ;;  %v3428_v9 = vmax.f32 %v2941_v26, 0.0  ;;  %v1454_v44 = vmax.f32 %v1078_v54, 0.0 }
 0x159   : > { %v1099_v16 = vadd.f32 %v2297_v18, %v2793_v38  ;;  %v1355_v55 = vadd.f32 %v2361_v29, %v2793_v38  ;;  %v1437_v1 = vmax.f32 %v3196_v12, 0.0  ;;  %v3430_v25 = vmax.f32 %v3429_v8, 0.0 }
 0x15a   : > { %v1552_v15 = vmax.f32 %v3428_v9, %v1456_v3  ;;  %2165 = vst [vmem:[%s3147_s9 + $0x20] sm:$0xff] %v2105_v24   ;;  %v1613_v19 = vmax.f32 %v1549_v57, %v1581_v61  ;;  %v1518_v42 = vmax.f32 %v1334_v52, 0.0  ;;  %v3432_v22 = vmax.f32 %v3431_v31, 0.0  ;;  %v1093_v61 = vpop.f32.mrf.mxu0 }
 0x15b   : > { %v1584_v53 = vmax.f32 %v3430_v25, %v1520_v4  ;;  %v1459_v26 = vmax.f32 %v1099_v16, 0.0  ;;  %v1523_v20 = vmax.f32 %v1355_v55, 0.0  ;;  %v1091_v41 = vadd.f32 %v2793_v38, %v1090_v58  ;;  %v1349_v4 = vpop.f32.mrf.mxu1 }
 0x15c   : > { %v1550_v14 = vmax.f32 %v3432_v22, %v1454_v44  ;;  %v1501_v47 = vmax.f32 %v3206_v39, 0.0  ;;  %v3434_v7 = vmax.f32 %v3433_v21, 0.0  ;;  %v1347_v50 = vadd.f32 %v2793_v38, %v1346_v6  ;;  %v2301_v25 = vpop.f32.mrf.mxu0 }
 0x15d   : > { %v1616_v13 = vmax.f32 %v1552_v15, %v1584_v53  ;;  %v3436_v10 = vmax.f32 %v3435_v40, 0.0  ;;  %v3438_v11 = vmax.f32 %v3437_v5, 0.0  ;;  %v1457_v48 = vmax.f32 %v1091_v41, 0.0  ;;  %v2365_v53 = vpop.f32.mrf.mxu1  ;;  %v3446_v5 = vld [vmem:[#allocation14_spill] sm:$0xff] }
 0x15e   : > { %v1582_v0 = vmax.f32 %v3434_v7, %v1518_v42  ;;  %v1102_v57 = vadd.f32 %v2298_v59, %v2793_v38  ;;  %v1521_v24 = vmax.f32 %v1347_v50, 0.0  ;;  %v1358_v45 = vadd.f32 %v2362_v62, %v2793_v38  ;;  %v3444_v50 = vld [vmem:[#allocation19_spill] sm:$0xff] }
 0x15f   : > { %v1555_v60 = vmax.f32 %v3436_v10, %v1459_v26  ;;  %v1587_v30 = vmax.f32 %v3438_v11, %v1523_v20  ;;  %v2120_v3 = vpack.c.bf16 %v1616_v13, %v1615_v33  ;;  %v3439_v18 = vmax.f32 %v2981_v34, 0.0  ;;  %v1106_v20 = vpop.f32.mrf.mxu0  ;;  %v1362_v41 = vpop.f32.mrf.mxu1 }
 0x160   : > { %v1614_v54 = vmax.f32 %v1550_v14, %v1582_v0  ;;  %v1460_v9 = vmax.f32 %v1102_v57, 0.0  ;;  %v1094_v15 = vadd.f32 %v2793_v38, %v1093_v61  ;;  %v3440_v16 = vmax.f32 %v2985_v35, 0.0 }
 0x161   : > { %v1619_v52 = vmax.f32 %v1555_v60, %v1587_v30  ;;  %v1553_v29 = vmax.f32 %v3439_v18, %v1457_v48  ;;  %2168 = vst [vmem:[%s3147_s9 + $0x38] sm:$0xff] %v2120_v3   ;;  %v1524_v33 = vmax.f32 %v1358_v45, 0.0  ;;  %v1350_v8 = vadd.f32 %v2793_v38, %v1349_v4  ;;  %v2302_v10 = vpop.f32.mrf.mxu0  ;;  %v2366_v60 = vpop.f32.mrf.mxu1 }
 0x162   : > { %v2115_v44 = vpack.c.bf16 %v1614_v54, %v1613_v19  ;;  %v1585_v55 = vmax.f32 %v3440_v16, %v1521_v24  ;;  %v3441_v42 = vmax.f32 %v2989_v17, 0.0  ;;  %v1458_v6 = vmax.f32 %v1094_v15, 0.0 }
 0x163   : > { %v1115_v34 = vadd.f32 %v2301_v25, %v2793_v38  ;;  %v1371_v31 = vadd.f32 %v2365_v53, %v2793_v38  ;;  %v3258_v22 = vadd.f32 %v3042_v56, %v2793_v38  ;;  %v3442_v19 = vmax.f32 %v2999_v36, 0.0  ;;  %v1109_v61 = vpop.f32.mrf.mxu0  ;;  %v1365_v4 = vpop.f32.mrf.mxu1 }
 0x164   : > { %v1556_v58 = vmax.f32 %v3441_v42, %v1460_v9  ;;  %2167 = vst [vmem:[%s3147_s9 + $0x30] sm:$0xff] %v2115_v44   ;;  %v1617_v35 = vmax.f32 %v1553_v29, %v1585_v55  ;;  %v1522_v26 = vmax.f32 %v1350_v8, 0.0  ;;  %v3443_v17 = vmax.f32 %v3003_v37, 0.0  ;;  %v3449_v29 = vld [vmem:[#allocation15_spill] sm:$0xff]  ;;  %v3451_v55 = vld [vmem:[#allocation16_spill] sm:$0xff] }
 0x165   : > { %v1588_v14 = vmax.f32 %v3442_v19, %v1524_v33  ;;  %v1463_v21 = vmax.f32 %v1115_v34, 0.0  ;;  %v1527_v7 = vmax.f32 %v1371_v31, 0.0  ;;  %v1107_v0 = vadd.f32 %v2793_v38, %v1106_v20  ;;  %v2305_v53 = vpop.f32.mrf.mxu0  ;;  %v2369_v42 = vpop.f32.mrf.mxu1  ;;  %v3455_v20 = vld [vmem:[#allocation18_spill] sm:$0xff] }
 0x166   : > { %v1554_v13 = vmax.f32 %v3443_v17, %v1458_v6  ;;  %v3268_v59 = vadd.f32 %v3444_v50, %v2793_v38  ;;  %v3445_v62 = vmax.f32 %v3009_v27, 0.0  ;;  %v1363_v36 = vadd.f32 %v2793_v38, %v1362_v41 }
 0x167   : > { %v1620_v56 = vmax.f32 %v1556_v58, %v1588_v14  ;;  %v3447_v37 = vmax.f32 %v3446_v5, 0.0  ;;  %v3448_v30 = vmax.f32 %v3021_v43, 0.0  ;;  %v1461_v57 = vmax.f32 %v1107_v0, 0.0  ;;  %v3453_v58 = vld [vmem:[#allocation17_spill] sm:$0xff]  ;;  %v3457_v0 = vld [vmem:[#allocation20_spill] sm:$0xff] }
 0x168   : > { %v1586_v40 = vmax.f32 %v3445_v62, %v1522_v26  ;;  %v1118_v3 = vadd.f32 %v2302_v10, %v2793_v38  ;;  %v1525_v45 = vmax.f32 %v1363_v36, 0.0  ;;  %v1374_v27 = vadd.f32 %v2366_v60, %v2793_v38  ;;  %v3459_v5 = vld [vmem:[#allocation21_spill] sm:$0xff] }
 0x169   : > { %v1559_v11 = vmax.f32 %v3447_v37, %v1463_v21  ;;  %v1591_v48 = vmax.f32 %v3448_v30, %v1527_v7  ;;  %v2130_v54 = vpack.c.bf16 %v1620_v56, %v1619_v52  ;;  %v3450_v9 = vmax.f32 %v3449_v29, 0.0  ;;  %v1122_v21 = vpop.f32.mrf.mxu0  ;;  %v1378_v7 = vpop.f32.mrf.mxu1 }
 0x16a   : > { %v1618_v24 = vmax.f32 %v1554_v13, %v1586_v40  ;;  %v1464_v44 = vmax.f32 %v1118_v3, 0.0  ;;  %v1110_v16 = vadd.f32 %v2793_v38, %v1109_v61  ;;  %v3452_v33 = vmax.f32 %v3451_v55, 0.0  ;;  %v3461_v3 = vld [vmem:[#allocation22_spill] sm:$0xff] }
 0x16b   : > { %v1623_v18 = vmax.f32 %v1559_v11, %v1591_v48  ;;  %v1557_v15 = vmax.f32 %v3450_v9, %v1461_v57  ;;  %2170 = vst [vmem:[%s3147_s9 + $0x48] sm:$0xff] %v2130_v54   ;;  %v1528_v52 = vmax.f32 %v1374_v27, 0.0  ;;  %v1366_v25 = vadd.f32 %v2793_v38, %v1365_v4  ;;  %v2306_v48 = vpop.f32.mrf.mxu0  ;;  %v2370_v57 = vpop.f32.mrf.mxu1 }
 0x16c   : > { %v2125_v43 = vpack.c.bf16 %v1618_v24, %v1617_v35  ;;  %v1589_v8 = vmax.f32 %v3452_v33, %v1525_v45  ;;  %v3454_v6 = vmax.f32 %v3453_v58, 0.0  ;;  %v1462_v31 = vmax.f32 %v1110_v16, 0.0  ;;  %v3463_v45 = vld [vmem:[#allocation23_spill] sm:$0xff] }
 0x16d   : > { %v1131_v19 = vadd.f32 %v2305_v53, %v2793_v38  ;;  %v1387_v14 = vadd.f32 %v2369_v42, %v2793_v38  ;;  %v1440_v26 = vmax.f32 %v3258_v22, 0.0  ;;  %v3456_v41 = vmax.f32 %v3455_v20, 0.0  ;;  %v1381_v55 = vpop.f32.mrf.mxu1 }
 0x16e   : > { %v1560_v34 = vmax.f32 %v3454_v6, %v1464_v44  ;;  %2169 = vst [vmem:[%s3147_s9 + $0x40] sm:$0xff] %v2125_v43   ;;  %v1621_v35 = vmax.f32 %v1557_v15, %v1589_v8  ;;  %v1526_v13 = vmax.f32 %v1366_v25, 0.0  ;;  %v3458_v50 = vmax.f32 %v3457_v0, 0.0  ;;  %v1125_v43 = vpop.f32.mrf.mxu0  ;;  %v3465_v8 = vld [vmem:[#allocation26_spill] sm:$0xff]  ;;  %v3467_v6 = vld [vmem:[#allocation27_spill] sm:$0xff] }
 0x16f   : > { %v1592_v17 = vmax.f32 %v3456_v41, %v1528_v52  ;;  %v1467_v62 = vmax.f32 %v1131_v19, 0.0  ;;  %v1531_v40 = vmax.f32 %v1387_v14, 0.0  ;;  %v1123_v36 = vadd.f32 %v2793_v38, %v1122_v21  ;;  %v2373_v20 = vpop.f32.mrf.mxu1  ;;  %v3469_v41 = vld [vmem:[#allocation28_spill] sm:$0xff] }
 0x170   : > { %v1558_v56 = vmax.f32 %v3458_v50, %v1462_v31  ;;  %v1504_v10 = vmax.f32 %v3268_v59, 0.0  ;;  %v3460_v37 = vmax.f32 %v3459_v5, 0.0  ;;  %v1379_v30 = vadd.f32 %v2793_v38, %v1378_v7  ;;  %v2309_v14 = vpop.f32.mrf.mxu0  ;;  %v3471_v50 = vld [vmem:[#allocation24_spill] sm:$0xff] }
 0x171   : > { %v1624_v60 = vmax.f32 %v1560_v34, %v1592_v17  ;;  %v3462_v54 = vmax.f32 %v3461_v3, 0.0  ;;  %v3464_v27 = vmax.f32 %v3463_v45, 0.0  ;;  %v1465_v4 = vmax.f32 %v1123_v36, 0.0  ;;  %v1394_v5 = vpop.f32.mrf.mxu1  ;;  %v3474_v3 = vld [vmem:[#allocation25_spill] sm:$0xff] }
 0x172   : > { %v1590_v11 = vmax.f32 %v3460_v37, %v1526_v13  ;;  %v1134_v29 = vadd.f32 %v2306_v48, %v2793_v38  ;;  %v1529_v44 = vmax.f32 %v1379_v30, 0.0  ;;  %v1390_v16 = vadd.f32 %v2370_v57, %v2793_v38 }
 0x173   : > { %v1563_v24 = vmax.f32 %v3462_v54, %v1467_v62  ;;  %v1595_v61 = vmax.f32 %v3464_v27, %v1531_v40  ;;  %v2140_v9 = vpack.c.bf16 %v1624_v60, %v1623_v18  ;;  %v3466_v52 = vmax.f32 %v3465_v8, 0.0  ;;  %v1138_v60 = vpop.f32.mrf.mxu0 }
 0x174   : > { %v1622_v15 = vmax.f32 %v1558_v56, %v1590_v11  ;;  %v1468_v53 = vmax.f32 %v1134_v29, 0.0  ;;  %v1126_v42 = vadd.f32 %v2793_v38, %v1125_v43  ;;  %v3468_v34 = vmax.f32 %v3467_v6, 0.0 }
 0x175   : > { %v1627_v33 = vmax.f32 %v1563_v24, %v1595_v61  ;;  %v1561_v25 = vmax.f32 %v3466_v52, %v1465_v4  ;;  %2172 = vst [vmem:[%s3147_s9 + $0x58] sm:$0xff] %v2140_v9   ;;  %v1532_v18 = vmax.f32 %v1390_v16, 0.0  ;;  %v1382_v19 = vadd.f32 %v2793_v38, %v1381_v55  ;;  %v2310_v27 = vpop.f32.mrf.mxu0  ;;  %v2374_v61 = vpop.f32.mrf.mxu1 }
 0x176   : > { %v2135_v58 = vpack.c.bf16 %v1622_v15, %v1621_v35  ;;  %v1593_v31 = vmax.f32 %v3468_v34, %v1529_v44  ;;  %v3470_v17 = vmax.f32 %v3469_v41, 0.0  ;;  %v1466_v21 = vmax.f32 %v1126_v42, 0.0 }
 0x177   : > { %v1147_v7 = vadd.f32 %v2309_v14, %v2793_v38  ;;  %v1403_v0 = vadd.f32 %v2373_v20, %v2793_v38  ;;  %v1014_v56 = vadd.f32 %v2793_v38, %v3471_v50  ;;  %v3472_v62 = vmax.f32 %v3094_v23, 0.0  ;;  %v1397_v43 = vpop.f32.mrf.mxu1 }
 0x178   : > { %v1564_v13 = vmax.f32 %v3470_v17, %v1468_v53  ;;  %2171 = vst [vmem:[%s3147_s9 + $0x50] sm:$0xff] %v2135_v58   ;;  %v1625_v35 = vmax.f32 %v1561_v25, %v1593_v31  ;;  %v1530_v36 = vmax.f32 %v1382_v19, 0.0  ;;  %v3473_v37 = vmax.f32 %v3097_v28, 0.0 }
 0x179   : > { %v1596_v40 = vmax.f32 %v3472_v62, %v1532_v18  ;;  %v1471_v30 = vmax.f32 %v1147_v7, 0.0  ;;  %v1535_v48 = vmax.f32 %v1403_v0, 0.0  ;;  %v1139_v57 = vadd.f32 %v2793_v38, %v1138_v60 }
 0x17a   : > { %v1562_v11 = vmax.f32 %v3473_v37, %v1466_v21  ;;  %v1270_v54 = vadd.f32 %v2793_v38, %v3474_v3  ;;  %v1594_v45 = vmax.f32 %v1498_v2, %v1530_v36  ;;  %v1395_v23 = vadd.f32 %v2793_v38, %v1394_v5  ;;  %v1141_v2 = vpop.f32.mrf.mxu0 }
 0x17b   : > { %v1628_v24 = vmax.f32 %v1564_v13, %v1596_v40  ;;  %v1567_v28 = vmax.f32 %v1439_v51, %v1471_v30  ;;  %v1599_v4 = vmax.f32 %v1503_v49, %v1535_v48  ;;  %v1469_v29 = vmax.f32 %v1139_v57, 0.0 }
 0x17c   : > { %v1150_v9 = vadd.f32 %v2310_v27, %v2793_v38  ;;  %v1626_v44 = vmax.f32 %v1562_v11, %v1594_v45  ;;  %v1533_v16 = vmax.f32 %v1395_v23, 0.0  ;;  %v1406_v63 = vadd.f32 %v2374_v61, %v2793_v38 }
 0x17d   : > { %v2150_v15 = vpack.c.bf16 %v1628_v24, %v1627_v33  ;;  %v1631_v55 = vmax.f32 %v1567_v28, %v1599_v4  ;;  %v1565_v8 = vmax.f32 %v1437_v1, %v1469_v29  ;;  %v1142_v51 = vadd.f32 %v2793_v38, %v1141_v2 }
 0x17e   : > { %v1472_v46 = vmax.f32 %v1150_v9, 0.0  ;;  %v2145_v32 = vpack.c.bf16 %v1626_v44, %v1625_v35  ;;  %v1597_v49 = vmax.f32 %v1501_v47, %v1533_v16  ;;  %v1536_v33 = vmax.f32 %v1406_v63, 0.0 }
 0x17f   : > { %2174 = vst [vmem:[%s3147_s9 + $0x68] sm:$0xff] %v2150_v15   ;;  %v1398_v52 = vadd.f32 %v2793_v38, %v1397_v43  ;;  %v1438_v25 = vmax.f32 %v1014_v56, 0.0  ;;  %v1470_v42 = vmax.f32 %v1142_v51, 0.0  ;;  %v1502_v12 = vmax.f32 %v1270_v54, 0.0 }
 0x180   : > { %v1568_v53 = vmax.f32 %v1440_v26, %v1472_v46  ;;  %2173 = vst [vmem:[%s3147_s9 + $0x60] sm:$0xff] %v2145_v32   ;;  %v1629_v1 = vmax.f32 %v1565_v8, %v1597_v49  ;;  %v1600_v58 = vmax.f32 %v1504_v10, %v1536_v33 }
 0x181   : > { %v1534_v6 = vmax.f32 %v1398_v52, 0.0  ;;  %v1566_v34 = vmax.f32 %v1438_v25, %v1470_v42 }
 0x182   : > { %v1632_v39 = vmax.f32 %v1568_v53, %v1600_v58 }
 0x183   : > { %v1598_v47 = vmax.f32 %v1502_v12, %v1534_v6 }
 0x184   : > { %v2160_v31 = vpack.c.bf16 %v1632_v39, %v1631_v55 }
 0x185   : > { %v1630_v18 = vmax.f32 %v1566_v34, %v1598_v47 }
 0x186   : > { %2176 = vst [vmem:[%s3147_s9 + $0x78] sm:$0xff] %v2160_v31  }
 0x187   : > { %v2155_v38 = vpack.c.bf16 %v1630_v18, %v1629_v1 }
 0x189   : > { %2175 = vst [vmem:[%s3147_s9 + $0x70] sm:$0xff] %v2155_v38  }
 0x18a PF: > { %s15_s12 = sadd.s32 1, %s2542_s12  }
 0x18b   : > { %p12_p2 = scmp.ge.s32.totalorder %s15_s12, 4  }
 0x18d   :  { %14 = sbr.rel (!%p12_p2) target bundleno = 2 (0x2), region = 71 }
 0x192   :  { %1814 = vsyncpa [#allocation3], 1 }
 0x193   :  { %1816 = vsyncpa [#allocation3 + $0x1], 1 }
 0x194   :  { %1817 = vsyncpa [#allocation5], 1 }

// kernel: depth_cnn_forward.4
= control target key start
LH: loop header
LB: loop body
LE: loop exit
PB: predicated region body
PF: predicated region fallthrough
CT: control target
= control target key end

     0   :  { %8 = vsyncpa [#allocation3], 0  ;;  %s9302_s0 = inlined_call_operand.vmem [shape: bf16[2,18,18,128], index: 0, kind: input, shape index: {}]   ;;  %s9303_s1 = inlined_call_operand.hbm [shape: bf16[9,128,128], index: 1, kind: input, shape index: {}]   ;;  %s9304_s2 = inlined_call_operand.hbm [shape: f32[1,128], index: 2, kind: input, shape index: {}]   ;;  %s9305_s3 = inlined_call_operand.vmem [shape: bf16[2,256,128], index: 3, kind: output, shape index: {}]  }
   0x1   :  { %9 = vsyncpa [#allocation5], 0  ;;  %s6868_s12 = smov 0  }
   0x2 LB: > { %s6874_s13 = sadd.s32 4294967295, %s6842_s12   ;;  %p5319_p0 = scmp.ge.s32.totalorder %s6842_s12, 1  ;;  %s6842_s12 = sphi %s6868_s12, %s15_s12  }
   0x3   : > { %p114_p1 = scmp.lt.s32.totalorder %s6842_s12, 3  ;;  %s6844_s14 = smov [#allocation2]  }
   0x4   : > { %s126_s15 = sshll.u32 %s6844_s14, 4  ;;  %p6628_p3 = scmp.eq.s32.totalorder %s6874_s13, 0  ;;  %s127_s15 = int_to_ptr.vmem [resolvable:$true] %s126_s15 }
   0x5   : > { %p6878_p2 = pnand %p5319_p0, %p114_p1  ;;  %s6845_s17 = smov [#allocation4]  }
   0x6   : > { %s140_s18 = sshll.u32 %s6845_s17, 4  ;;  %s6787_s20 = scalar_lea.vmem %s127_s15, 9216  ;;  %s141_s18 = int_to_ptr.vmem [resolvable:$true] %s140_s18 }
   0x7   : > { %p6621_p4 = pneg %p6878_p2  ;;  %p6788_p7 = scmp.ne.s32.totalorder %s127_s15, %s6787_s20 }
   0x8   : > { %p6795_p10 = scmp.lt.s32.totalorder %s127_s15, %s127_s15  ;;  %p6796_p11 = scmp.lt.s32.totalorder %s6787_s20, %s6787_s20 }
   0x9   : > { %p6887_p5 = pnand %p6628_p3, %p6621_p4 }
   0xa   : > { %p6797_p12 = por %p6796_p11, %p6795_p10 }
   0xb   : > { %p6778_p6 = pneg %p6887_p5 }
   0xd   : > { %p6790_p8 = pnand %p6788_p7, %p6778_p6 }
   0xf   : > { %p6791_p9 = pneg %p6790_p8 }
  0x11   : > { %p6798_p13 = pnand %p6797_p12, %p6791_p9 }
  0x13   : > { %6801 = shalt.err (!%p6798_p13)
}
  0x14   : > { %s6846_s21 = smov 64   ;;  %s6847_s22 = smov 4  }
  0x15   : > { %6624 = dma.hbm_to_vmem [thread:$0]  (!%p6887_p5), %s9303_s1, 9216, %s127_s15, [#allocation3], %s6846_s21, %s6846_s21, %s6847_s22  }
  0x16   : > { %s6813_s25 = scalar_lea.vmem %s141_s18, 16  ;;  %s6820_s26 = scalar_lea.vmem %s141_s18, 32 }
  0x17   : > { %p6814_p0 = scmp.ne.s32.totalorder %s141_s18, %s6813_s25  ;;  %p6821_p7 = scmp.lt.s32.totalorder %s141_s18, %s141_s18 }
  0x18   : > { %p6822_p8 = scmp.lt.s32.totalorder %s6820_s26, %s6813_s25 }
  0x19   : > { %p6816_p1 = pnand %p6814_p0, %p6778_p6 }
  0x1a   : > { %p6823_p9 = por %p6822_p8, %p6821_p7 }
  0x1b   : > { %p6817_p4 = pneg %p6816_p1 }
  0x1d   : > { %p6824_p10 = pnand %p6823_p9, %p6817_p4 }
  0x1f   : > { %6827 = shalt.err (!%p6824_p10)
}
  0x20   : > { %6627 = dma.hbm_to_vmem [thread:$0]  (!%p6887_p5), %s9304_s2, 16, %s141_s18, [#allocation5]  }
  0x21   : > { %161 = sbr.rel (%p6878_p2) target bundleno = 589 (0x24d), region = 32 }
  0x26   : > { %6833 = dma.done.wait (%p6628_p3), [#allocation3], 9216  }
  0x27   : > { %6835 = vsyncadd (%p6628_p3), [#allocation3], 4294958080 }
  0x28   : > { %6837 = dma.done.wait (%p6628_p3), [#allocation5], 16  }
  0x29   : > { %6839 = vsyncadd (%p6628_p3), [#allocation5], 4294967280  ;;  %p189_p6 = scmp.lt.s32.totalorder %s6874_s13, 1  ;;  %v6644_v0 = vld [vmem:[#allocation2 + $0x78] sm:$0xff]   ;;  %v6645_v1 = vld [vmem:[#allocation2 + $0x70] sm:$0xff]   ;;  %vm1294_vm3 = vcmask 1042432  }
  0x2a   : > { %6164 = vmatprep.subr.bf16.mxu0 %v6644_v0  ;;  %6596 = vmatprep.subr.bf16.mxu1 %v6644_v0  ;;  %v6646_v2 = vld [vmem:[#allocation2 + $0x68] sm:$0xff]   ;;  %vm264_vm0 = vsmask.f32 3328  ;;  %vm265_vm1 = vsmask.f32 7440  ;;  %v6647_v3 = vld [vmem:[#allocation2 + $0x60] sm:$0xff]  }
  0x2b   : > { %s9469_s13 = smov (!%p189_p6, %s6874_s13), 1  ;;  %6165 = vmatpush3.bf16.msra.mxu0 %v6644_v0  ;;  %6604 = vmatpush3.bf16.msra.mxu1 %v6644_v0  ;;  %v6648_v19 = vld [vmem:[#allocation2 + $0x58] sm:$0xff]   ;;  %vm6954_vm2 = vmor %vm264_vm0, %vm265_vm1  ;;  %v6649_v41 = vld [vmem:[#allocation2 + $0x50] sm:$0xff]   ;;  %vm1295_vm4 = vcmask 1046532  }
  0x2c   : > { %s6612_s29 = smul.u32 216, %s9469_s13  ;;  %6166 = vmatprep.subr.bf16.mxu0 %v6645_v1  ;;  %6597 = vmatprep.subr.bf16.mxu1 %v6645_v1  ;;  %v6650_v51 = vld [vmem:[#allocation2 + $0x48] sm:$0xff]   ;;  %vm7198_vm5 = vmor %vm1294_vm3, %vm1295_vm4  ;;  %s5820_s6 = sshll.u32 %s9469_s13, 7 }
  0x2d   : > { %s9205_s9 = scalar_lea.vmem %s9305_s3, %s5820_s6 }
  0x2e   : > { %s6927_s5 = scalar_lea.vmem %s9302_s0, %s6612_s29 }
  0x2f   : > { %6167 = vmatpush3.bf16.msra.mxu0 %v6645_v1  ;;  %6605 = vmatpush3.bf16.msra.mxu1 %v6645_v1  ;;  %v6930_v4 = vld [vmem:[%s6927_s5] sm:$0xf]  ;;  %v6933_v5 = vld [vmem:[%s6927_s5 + $0x4] sm:$0xf]  ;;  %v6936_v6 = vld [vmem:[%s6927_s5 + $0x8] sm:$0x1] }
  0x30   : > { %6168 = vmatprep.subr.bf16.mxu0 %v6646_v2  ;;  %6598 = vmatprep.subr.bf16.mxu1 %v6646_v2  ;;  %v268_v7 = vshrl.u32 %v6930_v4, 16  ;;  %v271_v8 = vshll.u32 %v6930_v4, 16  ;;  %v277_v9 = vshll.u32 %v6933_v5, 16  ;;  %v281_v10 = vshrl.u32 %v6933_v5, 16  ;;  %v216_v11 = vld [vmem:[%s6927_s5 + $0x60] sm:$0xf] }
  0x31   : > { %v287_v12 = vshll.u32 %v6936_v6, 16  ;;  %v217_v13 = vld [vmem:[%s6927_s5 + $0x64] sm:$0xf]  ;;  %v256_v14 = vld [vmem:[%s6927_s5 + $0x68] sm:$0x1]  ;;  %v460_v21 = vshrl.u32 %v216_v11, 16 }
  0x32   : > { %v270_v15 = vrot.slane %v268_v7, 4  ;;  %v273_v16 = vrot.slane %v271_v8, 5  ;;  %v279_v17 = vrot.slane %v277_v9, 5  ;;  %v283_v18 = vrot.slane %v281_v10, 4  ;;  %v6947_v28 = vld [vmem:[%s6927_s5 + $0xc] sm:$0xf] }
  0x33   : > { %6169 = vmatpush3.bf16.msra.mxu0 %v6646_v2  ;;  %6606 = vmatpush3.bf16.msra.mxu1 %v6646_v2  ;;  %v289_v20 = vrot.slane %v287_v12, 5  ;;  %v463_v22 = vshll.u32 %v216_v11, 16  ;;  %v469_v23 = vshll.u32 %v217_v13, 16  ;;  %v473_v26 = vshrl.u32 %v217_v13, 16  ;;  %v6950_v29 = vld [vmem:[%s6927_s5 + $0x10] sm:$0xf] }
  0x34   : > { %6170 = vmatprep.subr.bf16.mxu0 %v6647_v3  ;;  %6599 = vmatprep.subr.bf16.mxu1 %v6647_v3  ;;  %v274_v24 = vor.u32 %v273_v16, %v270_v15  ;;  %v284_v25 = vor.u32 %v283_v18, %v279_v17  ;;  %v479_v27 = vshll.u32 %v256_v14, 16  ;;  %v462_v32 = vrot.slane %v460_v21, 4  ;;  %v6960_v35 = vld [vmem:[%s6927_s5 + $0x14] sm:$0x1]  ;;  %v218_v40 = vld [vmem:[%s6927_s5 + $0x6c] sm:$0xf] }
  0x35   : > { %v465_v33 = vrot.slane %v463_v22, 5  ;;  %v471_v34 = vrot.slane %v469_v23, 5  ;;  %v475_v38 = vrot.slane %v473_v26, 4  ;;  %v292_v43 = vshrl.u32 %v6947_v28, 16  ;;  %v219_v50 = vld [vmem:[%s6927_s5 + $0x70] sm:$0xf] }
  0x36   : > { %v275_v36 = vrot.slane %v274_v24, 4  ;;  %v285_v37 = vrot.slane %v284_v25, 4  ;;  %v481_v39 = vrot.slane %v479_v27, 5  ;;  %v295_v44 = vshll.u32 %v6947_v28, 16  ;;  %v257_v56 = vld [vmem:[%s6927_s5 + $0x74] sm:$0x1] }
  0x37   : > { %6171 = vmatpush3.bf16.msra.mxu0 %v6647_v3  ;;  %6607 = vmatpush3.bf16.msra.mxu1 %v6647_v3  ;;  %v466_v42 = vor.u32 %v465_v33, %v462_v32  ;;  %v301_v45 = vshll.u32 %v6950_v29, 16  ;;  %v476_v48 = vor.u32 %v475_v38, %v471_v34  ;;  %v305_v49 = vshrl.u32 %v6950_v29, 16  ;;  %v6980_v12 = vld [vmem:[%s6927_s5 + $0x18] sm:$0xf]  ;;  %v6651_v18 = vld [vmem:[#allocation2 + $0x40] sm:$0xff]  }
  0x38   : > { %6172 = vmatprep.subr.bf16.mxu0 %v6648_v19  ;;  %6600 = vmatprep.subr.bf16.mxu1 %v6648_v19  ;;  %v280_v46 = vsel %vm6954_vm2, %v275_v36, %v279_v17  ;;  %v290_v47 = vsel %vm6954_vm2, %v285_v37, %v289_v20  ;;  %v294_v54 = vrot.slane %v292_v43, 4  ;;  %v297_v55 = vrot.slane %v295_v44, 5  ;;  %v6983_v17 = vld [vmem:[%s6927_s5 + $0x1c] sm:$0xf]  ;;  %v6988_v21 = vld [vmem:[%s6927_s5 + $0x20] sm:$0x1] }
  0x39   : > { %v5329_v52 = vcombine.low %v280_v46, %v290_v47  ;;  %v467_v53 = vrot.slane %v466_v42, 4  ;;  %v477_v57 = vrot.slane %v476_v48, 4  ;;  %v303_v58 = vrot.slane %v301_v45, 5  ;;  %v220_v32 = vld [vmem:[%s6927_s5 + $0x78] sm:$0xf] }
  0x3a   : > { %v307_v59 = vrot.slane %v305_v49, 4  ;;  %v311_v60 = vshll.u32 %v6960_v35, 16  ;;  %v298_v62 = vor.u32 %v297_v55, %v294_v54  ;;  %v484_v0 = vshrl.u32 %v218_v40, 16  ;;  %v221_v43 = vld [vmem:[%s6927_s5 + $0x7c] sm:$0xf]  ;;  %v6654_v54 = vld [vmem:[#allocation2 + $0x30] sm:$0xff]  }
  0x3b   : > { %6173 = vmatpush3.bf16.msra.mxu0 %v6648_v19  ;;  %6608 = vmatpush3.bf16.msra.mxu1 %v6648_v19  ;;  %v472_v61 = vsel %vm6954_vm2, %v467_v53, %v471_v34  ;;  %v482_v1 = vsel %vm6954_vm2, %v477_v57, %v481_v39  ;;  %v487_v7 = vshll.u32 %v218_v40, 16  ;;  %v493_v11 = vshll.u32 %v219_v50, 16  ;;  %v6652_v40 = vld [vmem:[#allocation2 + $0x38] sm:$0xff]   ;;  %v258_v47 = vld [vmem:[%s6927_s5 + $0x80] sm:$0x1] }
  0x3c   : > { %6174 = vmatprep.subr.bf16.mxu0 %v6649_v41  ;;  %6601 = vmatprep.subr.bf16.mxu1 %v6649_v41  ;;  %v308_v2 = vor.u32 %v307_v59, %v303_v58  ;;  %v313_v3 = vrot.slane %v311_v60, 5  ;;  %v5337_v8 = vcombine.low %v472_v61, %v482_v1  ;;  %v299_v9 = vrot.slane %v298_v62, 4  ;;  %v6653_v44 = vld [vmem:[#allocation2 + $0xb8] sm:$0xff]   ;;  %v7003_v59 = vld [vmem:[%s6927_s5 + $0x24] sm:$0xf] }
  0x3d   : > { %6180 = vmatprep.mubr.bf16.mxu0 %v5329_v52  ;;  %v486_v10 = vrot.slane %v484_v0, 4  ;;  %v489_v14 = vrot.slane %v487_v7, 5  ;;  %v497_v15 = vshrl.u32 %v219_v50, 16  ;;  %v503_v16 = vshll.u32 %v257_v56, 16  ;;  %v7008_v1 = vld [vmem:[%s6927_s5 + $0x28] sm:$0xf] }
  0x3e   : > { %v309_v13 = vrot.slane %v308_v2, 4  ;;  %v304_v19 = vsel %vm6954_vm2, %v299_v9, %v303_v58  ;;  %v495_v20 = vrot.slane %v493_v11, 5  ;;  %v316_v22 = vshrl.u32 %v6980_v12, 16  ;;  %6196 = vmatprep.mubr.bf16.mxu1 %v5337_v8  ;;  %v7011_v2 = vld [vmem:[%s6927_s5 + $0x2c] sm:$0x1]  ;;  %v6655_v7 = vld [vmem:[#allocation2 + $0xb0] sm:$0xff]  }
  0x3f   : > { %6175 = vmatpush3.bf16.msra.mxu0 %v6649_v41  ;;  %6609 = vmatpush3.bf16.msra.mxu1 %v6649_v41  ;;  %v319_v23 = vshll.u32 %v6980_v12, 16  ;;  %v490_v25 = vor.u32 %v489_v14, %v486_v10  ;;  %v499_v26 = vrot.slane %v497_v15, 4  ;;  %v505_v27 = vrot.slane %v503_v16, 5  ;;  %v7016_v11 = vld [vmem:[%s6927_s5 + $0x84] sm:$0xf] }
  0x40   : > { %6176 = vmatprep.subr.bf16.mxu0 %v6650_v51  ;;  %6602 = vmatprep.subr.bf16.mxu1 %v6650_v51  ;;  %v314_v24 = vsel %vm6954_vm2, %v309_v13, %v313_v3  ;;  %v318_v34 = vrot.slane %v316_v22, 4  ;;  %v325_v37 = vshll.u32 %v6983_v17, 16  ;;  %v329_v41 = vshrl.u32 %v6983_v17, 16 }
  0x41   : > { %v5330_v33 = vcombine.low %v304_v19, %v314_v24  ;;  %v321_v36 = vrot.slane %v319_v23, 5  ;;  %v491_v38 = vrot.slane %v490_v25, 4  ;;  %v500_v39 = vor.u32 %v499_v26, %v495_v20  ;;  %v7026_v24 = vld [vmem:[%s6927_s5 + $0x8c] sm:$0x1] }
  0x42   : > { %v335_v42 = vshll.u32 %v6988_v21, 16  ;;  %v327_v46 = vrot.slane %v325_v37, 5  ;;  %v508_v48 = vshrl.u32 %v220_v32, 16  ;;  %v511_v49 = vshll.u32 %v220_v32, 16  ;;  %v6656_v25 = vld [vmem:[#allocation2 + $0x28] sm:$0xff]  }
  0x43   : > { %6177 = vmatpush3.bf16.msra.mxu0 %v6650_v51  ;;  %6610 = vmatpush3.bf16.msra.mxu1 %v6650_v51  ;;  %v322_v45 = vor.u32 %v321_v36, %v318_v34  ;;  %v496_v50 = vsel %vm6954_vm2, %v491_v38, %v495_v20  ;;  %v501_v51 = vrot.slane %v500_v39, 4  ;;  %v331_v52 = vrot.slane %v329_v41, 4  ;;  %v6657_v26 = vld [vmem:[#allocation2 + $0xa8] sm:$0xff]  }
  0x44   : > { %6178 = vmatprep.subr.bf16.mxu0 %v6651_v18  ;;  %6603 = vmatprep.subr.bf16.mxu1 %v6651_v18  ;;  %v337_v53 = vrot.slane %v335_v42, 5  ;;  %v510_v56 = vrot.slane %v508_v48, 4  ;;  %v513_v57 = vrot.slane %v511_v49, 5  ;;  %v517_v58 = vshll.u32 %v221_v43, 16  ;;  %v7038_v48 = vld [vmem:[%s6927_s5 + $0x30] sm:$0xf] }
  0x45   : > { %v323_v55 = vrot.slane %v322_v45, 4  ;;  %v506_v60 = vsel %vm6954_vm2, %v501_v51, %v505_v27  ;;  %v332_v61 = vor.u32 %v331_v52, %v327_v46  ;;  %v521_v62 = vshrl.u32 %v221_v43, 16 }
  0x46   : > { %v527_v0 = vshll.u32 %v258_v47, 16  ;;  %v5338_v3 = vcombine.low %v496_v50, %v506_v60  ;;  %v514_v9 = vor.u32 %v513_v57, %v510_v56  ;;  %v519_v10 = vrot.slane %v517_v58, 5  ;;  %v6658_v60 = vld [vmem:[#allocation2 + $0x20] sm:$0xff]  }
  0x47   : > { %6179 = vmatpush3.bf16.msra.mxu0 %v6651_v18  ;;  %6611 = vmatpush3.bf16.msra.mxu1 %v6651_v18  ;;  %v328_v8 = vsel %vm6954_vm2, %v323_v55, %v327_v46  ;;  %v333_v13 = vrot.slane %v332_v61, 4  ;;  %v523_v14 = vrot.slane %v521_v62, 4  ;;  %v340_v16 = vshrl.u32 %v7003_v59, 16  ;;  %v7020_v18 = vld [vmem:[%s6927_s5 + $0x88] sm:$0xf] }
  0x48   : > { %6212 = vmatprep.subr.bf16.mxu1 %v6652_v40  ;;  %6260 = vmatprep.subr.bf16.mxu0 %v6653_v44  ;;  %v529_v15 = vrot.slane %v527_v0, 5  ;;  %v515_v19 = vrot.slane %v514_v9, 4  ;;  %v343_v20 = vshll.u32 %v7003_v59, 16  ;;  %v349_v22 = vshll.u32 %v7008_v1, 16  ;;  %v7050_v9 = vld [vmem:[%s6927_s5 + $0x38] sm:$0x1] }
  0x49   : > { %v353_v23 = vshrl.u32 %v7008_v1, 16  ;;  %v338_v27 = vsel %vm6954_vm2, %v333_v13, %v337_v53  ;;  %v524_v32 = vor.u32 %v523_v14, %v519_v10  ;;  %v342_v34 = vrot.slane %v340_v16, 4  ;;  %v7044_v53 = vld [vmem:[%s6927_s5 + $0x34] sm:$0xf]  ;;  %v7055_v14 = vld [vmem:[%s6927_s5 + $0x90] sm:$0xf] }
  0x4a   : > { %6181 = vmatmul.mubr.bf16.vlgmr.msra.gmra.mxu0 %v5330_v33  ;;  %6197 = vmatmul.mubr.bf16.vlgmr.msra.gmra.mxu1 %v5338_v3  ;;  %v359_v33 = vshll.u32 %v7011_v2, 16  ;;  %v5331_v36 = vcombine.low %v328_v8, %v338_v27  ;;  %v520_v37 = vsel %vm6954_vm2, %v515_v19, %v519_v10  ;;  %v345_v38 = vrot.slane %v343_v20, 5 }
  0x4b   : > { %6213 = vmatpush3.bf16.msra.mxu1 %v6652_v40  ;;  %6261 = vmatpush3.bf16.msra.mxu0 %v6653_v44  ;;  %v351_v39 = vrot.slane %v349_v22, 5  ;;  %v525_v41 = vrot.slane %v524_v32, 4  ;;  %v355_v40 = vrot.slane %v353_v23, 4  ;;  %v532_v43 = vshrl.u32 %v7016_v11, 16  ;;  %v7061_v22 = vld [vmem:[%s6927_s5 + $0x94] sm:$0xf] }
  0x4c   : > { %6214 = vmatprep.subr.bf16.mxu1 %v6654_v54  ;;  %6262 = vmatprep.subr.bf16.mxu0 %v6655_v7  ;;  %v361_v42 = vrot.slane %v359_v33, 5  ;;  %v346_v44 = vor.u32 %v345_v38, %v342_v34  ;;  %v535_v45 = vshll.u32 %v7016_v11, 16  ;;  %v541_v46 = vshll.u32 %v7020_v18, 16  ;;  %v6660_v23 = vld [vmem:[#allocation2 + $0x18] sm:$0xff]  }
  0x4d   : > { %6184 = vmatprep.mubr.bf16.mxu0 %v5331_v36  ;;  %v545_v47 = vshrl.u32 %v7020_v18, 16  ;;  %v530_v49 = vsel %vm6954_vm2, %v525_v41, %v529_v15  ;;  %v356_v50 = vor.u32 %v355_v40, %v351_v39  ;;  %v534_v51 = vrot.slane %v532_v43, 4  ;;  %v7064_v36 = vld [vmem:[%s6927_s5 + $0x98] sm:$0x1]  ;;  %v7072_v40 = vld [vmem:[%s6927_s5 + $0x40] sm:$0xf] }
  0x4e   : > { %v551_v52 = vshll.u32 %v7026_v24, 16  ;;  %v5339_v55 = vcombine.low %v520_v37, %v530_v49  ;;  %v347_v56 = vrot.slane %v346_v44, 4  ;;  %v537_v57 = vrot.slane %v535_v45, 5  ;;  %v7067_v37 = vld [vmem:[%s6927_s5 + $0x3c] sm:$0xf] }
  0x4f   : > { %6215 = vmatpush3.bf16.msra.mxu1 %v6654_v54  ;;  %6263 = vmatpush3.bf16.msra.mxu0 %v6655_v7  ;;  %v543_v58 = vrot.slane %v541_v46, 5  ;;  %v6659_v54 = vld [vmem:[#allocation2 + $0xa0] sm:$0xff]   ;;  %v357_v61 = vrot.slane %v356_v50, 4  ;;  %v547_v62 = vrot.slane %v545_v47, 4  ;;  %v364_v3 = vshrl.u32 %v7038_v48, 16  ;;  %v6661_v38 = vld [vmem:[#allocation2 + $0x98] sm:$0xff]  }
  0x50   : > { %6216 = vmatprep.subr.bf16.mxu1 %v6656_v25  ;;  %6264 = vmatprep.subr.bf16.mxu0 %v6657_v26  ;;  %v553_v0 = vrot.slane %v551_v52, 5  ;;  %v352_v7 = vsel %vm6954_vm2, %v347_v56, %v351_v39  ;;  %v538_v8 = vor.u32 %v537_v57, %v534_v51  ;;  %v367_v10 = vshll.u32 %v7038_v48, 16  ;;  %v6662_v46 = vld [vmem:[#allocation2 + $0x10] sm:$0xff]  }
  0x51   : > { %6200 = vmatprep.mubr.bf16.mxu1 %v5339_v55  ;;  %v373_v13 = vshll.u32 %v7044_v53, 16  ;;  %v362_v15 = vsel %vm6954_vm2, %v357_v61, %v361_v42  ;;  %v548_v16 = vor.u32 %v547_v62, %v543_v58  ;;  %v366_v19 = vrot.slane %v364_v3, 4  ;;  %v7084_v61 = vld [vmem:[%s6927_s5 + $0x9c] sm:$0xf]  ;;  %v6663_v62 = vld [vmem:[#allocation2 + $0x90] sm:$0xff]  }
  0x52   : > { %v377_v20 = vshrl.u32 %v7044_v53, 16  ;;  %v5332_v27 = vcombine.low %v352_v7, %v362_v15  ;;  %v539_v32 = vrot.slane %v538_v8, 4  ;;  %v369_v34 = vrot.slane %v367_v10, 5 }
  0x53   : > { %6217 = vmatpush3.bf16.msra.mxu1 %v6656_v25  ;;  %6265 = vmatpush3.bf16.msra.mxu0 %v6657_v26  ;;  %v375_v33 = vrot.slane %v373_v13, 5  ;;  %v549_v25 = vrot.slane %v548_v16, 4  ;;  %v383_v39 = vshll.u32 %v7050_v9, 16  ;;  %v556_v41 = vshrl.u32 %v7055_v14, 16 }
  0x54   : > { %6218 = vmatprep.subr.bf16.mxu1 %v6658_v60  ;;  %6266 = vmatprep.subr.bf16.mxu0 %v6659_v54  ;;  %v379_v26 = vrot.slane %v377_v20, 4  ;;  %v544_v42 = vsel %vm6954_vm2, %v539_v32, %v543_v58  ;;  %v370_v43 = vor.u32 %v369_v34, %v366_v19  ;;  %v559_v44 = vshll.u32 %v7055_v14, 16  ;;  %v7081_v58 = vld [vmem:[%s6927_s5 + $0x44] sm:$0x1] }
  0x55   : > { %6185 = vmatmul.mubr.bf16.gmra.mxu0 %v5332_v27  ;;  %v565_v45 = vshll.u32 %v7061_v22, 16  ;;  %v554_v47 = vsel %vm6954_vm2, %v549_v25, %v553_v0  ;;  %v385_v50 = vrot.slane %v383_v39, 5  ;;  %v558_v51 = vrot.slane %v556_v41, 4  ;;  %v7096_v27 = vld [vmem:[%s6927_s5 + $0xa0] sm:$0xf]  ;;  %v6665_v39 = vld [vmem:[#allocation2 + $0x88] sm:$0xff]  }
  0x56   : > { %v380_v49 = vor.u32 %v379_v26, %v375_v33  ;;  %v5340_v52 = vcombine.low %v544_v42, %v554_v47  ;;  %v371_v55 = vrot.slane %v370_v43, 4  ;;  %v561_v56 = vrot.slane %v559_v44, 5  ;;  %v6664_v26 = vld [vmem:[#allocation2 + $0x8] sm:$0xff]  }
  0x57   : > { %6219 = vmatpush3.bf16.msra.mxu1 %v6658_v60  ;;  %6267 = vmatpush3.bf16.msra.mxu0 %v6659_v54  ;;  %v567_v57 = vrot.slane %v565_v45, 5  ;;  %v569_v0 = vshrl.u32 %v7061_v22, 16  ;;  %v575_v60 = vshll.u32 %v7064_v36, 16  ;;  %v388_v54 = vshrl.u32 %v7067_v37, 16  ;;  %v7106_v45 = vld [vmem:[%s6927_s5 + $0xa4] sm:$0x1] }
  0x58   : > { %6220 = vmatprep.subr.bf16.mxu1 %v6660_v23  ;;  %6268 = vmatprep.subr.bf16.mxu0 %v6661_v38  ;;  %v381_v3 = vrot.slane %v380_v49, 4  ;;  %v376_v7 = vsel %vm6954_vm2, %v371_v55, %v375_v33  ;;  %v562_v8 = vor.u32 %v561_v56, %v558_v51  ;;  %v391_v10 = vshll.u32 %v7067_v37, 16 }
  0x59   : > { %6201 = vmatmul.mubr.bf16.gmra.mxu1 %v5340_v52  ;;  %v397_v13 = vshll.u32 %v7072_v40, 16  ;;  %v571_v16 = vrot.slane %v569_v0, 4  ;;  %v577_v19 = vrot.slane %v575_v60, 5  ;;  %v390_v20 = vrot.slane %v388_v54, 4  ;;  %v6666_v54 = vld [vmem:[#allocation2] sm:$0xff]  }
  0x5a   : > { %v386_v15 = vsel %vm6954_vm2, %v381_v3, %v385_v50  ;;  %v563_v34 = vrot.slane %v562_v8, 4  ;;  %v393_v25 = vrot.slane %v391_v10, 5  ;;  %v401_v42 = vshrl.u32 %v7072_v40, 16  ;;  %v7111_v50 = vld [vmem:[%s6927_s5 + $0x48] sm:$0xf] }
  0x5b   : > { %6221 = vmatpush3.bf16.msra.mxu1 %v6660_v23  ;;  %6269 = vmatpush3.bf16.msra.mxu0 %v6661_v38  ;;  %v5333_v32 = vcombine.low %v376_v7, %v386_v15  ;;  %v7098_v33 = vrot.slane %v397_v13, 5  ;;  %v572_v41 = vor.u32 %v571_v16, %v567_v57  ;;  %v407_v43 = vshll.u32 %v7081_v58, 16  ;;  %v6667_v13 = vld [vmem:[#allocation2 + $0x80] sm:$0xff]  }
  0x5c   : > { %6222 = vmatprep.subr.bf16.mxu1 %v6662_v46  ;;  %6270 = vmatprep.subr.bf16.mxu0 %v6663_v62  ;;  %v580_v44 = vshrl.u32 %v7084_v61, 16  ;;  %v568_v23 = vsel %vm6954_vm2, %v563_v34, %v567_v57  ;;  %v394_v38 = vor.u32 %v393_v25, %v390_v20  ;;  %v583_v47 = vshll.u32 %v7084_v61, 16  ;;  %v7126_v34 = vld [vmem:[%s6927_s5 + $0x50] sm:$0x1] }
  0x5d   : > { %6188 = vmatprep.mubr.bf16.mxu0 %v5333_v32  ;;  %v589_v49 = vshll.u32 %v7096_v27, 16  ;;  %v573_v51 = vrot.slane %v572_v41, 4  ;;  %v403_v52 = vrot.slane %v401_v42, 4  ;;  %v409_v55 = vrot.slane %v407_v43, 5 }
  0x5e   : > { %v582_v56 = vrot.slane %v580_v44, 4  ;;  %v395_v3 = vrot.slane %v394_v38, 4  ;;  %v585_v0 = vrot.slane %v583_v47, 5  ;;  %v593_v60 = vshrl.u32 %v7096_v27, 16  ;;  %v7133_v44 = vld [vmem:[%s6927_s5 + $0xac] sm:$0xf] }
  0x5f   : > { %6223 = vmatpush3.bf16.msra.mxu1 %v6662_v46  ;;  %6271 = vmatpush3.bf16.msra.mxu0 %v6663_v62  ;;  %v591_v57 = vrot.slane %v589_v49, 5  ;;  %v578_v7 = vsel %vm6954_vm2, %v573_v51, %v577_v19  ;;  %v404_v8 = vor.u32 %v403_v52, %v7098_v33  ;;  %v599_v10 = vshll.u32 %v7106_v45, 16  ;;  %v7119_v46 = vld [vmem:[%s6927_s5 + $0x4c] sm:$0xf]  ;;  %v7129_v19 = vld [vmem:[%s6927_s5 + $0xa8] sm:$0xf] }
  0x60   : > { %6224 = vmatprep.subr.bf16.mxu1 %v6664_v26  ;;  %6272 = vmatprep.subr.bf16.mxu0 %v6665_v39  ;;  %v412_v62 = vshrl.u32 %v7111_v50, 16  ;;  %v5341_v15 = vcombine.low %v568_v23, %v578_v7  ;;  %v400_v16 = vsel %vm6954_vm2, %v395_v3, %v7098_v33  ;;  %v586_v20 = vor.u32 %v585_v0, %v582_v56  ;;  %v7138_v49 = vld [vmem:[%s6927_s5 + $0xb0] sm:$0x1]  ;;  %v7140_v51 = vld [vmem:[#allocation2 + $0xf8] sm:$0xff]   ;;  %v7147_v3 = vld [vmem:[%s6927_s5 + $0x54] sm:$0xf] }
  0x61   : > { %v595_v32 = vrot.slane %v593_v60, 4  ;;  %v405_v25 = vrot.slane %v404_v8, 4  ;;  %v601_v41 = vrot.slane %v599_v10, 5  ;;  %v415_v43 = vshll.u32 %v7111_v50, 16  ;;  %9321 = vst [vmem:[#allocation8_spill] sm:$0xff] %v7147_v3  ;;  %v7149_v0 = vld [vmem:[#allocation2 + $0x138] sm:$0xff]  }
  0x62   : > { %v414_v42 = vrot.slane %v412_v62, 4  ;;  %6204 = vmatprep.mubr.bf16.mxu1 %v5341_v15  ;;  %v587_v23 = vrot.slane %v586_v20, 4  ;;  %v421_v38 = vshll.u32 %v7119_v46, 16  ;;  %v425_v47 = vshrl.u32 %v7119_v46, 16 }
  0x63   : > { %6225 = vmatpush3.bf16.msra.mxu1 %v6664_v26  ;;  %6273 = vmatpush3.bf16.msra.mxu0 %v6665_v39  ;;  %v596_v33 = vor.u32 %v595_v32, %v591_v57  ;;  %v410_v52 = vsel %vm6954_vm2, %v405_v25, %v409_v55  ;;  %v417_v56 = vrot.slane %v415_v43, 5  ;;  %v431_v26 = vshll.u32 %v7126_v34, 16  ;;  %v7154_v32 = vld [vmem:[%s6927_s5 + $0x58] sm:$0xf]  ;;  %v7162_v43 = vld [vmem:[%s6927_s5 + $0x5c] sm:$0x1] }
  0x64   : > { %6226 = vmatprep.subr.bf16.mxu1 %v6666_v54  ;;  %v604_v39 = vshrl.u32 %v7129_v19, 16  ;;  %6274 = vmatprep.subr.bf16.mxu0 %v6667_v13  ;;  %v5334_v60 = vcombine.low %v400_v16, %v410_v52  ;;  %v592_v7 = vsel %vm6954_vm2, %v587_v23, %v591_v57  ;;  %v423_v10 = vrot.slane %v421_v38, 5 }
  0x65   : > { %v597_v8 = vrot.slane %v596_v33, 4  ;;  %v418_v62 = vor.u32 %v417_v56, %v414_v42  ;;  %v427_v15 = vrot.slane %v425_v47, 4  ;;  %v433_v55 = vrot.slane %v431_v26, 5  ;;  %v7169_v56 = vld [vmem:[%s6927_s5 + $0xb4] sm:$0xf] }
  0x66   : > { %v606_v20 = vrot.slane %v604_v39, 4  ;;  %6189 = vmatmul.mubr.bf16.gmra.mxu0 %v5334_v60  ;;  %v607_v57 = vshll.u32 %v7129_v19, 16  ;;  %v613_v25 = vshll.u32 %v7133_v44, 16  ;;  %v617_v42 = vshrl.u32 %v7133_v44, 16 }
  0x67   : > { %6227 = vmatpush3.bf16.msra.mxu1 %v6666_v54  ;;  %6275 = vmatpush3.bf16.msra.mxu0 %v6667_v13  ;;  %v602_v16 = vsel %vm6954_vm2, %v597_v8, %v601_v41  ;;  %v419_v13 = vrot.slane %v418_v62, 4  ;;  %v428_v23 = vor.u32 %v427_v15, %v423_v10  ;;  %v623_v33 = vshll.u32 %v7138_v49, 16  ;;  %v7175_v8 = vld [vmem:[%s6927_s5 + $0xb8] sm:$0xf] }
  0x68   : > { %6308 = vmatprep.subr.bf16.mxu1 %v7140_v51  ;;  %v5342_v54 = vcombine.low %v592_v7, %v602_v16  ;;  %6356 = vmatprep.subr.bf16.mxu0 %v7149_v0  ;;  %v609_v38 = vrot.slane %v607_v57, 5  ;;  %v615_v41 = vrot.slane %v613_v25, 5  ;;  %v619_v47 = vrot.slane %v617_v42, 4 }
  0x69   : > { %v436_v52 = vshrl.u32 %v7147_v3, 16  ;;  %v424_v26 = vsel %vm6954_vm2, %v419_v13, %v423_v10  ;;  %v429_v39 = vrot.slane %v428_v23, 4  ;;  %v625_v60 = vrot.slane %v623_v33, 5  ;;  %v7183_v13 = vld [vmem:[%s6927_s5 + $0xbc] sm:$0x1] }
  0x6a   : > { %6205 = vmatmul.mubr.bf16.gmra.mxu1 %v5342_v54  ;;  %v439_v7 = vshll.u32 %v7147_v3, 16  ;;  %v610_v62 = vor.u32 %v609_v38, %v606_v20  ;;  %v620_v15 = vor.u32 %v619_v47, %v615_v41  ;;  %v445_v57 = vshll.u32 %v7154_v32, 16  ;;  %9322 = vst [vmem:[#allocation9_spill] sm:$0xff] %v7183_v13  ;;  %v1246_v3 = vld [vmem:[%s6927_s5] sm:$0xe] }
  0x6b   : > { %v438_v16 = vrot.slane %v436_v52, 4  ;;  %v434_v25 = vsel %vm6954_vm2, %v429_v39, %v433_v55  ;;  %v449_v54 = vshrl.u32 %v7154_v32, 16  ;;  %v455_v10 = vshll.u32 %v7162_v43, 16 }
  0x6c   : > { %v441_v42 = vrot.slane %v439_v7, 5  ;;  %v5335_v23 = vcombine.low %v424_v26, %v434_v25  ;;  %v611_v33 = vrot.slane %v610_v62, 4  ;;  %v621_v63 = vrot.slane %v620_v15, 4  ;;  %v1247_v62 = vld [vmem:[%s6927_s5 + $0xc] sm:$0xe] }
  0x6d   : > { %v447_v20 = vrot.slane %v445_v57, 5  ;;  %v451_v47 = vrot.slane %v449_v54, 4  ;;  %v457_v52 = vrot.slane %v455_v10, 5  ;;  %v628_v31 = vshrl.u32 %v7169_v56, 16 }
  0x6e   : > { %v442_v38 = vor.u32 %v441_v42, %v438_v16  ;;  %6192 = vmatprep.mubr.bf16.mxu0 %v5335_v23  ;;  %v616_v55 = vsel %vm6954_vm2, %v611_v33, %v615_v41  ;;  %v626_v39 = vsel %vm6954_vm2, %v621_v63, %v625_v60  ;;  %v631_v7 = vshll.u32 %v7169_v56, 16 }
  0x6f   : > { %v637_v26 = vshll.u32 %v7175_v8, 16  ;;  %v5343_v15 = vcombine.low %v616_v55, %v626_v39  ;;  %v452_v16 = vor.u32 %v451_v47, %v447_v20  ;;  %v630_v25 = vrot.slane %v628_v31, 4 }
  0x70   : > { %v443_v57 = vrot.slane %v442_v38, 4  ;;  %v633_v42 = vrot.slane %v631_v7, 5  ;;  %v641_v10 = vshrl.u32 %v7175_v8, 16  ;;  %v647_v23 = vshll.u32 %v7183_v13, 16  ;;  %v1248_v7 = vld [vmem:[%s6927_s5 + $0x18] sm:$0xe] }
  0x71   : > { %v639_v54 = vrot.slane %v637_v26, 5  ;;  %6208 = vmatprep.mubr.bf16.mxu1 %v5343_v15  ;;  %v453_v60 = vrot.slane %v452_v16, 4  ;;  %v5377_v33 = vrot.slane %v1246_v3, 9  ;;  %v1299_v31 = vrot.slane %v6933_v5, 5 }
  0x72   : > { %v448_v41 = vsel %vm6954_vm2, %v443_v57, %v447_v20  ;;  %v634_v38 = vor.u32 %v633_v42, %v630_v25  ;;  %v643_v47 = vrot.slane %v641_v10, 4  ;;  %v649_v55 = vrot.slane %v647_v23, 5 }
  0x73   : > { %v458_v26 = vsel %vm6954_vm2, %v453_v60, %v457_v52  ;;  %v1300_v15 = vsel %vm7198_vm5, %v5377_v33, %v1299_v31  ;;  %v1301_v13 = vrot.slane %v1299_v31, 4  ;;  %v5378_v20 = vrot.slane %v1247_v62, 9  ;;  %v1249_v60 = vld [vmem:[%s6927_s5 + $0x24] sm:$0xe] }
  0x74   : > { %v5336_v57 = vcombine.low %v448_v41, %v458_v26  ;;  %v635_v3 = vrot.slane %v634_v38, 4  ;;  %v644_v16 = vor.u32 %v643_v47, %v639_v54  ;;  %v1306_v25 = vrot.slane %v6950_v29, 5 }
  0x75   : > { %v9325_v42 = vrot.slane %v6936_v6, 5  ;;  %v5355_v23 = vcombine.low %v6980_v12, %v6983_v17  ;;  %v5379_v39 = vrot.slane %v1248_v7, 9  ;;  %v1313_v52 = vrot.slane %v6983_v17, 5  ;;  %v7297_v12 = vld [vmem:[%s6927_s5 + $0x6c] sm:$0xe] }
  0x76   : > { %6193 = vmatmul.mubr.bf16.gmra.mxu0 %v5336_v57  ;;  %v640_v62 = vsel %vm6954_vm2, %v635_v3, %v639_v54  ;;  %v645_v41 = vrot.slane %v644_v16, 4  ;;  %v5353_v33 = vcombine.low %v6930_v4, %v6933_v5  ;;  %v1308_v31 = vrot.slane %v1306_v25, 4 }
  0x77   : > { %v1303_v10 = vsel %vm7198_vm5, %v1301_v13, %v9325_v42  ;;  %v1307_v13 = vsel %vm7198_vm5, %v5378_v20, %v1306_v25  ;;  %v1315_v38 = vrot.slane %v1313_v52, 4  ;;  %v1316_v47 = vrot.slane %v6988_v21, 5 }
  0x78   : > { %v5393_v6 = vcombine.low %v1300_v15, %v1303_v10  ;;  %v650_v7 = vsel %vm6954_vm2, %v645_v41, %v649_v55  ;;  %v1314_v54 = vsel %vm7198_vm5, %v5379_v39, %v1313_v52  ;;  %v5356_v26 = vcombine.low %v7003_v59, %v7008_v1  ;;  %v1250_v55 = vld [vmem:[%s6927_s5 + $0x30] sm:$0xe]  ;;  %v1251_v10 = vld [vmem:[%s6927_s5 + $0x3c] sm:$0xe] }
  0x79   : > { %v1320_v4 = vrot.slane %v7008_v1, 5  ;;  %v5344_v5 = vcombine.low %v640_v62, %v650_v7  ;;  %v9326_v15 = vrot.slane %v6960_v35, 5  ;;  %v1317_v21 = vsel %vm7198_vm5, %v1315_v38, %v1316_v47  ;;  %v6675_v35 = vld [vmem:[#allocation2 + $0x130] sm:$0xff]  }
  0x7a   : > { %6276 = vmatprep.mubr.bf16.mxu0 %v5393_v6  ;;  %v5380_v3 = vrot.slane %v1249_v60, 9  ;;  %v5395_v39 = vcombine.low %v1314_v54, %v1317_v21  ;;  %v1323_v25 = vrot.slane %v7011_v2, 5  ;;  %v1327_v42 = vrot.slane %v7044_v53, 5  ;;  %v1252_v6 = vld [vmem:[%s6927_s5 + $0x48] sm:$0xe]  ;;  %v6674_v7 = vld [vmem:[#allocation2 + $0xf0] sm:$0xff]  }
  0x7b   : > { %v1310_v20 = vsel %vm7198_vm5, %v1308_v31, %v9326_v15  ;;  %6209 = vmatmul.mubr.bf16.gmra.mxu1 %v5344_v5  ;;  %v1322_v16 = vrot.slane %v1320_v4, 4  ;;  %v5381_v52 = vrot.slane %v1250_v55, 9  ;;  %v1330_v62 = vrot.slane %v7050_v9, 5  ;;  %v1253_v38 = vld [vmem:[%s6927_s5 + $0x54] sm:$0xe] }
  0x7c   : > { %v5394_v57 = vcombine.low %v1307_v13, %v1310_v20  ;;  %6228 = vmatprep.mubr.bf16.mxu1 %v5353_v33  ;;  %v1334_v41 = vrot.slane %v7072_v40, 5  ;;  %v1329_v31 = vrot.slane %v1327_v42, 4  ;;  %v1321_v60 = vsel %vm7198_vm5, %v5380_v3, %v1320_v4  ;;  %v7263_v55 = vld [vmem:[%s6927_s5 + $0x68] sm:$0x1] }
  0x7d   : > { %v5382_v13 = vrot.slane %v1251_v10, 9  ;;  %v1324_v2 = vsel %vm7198_vm5, %v1322_v16, %v1323_v25  ;;  %v1337_v9 = vrot.slane %v7081_v58, 5  ;;  %v1341_v47 = vrot.slane %v7119_v46, 5  ;;  %v6683_v16 = vld [vmem:[#allocation2 + $0x120] sm:$0xff]   ;;  %v6678_v10 = vld [vmem:[#allocation2 + $0xe8] sm:$0xff]  }
  0x7e   : > { %6277 = vmatmul.mubr.bf16.vlgmr.msra.gmra.mxu0 %v5394_v57  ;;  %v1336_v33 = vrot.slane %v1334_v41, 4  ;;  %v1328_v54 = vsel %vm7198_vm5, %v5381_v52, %v1327_v42  ;;  %v1331_v4 = vsel %vm7198_vm5, %v1329_v31, %v1330_v62  ;;  %v1348_v5 = vrot.slane %v7154_v32, 5  ;;  %v7315_v31 = vld [vmem:[%s6927_s5 + $0x64] sm:$0xf] }
  0x7f   : > { %6357 = vmatpush3.bf16.msra.mxu0 %v7149_v0  ;;  %6280 = vmatprep.mubr.bf16.mxu0 %v5395_v39  ;;  %v6679_v0 = vld [vmem:[#allocation2 + $0x128] sm:$0xff]   ;;  %v5383_v15 = vrot.slane %v1252_v6, 9  ;;  %v1343_v20 = vrot.slane %v1341_v47, 4  ;;  %v1344_v21 = vrot.slane %v7126_v34, 5  ;;  %v1358_v58 = vrot.slane %v7263_v55, 5 }
  0x80   : > { %6358 = vmatprep.subr.bf16.mxu0 %v6675_v35  ;;  %v5396_v57 = vcombine.low %v1321_v60, %v1324_v2  ;;  %v7268_v3 = vsel %vm7198_vm5, %v5382_v13, %v1334_v41  ;;  %v5384_v39 = vrot.slane %v1253_v38, 9  ;;  %v9327_v25 = vcombine.low %v6947_v28, %v6950_v29  ;;  %v1257_v28 = vld [vmem:[%s6927_s5 + $0x84] sm:$0xe]  ;;  %v1258_v41 = vld [vmem:[%s6927_s5 + $0x90] sm:$0xe] }
  0x81   : > { %v5397_v34 = vcombine.low %v1328_v54, %v1331_v4  ;;  %v7275_v42 = vsel %vm7198_vm5, %v1336_v33, %v1337_v9  ;;  %v1350_v52 = vrot.slane %v1348_v5, 4  ;;  %v1351_v62 = vrot.slane %v7162_v43, 5  ;;  %v1259_v2 = vld [vmem:[%s6927_s5 + $0x9c] sm:$0xe]  ;;  %v6682_v9 = vld [vmem:[#allocation2 + $0xe0] sm:$0xff]  }
  0x82   : > { %v5357_v29 = vcombine.low %v7038_v48, %v7044_v53  ;;  %v7291_v43 = vsel %vm7198_vm5, %v1343_v20, %v1344_v21  ;;  %v5358_v17 = vcombine.low %v7067_v37, %v7072_v40  ;;  %v5398_v48 = vcombine.low %v7268_v3, %v7275_v42  ;;  %v7326_v4 = vld [vmem:[%s6927_s5 + $0x70] sm:$0xf]  ;;  %v6687_v20 = vld [vmem:[#allocation2 + $0x118] sm:$0xff]   ;;  %v1260_v3 = vld [vmem:[%s6927_s5 + $0xa8] sm:$0xe] }
  0x83   : > { %6229 = vmatmul.mubr.bf16.vlgmr.msra.gmra.mxu1 %v9327_v25  ;;  %6359 = vmatpush3.bf16.msra.mxu0 %v6675_v35  ;;  %v7287_v35 = vsel %vm7198_vm5, %v5383_v15, %v1341_v47  ;;  %v5359_v53 = vcombine.low %v7111_v50, %v7119_v46  ;;  %v7312_v6 = vsel %vm7198_vm5, %v1350_v52, %v1351_v62  ;;  %v1355_v60 = vrot.slane %v7315_v31, 5  ;;  %v7345_v62 = vld [vmem:[#allocation2 + $0xd8] sm:$0xff]   ;;  %v1261_v13 = vld [vmem:[%s6927_s5 + $0xb4] sm:$0xe]  ;;  %v9328_v37 = vld [vmem:[#allocation8_spill] sm:$0xff] }
  0x84   : > { %6309 = vmatpush3.bf16.msra.mxu1 %v7140_v51  ;;  %6232 = vmatprep.mubr.bf16.mxu1 %v5355_v23  ;;  %v7294_v51 = vld [vmem:[%s6927_s5 + $0x60] sm:$0xe]  ;;  %v7307_v23 = vsel %vm7198_vm5, %v5384_v39, %v1348_v5  ;;  %v5388_v38 = vrot.slane %v1257_v28, 9  ;;  %v5399_v33 = vcombine.low %v7287_v35, %v7291_v43  ;;  %v5386_v54 = vrot.slane %v7297_v12, 9  ;;  %v6769_v35 = vld [vmem:[%s6927_s5 + $0x80] sm:$0x1] }
  0x85   : > { %6310 = vmatprep.subr.bf16.mxu1 %v6674_v7  ;;  %6360 = vmatprep.subr.bf16.mxu0 %v6679_v0  ;;  %v5385_v47 = vrot.slane %v7294_v51, 9  ;;  %v1362_v5 = vrot.slane %v7326_v4, 5  ;;  %v1379_v21 = vrot.slane %v7026_v24, 5  ;;  %v5400_v39 = vcombine.low %v7307_v23, %v7312_v6 }
  0x86   : > { %6281 = vmatmul.mubr.bf16.gmra.mxu0 %v5396_v57  ;;  %v5389_v25 = vrot.slane %v1258_v41, 9  ;;  %v1386_v42 = vrot.slane %v7064_v36, 5  ;;  %v1357_v52 = vrot.slane %v1355_v60, 4  ;;  %v6691_v36 = vld [vmem:[#allocation2 + $0x110] sm:$0xff]   ;;  %v1393_v51 = vrot.slane %v7106_v45, 5 }
  0x87   : > { %6284 = vmatprep.mubr.bf16.mxu0 %v5397_v34  ;;  %6361 = vmatpush3.bf16.msra.mxu0 %v6679_v0  ;;  %v7330_v0 = vld [vmem:[%s6927_s5 + $0x74] sm:$0x1]  ;;  %v1383_v34 = vrot.slane %v7061_v22, 5  ;;  %v7366_v41 = vld [vmem:[%s6927_s5 + $0x78] sm:$0xe]  ;;  %v1372_v55 = vrot.slane %v6769_v35, 5  ;;  %v5360_v40 = vcombine.low %v9328_v37, %v7154_v32  ;;  %v1363_v32 = vsel %vm7198_vm5, %v5386_v54, %v1362_v5 }
  0x88   : > { %6311 = vmatpush3.bf16.msra.mxu1 %v6674_v7  ;;  %6362 = vmatprep.subr.bf16.mxu0 %v6683_v16  ;;  %v1365_v15 = vrot.slane %v7330_v0, 5  ;;  %v1376_v7 = vrot.slane %v7020_v18, 5  ;;  %v5479_v54 = vld [vmem:[%s6927_s5 + $0x24] sm:$0xf]  ;;  %v5392_v0 = vrot.slane %v1261_v13, 9 }
  0x89   : > { %6312 = vmatprep.subr.bf16.mxu1 %v6678_v10  ;;  %v7355_v59 = vsel %vm7198_vm5, %v5389_v25, %v1383_v34  ;;  %v1385_v1 = vrot.slane %v1383_v34, 4  ;;  %v1400_v25 = vrot.slane %v7138_v49, 5  ;;  %v2215_v13 = vshrl.u32 %v5479_v54, 16 }
  0x8a   : > { %v7349_v24 = vsel %vm7198_vm5, %v5388_v38, %v1376_v7  ;;  %v1378_v28 = vrot.slane %v1376_v7, 4 }
  0x8b   : > { %6233 = vmatmul.mubr.bf16.gmra.mxu1 %v5356_v26  ;;  %6363 = vmatpush3.bf16.msra.mxu0 %v6683_v16  ;;  %v5390_v26 = vrot.slane %v1259_v2, 9  ;;  %v1390_v16 = vrot.slane %v7096_v27, 5  ;;  %v7372_v2 = vsel %vm7198_vm5, %v1385_v1, %v1386_v42  ;;  %v7386_v42 = vld [vmem:[%s6927_s5 + $0x10] sm:$0xf] }
  0x8c   : > { %6236 = vmatprep.mubr.bf16.mxu1 %v5357_v29  ;;  %6313 = vmatpush3.bf16.msra.mxu1 %v6678_v10  ;;  %v7360_v43 = vsel %vm7198_vm5, %v1378_v28, %v1379_v21  ;;  %v5391_v29 = vrot.slane %v1260_v3, 9  ;;  %v5473_v21 = vld [vmem:[%s6927_s5 + $0xc] sm:$0xf]  ;;  %v1397_v3 = vrot.slane %v7133_v44, 5  ;;  %v1356_v28 = vsel %vm7198_vm5, %v5385_v47, %v1355_v60  ;;  %v5476_v10 = vld [vmem:[%s6927_s5 + $0x18] sm:$0xf] }
  0x8d   : > { %6314 = vmatprep.subr.bf16.mxu1 %v6682_v9  ;;  %6364 = vmatprep.subr.bf16.mxu0 %v6687_v20  ;;  %v5404_v38 = vcombine.low %v7349_v24, %v7360_v43  ;;  %v7376_v7 = vsel %vm7198_vm5, %v5390_v26, %v1390_v16  ;;  %v1392_v45 = vrot.slane %v1390_v16, 4  ;;  %v6695_v60 = vld [vmem:[#allocation2 + $0x108] sm:$0xff]   ;;  %v1364_v26 = vrot.slane %v1362_v5, 4 }
  0x8e   : > { %6285 = vmatmul.mubr.bf16.gmra.mxu0 %v5398_v48  ;;  %v5405_v48 = vcombine.low %v7355_v59, %v7372_v2  ;;  %v1399_v47 = vrot.slane %v1397_v3, 4  ;;  %v5387_v16 = vrot.slane %v7366_v41, 9  ;;  %v2176_v34 = vshll.u32 %v7386_v42, 16  ;;  %v7563_v59 = vld [vmem:[%s6927_s5 + $0x58] sm:$0xf] }
  0x8f   : > { %6288 = vmatprep.mubr.bf16.mxu0 %v5399_v33  ;;  %6365 = vmatpush3.bf16.msra.mxu0 %v6687_v20  ;;  %v1359_v33 = vsel %vm7198_vm5, %v1357_v52, %v1358_v58  ;;  %v7395_v20 = vld [vmem:[%s6927_s5 + $0x7c] sm:$0xf]  ;;  %v7400_v49 = vsel %vm7198_vm5, %v1392_v45, %v1393_v51  ;;  %v7407_v58 = vsel %vm7198_vm5, %v5391_v29, %v1397_v3  ;;  %v2167_v52 = vshrl.u32 %v5473_v21, 16  ;;  %v6699_v51 = vld [vmem:[#allocation2 + $0x100] sm:$0xff]   ;;  %v6694_v3 = vld [vmem:[#allocation2 + $0xc8] sm:$0xff]  }
  0x90   : > { %6315 = vmatpush3.bf16.msra.mxu1 %v6682_v9  ;;  %v1369_v1 = vrot.slane %v7395_v20, 5  ;;  %6366 = vmatprep.subr.bf16.mxu0 %v6691_v36  ;;  %v6690_v9 = vld [vmem:[#allocation2 + $0xd0] sm:$0xff]   ;;  %v2170_v45 = vshll.u32 %v5473_v21, 16  ;;  %v5401_v29 = vcombine.low %v1356_v28, %v1359_v33  ;;  %v7420_v57 = vsel %vm7198_vm5, %v1399_v47, %v1400_v25  ;;  %v5477_v21 = vld [vmem:[%s6927_s5 + $0x1c] sm:$0xf]  ;;  %9332 = vst [vmem:[#allocation10_spill] sm:$0xff] %v7563_v59 }
  0x91   : > { %6316 = vmatprep.subr.bf16.mxu1 %v7345_v62  ;;  %v2180_v41 = vshrl.u32 %v7386_v42, 16  ;;  %v2169_v25 = vrot.slane %v2167_v52, 4  ;;  %v7434_v50 = vrot.slane %v2176_v34, 5  ;;  %v2191_v34 = vshrl.u32 %v5476_v10, 16  ;;  %v6770_v47 = vld [vmem:[%s6927_s5 + $0x60] sm:$0xf] }
  0x92   : > { %v2172_v28 = vrot.slane %v2170_v45, 5  ;;  %v2194_v33 = vshll.u32 %v5476_v10, 16  ;;  %v5361_v52 = vcombine.low %v6770_v47, %v7315_v31  ;;  %v1370_v23 = vsel %vm7198_vm5, %v5387_v16, %v1369_v1  ;;  %v5478_v16 = vld [vmem:[%s6927_s5 + $0x20] sm:$0x1] }
  0x93   : > { %6237 = vmatmul.mubr.bf16.gmra.mxu1 %v5358_v17  ;;  %6367 = vmatpush3.bf16.msra.mxu0 %v6691_v36  ;;  %v1371_v17 = vrot.slane %v1369_v1, 4  ;;  %v1404_v36 = vrot.slane %v7175_v8, 5  ;;  %v2182_v46 = vrot.slane %v2180_v41, 4  ;;  %v2200_v12 = vshll.u32 %v5477_v21, 16  ;;  %v7463_v41 = vld [vmem:[%s6927_s5 + $0x28] sm:$0xf] }
  0x94   : > { %6240 = vmatprep.mubr.bf16.mxu1 %v5359_v53  ;;  %6317 = vmatpush3.bf16.msra.mxu1 %v7345_v62  ;;  %v1366_v53 = vsel %vm7198_vm5, %v1364_v26, %v1365_v15  ;;  %v5475_v62 = vld [vmem:[%s6927_s5 + $0x14] sm:$0x1]  ;;  %v2204_v6 = vshrl.u32 %v5477_v21, 16  ;;  %v6698_v26 = vld [vmem:[#allocation2 + $0xc0] sm:$0xff]   ;;  %v2173_v45 = vor.u32 %v2172_v28, %v2169_v25  ;;  %v2218_v21 = vshll.u32 %v5479_v54, 16 }
  0x95   : > { %6318 = vmatprep.subr.bf16.mxu1 %v6690_v9  ;;  %6368 = vmatprep.subr.bf16.mxu0 %v6695_v60  ;;  %v1373_v5 = vsel %vm7198_vm5, %v1371_v17, %v1372_v55  ;;  %v1406_v15 = vrot.slane %v1404_v36, 4  ;;  %v5402_v31 = vcombine.low %v1363_v32, %v1366_v53  ;;  %v2183_v1 = vor.u32 %v2182_v46, %v7434_v50 }
  0x96   : > { %6289 = vmatmul.mubr.bf16.gmra.mxu0 %v5400_v39  ;;  %v9329_v39 = vld [vmem:[#allocation9_spill] sm:$0xff]  ;;  %v2193_v55 = vrot.slane %v2191_v34, 4  ;;  %v5403_v37 = vcombine.low %v1370_v23, %v1373_v5  ;;  %v7465_v17 = vrot.slane %v2200_v12, 5  ;;  %v2206_v25 = vrot.slane %v2204_v6, 4  ;;  %v7491_v12 = vld [vmem:[%s6927_s5 + $0x34] sm:$0xf] }
  0x97   : > { %6292 = vmatprep.mubr.bf16.mxu0 %v5401_v29  ;;  %6369 = vmatpush3.bf16.msra.mxu0 %v6695_v60  ;;  %v1407_v10 = vrot.slane %v9329_v39, 5  ;;  %v2186_v60 = vshll.u32 %v5475_v62, 16  ;;  %v7460_v29 = vld [vmem:[#allocation2 + $0x1b8] sm:$0xff]   ;;  %v7469_v28 = vsel %vm7198_vm5, %v5392_v0, %v1404_v36  ;;  %v2210_v32 = vshll.u32 %v5478_v16, 16  ;;  %v5482_v34 = vld [vmem:[%s6927_s5 + $0x30] sm:$0xf] }
  0x98   : > { %6319 = vmatpush3.bf16.msra.mxu1 %v6690_v9  ;;  %6370 = vmatprep.subr.bf16.mxu0 %v6699_v51  ;;  %v2196_v9 = vrot.slane %v2194_v33, 5  ;;  %v7480_v53 = vrot.slane %v2173_v45, 4  ;;  %v2224_v36 = vshll.u32 %v7463_v41, 16  ;;  %v2228_v62 = vshrl.u32 %v7463_v41, 16  ;;  %v6771_v6 = vld [vmem:[%s6927_s5 + $0x6c] sm:$0xf] }
  0x99   : > { %6320 = vmatprep.subr.bf16.mxu1 %v6694_v3  ;;  %v7473_v46 = vsel %vm7198_vm5, %v1406_v15, %v1407_v10  ;;  %v7488_v33 = vrot.slane %v2183_v1, 4  ;;  %v2220_v23 = vrot.slane %v2218_v21, 5  ;;  %v5362_v54 = vcombine.low %v6771_v6, %v7326_v4  ;;  %v5485_v0 = vld [vmem:[%s6927_s5 + $0x3c] sm:$0xf]  ;;  %v6772_v15 = vld [vmem:[%s6927_s5 + $0x78] sm:$0xf] }
  0x9a   : > { %v2197_v47 = vor.u32 %v2196_v9, %v2193_v55  ;;  %v2207_v5 = vor.u32 %v2206_v25, %v7465_v17  ;;  %v5363_v39 = vcombine.low %v6772_v15, %v7395_v20  ;;  %v7505_v1 = vld [vmem:[%s6927_s5 + $0x40] sm:$0xf]  ;;  %v7508_v4 = vrot.slane %v2224_v36, 5  ;;  %v5488_v21 = vld [vmem:[%s6927_s5 + $0x48] sm:$0xf] }
  0x9b   : > { %6241 = vmatmul.mubr.bf16.gmra.mxu1 %v5360_v40  ;;  %6371 = vmatpush3.bf16.msra.mxu0 %v6699_v51  ;;  %v7475_v40 = vld [vmem:[#allocation2 + $0x178] sm:$0xff]   ;;  %v7478_v51 = vld [vmem:[%s6927_s5 + $0x2c] sm:$0x1]  ;;  %v2239_v16 = vshrl.u32 %v5482_v34, 16  ;;  %v2242_v55 = vshll.u32 %v5482_v34, 16  ;;  %v2248_v25 = vshll.u32 %v7491_v12, 16 }
  0x9c   : > { %6244 = vmatprep.mubr.bf16.mxu1 %v5361_v52  ;;  %6321 = vmatpush3.bf16.msra.mxu1 %v6694_v3  ;;  %v7482_v3 = vrot.slane %v2186_v60, 5  ;;  %v2217_v52 = vrot.slane %v2215_v13, 4  ;;  %v2234_v45 = vshll.u32 %v7478_v51, 16  ;;  %v2230_v60 = vrot.slane %v2228_v62, 4  ;;  %v7526_v62 = vld [vmem:[%s6927_s5 + $0x4c] sm:$0xf] }
  0x9d   : > { %6322 = vmatprep.subr.bf16.mxu1 %v6698_v26  ;;  %6452 = vmatprep.subr.bf16.mxu0 %v7460_v29  ;;  %v7518_v9 = vrot.slane %v2197_v47, 4  ;;  %v2263_v36 = vshrl.u32 %v5485_v0, 16  ;;  %9330 = vst [vmem:[#allocation8_spill] sm:$0xff] %v7526_v62  ;;  %v7531_v6 = vld [vmem:[%s6927_s5 + $0x38] sm:$0x1]  ;;  %v2266_v15 = vshll.u32 %v5485_v0, 16 }
  0x9e   : > { %6293 = vmatmul.mubr.bf16.gmra.mxu0 %v5402_v31  ;;  %v7501_v31 = vrot.slane %v2210_v32, 5  ;;  %v2221_v13 = vor.u32 %v2220_v23, %v2217_v52  ;;  %v2252_v32 = vshrl.u32 %v7491_v12, 16  ;;  %v7528_v34 = vrot.slane %v2234_v45, 5 }
  0x9f   : > { %6296 = vmatprep.mubr.bf16.mxu0 %v5403_v37  ;;  %v7521_v37 = vrot.slane %v2207_v5, 4  ;;  %v2272_v47 = vshll.u32 %v7505_v1, 16  ;;  %v2276_v52 = vshrl.u32 %v7505_v1, 16  ;;  %v2231_v23 = vor.u32 %v2230_v60, %v7508_v4 }
  0xa0   : > { %6323 = vmatpush3.bf16.msra.mxu1 %v6698_v26  ;;  %v2244_v5 = vrot.slane %v2242_v55, 5  ;;  %v2287_v10 = vshrl.u32 %v5488_v21, 16  ;;  %v2290_v45 = vshll.u32 %v5488_v21, 16  ;;  %v2296_v20 = vshll.u32 %v7526_v62, 16  ;;  %v5491_v55 = vld [vmem:[%s6927_s5 + $0x54] sm:$0xf] }
  0xa1   : > { %6404 = vmatprep.subr.bf16.mxu1 %v7475_v40  ;;  %v7549_v60 = vrot.slane %v2248_v25, 5  ;;  %v2254_v24 = vrot.slane %v2252_v32, 4  ;;  %v2258_v43 = vshll.u32 %v7531_v6, 16  ;;  %v2268_v0 = vrot.slane %v2266_v15, 5  ;;  %v7559_v26 = vld [vmem:[%s6927_s5 + $0x50] sm:$0x1] }
  0xa2   : > { %v2278_v21 = vrot.slane %v2276_v52, 4  ;;  %9331 = vst [vmem:[#allocation9_spill] sm:$0xff] %v7559_v26  ;;  %v2300_v35 = vshrl.u32 %v7526_v62, 16  ;;  %v2232_v2 = vrot.slane %v2231_v23, 4  ;;  %v2289_v25 = vrot.slane %v2287_v10, 4 }
  0xa3   : > { %6245 = vmatmul.mubr.bf16.gmra.mxu1 %v5362_v54  ;;  %v2241_v54 = vrot.slane %v2239_v16, 4  ;;  %v2265_v16 = vrot.slane %v2263_v36, 4  ;;  %v2292_v32 = vrot.slane %v2290_v45, 5  ;;  %v2213_v36 = vsel %vm6954_vm2, %v7521_v37, %v7501_v31  ;;  %v5494_v62 = vld [vmem:[%s6927_s5 + $0x60] sm:$0xf] }
  0xa4   : > { %6248 = vmatprep.mubr.bf16.mxu1 %v5363_v39  ;;  %v7543_v39 = vrot.slane %v2221_v13, 4  ;;  %v7556_v13 = vrot.slane %v2272_v47, 5  ;;  %v7573_v47 = vrot.slane %v2296_v20, 5  ;;  %v2302_v52 = vrot.slane %v2300_v35, 4 }
  0xa5   : > { %v9333_v23 = vcombine.low %v7016_v11, %v7020_v18  ;;  %v2311_v10 = vshrl.u32 %v5491_v55, 16  ;;  %v2324_v31 = vshrl.u32 %v7563_v59, 16  ;;  %v9334_v37 = vcombine.low %v7055_v14, %v7061_v22 }
  0xa6   : > { %6297 = vmatmul.mubr.bf16.gmra.mxu0 %v5404_v38  ;;  %v7553_v38 = vld [vmem:[%s6927_s5 + $0x44] sm:$0x1]  ;;  %v2227_v15 = vsel %vm6954_vm2, %v7543_v39, %v7508_v4  ;;  %v2255_v4 = vor.u32 %v2254_v24, %v7549_v60  ;;  %v2269_v35 = vor.u32 %v2268_v0, %v2265_v16  ;;  %v2279_v20 = vor.u32 %v2278_v21, %v7556_v13  ;;  %v7598_v0 = vld [vmem:[%s6927_s5 + $0x5c] sm:$0x1] }
  0xa7   : > { %6300 = vmatprep.mubr.bf16.mxu0 %v5405_v48  ;;  %v2245_v48 = vor.u32 %v2244_v5, %v2241_v54  ;;  %v2314_v54 = vshll.u32 %v5491_v55, 16  ;;  %v2320_v5 = vshll.u32 %v7563_v59, 16  ;;  %v2282_v11 = vshll.u32 %v7553_v38, 16  ;;  %v7601_v24 = vld [vmem:[%s6927_s5 + $0x64] sm:$0xf] }
  0xa8   : > { %v2260_v39 = vrot.slane %v2258_v43, 5  ;;  %v2293_v45 = vor.u32 %v2292_v32, %v2289_v25  ;;  %v2306_v55 = vshll.u32 %v7559_v26, 16  ;;  %v2237_v14 = vsel %vm6954_vm2, %v2232_v2, %v7528_v34 }
  0xa9   : > { %v7587_v18 = vrot.slane %v2245_v48, 4  ;;  %v2303_v22 = vor.u32 %v2302_v52, %v7573_v47  ;;  %v2335_v16 = vshrl.u32 %v5494_v62, 16  ;;  %v2338_v21 = vshll.u32 %v5494_v62, 16 }
  0xaa   : > { %v9336_v43 = vcombine.low %v7407_v58, %v7420_v57  ;;  %v2313_v48 = vrot.slane %v2311_v10, 4  ;;  %v2316_v25 = vrot.slane %v2314_v54, 5  ;;  %v2256_v32 = vrot.slane %v2255_v4, 4 }
  0xab   : > { %6249 = vmatmul.mubr.bf16.gmra.mxu1 %v9333_v23  ;;  %v9335_v23 = vcombine.low %v7376_v7, %v7400_v49  ;;  %v7606_v7 = vrot.slane %v2320_v5, 5  ;;  %v2326_v49 = vrot.slane %v2324_v31, 4  ;;  %v2280_v34 = vrot.slane %v2279_v20, 4 }
  0xac   : > { %6252 = vmatprep.mubr.bf16.mxu1 %v9334_v37  ;;  %v2270_v37 = vrot.slane %v2269_v35, 4  ;;  %v2284_v2 = vrot.slane %v2282_v11, 5  ;;  %v2294_v52 = vrot.slane %v2293_v45, 4  ;;  %v2330_v59 = vshll.u32 %v7598_v0, 16  ;;  %v7631_v11 = vld [vmem:[%s6927_s5 + $0x68] sm:$0x1] }
  0xad   : > { %v2344_v62 = vshll.u32 %v7601_v24, 16  ;;  %v2304_v26 = vrot.slane %v2303_v22, 4  ;;  %v2337_v57 = vrot.slane %v2335_v16, 4  ;;  %v2340_v58 = vrot.slane %v2338_v21, 5  ;;  %v7668_v16 = vld [vmem:[%s6927_s5 + $0x7c] sm:$0xf] }
  0xae   : > { %6301 = vmatmul.mubr.bf16.gmra.mxu0 %v9335_v23  ;;  %v2308_v23 = vrot.slane %v2306_v55, 5  ;;  %v2348_v10 = vshrl.u32 %v7601_v24, 16  ;;  %v9337_v54 = vcombine.low %v7084_v61, %v7096_v27  ;;  %v9338_v5 = vsel %vm6954_vm2, %v7488_v33, %v7482_v3  ;;  %v5497_v3 = vld [vmem:[%s6927_s5 + $0x6c] sm:$0xf] }
  0xaf   : > { %6304 = vmatprep.mubr.bf16.mxu0 %v9336_v43  ;;  %v9339_v31 = vsel %vm6954_vm2, %v7480_v53, %v7434_v50  ;;  %v9340_v35 = vsel %vm6954_vm2, %v7518_v9, %v7465_v17  ;;  %v2317_v61 = vor.u32 %v2316_v25, %v2313_v48  ;;  %v2327_v27 = vor.u32 %v2326_v49, %v7606_v7 }
  0xb0   : > { %v5521_v4 = vcombine.low %v9339_v31, %v9338_v5  ;;  %v5522_v20 = vcombine.low %v9340_v35, %v2213_v36  ;;  %v9341_v33 = vcombine.low %v7129_v19, %v7133_v44  ;;  %v7637_v50 = vcombine.low %v2227_v15, %v2237_v14  ;;  %v7649_v36 = vld [vmem:[%s6927_s5 + $0x70] sm:$0xf] }
  0xb1   : > { %v2251_v17 = vsel %vm6954_vm2, %v7587_v18, %v7549_v60  ;;  %v2261_v53 = vsel %vm6954_vm2, %v2256_v32, %v2260_v39  ;;  %v2275_v9 = vsel %vm6954_vm2, %v2270_v37, %v7556_v13  ;;  %v2285_v19 = vsel %vm6954_vm2, %v2280_v34, %v2284_v2  ;;  %v5500_v60 = vld [vmem:[%s6927_s5 + $0x78] sm:$0xf]  ;;  %v6700_v39 = vld [vmem:[%s6927_s5 + $0xc] sm:$0xff]   ;;  %v5503_v34 = vld [vmem:[%s6927_s5 + $0x84] sm:$0xf] }
  0xb2   : > { %v2299_v44 = vsel %vm6954_vm2, %v2294_v52, %v7573_v47  ;;  %v7656_v15 = vrot.slane %v2330_v59, 5  ;;  %v7658_v45 = vrot.slane %v2344_v62, 5  ;;  %v9342_v18 = vcombine.low %v7469_v28, %v7473_v46  ;;  %v7685_v2 = vld [vmem:[%s6927_s5 + $0x88] sm:$0xf]  ;;  %v6707_v52 = vld [vmem:[#allocation2 + $0x1b0] sm:$0xff]  }
  0xb3   : > { %6253 = vmatmul.mubr.bf16.gmra.mxu1 %v9337_v54  ;;  %v2309_v13 = vsel %vm6954_vm2, %v2304_v26, %v2308_v23  ;;  %v2341_v55 = vor.u32 %v2340_v58, %v2337_v57  ;;  %v2350_v14 = vrot.slane %v2348_v10, 4  ;;  %v2359_v22 = vshrl.u32 %v5497_v3, 16  ;;  %v7691_v57 = vld [vmem:[%s6927_s5 + $0x74] sm:$0x1] }
  0xb4   : > { %6256 = vmatprep.mubr.bf16.mxu1 %v9341_v33  ;;  %v7670_v59 = vrot.slane %v2317_v61, 4  ;;  %v7672_v47 = vrot.slane %v2327_v27, 4  ;;  %v2354_v28 = vshll.u32 %v7631_v11, 16  ;;  %v2362_v46 = vshll.u32 %v5497_v3, 16  ;;  %v7705_v3 = vld [vmem:[%s6927_s5 + $0x80] sm:$0x1] }
  0xb5   : > { %v2368_v21 = vshll.u32 %v7649_v36, 16  ;;  %v2372_v26 = vshrl.u32 %v7649_v36, 16  ;;  %v2383_v43 = vshrl.u32 %v5500_v60, 16  ;;  %v2386_v48 = vshll.u32 %v5500_v60, 16  ;;  %v5506_v33 = vld [vmem:[%s6927_s5 + $0x90] sm:$0xf] }
  0xb6   : > { %6305 = vmatmul.mubr.bf16.gmra.mxu0 %v9342_v18  ;;  %v7677_v25 = vcombine.low %v2251_v17, %v2261_v53  ;;  %v7679_v49 = vcombine.low %v2275_v9, %v2285_v19  ;;  %v2392_v32 = vshll.u32 %v7668_v16, 16  ;;  %v2396_v37 = vshrl.u32 %v7668_v16, 16  ;;  %v6701_v17 = vld [vmem:[%s6927_s5 + $0x18] sm:$0xff]   ;;  %v6704_v60 = vld [vmem:[%s6927_s5 + $0x24] sm:$0xff]  }
  0xb7   : > { %6372 = vmatprep.mubr.bf16.mxu0 %v5521_v4  ;;  %v7687_v23 = vrot.slane %v2341_v55, 4  ;;  %v2351_v62 = vor.u32 %v2350_v14, %v7658_v45  ;;  %v2361_v58 = vrot.slane %v2359_v22, 4  ;;  %v2407_v10 = vshrl.u32 %v5503_v34, 16  ;;  %v7723_v55 = vld [vmem:[%s6927_s5 + $0x8c] sm:$0x1]  ;;  %v6706_v22 = vld [vmem:[#allocation2 + $0x170] sm:$0xff]  }
  0xb8   : > { %v9343_v54 = vcombine.low %v7169_v56, %v7175_v8  ;;  %v7696_v5 = vcombine.low %v2299_v44, %v2309_v13  ;;  %v2323_v31 = vsel %vm6954_vm2, %v7670_v59, %v7606_v7  ;;  %v2364_v4 = vrot.slane %v2362_v46, 5  ;;  %v7714_v44 = vld [vmem:[%s6927_s5 + $0x94] sm:$0xf] }
  0xb9   : > { %v2410_v35 = vshll.u32 %v5503_v34, 16  ;;  %v7702_v61 = vrot.slane %v2368_v21, 5  ;;  %v2374_v27 = vrot.slane %v2372_v26, 4  ;;  %v2385_v56 = vrot.slane %v2383_v43, 4 }
  0xba   : > { %v2416_v8 = vshll.u32 %v7685_v2, 16  ;;  %v2388_v53 = vrot.slane %v2386_v48, 5  ;;  %v7710_v9 = vrot.slane %v2392_v32, 5  ;;  %v2398_v19 = vrot.slane %v2396_v37, 4  ;;  %v6711_v32 = vld [vmem:[#allocation2 + $0x1a8] sm:$0xff]  }
  0xbb   : > { %6257 = vmatmul.mubr.bf16.gmra.mxu1 %v9343_v54  ;;  %v2420_v7 = vshrl.u32 %v7685_v2, 16  ;;  %v7717_v18 = vrot.slane %v2351_v62, 4  ;;  %v2378_v13 = vshll.u32 %v7691_v57, 16  ;;  %v7725_v14 = vrot.slane %v2407_v10, 4  ;;  %v6710_v10 = vld [vmem:[#allocation2 + $0x168] sm:$0xff]  }
  0xbc   : > { %6324 = vmatprep.mubr.bf16.mxu1 %v6700_v39  ;;  %v7719_v39 = vrot.slane %v2354_v28, 5  ;;  %v2365_v59 = vor.u32 %v2364_v4, %v2361_v58  ;;  %v2412_v46 = vrot.slane %v2410_v35, 5  ;;  %v2431_v28 = vshrl.u32 %v5506_v33, 16  ;;  %v6715_v35 = vld [vmem:[#allocation2 + $0x1a0] sm:$0xff]  }
  0xbd   : > { %v7733_v21 = vrot.slane %v2416_v8, 5  ;;  %v2422_v26 = vrot.slane %v2420_v7, 4  ;;  %v2434_v43 = vshll.u32 %v5506_v33, 16  ;;  %v2440_v48 = vshll.u32 %v7714_v44, 16  ;;  %v7752_v8 = vld [vmem:[%s6927_s5 + $0x98] sm:$0x1] }
  0xbe   : > { %6373 = vmatmul.mubr.bf16.vlgmr.msra.gmra.mxu0 %v5522_v20  ;;  %v2333_v20 = vsel %vm6954_vm2, %v7672_v47, %v7656_v15  ;;  %v2399_v37 = vor.u32 %v2398_v19, %v7710_v9  ;;  %v2402_v34 = vshll.u32 %v7705_v3, 16  ;;  %v2426_v15 = vshll.u32 %v7723_v55, 16  ;;  %9344 = vst [vmem:[#allocation11_spill] sm:$0xff] %v7752_v8  ;;  %v7761_v19 = vld [vmem:[%s6927_s5 + $0xa0] sm:$0xf]  ;;  %v6705_v7 = vld [vmem:[%s6927_s5 + $0x30] sm:$0xff]  }
  0xbf   : > { %6453 = vmatpush3.bf16.msra.mxu0 %v7460_v29  ;;  %6376 = vmatprep.mubr.bf16.mxu0 %v7637_v50  ;;  %v2375_v29 = vor.u32 %v2374_v27, %v7702_v61  ;;  %v2389_v50 = vor.u32 %v2388_v53, %v2385_v56  ;;  %v2433_v47 = vrot.slane %v2431_v28, 4  ;;  %v2436_v62 = vrot.slane %v2434_v43, 5  ;;  %v5509_v53 = vld [vmem:[%s6927_s5 + $0x9c] sm:$0xf]  ;;  %9345 = vst [vmem:[#allocation12_spill] sm:$0xff] %v7761_v19 }
  0xc0   : > { %6454 = vmatprep.subr.bf16.mxu0 %v6707_v52  ;;  %v2444_v58 = vshrl.u32 %v7714_v44, 16  ;;  %v7741_v54 = vcombine.low %v2323_v31, %v2333_v20  ;;  %v7747_v27 = vrot.slane %v2365_v59, 4  ;;  %v7749_v56 = vrot.slane %v2378_v13, 5  ;;  %v5512_v43 = vld [vmem:[%s6927_s5 + $0xa8] sm:$0xf] }
  0xc1   : > { %v2423_v31 = vor.u32 %v2422_v26, %v7733_v21  ;;  %v7757_v33 = vrot.slane %v2440_v48, 5  ;;  %v2376_v13 = vrot.slane %v2375_v29, 4  ;;  %v7764_v20 = vrot.slane %v2389_v50, 4  ;;  %v6714_v48 = vld [vmem:[#allocation2 + $0x160] sm:$0xff]  }
  0xc2   : > { %v2357_v59 = vsel %vm6954_vm2, %v7717_v18, %v7719_v39  ;;  %v2437_v28 = vor.u32 %v2436_v62, %v2433_v47  ;;  %v2450_v26 = vshll.u32 %v7752_v8, 16  ;;  %v2455_v29 = vshrl.u32 %v5509_v53, 16  ;;  %v6719_v18 = vld [vmem:[#allocation2 + $0x198] sm:$0xff]  }
  0xc3   : > { %6325 = vmatmul.mubr.bf16.vlgmr.msra.gmra.mxu1 %v6701_v17  ;;  %6455 = vmatpush3.bf16.msra.mxu0 %v6707_v52  ;;  %v2413_v52 = vor.u32 %v2412_v46, %v7725_v14  ;;  %v2446_v17 = vrot.slane %v2444_v58, 4  ;;  %v6708_v14 = vld [vmem:[%s6927_s5 + $0x3c] sm:$0xff]   ;;  %v7776_v46 = vrot.slane %v2426_v15, 5  ;;  %v2458_v50 = vshll.u32 %v5509_v53, 16  ;;  %v6723_v53 = vld [vmem:[#allocation2 + $0x190] sm:$0xff]  }
  0xc4   : > { %6405 = vmatpush3.bf16.msra.mxu1 %v7475_v40  ;;  %6328 = vmatprep.mubr.bf16.mxu1 %v6704_v60  ;;  %v7766_v40 = vrot.slane %v2399_v37, 4  ;;  %v7768_v60 = vrot.slane %v2402_v34, 5  ;;  %v2468_v37 = vshrl.u32 %v7761_v19, 16  ;;  %v7784_v34 = vld [vmem:[%s6927_s5 + $0xac] sm:$0xf]  ;;  %v7788_v15 = vrot.slane %v2423_v31, 4 }
  0xc5   : > { %6406 = vmatprep.subr.bf16.mxu1 %v6706_v22  ;;  %6456 = vmatprep.subr.bf16.mxu0 %v6711_v32  ;;  %9346 = vst [vmem:[#allocation13_spill] sm:$0xff] %v7784_v34  ;;  %v7786_v39 = vrot.slane %v2413_v52, 4  ;;  %v2447_v47 = vor.u32 %v2446_v17, %v7757_v33  ;;  %v2371_v62 = vsel %vm6954_vm2, %v7747_v27, %v7702_v61  ;;  %v2479_v58 = vshrl.u32 %v5512_v43, 16  ;;  %v6718_v61 = vld [vmem:[#allocation2 + $0x158] sm:$0xff]  }
  0xc6   : > { %6377 = vmatmul.mubr.bf16.gmra.mxu0 %v7677_v25  ;;  %v2464_v25 = vshll.u32 %v7761_v19, 16  ;;  %v2482_v52 = vshll.u32 %v5512_v43, 16  ;;  %v7802_v31 = vrot.slane %v2437_v28, 4  ;;  %v7804_v17 = vrot.slane %v2450_v26, 5  ;;  %v7822_v19 = vld [vmem:[%s6927_s5 + $0xb8] sm:$0xf] }
  0xc7   : > { %6380 = vmatprep.mubr.bf16.mxu0 %v7679_v49  ;;  %6457 = vmatpush3.bf16.msra.mxu0 %v6711_v32  ;;  %v7792_v49 = vld [vmem:[%s6927_s5 + $0xa4] sm:$0x1]  ;;  %v2488_v32 = vshll.u32 %v7784_v34, 16  ;;  %v2492_v4 = vshrl.u32 %v7784_v34, 16  ;;  %v7808_v27 = vrot.slane %v2455_v29, 4  ;;  %v7814_v28 = vrot.slane %v2468_v37, 4 }
  0xc8   : > { %6407 = vmatpush3.bf16.msra.mxu1 %v6706_v22  ;;  %6458 = vmatprep.subr.bf16.mxu0 %v6715_v35  ;;  %9347 = vst [vmem:[#allocation14_spill] sm:$0xff] %v7792_v49  ;;  %v2381_v22 = vsel %vm6954_vm2, %v2376_v13, %v7749_v56  ;;  %v7810_v56 = vrot.slane %v2458_v50, 5  ;;  %v7812_v13 = vrot.slane %v2464_v25, 5  ;;  %v7816_v26 = vrot.slane %v2447_v47, 4  ;;  %v5515_v29 = vld [vmem:[%s6927_s5 + $0xb4] sm:$0xf] }
  0xc9   : > { %6408 = vmatprep.subr.bf16.mxu1 %v6710_v10  ;;  %v2474_v43 = vshll.u32 %v7792_v49, 16  ;;  %v2484_v34 = vrot.slane %v2482_v52, 5  ;;  %v6712_v50 = vld [vmem:[%s6927_s5 + $0x54] sm:$0xff]   ;;  %v5529_v25 = vcombine.low %v2371_v62, %v2381_v22  ;;  %v7831_v37 = vrot.slane %v2488_v32, 5  ;;  %v7853_v32 = vld [vmem:[%s6927_s5 + $0xbc] sm:$0x1] }
  0xca   : > { %v7833_v47 = vrot.slane %v2492_v4, 4  ;;  %v2503_v52 = vshrl.u32 %v5515_v29, 16  ;;  %v2506_v49 = vshll.u32 %v5515_v29, 16  ;;  %v2512_v8 = vshll.u32 %v7822_v19, 16  ;;  %9349 = vst [vmem:[#allocation15_spill] sm:$0xff] %v7853_v32 }
  0xcb   : > { %6329 = vmatmul.mubr.bf16.gmra.mxu1 %v6705_v7  ;;  %6459 = vmatpush3.bf16.msra.mxu0 %v6715_v35  ;;  %v6709_v7 = vld [vmem:[%s6927_s5 + $0x48] sm:$0xff]   ;;  %v2481_v35 = vrot.slane %v2479_v58, 4  ;;  %v6722_v58 = vld [vmem:[#allocation2 + $0x150] sm:$0xff]   ;;  %v2395_v4 = vsel %vm6954_vm2, %v7764_v20, %v7710_v9  ;;  %v7856_v62 = vld [vmem:[%s6927_s5 + $0xc4] sm:$0xf]  ;;  %v2471_v20 = vor.u32 %v7814_v28, %v7812_v13 }
  0xcc   : > { %6332 = vmatprep.mubr.bf16.mxu1 %v6708_v14  ;;  %6409 = vmatpush3.bf16.msra.mxu1 %v6710_v10  ;;  %v9348_v10 = vsel %vm6954_vm2, %v7687_v23, %v7658_v45  ;;  %v2516_v45 = vshrl.u32 %v7822_v19, 16  ;;  %v5518_v23 = vld [vmem:[%s6927_s5 + $0xc0] sm:$0xf]  ;;  %9350 = vst [vmem:[#allocation16_spill] sm:$0xff] %v7856_v62  ;;  %v2508_v22 = vrot.slane %v2506_v49, 5  ;;  %v7858_v29 = vrot.slane %v2512_v8, 5 }
  0xcd   : > { %6410 = vmatprep.subr.bf16.mxu1 %v6714_v48  ;;  %6460 = vmatprep.subr.bf16.mxu0 %v6719_v18  ;;  %v5528_v14 = vcombine.low %v9348_v10, %v2357_v59  ;;  %v2461_v59 = vor.u32 %v7810_v56, %v7808_v27  ;;  %v2530_v27 = vshll.u32 %v5518_v23, 16  ;;  %v6731_v56 = vld [vmem:[#allocation2 + $0x180] sm:$0xff]   ;;  %v2419_v10 = vsel %vm6954_vm2, %v7786_v39, %v7733_v21  ;;  %v7872_v28 = vld [vmem:[%s6927_s5 + $0xc8] sm:$0x1] }
  0xce   : > { %6381 = vmatmul.mubr.bf16.gmra.mxu0 %v7696_v5  ;;  %v6727_v5 = vld [vmem:[#allocation2 + $0x188] sm:$0xff]   ;;  %v2518_v9 = vrot.slane %v2516_v45, 4  ;;  %v2495_v8 = vor.u32 %v7833_v47, %v7831_v37  ;;  %v2540_v45 = vshrl.u32 %v7856_v62, 16  ;;  %v6713_v21 = vld [vmem:[%s6927_s5 + $0x60] sm:$0xff]   ;;  %v7876_v39 = vrot.slane %v2474_v43, 5 }
  0xcf   : > { %6384 = vmatprep.mubr.bf16.mxu0 %v7741_v54  ;;  %6461 = vmatpush3.bf16.msra.mxu0 %v6719_v18  ;;  %v2405_v54 = vsel %vm6954_vm2, %v7766_v40, %v7768_v60  ;;  %v7850_v18 = vld [vmem:[%s6927_s5 + $0xb0] sm:$0x1]  ;;  %v2485_v40 = vor.u32 %v2484_v34, %v2481_v35  ;;  %v2527_v60 = vshrl.u32 %v5518_v23, 16  ;;  %v2522_v34 = vshll.u32 %v7853_v32, 16 }
  0xd0   : > { %6411 = vmatpush3.bf16.msra.mxu1 %v6714_v48  ;;  %6462 = vmatprep.subr.bf16.mxu0 %v6723_v53  ;;  %v2505_v48 = vrot.slane %v2503_v52, 4  ;;  %v2498_v49 = vshll.u32 %v7850_v18, 16  ;;  %v2536_v52 = vshll.u32 %v7856_v62, 16  ;;  %v2532_v35 = vrot.slane %v2530_v27, 5 }
  0xd1   : > { %6412 = vmatprep.subr.bf16.mxu1 %v6718_v61  ;;  %v7882_v32 = vrot.slane %v2461_v59, 4  ;;  %v7886_v27 = vrot.slane %v2485_v40, 4  ;;  %v2542_v62 = vrot.slane %v2540_v45, 4  ;;  %v2429_v43 = vsel %vm6954_vm2, %v7788_v15, %v7776_v46  ;;  %v6730_v59 = vld [vmem:[#allocation2 + $0x140] sm:$0xff]   ;;  %v7916_v45 = vld [vmem:[#allocation2 + $0x1f8] sm:$0xff]  }
  0xd2   : > { %v2509_v47 = vor.u32 %v2508_v22, %v2505_v48  ;;  %v7879_v23 = vrot.slane %v2536_v52, 5  ;;  %v7892_v48 = vrot.slane %v2498_v49, 5  ;;  %v7900_v40 = vrot.slane %v2495_v8, 4 }
  0xd3   : > { %6333 = vmatmul.mubr.bf16.gmra.mxu1 %v6709_v7  ;;  %6463 = vmatpush3.bf16.msra.mxu0 %v6723_v53  ;;  %v2529_v7 = vrot.slane %v2527_v60, 4  ;;  %v6726_v53 = vld [vmem:[#allocation2 + $0x148] sm:$0xff]   ;;  %v7884_v60 = vrot.slane %v2471_v20, 4  ;;  %v7898_v20 = vld [vmem:[#allocation2 + $0x238] sm:$0xff]   ;;  %v5530_v49 = vcombine.low %v2395_v4, %v2405_v54  ;;  %v5531_v52 = vcombine.low %v2419_v10, %v2429_v43  ;;  %v5548_v54 = vld [vmem:[%s6927_s5 + $0x30] sm:$0xe] }
  0xd4   : > { %6336 = vmatprep.mubr.bf16.mxu1 %v6712_v50  ;;  %6413 = vmatpush3.bf16.msra.mxu1 %v6718_v61  ;;  %v2519_v50 = vor.u32 %v2518_v9, %v7858_v29  ;;  %v6716_v61 = vld [vmem:[%s6927_s5 + $0x6c] sm:$0xff]   ;;  %v7904_v46 = vrot.slane %v2509_v47, 4  ;;  %v2959_v10 = vrot.slane %v7491_v12, 5  ;;  %v2453_v12 = vsel %vm6954_vm2, %v7816_v26, %v7804_v17 }
  0xd5   : > { %6414 = vmatprep.subr.bf16.mxu1 %v6722_v58  ;;  %6464 = vmatprep.subr.bf16.mxu0 %v6727_v5  ;;  %v2533_v22 = vor.u32 %v2532_v35, %v2529_v7  ;;  %v7896_v9 = vld [vmem:[%s6927_s5 + $0xc] sm:$0xe]  ;;  %v5547_v35 = vld [vmem:[%s6927_s5 + $0x24] sm:$0xe]  ;;  %v2477_v43 = vsel %vm6954_vm2, %v7884_v60, %v7876_v39  ;;  %v5550_v60 = vld [vmem:[%s6927_s5 + $0x48] sm:$0xe] }
  0xd6   : > { %6385 = vmatmul.mubr.bf16.gmra.mxu0 %v5528_v14  ;;  %v2546_v14 = vshll.u32 %v7872_v28, 16  ;;  %v7906_v15 = vrot.slane %v2519_v50, 4  ;;  %v5561_v7 = vrot.slane %v7896_v9, 9  ;;  %v5563_v47 = vrot.slane %v5547_v35, 9  ;;  %v6717_v50 = vld [vmem:[%s6927_s5 + $0x78] sm:$0xff]   ;;  %v9352_v35 = vld [vmem:[#allocation9_spill] sm:$0xff] }
  0xd7   : > { %6388 = vmatprep.mubr.bf16.mxu0 %v5529_v25  ;;  %6465 = vmatpush3.bf16.msra.mxu0 %v6727_v5  ;;  %v7902_v25 = vrot.slane %v2522_v34, 5  ;;  %v2543_v5 = vor.u32 %v2542_v62, %v7879_v23  ;;  %v7912_v8 = vrot.slane %v2533_v22, 4  ;;  %v2955_v62 = vrot.slane %v7478_v51, 5  ;;  %v5549_v22 = vld [vmem:[%s6927_s5 + $0x3c] sm:$0xe] }
  0xd8   : > { %6415 = vmatpush3.bf16.msra.mxu1 %v6722_v58  ;;  %6466 = vmatprep.subr.bf16.mxu0 %v6731_v56  ;;  %v2952_v58 = vrot.slane %v7463_v41, 5  ;;  %v7914_v34 = vrot.slane %v2546_v14, 5  ;;  %v2443_v41 = vsel %vm6954_vm2, %v7802_v31, %v7757_v33  ;;  %v2961_v31 = vrot.slane %v2959_v10, 4 }
  0xd9   : > { %6416 = vmatprep.subr.bf16.mxu1 %v6726_v53  ;;  %v3032_v9 = vrot.slane %v7850_v18, 5 }
  0xda   : > { %v2954_v4 = vrot.slane %v2952_v58, 4  ;;  %v7931_v51 = vsel %vm7198_vm5, %v5563_v47, %v2952_v58  ;;  %v5532_v58 = vcombine.low %v2443_v41, %v2453_v12  ;;  %v2501_v41 = vsel %vm6954_vm2, %v7900_v40, %v7892_v48  ;;  %v6724_v48 = vld [vmem:[%s6927_s5 + $0x9c] sm:$0xff]  }
  0xdb   : > { %6337 = vmatmul.mubr.bf16.gmra.mxu1 %v6713_v21  ;;  %6467 = vmatpush3.bf16.msra.mxu0 %v6731_v56  ;;  %v7926_v21 = vrot.slane %v2543_v5, 4  ;;  %v5564_v56 = vrot.slane %v5548_v54, 9  ;;  %v2969_v5 = vrot.slane %v7553_v38, 5  ;;  %v9353_v54 = vld [vmem:[#allocation10_spill] sm:$0xff]  ;;  %v8248_v40 = vld [vmem:[%s6927_s5 + $0x40] sm:$0xf] }
  0xdc   : > { %6340 = vmatprep.mubr.bf16.mxu1 %v6716_v61  ;;  %6417 = vmatpush3.bf16.msra.mxu1 %v6726_v53  ;;  %v7939_v33 = vsel %vm7198_vm5, %v2954_v4, %v2955_v62  ;;  %v2962_v53 = vrot.slane %v7531_v6, 5  ;;  %v2467_v61 = vsel %vm6954_vm2, %v7882_v32, %v7812_v13  ;;  %v6720_v6 = vld [vmem:[%s6927_s5 + $0x84] sm:$0xff]   ;;  %v5565_v13 = vrot.slane %v5549_v22, 9 }
  0xdd   : > { %6418 = vmatprep.subr.bf16.mxu1 %v6730_v59  ;;  %6548 = vmatprep.subr.bf16.mxu0 %v7898_v20  ;;  %v5579_v17 = vcombine.low %v7931_v51, %v7939_v33  ;;  %v7954_v26 = vsel %vm7198_vm5, %v5564_v56, %v2959_v10  ;;  %v2966_v32 = vrot.slane %v7505_v1, 5  ;;  %v5566_v62 = vrot.slane %v5550_v60, 9 }
  0xde   : > { %6389 = vmatmul.mubr.bf16.gmra.mxu0 %v5530_v49  ;;  %v7960_v14 = vsel %vm7198_vm5, %v2961_v31, %v2962_v53  ;;  %v9351_v49 = vld [vmem:[#allocation8_spill] sm:$0xff]  ;;  %v5533_v38 = vcombine.low %v2467_v61, %v2477_v43  ;;  %v2980_v10 = vrot.slane %v9353_v54, 5  ;;  %v2491_v56 = vsel %vm6954_vm2, %v7886_v27, %v7831_v37  ;;  %v5551_v31 = vld [vmem:[%s6927_s5 + $0x54] sm:$0xe] }
  0xdf   : > { %6392 = vmatprep.mubr.bf16.mxu0 %v5531_v52  ;;  %v5580_v39 = vcombine.low %v7954_v26, %v7960_v14  ;;  %v2973_v52 = vrot.slane %v9351_v49, 5  ;;  %v7972_v47 = vsel %vm7198_vm5, %v5565_v13, %v2966_v32  ;;  %v2968_v1 = vrot.slane %v2966_v32, 4  ;;  %v6721_v53 = vld [vmem:[%s6927_s5 + $0x90] sm:$0xff]  }
  0xe0   : > { %6419 = vmatpush3.bf16.msra.mxu1 %v6730_v59  ;;  %v2976_v59 = vrot.slane %v9352_v35, 5  ;;  %v5567_v27 = vrot.slane %v5551_v31, 9  ;;  %v2982_v43 = vrot.slane %v2980_v10, 4  ;;  %v2983_v22 = vrot.slane %v7598_v0, 5  ;;  %v6725_v31 = vld [vmem:[%s6927_s5 + $0xa8] sm:$0xff]  }
  0xe1   : > { %6500 = vmatprep.subr.bf16.mxu1 %v7916_v45  ;;  %v2975_v4 = vrot.slane %v2973_v52, 4  ;;  %v7989_v12 = vsel %vm7198_vm5, %v5566_v62, %v2973_v52  ;;  %v2987_v13 = vrot.slane %v7601_v24, 5  ;;  %v2990_v32 = vrot.slane %v7631_v11, 5  ;;  %v5554_v62 = vld [vmem:[%s6927_s5 + $0x78] sm:$0xe] }
  0xe2   : > { %v8012_v60 = vsel %vm7198_vm5, %v5567_v27, %v2980_v10  ;;  %v2994_v52 = vrot.slane %v7649_v36, 5  ;;  %v2525_v0 = vsel %vm6954_vm2, %v7906_v15, %v7902_v25  ;;  %v8021_v24 = vsel %vm7198_vm5, %v2982_v43, %v2983_v22  ;;  %v5553_v36 = vld [vmem:[%s6927_s5 + $0x6c] sm:$0xe]  ;;  %v6728_v27 = vld [vmem:[%s6927_s5 + $0xb4] sm:$0xff]  }
  0xe3   : > { %6341 = vmatmul.mubr.bf16.gmra.mxu1 %v6717_v50  ;;  %v7985_v50 = vsel %vm7198_vm5, %v2968_v1, %v2969_v5  ;;  %v7997_v37 = vsel %vm7198_vm5, %v2975_v4, %v2976_v59  ;;  %v2515_v5 = vsel %vm6954_vm2, %v7904_v46, %v7858_v29  ;;  %v2989_v11 = vrot.slane %v2987_v13, 4 }
  0xe4   : > { %6344 = vmatprep.mubr.bf16.mxu1 %v6720_v6  ;;  %v5581_v61 = vcombine.low %v7972_v47, %v7985_v50  ;;  %v5552_v6 = vld [vmem:[%s6927_s5 + $0x60] sm:$0xe]  ;;  %v2997_v29 = vrot.slane %v7691_v57, 5  ;;  %v5534_v59 = vcombine.low %v2491_v56, %v2501_v41  ;;  %v5569_v15 = vrot.slane %v5553_v36, 9  ;;  %v6750_v57 = vld [vmem:[#allocation2 + $0x1d8] sm:$0xff]  }
  0xe5   : > { %v5568_v49 = vrot.slane %v5552_v6, 9  ;;  %v8033_v25 = vsel %vm7198_vm5, %v2989_v11, %v2990_v32  ;;  %v5535_v1 = vcombine.low %v2515_v5, %v2525_v0  ;;  %v3004_v4 = vrot.slane %v7705_v3, 5  ;;  %v5555_v6 = vld [vmem:[%s6927_s5 + $0x84] sm:$0xe]  ;;  %v6773_v5 = vld [vmem:[%s6927_s5 + $0x14] sm:$0x1] }
  0xe6   : > { %6393 = vmatmul.mubr.bf16.gmra.mxu0 %v5532_v58  ;;  %v2996_v58 = vrot.slane %v2994_v52, 4  ;;  %v8042_v54 = vsel %vm7198_vm5, %v5569_v15, %v2994_v52  ;;  %v5570_v56 = vrot.slane %v5554_v62, 9  ;;  %v3008_v41 = vrot.slane %v7685_v2, 5  ;;  %v5546_v52 = vld [vmem:[%s6927_s5 + $0x18] sm:$0xe]  ;;  %v9356_v62 = vld [vmem:[#allocation12_spill] sm:$0xff] }
  0xe7   : > { %6396 = vmatprep.mubr.bf16.mxu0 %v5533_v38  ;;  %v8028_v35 = vsel %vm7198_vm5, %v5568_v49, %v2987_v13  ;;  %v3001_v38 = vrot.slane %v7668_v16, 5  ;;  %v3011_v3 = vrot.slane %v7723_v55, 5  ;;  %v2539_v43 = vsel %vm6954_vm2, %v7912_v8, %v7879_v23  ;;  %v6741_v0 = vld [vmem:[%s6927_s5 + $0x54] sm:$0xff]  }
  0xe8   : > { %v8046_v10 = vsel %vm7198_vm5, %v2996_v58, %v2997_v29  ;;  %v3010_v13 = vrot.slane %v3008_v41, 4  ;;  %v2549_v55 = vsel %vm6954_vm2, %v7926_v21, %v7914_v34  ;;  %v5571_v23 = vrot.slane %v5555_v6, 9  ;;  %v5556_v34 = vld [vmem:[%s6927_s5 + $0x90] sm:$0xe]  ;;  %v9355_v21 = vld [vmem:[#allocation11_spill] sm:$0xff] }
  0xe9   : > { %v8062_v22 = vsel %vm7198_vm5, %v5570_v56, %v3001_v38  ;;  %v3015_v8 = vrot.slane %v7714_v44, 5  ;;  %v2941_v49 = vrot.slane %v6773_v5, 5  ;;  %v3018_v29 = vrot.slane %v9355_v21, 5  ;;  %v6732_v58 = vld [vmem:[%s6927_s5 + $0x18] sm:$0xff]   ;;  %v5558_v21 = vld [vmem:[%s6927_s5 + $0xa8] sm:$0xe] }
  0xea   : > { %v8080_v11 = vsel %vm7198_vm5, %v3010_v13, %v3011_v3  ;;  %v8086_v36 = vsel %vm7198_vm5, %v5571_v23, %v3008_v41  ;;  %v5572_v44 = vrot.slane %v5556_v34, 9  ;;  %v5536_v15 = vcombine.low %v2539_v43, %v2549_v55  ;;  %v5557_v3 = vld [vmem:[%s6927_s5 + $0x9c] sm:$0xe]  ;;  %v9357_v43 = vld [vmem:[#allocation14_spill] sm:$0xff] }
  0xeb   : > { %6345 = vmatmul.mubr.bf16.gmra.mxu1 %v6721_v53  ;;  %v3003_v53 = vrot.slane %v3001_v38, 4  ;;  %v3022_v38 = vrot.slane %v9356_v62, 5  ;;  %v9358_v6 = vrot.slane %v7386_v42, 5  ;;  %v5573_v55 = vrot.slane %v5557_v3, 9  ;;  %v6736_v3 = vld [vmem:[%s6927_s5 + $0x30] sm:$0xff]  }
  0xec   : > { %6348 = vmatprep.mubr.bf16.mxu1 %v6724_v48  ;;  %v9354_v48 = vrot.slane %v7386_v42, 5  ;;  %v5562_v34 = vrot.slane %v5546_v52, 9 }
  0xed   : > { %v8071_v32 = vsel %vm7198_vm5, %v3003_v53, %v3004_v4  ;;  %v6774_v4 = vld [vmem:[%s6927_s5 + $0x1c] sm:$0xf]  ;;  %v8095_v53 = vsel %vm7198_vm5, %v5572_v44, %v3015_v8  ;;  %v3024_v23 = vrot.slane %v3022_v38, 4  ;;  %v8120_v44 = vsel %vm7198_vm5, %v5573_v55, %v3022_v38  ;;  %v5559_v38 = vld [vmem:[%s6927_s5 + $0xb4] sm:$0xe] }
  0xee   : > { %6397 = vmatmul.mubr.bf16.gmra.mxu0 %v5534_v59  ;;  %v2940_v2 = vrot.slane %v9354_v48, 4  ;;  %v3017_v59 = vrot.slane %v3015_v8, 4  ;;  %v2945_v56 = vrot.slane %v6774_v4, 5  ;;  %v3025_v48 = vrot.slane %v9357_v43, 5  ;;  %v6729_v8 = vld [vmem:[%s6927_s5 + $0xc0] sm:$0xff]  }
  0xef   : > { %6400 = vmatprep.mubr.bf16.mxu0 %v5535_v1 }
  0xf0   : > { %v8099_v41 = vsel %vm7198_vm5, %v3017_v59, %v3018_v29  ;;  %v2942_v5 = vsel %vm7198_vm5, %v2940_v2, %v2941_v49  ;;  %v8124_v59 = vsel %vm7198_vm5, %v3024_v23, %v3025_v48  ;;  %v5574_v2 = vrot.slane %v5558_v21, 9 }
  0xf1   : > { %v2947_v49 = vrot.slane %v2945_v56, 4  ;;  %v5575_v48 = vrot.slane %v5559_v38, 9 }
  0xf3   : > { %6349 = vmatmul.mubr.bf16.gmra.mxu1 %v6725_v31  ;;  %v2939_v31 = vsel %vm7198_vm5, %v5561_v7, %v9358_v6  ;;  %v6775_v7 = vld [vmem:[%s6927_s5 + $0x20] sm:$0x1] }
  0xf4   : > { %6352 = vmatprep.mubr.bf16.mxu1 %v6728_v27  ;;  %v9359_v27 = vld [vmem:[#allocation13_spill] sm:$0xff]  ;;  %v2948_v29 = vrot.slane %v6775_v7, 5  ;;  %v5577_v18 = vcombine.low %v2939_v31, %v2942_v5  ;;  %v9360_v6 = vld [vmem:[#allocation15_spill] sm:$0xff]  ;;  %v9361_v5 = vld [vmem:[#allocation16_spill] sm:$0xff] }
  0xf5   : > { %v3029_v42 = vrot.slane %v9359_v27, 5  ;;  %v3039_v55 = vrot.slane %v9360_v6, 5  ;;  %v5560_v31 = vld [vmem:[%s6927_s5 + $0xc0] sm:$0xe]  ;;  %v3043_v21 = vrot.slane %v9361_v5, 5  ;;  %v3046_v27 = vrot.slane %v7872_v28, 5 }
  0xf6   : > { %6401 = vmatmul.mubr.bf16.gmra.mxu0 %v5536_v15  ;;  %v6733_v15 = vld [vmem:[%s6927_s5 + $0x24] sm:$0xff]   ;;  %v5576_v7 = vrot.slane %v5560_v31, 9  ;;  %v6737_v5 = vld [vmem:[%s6927_s5 + $0x3c] sm:$0xff]  }
  0xf7   : > { %6468 = vmatprep.mubr.bf16.mxu0 %v6732_v58  ;;  %v3031_v62 = vrot.slane %v3029_v42, 4  ;;  %v8131_v4 = vsel %vm7198_vm5, %v5574_v2, %v3029_v42  ;;  %v3036_v58 = vrot.slane %v7822_v19, 5  ;;  %v2946_v19 = vsel %vm7198_vm5, %v5562_v34, %v2945_v56  ;;  %v5657_v34 = vld [vmem:[%s6927_s5 + $0x18] sm:$0xf]  ;;  %v5660_v31 = vld [vmem:[%s6927_s5 + $0x24] sm:$0xf] }
  0xf8   : > { %v2949_v2 = vsel %vm7198_vm5, %v2947_v49, %v2948_v29  ;;  %v3045_v38 = vrot.slane %v3043_v21, 4  ;;  %v3806_v6 = vshrl.u32 %v5657_v34, 16 }
  0xf9   : > { %v8137_v43 = vsel %vm7198_vm5, %v3031_v62, %v3032_v9  ;;  %v8148_v42 = vsel %vm7198_vm5, %v5575_v48, %v3036_v58  ;;  %v3038_v9 = vrot.slane %v3036_v58, 4  ;;  %v6739_v62 = vld [vmem:[#allocation2 + $0x230] sm:$0xff]   ;;  %v5578_v29 = vcombine.low %v2946_v19, %v2949_v2  ;;  %v8173_v48 = vld [vmem:[%s6927_s5 + $0x1c] sm:$0xf]  ;;  %v6743_v58 = vld [vmem:[#allocation2 + $0x228] sm:$0xff]  }
  0xfa   : > { %v8166_v56 = vsel %vm7198_vm5, %v3045_v38, %v3046_v27  ;;  %v3819_v27 = vshrl.u32 %v8173_v48, 16  ;;  %v5659_v19 = vld [vmem:[%s6927_s5 + $0x20] sm:$0x1]  ;;  %v4577_v2 = vrot.slane %v8173_v48, 5  ;;  %v3830_v38 = vshrl.u32 %v5660_v31, 16 }
  0xfb   : > { %6353 = vmatmul.mubr.bf16.gmra.mxu1 %v6729_v8  ;;  %v8156_v28 = vsel %vm7198_vm5, %v3038_v9, %v3039_v55  ;;  %v8160_v8 = vsel %vm7198_vm5, %v5576_v7, %v3043_v21  ;;  %v3809_v55 = vshll.u32 %v5657_v34, 16  ;;  %v3815_v21 = vshll.u32 %v8173_v48, 16  ;;  %v6742_v9 = vld [vmem:[#allocation2 + $0x1e8] sm:$0xff]   ;;  %v6747_v7 = vld [vmem:[#allocation2 + $0x220] sm:$0xff]  }
  0xfc   : > { %6420 = vmatprep.mubr.bf16.mxu1 %v5577_v18  ;;  %v3833_v34 = vshll.u32 %v5660_v31, 16  ;;  %v3808_v49 = vrot.slane %v3806_v6, 4  ;;  %v3821_v33 = vrot.slane %v3819_v27, 4  ;;  %v3825_v48 = vshll.u32 %v5659_v19, 16  ;;  %v5663_v31 = vld [vmem:[%s6927_s5 + $0x30] sm:$0xf] }
  0xfd   : > { %v8192_v51 = vrot.slane %v3815_v21, 5  ;;  %v4580_v23 = vrot.slane %v5659_v19, 5  ;;  %v3832_v52 = vrot.slane %v3830_v38, 4  ;;  %v6751_v21 = vld [vmem:[#allocation2 + $0x218] sm:$0xff]   ;;  %v4579_v27 = vrot.slane %v4577_v2, 4 }
  0xfe   : > { %6469 = vmatmul.mubr.bf16.vlgmr.msra.gmra.mxu0 %v6733_v15  ;;  %v6738_v15 = vld [vmem:[#allocation2 + $0x1f0] sm:$0xff]   ;;  %v3835_v13 = vrot.slane %v3833_v34, 5  ;;  %v3854_v38 = vshrl.u32 %v5663_v31, 16  ;;  %v3857_v34 = vshll.u32 %v5663_v31, 16  ;;  %v8223_v31 = vrot.slane %v3825_v48, 5 }
  0xff   : > { %6549 = vmatpush3.bf16.msra.mxu0 %v7898_v20  ;;  %6472 = vmatprep.mubr.bf16.mxu0 %v6736_v3  ;;  %v8180_v20 = vld [vmem:[%s6927_s5 + $0x28] sm:$0xf]  ;;  %v3822_v19 = vor.u32 %v3821_v33, %v8192_v51  ;;  %v6755_v33 = vld [vmem:[#allocation2 + $0x210] sm:$0xff]   ;;  %v8236_v50 = vsel %vm7198_vm5, %v4579_v27, %v4580_v23 }
 0x100   : > { %6550 = vmatprep.subr.bf16.mxu0 %v6739_v62  ;;  %v6740_v3 = vld [vmem:[%s6927_s5 + $0x48] sm:$0xff]   ;;  %v3839_v18 = vshll.u32 %v8180_v20, 16  ;;  %v3836_v26 = vor.u32 %v3835_v13, %v3832_v52  ;;  %v8240_v13 = vld [vmem:[%s6927_s5 + $0x38] sm:$0x1]  ;;  %v3856_v48 = vrot.slane %v3854_v38, 4 }
 0x102   : > { %v8203_v1 = vrot.slane %v3839_v18, 5 }
 0x103   : > { %6421 = vmatmul.mubr.bf16.vlgmr.msra.gmra.mxu1 %v5578_v29  ;;  %6551 = vmatpush3.bf16.msra.mxu0 %v6739_v62  ;;  %v3811_v29 = vrot.slane %v3809_v55, 5  ;;  %v5729_v62 = vld [vmem:[%s6927_s5 + $0x18] sm:$0xe] }
 0x104   : > { %6501 = vmatpush3.bf16.msra.mxu1 %v7916_v45  ;;  %6424 = vmatprep.mubr.bf16.mxu1 %v5579_v17  ;;  %v3843_v45 = vshrl.u32 %v8180_v20, 16  ;;  %v6746_v17 = vld [vmem:[#allocation2 + $0x1e0] sm:$0xff]   ;;  %v5745_v55 = vrot.slane %v5729_v62, 9 }
 0x105   : > { %6502 = vmatprep.subr.bf16.mxu1 %v6738_v15  ;;  %6552 = vmatprep.subr.bf16.mxu0 %v6743_v58  ;;  %v6744_v62 = vld [vmem:[%s6927_s5 + $0x60] sm:$0xff]  }
 0x106   : > { %6473 = vmatmul.mubr.bf16.gmra.mxu0 %v6737_v5  ;;  %v8198_v5 = vld [vmem:[%s6927_s5 + $0x34] sm:$0xf]  ;;  %v8232_v47 = vsel %vm7198_vm5, %v5745_v55, %v4577_v2 }
 0x107   : > { %6476 = vmatprep.mubr.bf16.mxu0 %v6740_v3  ;;  %6553 = vmatpush3.bf16.msra.mxu0 %v6743_v58  ;;  %v3812_v58 = vor.u32 %v3811_v29, %v3808_v49  ;;  %v8201_v3 = vld [vmem:[%s6927_s5 + $0x2c] sm:$0x1]  ;;  %v8216_v29 = vld [vmem:[%s6927_s5 + $0x24] sm:$0xe]  ;;  %v3863_v18 = vshll.u32 %v8198_v5, 16 }
 0x108   : > { %6503 = vmatpush3.bf16.msra.mxu1 %v6738_v15  ;;  %6554 = vmatprep.subr.bf16.mxu0 %v6747_v7  ;;  %v3845_v15 = vrot.slane %v3843_v45, 4  ;;  %v3867_v45 = vshrl.u32 %v8198_v5, 16  ;;  %v3849_v14 = vshll.u32 %v8201_v3, 16 }
 0x109   : > { %6504 = vmatprep.subr.bf16.mxu1 %v6742_v9  ;;  %v8228_v46 = vrot.slane %v3812_v58, 4  ;;  %v3859_v58 = vrot.slane %v3857_v34, 5  ;;  %v8252_v23 = vrot.slane %v3863_v18, 5  ;;  %v4587_v34 = vrot.slane %v8201_v3, 5  ;;  %v5731_v3 = vld [vmem:[%s6927_s5 + $0x30] sm:$0xe] }
 0x10a   : > { %v8195_v6 = vpop.f32.mrf.mxu0  ;;  %v8213_v49 = vpop.f32.mrf.mxu1  ;;  %v3869_v55 = vrot.slane %v3867_v45, 4  ;;  %v3873_v18 = vshll.u32 %v8240_v13, 16  ;;  %v3887_v45 = vshll.u32 %v8248_v40, 16 }
 0x10b   : > { %6425 = vmatmul.mubr.bf16.gmra.mxu1 %v5580_v39  ;;  %6555 = vmatpush3.bf16.msra.mxu0 %v6747_v7  ;;  %9363 = vst [vmem:[#allocation9_spill] sm:$0xff] %v8213_v49  ;;  %v4584_v39 = vrot.slane %v8180_v20, 5  ;;  %v5666_v7 = vld [vmem:[%s6927_s5 + $0x3c] sm:$0xf]  ;;  %v8244_v20 = vrot.slane %v3822_v19, 4  ;;  %v8256_v19 = vrot.slane %v3849_v14, 5  ;;  %v3818_v14 = vsel %vm6954_vm2, %v8228_v46, %v8192_v51 }
 0x10c   : > { %v8206_v16 = vpop.f32.mrf.mxu0  ;;  %6428 = vmatprep.mubr.bf16.mxu1 %v5581_v61  ;;  %6505 = vmatpush3.bf16.msra.mxu1 %v6742_v9  ;;  %v3846_v61 = vor.u32 %v3845_v15, %v8203_v1  ;;  %v5746_v9 = vrot.slane %v8216_v29, 9  ;;  %v8250_v2 = vpop.f32.mrf.mxu1  ;;  %v3878_v27 = vshrl.u32 %v5666_v7, 16  ;;  %v8254_v15 = vrot.slane %v3836_v26, 4  ;;  %v6759_v29 = vld [vmem:[#allocation2 + $0x208] sm:$0xff]  }
 0x10d   : > { %9362 = vst [vmem:[#allocation8_spill] sm:$0xff] %v8206_v16  ;;  %6506 = vmatprep.subr.bf16.mxu1 %v6746_v17  ;;  %6556 = vmatprep.subr.bf16.mxu0 %v6751_v21  ;;  %9365 = vst [vmem:[#allocation11_spill] sm:$0xff] %v8250_v2  ;;  %v4586_v38 = vrot.slane %v4584_v39, 4  ;;  %v3860_v2 = vor.u32 %v3859_v58, %v3856_v48  ;;  %v9366_v49 = vcombine.low %v7989_v12, %v7997_v37  ;;  %v6763_v37 = vld [vmem:[#allocation2 + $0x200] sm:$0xff]  }
 0x10e   : > { %6477 = vmatmul.mubr.bf16.gmra.mxu0 %v6741_v0  ;;  %v8242_v52 = vpop.f32.mrf.mxu0  ;;  %v3881_v0 = vshll.u32 %v5666_v7, 16  ;;  %v6745_v7 = vld [vmem:[%s6927_s5 + $0x6c] sm:$0xff]   ;;  %v8276_v16 = vpop.f32.mrf.mxu1  ;;  %v3828_v46 = vsel %vm6954_vm2, %v8244_v20, %v8223_v31  ;;  %v3870_v51 = vor.u32 %v3869_v55, %v8252_v23  ;;  %v3880_v48 = vrot.slane %v3878_v27, 4  ;;  %v5669_v20 = vld [vmem:[%s6927_s5 + $0x48] sm:$0xf] }
 0x10f   : > { %9364 = vst [vmem:[#allocation10_spill] sm:$0xff] %v8242_v52  ;;  %6480 = vmatprep.mubr.bf16.mxu0 %v6744_v62  ;;  %6557 = vmatpush3.bf16.msra.mxu0 %v6751_v21  ;;  %v6754_v62 = vld [vmem:[#allocation2 + $0x1d0] sm:$0xff]   ;;  %v3847_v21 = vrot.slane %v3846_v61, 4  ;;  %v4591_v61 = vrot.slane %v8198_v5, 5  ;;  %v6748_v52 = vld [vmem:[%s6927_s5 + $0x78] sm:$0xff]   ;;  %9367 = vst [vmem:[#allocation12_spill] sm:$0xff] %v8276_v16  ;;  %v9368_v12 = vcombine.low %v8012_v60, %v8021_v24 }
 0x110   : > { %6507 = vmatpush3.bf16.msra.mxu1 %v6746_v17  ;;  %6558 = vmatprep.subr.bf16.mxu0 %v6755_v33  ;;  %v3891_v17 = vshrl.u32 %v8248_v40, 16  ;;  %v8263_v26 = vpop.f32.mrf.mxu0  ;;  %v3883_v5 = vrot.slane %v3881_v0, 5  ;;  %v8297_v31 = vsel %vm7198_vm5, %v4586_v38, %v4587_v34  ;;  %v6758_v60 = vld [vmem:[#allocation2 + $0x1c8] sm:$0xff]   ;;  %v3861_v55 = vrot.slane %v3860_v2, 4  ;;  %v8312_v38 = vld [vmem:[%s6927_s5 + $0x44] sm:$0x1]  ;;  %v8314_v34 = vpop.f32.mrf.mxu1 }
 0x111   : > { %6508 = vmatprep.subr.bf16.mxu1 %v6750_v57  ;;  %v3852_v24 = vsel %vm6954_vm2, %v3847_v21, %v8256_v19  ;;  %v5747_v27 = vrot.slane %v5731_v3, 9  ;;  %v4593_v0 = vrot.slane %v4591_v61, 4  ;;  %9369 = vst [vmem:[#allocation14_spill] sm:$0xff] %v8314_v34  ;;  %v3871_v19 = vrot.slane %v3870_v51, 4  ;;  %v8354_v34 = vld [vmem:[%s6927_s5 + $0x58] sm:$0xf] }
 0x112   : > { %v3893_v58 = vrot.slane %v3891_v17, 4  ;;  %v3884_v21 = vor.u32 %v3883_v5, %v3880_v48  ;;  %v3905_v17 = vshll.u32 %v5669_v20, 16  ;;  %v8317_v2 = vcombine.low %v3818_v14, %v3828_v46  ;;  %v5672_v14 = vld [vmem:[%s6927_s5 + $0x54] sm:$0xf]  ;;  %v6749_v46 = vld [vmem:[%s6927_s5 + $0x84] sm:$0xff]  }
 0x113   : > { %6429 = vmatmul.mubr.bf16.gmra.mxu1 %v9366_v49  ;;  %6559 = vmatpush3.bf16.msra.mxu0 %v6755_v33  ;;  %v3842_v49 = vsel %vm6954_vm2, %v8254_v15, %v8203_v1  ;;  %v8293_v33 = vsel %vm7198_vm5, %v5746_v9, %v4584_v39  ;;  %v8303_v1 = vrot.slane %v3887_v45, 5  ;;  %v8306_v39 = vld [vmem:[%s6927_s5 + $0x4c] sm:$0xf]  ;;  %v4594_v15 = vrot.slane %v8240_v13, 5 }
 0x114   : > { %6432 = vmatprep.mubr.bf16.mxu1 %v9368_v12  ;;  %6509 = vmatpush3.bf16.msra.mxu1 %v6750_v57  ;;  %v3875_v57 = vrot.slane %v3873_v18, 5  ;;  %v5732_v18 = vld [vmem:[%s6927_s5 + $0x3c] sm:$0xe]  ;;  %v3902_v45 = vshrl.u32 %v5669_v20, 16  ;;  %v8323_v3 = vcombine.low %v3842_v49, %v3852_v24  ;;  %v3897_v48 = vshll.u32 %v8312_v38, 16 }
 0x115   : > { %6510 = vmatprep.subr.bf16.mxu1 %v6754_v62  ;;  %6560 = vmatprep.subr.bf16.mxu0 %v6759_v29  ;;  %v8308_v9 = vpop.f32.mrf.mxu0  ;;  %v3894_v51 = vor.u32 %v3893_v58, %v8303_v1  ;;  %v3866_v12 = vsel %vm6954_vm2, %v3861_v55, %v8252_v23  ;;  %v8337_v49 = vsel %vm7198_vm5, %v5747_v27, %v4591_v61  ;;  %v5748_v24 = vrot.slane %v5732_v18, 9  ;;  %v6752_v58 = vld [vmem:[%s6927_s5 + $0x90] sm:$0xff]  }
 0x116   : > { %6481 = vmatmul.mubr.bf16.gmra.mxu0 %v6745_v7  ;;  %v3911_v7 = vshll.u32 %v8306_v39, 16  ;;  %v8341_v20 = vsel %vm7198_vm5, %v4593_v0, %v4594_v15  ;;  %v3876_v23 = vsel %vm6954_vm2, %v3871_v19, %v3875_v57  ;;  %v8351_v55 = vrot.slane %v3884_v21, 4 }
 0x117   : > { %6484 = vmatprep.mubr.bf16.mxu0 %v6748_v52  ;;  %6561 = vmatpush3.bf16.msra.mxu0 %v6759_v29  ;;  %v3915_v52 = vshrl.u32 %v8306_v39, 16  ;;  %v6762_v29 = vld [vmem:[#allocation2 + $0x1c0] sm:$0xff]   ;;  %v8330_v5 = vpop.f32.mrf.mxu0  ;;  %v3904_v61 = vrot.slane %v3902_v45, 4  ;;  %v3907_v27 = vrot.slane %v3905_v17, 5  ;;  %v9372_v0 = vcombine.low %v8042_v54, %v8046_v10 }
 0x118   : > { %6511 = vmatpush3.bf16.msra.mxu1 %v6754_v62  ;;  %6562 = vmatprep.subr.bf16.mxu0 %v6763_v37  ;;  %v4598_v62 = vrot.slane %v8248_v40, 5  ;;  %v9370_v40 = vcombine.low %v8028_v35, %v8033_v25  ;;  %v8360_v35 = vld [vmem:[%s6927_s5 + $0x50] sm:$0x1]  ;;  %v8362_v25 = vrot.slane %v3911_v7, 5  ;;  %v3926_v15 = vshrl.u32 %v5672_v14, 16 }
 0x119   : > { %6512 = vmatprep.subr.bf16.mxu1 %v6758_v60  ;;  %v8347_v13 = vpop.f32.mrf.mxu1  ;;  %v3929_v18 = vshll.u32 %v5672_v14, 16  ;;  %v3895_v57 = vrot.slane %v3894_v51, 4  ;;  %v3899_v19 = vrot.slane %v3897_v48, 5  ;;  %v4601_v45 = vrot.slane %v8312_v38, 5  ;;  %v8365_v54 = vpop.f32.mrf.mxu0 }
 0x11a   : > { %9371 = vst [vmem:[#allocation13_spill] sm:$0xff] %v8347_v13  ;;  %v4600_v21 = vrot.slane %v4598_v62, 4  ;;  %v8367_v10 = vcombine.low %v3866_v12, %v3876_v23  ;;  %v3935_v17 = vshll.u32 %v8354_v34, 16  ;;  %v3939_v7 = vshrl.u32 %v8354_v34, 16  ;;  %v8386_v12 = vld [vmem:[%s6927_s5 + $0x64] sm:$0xf] }
 0x11b   : > { %6433 = vmatmul.mubr.bf16.gmra.mxu1 %v9370_v40  ;;  %6563 = vmatpush3.bf16.msra.mxu0 %v6763_v37  ;;  %v3917_v37 = vrot.slane %v3915_v52, 4  ;;  %v5675_v52 = vld [vmem:[%s6927_s5 + $0x60] sm:$0xf]  ;;  %v8374_v51 = vpop.f32.mrf.mxu1  ;;  %v3890_v38 = vsel %vm6954_vm2, %v8351_v55, %v8303_v1  ;;  %v8382_v48 = vsel %vm7198_vm5, %v5748_v24, %v4598_v62  ;;  %v3908_v14 = vor.u32 %v3907_v27, %v3904_v61  ;;  %v8398_v24 = vld [vmem:[%s6927_s5 + $0x5c] sm:$0x1]  ;;  %v8401_v27 = vpop.f32.mrf.mxu0 }
 0x11c   : > { %6436 = vmatprep.mubr.bf16.mxu1 %v9372_v0  ;;  %6513 = vmatpush3.bf16.msra.mxu1 %v6758_v60  ;;  %9373 = vst [vmem:[#allocation15_spill] sm:$0xff] %v8374_v51  ;;  %v4605_v23 = vrot.slane %v8306_v39, 5  ;;  %v3928_v0 = vrot.slane %v3926_v15, 4  ;;  %v3931_v60 = vrot.slane %v3929_v18, 5  ;;  %v3900_v1 = vsel %vm6954_vm2, %v3895_v57, %v3899_v19  ;;  %9374 = vst [vmem:[#allocation16_spill] sm:$0xff] %v8401_v27 }
 0x11d   : > { %6514 = vmatprep.subr.bf16.mxu1 %v6762_v29  ;;  %v3918_v40 = vor.u32 %v3917_v37, %v8362_v25  ;;  %v8395_v62 = vsel %vm7198_vm5, %v4600_v21, %v4601_v45  ;;  %v3950_v55 = vshrl.u32 %v5675_v52, 16  ;;  %v3953_v61 = vshll.u32 %v5675_v52, 16  ;;  %v8410_v19 = vpop.f32.mrf.mxu1  ;;  %v6756_v21 = vld [vmem:[%s6927_s5 + $0xa8] sm:$0xff]  }
 0x11e   : > { %6485 = vmatmul.mubr.bf16.gmra.mxu0 %v6749_v46  ;;  %v3921_v46 = vshll.u32 %v8360_v35, 16  ;;  %v8403_v37 = vrot.slane %v3935_v17, 5  ;;  %v3941_v39 = vrot.slane %v3939_v7, 4  ;;  %v3959_v15 = vshll.u32 %v8386_v12, 16  ;;  %9376 = vst [vmem:[#allocation17_spill] sm:$0xff] %v8410_v19 }
 0x11f   : > { %6488 = vmatprep.mubr.bf16.mxu0 %v6752_v58  ;;  %v5733_v58 = vld [vmem:[%s6927_s5 + $0x48] sm:$0xe]  ;;  %v3963_v18 = vshrl.u32 %v8386_v12, 16  ;;  %v9375_v57 = vcombine.low %v8062_v22, %v8071_v32  ;;  %v8413_v45 = vrot.slane %v3908_v14, 4  ;;  %v4608_v51 = vrot.slane %v8360_v35, 5 }
 0x120   : > { %6515 = vmatpush3.bf16.msra.mxu1 %v6762_v29  ;;  %v6753_v29 = vld [vmem:[%s6927_s5 + $0x9c] sm:$0xff]   ;;  %v8415_v52 = vrot.slane %v3921_v46, 5  ;;  %v5749_v17 = vrot.slane %v5733_v58, 9  ;;  %v9377_v7 = vcombine.low %v8086_v36, %v8080_v11  ;;  %v8421_v13 = vrot.slane %v3918_v40, 4  ;;  %v5734_v19 = vld [vmem:[%s6927_s5 + $0x54] sm:$0xe] }
 0x121   : > { %v4607_v16 = vrot.slane %v4605_v23, 4  ;;  %v3932_v22 = vor.u32 %v3931_v60, %v3928_v0  ;;  %v3945_v32 = vshll.u32 %v8398_v24, 16  ;;  %v3952_v14 = vrot.slane %v3950_v55, 4  ;;  %v8437_v0 = vld [vmem:[%s6927_s5 + $0x68] sm:$0x1]  ;;  %v8439_v55 = vpop.f32.mrf.mxu1 }
 0x122   : > { %v3955_v27 = vrot.slane %v3953_v61, 5  ;;  %v8426_v46 = vrot.slane %v3959_v15, 5  ;;  %v3965_v58 = vrot.slane %v3963_v18, 4  ;;  %v8430_v11 = vcombine.low %v3890_v38, %v3900_v1  ;;  %9378 = vst [vmem:[#allocation18_spill] sm:$0xff] %v8439_v55 }
 0x123   : > { %6437 = vmatmul.mubr.bf16.gmra.mxu1 %v9375_v57  ;;  %v5678_v57 = vld [vmem:[%s6927_s5 + $0x6c] sm:$0xf]  ;;  %v3942_v60 = vor.u32 %v3941_v39, %v8403_v37  ;;  %v4612_v40 = vrot.slane %v8354_v34, 5  ;;  %v3914_v38 = vsel %vm6954_vm2, %v8413_v45, %v8362_v25  ;;  %v8447_v1 = vsel %vm7198_vm5, %v5749_v17, %v4605_v23  ;;  %v8458_v25 = vld [vmem:[%s6927_s5 + $0x70] sm:$0xf] }
 0x124   : > { %6440 = vmatprep.mubr.bf16.mxu1 %v9377_v7  ;;  %v3974_v61 = vshrl.u32 %v5678_v57, 16  ;;  %v3924_v34 = vsel %vm6954_vm2, %v8421_v13, %v8415_v52  ;;  %v8455_v39 = vsel %vm7198_vm5, %v4607_v16, %v4608_v51  ;;  %v3933_v15 = vrot.slane %v3932_v22, 4  ;;  %v5681_v7 = vld [vmem:[%s6927_s5 + $0x78] sm:$0xf]  ;;  %v6760_v13 = vld [vmem:[%s6927_s5 + $0xc0] sm:$0xff]  }
 0x125   : > { %v5750_v18 = vrot.slane %v5734_v19, 9  ;;  %v3956_v45 = vor.u32 %v3955_v27, %v3952_v14  ;;  %v3966_v23 = vor.u32 %v3965_v58, %v8426_v46  ;;  %v3969_v17 = vshll.u32 %v8437_v0, 16  ;;  %v5735_v22 = vld [vmem:[%s6927_s5 + $0x60] sm:$0xe] }
 0x126   : > { %6489 = vmatmul.mubr.bf16.gmra.mxu0 %v6753_v29  ;;  %v8428_v35 = vpop.f32.mrf.mxu0  ;;  %v3977_v29 = vshll.u32 %v5678_v57, 16  ;;  %v6757_v57 = vld [vmem:[%s6927_s5 + $0xb4] sm:$0xff]   ;;  %v3943_v52 = vrot.slane %v3942_v60, 4  ;;  %v4614_v55 = vrot.slane %v4612_v40, 4  ;;  %v4615_v16 = vrot.slane %v8398_v24, 5 }
 0x127   : > { %6492 = vmatprep.mubr.bf16.mxu0 %v6756_v21  ;;  %v3947_v21 = vrot.slane %v3945_v32, 5  ;;  %v4619_v51 = vrot.slane %v8386_v12, 5  ;;  %v9380_v19 = vcombine.low %v8095_v53, %v8099_v41  ;;  %v3976_v32 = vrot.slane %v3974_v61, 4 }
 0x128   : > { %v8464_v36 = vpop.f32.mrf.mxu0  ;;  %v3979_v14 = vrot.slane %v3977_v29, 5  ;;  %v3983_v58 = vshll.u32 %v8458_v25, 16  ;;  %v9382_v60 = vcombine.low %v8120_v44, %v8124_v59  ;;  %v3938_v53 = vsel %vm6954_vm2, %v3933_v15, %v8403_v37 }
 0x129   : > { %9379 = vst [vmem:[#allocation19_spill] sm:$0xff] %v8464_v36  ;;  %v3987_v36 = vshrl.u32 %v8458_v25, 16  ;;  %v8487_v41 = vsel %vm7198_vm5, %v5750_v18, %v4612_v40  ;;  %v3998_v24 = vshrl.u32 %v5681_v7, 16  ;;  %v3957_v61 = vrot.slane %v3956_v45, 4 }
 0x12a   : > { %v8472_v27 = vpop.f32.mrf.mxu1  ;;  %v3967_v29 = vrot.slane %v3966_v23, 4  ;;  %v4001_v44 = vshll.u32 %v5681_v7, 16  ;;  %v8492_v59 = vpop.f32.mrf.mxu0  ;;  %v5751_v37 = vrot.slane %v5735_v22, 9  ;;  %v4621_v15 = vrot.slane %v4619_v51, 4  ;;  %v8504_v23 = vld [vmem:[%s6927_s5 + $0x74] sm:$0x1] }
 0x12b   : > { %6441 = vmatmul.mubr.bf16.gmra.mxu1 %v9380_v19  ;;  %9381 = vst [vmem:[#allocation20_spill] sm:$0xff] %v8472_v27  ;;  %v3971_v19 = vrot.slane %v3969_v17, 5  ;;  %v8490_v27 = vld [vmem:[%s6927_s5 + $0x7c] sm:$0xf]  ;;  %v4622_v40 = vrot.slane %v8437_v0, 5  ;;  %v8501_v45 = vsel %vm7198_vm5, %v4614_v55, %v4615_v16  ;;  %v3980_v17 = vor.u32 %v3979_v14, %v3976_v32  ;;  %v6761_v32 = vld [vmem:[%s6927_s5 + $0xcc] sm:$0xff]  }
 0x12c   : > { %6444 = vmatprep.mubr.bf16.mxu1 %v9382_v60  ;;  %v3948_v60 = vsel %vm6954_vm2, %v3943_v52, %v3947_v21  ;;  %v8497_v18 = vpop.f32.mrf.mxu1  ;;  %v8506_v7 = vrot.slane %v3983_v58, 5  ;;  %v5736_v21 = vld [vmem:[%s6927_s5 + $0x6c] sm:$0xe]  ;;  %v4000_v52 = vrot.slane %v3998_v24, 4  ;;  %v4003_v22 = vrot.slane %v4001_v44, 5  ;;  %v8520_v16 = vpop.f32.mrf.mxu0 }
 0x12d   : > { %9383 = vst [vmem:[#allocation21_spill] sm:$0xff] %v8497_v18  ;;  %v4007_v0 = vshll.u32 %v8490_v27, 16  ;;  %v8511_v12 = vcombine.low %v3914_v38, %v3924_v34  ;;  %v8513_v18 = vcombine.low %v3938_v53, %v3948_v60  ;;  %v3962_v55 = vsel %vm6954_vm2, %v3957_v61, %v8426_v46  ;;  %9384 = vst [vmem:[#allocation22_spill] sm:$0xff] %v8520_v16  ;;  %v5684_v58 = vld [vmem:[%s6927_s5 + $0x84] sm:$0xf] }
 0x12e   : > { %6493 = vmatmul.mubr.bf16.gmra.mxu0 %v6757_v57  ;;  %v3989_v57 = vrot.slane %v3987_v36, 4  ;;  %v3972_v36 = vsel %vm6954_vm2, %v3967_v29, %v3971_v19  ;;  %v8527_v38 = vsel %vm7198_vm5, %v5751_v37, %v4619_v51  ;;  %v8531_v34 = vsel %vm7198_vm5, %v4621_v15, %v4622_v40  ;;  %v8536_v53 = vld [vmem:[%s6927_s5 + $0x88] sm:$0xf]  ;;  %v8541_v61 = vpop.f32.mrf.mxu1  ;;  %v5683_v37 = vld [vmem:[%s6927_s5 + $0x80] sm:$0x1] }
 0x12f   : > { %6496 = vmatprep.mubr.bf16.mxu0 %v6760_v13  ;;  %v4011_v13 = vshrl.u32 %v8490_v27, 16  ;;  %v4626_v46 = vrot.slane %v8458_v25, 5  ;;  %v9385_v24 = vcombine.low %v8131_v4, %v8137_v43  ;;  %9386 = vst [vmem:[#allocation23_spill] sm:$0xff] %v8541_v61  ;;  %v8543_v29 = vrot.slane %v3980_v17, 4  ;;  %v5737_v43 = vld [vmem:[%s6927_s5 + $0x78] sm:$0xe] }
 0x130   : > { %v3990_v51 = vor.u32 %v3989_v57, %v8506_v7  ;;  %v3993_v19 = vshll.u32 %v8504_v23, 16  ;;  %v5752_v44 = vrot.slane %v5736_v21, 9  ;;  %v9387_v60 = vcombine.low %v8148_v42, %v8156_v28  ;;  %v8588_v42 = vld [vmem:[%s6927_s5 + $0x94] sm:$0xf] }
 0x131   : > { %v8550_v25 = vcombine.low %v3962_v55, %v3972_v36  ;;  %v4004_v15 = vor.u32 %v4003_v22, %v4000_v52  ;;  %v8553_v40 = vrot.slane %v4007_v0, 5  ;;  %v4013_v4 = vrot.slane %v4011_v13, 4  ;;  %v8564_v0 = vpop.f32.mrf.mxu1 }
 0x132   : > { %v4025_v17 = vshll.u32 %v5684_v58, 16  ;;  %v4031_v57 = vshll.u32 %v8536_v53, 16  ;;  %v4035_v14 = vshrl.u32 %v8536_v53, 16  ;;  %v4628_v28 = vrot.slane %v4626_v46, 4  ;;  %9389 = vst [vmem:[#allocation25_spill] sm:$0xff] %v8564_v0  ;;  %v9425_v63 = vld [vmem:[#allocation20_spill] sm:$0xff] }
 0x133   : > { %6445 = vmatmul.mubr.bf16.gmra.mxu1 %v9385_v24  ;;  %v4022_v24 = vshrl.u32 %v5684_v58, 16  ;;  %v4629_v52 = vrot.slane %v8504_v23, 5  ;;  %v4633_v22 = vrot.slane %v8490_v27, 5  ;;  %v9390_v13 = vcombine.low %v8232_v47, %v8236_v50  ;;  %v5687_v27 = vld [vmem:[%s6927_s5 + $0x90] sm:$0xf] }
 0x134   : > { %6448 = vmatprep.mubr.bf16.mxu1 %v9387_v60  ;;  %v8573_v36 = vrot.slane %v3990_v51, 4  ;;  %v8579_v23 = vsel %vm7198_vm5, %v5752_v44, %v4626_v46  ;;  %v8584_v60 = vrot.slane %v4004_v15, 4  ;;  %v4014_v47 = vor.u32 %v4013_v4, %v8553_v40  ;;  %v5686_v51 = vld [vmem:[%s6927_s5 + $0x8c] sm:$0x1] }
 0x135   : > { %v4017_v50 = vshll.u32 %v5683_v37, 16  ;;  %v4024_v55 = vrot.slane %v4022_v24, 4  ;;  %v8591_v0 = vrot.slane %v4031_v57, 5  ;;  %v4037_v61 = vrot.slane %v4035_v14, 4  ;;  %v5738_v24 = vld [vmem:[%s6927_s5 + $0x84] sm:$0xe] }
 0x136   : > { %v8558_v21 = vpop.f32.mrf.mxu0  ;;  %6497 = vmatmul.mubr.bf16.gmra.mxu0 %v6761_v32  ;;  %v8575_v32 = vrot.slane %v3993_v19, 5  ;;  %v4027_v19 = vrot.slane %v4025_v17, 5  ;;  %v8597_v44 = vsel %vm7198_vm5, %v4628_v28, %v4629_v52  ;;  %v4635_v15 = vrot.slane %v4633_v22, 4 }
 0x137   : > { %9388 = vst [vmem:[#allocation24_spill] sm:$0xff] %v8558_v21  ;;  %6564 = vmatprep.mubr.bf16.mxu0 %v9390_v13  ;;  %v5753_v13 = vrot.slane %v5737_v43, 9  ;;  %v4640_v4 = vrot.slane %v8536_v53, 5  ;;  %v9394_v43 = vcombine.low %v8160_v8, %v8166_v56  ;;  %v4046_v17 = vshrl.u32 %v5687_v27, 16 }
 0x138   : > { %v8582_v58 = vpop.f32.mrf.mxu0  ;;  %v4049_v14 = vshll.u32 %v5687_v27, 16  ;;  %v4055_v57 = vshll.u32 %v8588_v42, 16  ;;  %v3996_v53 = vsel %vm6954_vm2, %v8573_v36, %v8575_v32  ;;  %v4015_v8 = vrot.slane %v4014_v47, 4 }
 0x139   : > { %9391 = vst [vmem:[#allocation26_spill] sm:$0xff] %v8582_v58  ;;  %v4636_v58 = vrot.slane %v5683_v37, 5  ;;  %v4019_v56 = vrot.slane %v4017_v50, 5  ;;  %v4041_v37 = vshll.u32 %v5686_v51, 16  ;;  %v4010_v27 = vsel %vm6954_vm2, %v8584_v60, %v8553_v40 }
 0x13a   : > { %v8593_v46 = vpop.f32.mrf.mxu0  ;;  %v9397_v32 = vcombine.low %v8293_v33, %v8297_v31  ;;  %v5754_v50 = vrot.slane %v5738_v24, 9  ;;  %v4642_v40 = vrot.slane %v4640_v4, 4  ;;  %v4643_v60 = vrot.slane %v5686_v51, 5  ;;  %v8647_v24 = vld [vmem:[%s6927_s5 + $0x98] sm:$0x1] }
 0x13b   : > { %9392 = vst [vmem:[#allocation27_spill] sm:$0xff] %v8593_v46  ;;  %v8600_v21 = vpop.f32.mrf.mxu1  ;;  %6449 = vmatmul.mubr.bf16.gmra.mxu1 %v9394_v43  ;;  %v4059_v46 = vshrl.u32 %v8588_v42, 16  ;;  %v8623_v43 = vsel %vm7198_vm5, %v5753_v13, %v4633_v22  ;;  %v8632_v47 = vsel %vm7198_vm5, %v4635_v15, %v4636_v58  ;;  %v4051_v13 = vrot.slane %v4049_v14, 5 }
 0x13c   : > { %9393 = vst [vmem:[#allocation28_spill] sm:$0xff] %v8600_v21  ;;  %v8608_v28 = vpop.f32.mrf.mxu0  ;;  %6516 = vmatprep.mubr.bf16.mxu1 %v8317_v2  ;;  %v4028_v2 = vor.u32 %v4027_v19, %v4024_v55  ;;  %v4038_v21 = vor.u32 %v4037_v61, %v8591_v0  ;;  %v9399_v61 = vcombine.low %v8337_v49, %v8341_v20  ;;  %v4048_v55 = vrot.slane %v4046_v17, 4 }
 0x13d   : > { %9395 = vst [vmem:[#allocation29_spill] sm:$0xff] %v8608_v28  ;;  %v8615_v52 = vpop.f32.mrf.mxu1  ;;  %v5690_v28 = vld [vmem:[%s6927_s5 + $0x9c] sm:$0xf]  ;;  %v8642_v33 = vrot.slane %v4055_v57, 5  ;;  %v4061_v31 = vrot.slane %v4059_v46, 4  ;;  %v4020_v58 = vsel %vm6954_vm2, %v4015_v8, %v4019_v56  ;;  %v4043_v15 = vrot.slane %v4041_v37, 5 }
 0x13e   : > { %9396 = vst [vmem:[#allocation30_spill] sm:$0xff] %v8615_v52  ;;  %v6278_v36 = vpop.f32.mrf.mxu0  ;;  %6565 = vmatmul.mubr.bf16.vlgmr.msra.gmra.mxu0 %v9397_v32  ;;  %v8635_v52 = vld [vmem:[%s6927_s5 + $0xa0] sm:$0xf]  ;;  %v4070_v51 = vshrl.u32 %v5690_v28, 16  ;;  %v4073_v32 = vshll.u32 %v5690_v28, 16  ;;  %v4039_v49 = vrot.slane %v4038_v21, 4  ;;  %v9400_v46 = vsel %vm6954_vm2, %v8543_v29, %v8506_v7 }
 0x13f   : > { %v8637_v22 = vpop.f32.mrf.mxu1  ;;  %6568 = vmatprep.mubr.bf16.mxu0 %v9399_v61  ;;  %v4079_v20 = vshll.u32 %v8635_v52, 16  ;;  %v4083_v17 = vshrl.u32 %v8635_v52, 16  ;;  %v8658_v57 = vcombine.low %v9400_v46, %v3996_v53  ;;  %v8666_v21 = vsel %vm7198_vm5, %v5754_v50, %v4640_v4 }
 0x140   : > { %9398 = vst [vmem:[#allocation31_spill] sm:$0xff] %v8637_v22  ;;  %v1572_v19 = vpop.f32.mrf.mxu0  ;;  %v4029_v22 = vrot.slane %v4028_v2, 4  ;;  %v8671_v37 = vsel %vm7198_vm5, %v4642_v40, %v4643_v60  ;;  %v4052_v7 = vor.u32 %v4051_v13, %v4048_v55  ;;  %v4062_v29 = vor.u32 %v4061_v31, %v8642_v33  ;;  %v8676_v2 = vld [vmem:[%s6927_s5 + $0x90] sm:$0xe] }
 0x141   : > { %v8649_v16 = vpop.f32.mrf.mxu1  ;;  %v4065_v53 = vshll.u32 %v8647_v24, 16  ;;  %v8680_v4 = vcombine.low %v4010_v27, %v4020_v58  ;;  %v4075_v50 = vrot.slane %v4073_v32, 5  ;;  %v4044_v55 = vsel %vm6954_vm2, %v4039_v49, %v4043_v15  ;;  %v5693_v15 = vld [vmem:[%s6927_s5 + $0xa8] sm:$0xf] }
 0x142   : > { %v6279_v14 = vpop.f32.mrf.mxu0  ;;  %v4034_v60 = vsel %vm6954_vm2, %v4029_v22, %v8591_v0  ;;  %v8687_v13 = vrot.slane %v4079_v20, 5  ;;  %v9402_v58 = vcombine.low %v8382_v48, %v8395_v62  ;;  %v5755_v0 = vrot.slane %v8676_v2, 9  ;;  %v8699_v22 = vld [vmem:[%s6927_s5 + $0xa4] sm:$0x1]  ;;  %v8707_v48 = vld [vmem:[%s6927_s5 + $0xac] sm:$0xf] }
 0x143   : > { %v6230_v56 = vpop.f32.mrf.mxu1  ;;  %6517 = vmatmul.mubr.bf16.vlgmr.msra.gmra.mxu1 %v8323_v3  ;;  %v4072_v3 = vrot.slane %v4070_v51, 4  ;;  %v4053_v49 = vrot.slane %v4052_v7, 4  ;;  %v4063_v20 = vrot.slane %v4062_v29, 4  ;;  %v4097_v7 = vshll.u32 %v5693_v15, 16 }
 0x144   : > { %v1128_v61 = vadd.f32 %v6230_v56, %v8195_v6  ;;  %v1575_v46 = vpop.f32.mrf.mxu0  ;;  %6520 = vmatprep.mubr.bf16.mxu1 %v8367_v10  ;;  %v4085_v6 = vrot.slane %v4083_v17, 4  ;;  %v9401_v10 = vld [vmem:[#allocation8_spill] sm:$0xff]  ;;  %v4067_v17 = vrot.slane %v4065_v53, 5 }
 0x145   : > { %v1119_v40 = vpop.f32.mrf.mxu1  ;;  %v4076_v51 = vor.u32 %v4075_v50, %v4072_v3  ;;  %v4058_v3 = vsel %vm6954_vm2, %v4053_v49, %v8642_v33  ;;  %v5740_v49 = vld [vmem:[%s6927_s5 + $0x9c] sm:$0xe] }
 0x146   : > { %v8689_v31 = vadd.f32 %v6278_v36, %v1128_v61  ;;  %v1120_v56 = vadd.f32 %v1119_v40, %v9401_v10  ;;  %v6282_v27 = vpop.f32.mrf.mxu0  ;;  %6569 = vmatmul.mubr.bf16.gmra.mxu0 %v9402_v58  ;;  %v9403_v36 = vcombine.low %v8447_v1, %v8455_v39  ;;  %v4647_v61 = vrot.slane %v8588_v42, 5  ;;  %v9404_v40 = vld [vmem:[#allocation10_spill] sm:$0xff] }
 0x147   : > { %v6231_v32 = vpop.f32.mrf.mxu1  ;;  %v8712_v58 = vcombine.low %v4034_v60, %v4044_v55  ;;  %v4086_v28 = vor.u32 %v4085_v6, %v8687_v13  ;;  %v4089_v1 = vshll.u32 %v8699_v22, 16  ;;  %v4094_v39 = vshrl.u32 %v5693_v15, 16 }
 0x148   : > { %6572 = vmatprep.mubr.bf16.mxu0 %v9403_v36  ;;  %v8709_v62 = vadd.f32 %v1572_v19, %v1120_v56  ;;  %v1131_v10 = vadd.f32 %v6231_v32, %v9404_v40  ;;  %v1588_v2 = vpop.f32.mrf.mxu0  ;;  %v4103_v19 = vshll.u32 %v8707_v48, 16  ;;  %v4107_v56 = vshrl.u32 %v8707_v48, 16 }
 0x149   : > { %v1122_v8 = vpop.f32.mrf.mxu1  ;;  %v4068_v50 = vsel %vm6954_vm2, %v4063_v20, %v4067_v17  ;;  %v4650_v55 = vrot.slane %v8647_v24, 5  ;;  %v4077_v15 = vrot.slane %v4076_v51, 4  ;;  %v4087_v36 = vrot.slane %v4086_v28, 4 }
 0x14a   : > { %v8716_v29 = vadd.f32 %v6279_v14, %v1131_v10  ;;  %v1123_v42 = vadd.f32 %v1122_v8, %v8263_v26  ;;  %v6283_v53 = vpop.f32.mrf.mxu0  ;;  %v4649_v14 = vrot.slane %v4647_v61, 4  ;;  %v4091_v33 = vrot.slane %v4089_v1, 5 }
 0x14b   : > { %v6234_v60 = vpop.f32.mrf.mxu1  ;;  %6521 = vmatmul.mubr.bf16.gmra.mxu1 %v8430_v11  ;;  %v4654_v11 = vrot.slane %v8635_v52, 5  ;;  %v4096_v40 = vrot.slane %v4094_v39, 4  ;;  %v4099_v20 = vrot.slane %v4097_v7, 5  ;;  %v4109_v52 = vrot.slane %v4107_v56, 4 }
 0x14c   : > { %v8728_v26 = vadd.f32 %v1575_v46, %v1123_v42  ;;  %v1144_v8 = vadd.f32 %v6234_v60, %v8308_v9  ;;  %v1591_v6 = vpop.f32.mrf.mxu0  ;;  %6524 = vmatprep.mubr.bf16.mxu1 %v8511_v12  ;;  %v9405_v9 = vcombine.low %v8487_v41, %v8501_v45  ;;  %v8740_v12 = vrot.slane %v4103_v19, 5  ;;  %v5695_v45 = vld [vmem:[%s6927_s5 + $0xb0] sm:$0x1]  ;;  %v5741_v42 = vld [vmem:[%s6927_s5 + $0xa8] sm:$0xe] }
 0x14d   : > { %v1135_v32 = vpop.f32.mrf.mxu1  ;;  %v9406_v28 = vcombine.low %v8527_v38, %v8531_v34  ;;  %v8745_v10 = vcombine.low %v4058_v3, %v4068_v50  ;;  %v8753_v41 = vsel %vm7198_vm5, %v4649_v14, %v4650_v55  ;;  %v5756_v34 = vrot.slane %v5740_v49, 9  ;;  %v8780_v49 = vld [vmem:[%s6927_s5 + $0xb8] sm:$0xf] }
 0x14e   : > { %v8734_v17 = vadd.f32 %v6282_v27, %v1144_v8  ;;  %v1136_v24 = vadd.f32 %v1135_v32, %v8330_v5  ;;  %v6286_v46 = vpop.f32.mrf.mxu0  ;;  %6573 = vmatmul.mubr.bf16.gmra.mxu0 %v9405_v9  ;;  %v8749_v5 = vsel %vm7198_vm5, %v5755_v0, %v4647_v61  ;;  %v4661_v27 = vrot.slane %v8707_v48, 5  ;;  %v5696_v48 = vld [vmem:[%s6927_s5 + $0xb4] sm:$0xf] }
 0x14f   : > { %v6235_v51 = vpop.f32.mrf.mxu1  ;;  %6576 = vmatprep.mubr.bf16.mxu0 %v9406_v28  ;;  %v4657_v7 = vrot.slane %v8699_v22, 5  ;;  %v4082_v0 = vsel %vm6954_vm2, %v4077_v15, %v8687_v13  ;;  %v4092_v61 = vsel %vm6954_vm2, %v4087_v36, %v4091_v33  ;;  %v4656_v56 = vrot.slane %v4654_v11, 4 }
 0x150   : > { %v8757_v1 = vadd.f32 %v1588_v2, %v1136_v24  ;;  %v1147_v39 = vadd.f32 %v6235_v51, %v8365_v54  ;;  %v1604_v38 = vpop.f32.mrf.mxu0  ;;  %v4100_v60 = vor.u32 %v4099_v20, %v4096_v40  ;;  %v9407_v54 = vld [vmem:[#allocation16_spill] sm:$0xff]  ;;  %v4110_v22 = vor.u32 %v4109_v52, %v8740_v12  ;;  %v9408_v51 = vld [vmem:[#allocation19_spill] sm:$0xff] }
 0x151   : > { %v1138_v19 = vpop.f32.mrf.mxu1  ;;  %v4113_v14 = vshll.u32 %v5695_v45, 16  ;;  %v5771_v13 = vcombine.low %v8749_v5, %v8753_v41  ;;  %v5757_v8 = vrot.slane %v5741_v42, 9  ;;  %v4663_v15 = vrot.slane %v4661_v27, 4 }
 0x152   : > { %v8768_v2 = vadd.f32 %v6283_v53, %v1147_v39  ;;  %v1139_v3 = vadd.f32 %v1138_v19, %v9407_v54  ;;  %v6287_v50 = vpop.f32.mrf.mxu0  ;;  %v4664_v32 = vrot.slane %v5695_v45, 5  ;;  %v4118_v40 = vshrl.u32 %v5696_v48, 16  ;;  %v5699_v19 = vld [vmem:[%s6927_s5 + $0xc0] sm:$0xf] }
 0x153   : > { %v6238_v55 = vpop.f32.mrf.mxu1  ;;  %6525 = vmatmul.mubr.bf16.gmra.mxu1 %v8513_v18  ;;  %v4121_v20 = vshll.u32 %v5696_v48, 16  ;;  %v8782_v18 = vcombine.low %v4082_v0, %v4092_v61  ;;  %v8786_v9 = vsel %vm7198_vm5, %v5756_v34, %v4654_v11  ;;  %v9409_v45 = vcombine.low %v8579_v23, %v8597_v44 }
 0x154   : > { %v8775_v36 = vadd.f32 %v1591_v6, %v1139_v3  ;;  %v1160_v53 = vadd.f32 %v6238_v55, %v8428_v35  ;;  %v1607_v33 = vpop.f32.mrf.mxu0  ;;  %6528 = vmatprep.mubr.bf16.mxu1 %v8550_v25  ;;  %v8790_v6 = vsel %vm7198_vm5, %v4656_v56, %v4657_v7  ;;  %v4101_v35 = vrot.slane %v4100_v60, 4  ;;  %v8824_v3 = vld [vmem:[%s6927_s5 + $0xbc] sm:$0x1] }
 0x155   : > { %v1151_v24 = vpop.f32.mrf.mxu1  ;;  %v4111_v39 = vrot.slane %v4110_v22, 4  ;;  %v4115_v42 = vrot.slane %v4113_v14, 5  ;;  %v9410_v34 = vcombine.low %v8623_v43, %v8632_v47  ;;  %v8808_v7 = vsel %vm7198_vm5, %v4663_v15, %v4664_v32  ;;  %v8816_v47 = vld [vmem:[%s6927_s5 + $0xc4] sm:$0xf] }
 0x156   : > { %v8792_v52 = vadd.f32 %v6286_v46, %v1160_v53  ;;  %v1152_v25 = vadd.f32 %v1151_v24, %v9408_v51  ;;  %v6290_v28 = vpop.f32.mrf.mxu0  ;;  %6577 = vmatmul.mubr.bf16.gmra.mxu0 %v9409_v45  ;;  %v8804_v46 = vsel %vm7198_vm5, %v5757_v8, %v4661_v27  ;;  %v4127_v23 = vshll.u32 %v8780_v49, 16  ;;  %v9412_v51 = vld [vmem:[#allocation24_spill] sm:$0xff] }
 0x157   : > { %v6239_v11 = vpop.f32.mrf.mxu1  ;;  %6580 = vmatprep.mubr.bf16.mxu0 %v9410_v34  ;;  %v4131_v44 = vshrl.u32 %v8780_v49, 16  ;;  %v4120_v60 = vrot.slane %v4118_v40, 4  ;;  %v4123_v43 = vrot.slane %v4121_v20, 5  ;;  %v5772_v48 = vcombine.low %v8786_v9, %v8790_v6  ;;  %v5742_v20 = vld [vmem:[%s6927_s5 + $0xb4] sm:$0xe]  ;;  %v9419_v6 = vld [vmem:[#allocation12_spill] sm:$0xff] }
 0x158   : > { %v8812_v0 = vadd.f32 %v1604_v38, %v1152_v25  ;;  %v1163_v61 = vadd.f32 %v6239_v11, %v8492_v59  ;;  %v1620_v56 = vpop.f32.mrf.mxu0  ;;  %v4106_v54 = vsel %vm6954_vm2, %v4101_v35, %v8740_v12  ;;  %v4142_v38 = vshrl.u32 %v5699_v19, 16  ;;  %v9411_v59 = vld [vmem:[#allocation22_spill] sm:$0xff] }
 0x159   : > { %v1154_v27 = vpop.f32.mrf.mxu1  ;;  %v4145_v22 = vshll.u32 %v5699_v19, 16  ;;  %v4116_v15 = vsel %vm6954_vm2, %v4111_v39, %v4115_v42  ;;  %v5773_v32 = vcombine.low %v8804_v46, %v8808_v7  ;;  %v8834_v40 = vrot.slane %v4127_v23, 5 }
 0x15a   : > { %v8826_v14 = vadd.f32 %v6287_v50, %v1163_v61  ;;  %v1155_v55 = vadd.f32 %v1154_v27, %v9411_v59  ;;  %v6291_v8 = vpop.f32.mrf.mxu0  ;;  %v4133_v12 = vrot.slane %v4131_v44, 4  ;;  %v4151_v24 = vshll.u32 %v8816_v47, 16 }
 0x15b   : > { %v6242_v53 = vpop.f32.mrf.mxu1  ;;  %6529 = vmatmul.mubr.bf16.gmra.mxu1 %v8658_v57  ;;  %v4155_v50 = vshrl.u32 %v8816_v47, 16  ;;  %v4124_v39 = vor.u32 %v4123_v43, %v4120_v60  ;;  %v4137_v57 = vshll.u32 %v8824_v3, 16  ;;  %v8844_v19 = vcombine.low %v4106_v54, %v4116_v15  ;;  %v5701_v60 = vld [vmem:[%s6927_s5 + $0xc8] sm:$0x1]  ;;  %v5743_v43 = vld [vmem:[%s6927_s5 + $0xc0] sm:$0xe] }
 0x15c   : > { %v8839_v35 = vadd.f32 %v1607_v33, %v1155_v55  ;;  %v1176_v25 = vadd.f32 %v6242_v53, %v9412_v51  ;;  %v1623_v45 = vpop.f32.mrf.mxu0  ;;  %6532 = vmatprep.mubr.bf16.mxu1 %v8680_v4  ;;  %v4668_v11 = vrot.slane %v8780_v49, 5  ;;  %v4144_v34 = vrot.slane %v4142_v38, 4  ;;  %v9413_v33 = vld [vmem:[#allocation26_spill] sm:$0xff]  ;;  %v5702_v51 = vld [vmem:[%s6927_s5 + $0xcc] sm:$0xf] }
 0x15d   : > { %v1167_v42 = vpop.f32.mrf.mxu1  ;;  %v4147_v23 = vrot.slane %v4145_v22, 5  ;;  %v9414_v59 = vcombine.low %v8666_v21, %v8671_v37  ;;  %v5758_v4 = vrot.slane %v5742_v20, 9  ;;  %v4675_v54 = vrot.slane %v8816_v47, 5  ;;  %v9415_v22 = vld [vmem:[#allocation27_spill] sm:$0xff] }
 0x15e   : > { %v8847_v44 = vadd.f32 %v6290_v28, %v1176_v25  ;;  %v1168_v61 = vadd.f32 %v1167_v42, %v9413_v33  ;;  %v6294_v27 = vpop.f32.mrf.mxu0  ;;  %v4134_v49 = vor.u32 %v4133_v12, %v8834_v40  ;;  %v4671_v28 = vrot.slane %v8824_v3, 5  ;;  %v8872_v42 = vld [vmem:[%s6927_s5 + $0xd0] sm:$0xf] }
 0x15f   : > { %6581 = vmatmul.mubr.bf16.gmra.mxu0 %v9414_v59  ;;  %v6243_v55 = vpop.f32.mrf.mxu1  ;;  %v8861_v38 = vrot.slane %v4151_v24, 5  ;;  %v4157_v21 = vrot.slane %v4155_v50, 4  ;;  %v8866_v20 = vrot.slane %v4124_v39, 4  ;;  %v8868_v47 = vrot.slane %v4137_v57, 5  ;;  %v9416_v24 = vld [vmem:[#allocation29_spill] sm:$0xff] }
 0x160   : > { %6584 = vmatprep.mubr.bf16.mxu0 %v5771_v13  ;;  %v8863_v37 = vadd.f32 %v1620_v56, %v1168_v61  ;;  %v1179_v15 = vadd.f32 %v6243_v55, %v9415_v22  ;;  %v1636_v53 = vpop.f32.mrf.mxu0  ;;  %v4670_v41 = vrot.slane %v4668_v11, 4  ;;  %v4148_v13 = vor.u32 %v4147_v23, %v4144_v34  ;;  %v9417_v55 = vld [vmem:[#allocation9_spill] sm:$0xff] }
 0x161   : > { %v1170_v5 = vpop.f32.mrf.mxu1  ;;  %v4161_v25 = vshll.u32 %v5701_v60, 16  ;;  %v5759_v12 = vrot.slane %v5743_v43, 9  ;;  %v4677_v33 = vrot.slane %v4675_v54, 4  ;;  %v4678_v61 = vrot.slane %v5701_v60, 5 }
 0x162   : > { %v8874_v3 = vadd.f32 %v6291_v8, %v1179_v15  ;;  %v1171_v56 = vadd.f32 %v1170_v5, %v9416_v24  ;;  %v6295_v50 = vpop.f32.mrf.mxu0  ;;  %v4669_v39 = vsel %vm7198_vm5, %v5758_v4, %v4668_v11  ;;  %v4158_v57 = vor.u32 %v4157_v21, %v8861_v38 }
 0x163   : > { %v6246_v59 = vpop.f32.mrf.mxu1  ;;  %6533 = vmatmul.mubr.bf16.gmra.mxu1 %v8712_v58  ;;  %v4166_v34 = vshrl.u32 %v5702_v51, 16  ;;  %v4169_v23 = vshll.u32 %v5702_v51, 16  ;;  %v4175_v15 = vshll.u32 %v8872_v42, 16  ;;  %v4179_v60 = vshrl.u32 %v8872_v42, 16 }
 0x164   : > { %v8881_v43 = vadd.f32 %v1623_v45, %v1171_v56  ;;  %v1192_v8 = vadd.f32 %v6246_v59, %v9417_v55  ;;  %v1639_v22 = vpop.f32.mrf.mxu0  ;;  %6536 = vmatprep.mubr.bf16.mxu1 %v8745_v10  ;;  %v4135_v5 = vrot.slane %v4134_v49, 4  ;;  %v4672_v11 = vsel %vm7198_vm5, %v4670_v41, %v4671_v28  ;;  %v9418_v45 = vld [vmem:[#allocation11_spill] sm:$0xff]  ;;  %v5704_v28 = vld [vmem:[%s6927_s5 + $0xd4] sm:$0x1] }
 0x165   : > { %v1183_v58 = vpop.f32.mrf.mxu1  ;;  %v4149_v4 = vrot.slane %v4148_v13, 4  ;;  %v4163_v21 = vrot.slane %v4161_v25, 5  ;;  %v4676_v10 = vsel %vm7198_vm5, %v5759_v12, %v4675_v54  ;;  %v4679_v49 = vsel %vm7198_vm5, %v4677_v33, %v4678_v61  ;;  %v9420_v61 = vld [vmem:[#allocation14_spill] sm:$0xff] }
 0x166   : > { %v8889_v51 = vadd.f32 %v6294_v27, %v1192_v8  ;;  %v1184_v24 = vadd.f32 %v1183_v58, %v9418_v45  ;;  %v6298_v56 = vpop.f32.mrf.mxu0  ;;  %v4159_v27 = vrot.slane %v4158_v57, 4  ;;  %v4168_v41 = vrot.slane %v4166_v34, 4  ;;  %v5744_v8 = vld [vmem:[%s6927_s5 + $0xcc] sm:$0xe] }
 0x167   : > { %6585 = vmatmul.mubr.bf16.gmra.mxu0 %v5772_v48  ;;  %v6247_v59 = vpop.f32.mrf.mxu1  ;;  %v4171_v13 = vrot.slane %v4169_v23, 5  ;;  %v4682_v25 = vrot.slane %v8872_v42, 5  ;;  %v4177_v54 = vrot.slane %v4175_v15, 5  ;;  %v4181_v12 = vrot.slane %v4179_v60, 4 }
 0x168   : > { %6588 = vmatprep.mubr.bf16.mxu0 %v5773_v32  ;;  %v8904_v9 = vadd.f32 %v1636_v53, %v1184_v24  ;;  %v1195_v48 = vadd.f32 %v6247_v59, %v9419_v6  ;;  %v1652_v55 = vpop.f32.mrf.mxu0  ;;  %v4130_v46 = vsel %vm6954_vm2, %v8866_v20, %v8834_v40  ;;  %v4140_v7 = vsel %vm6954_vm2, %v4135_v5, %v8868_v47  ;;  %v9421_v5 = vld [vmem:[#allocation13_spill] sm:$0xff] }
 0x169   : > { %v1186_v33 = vpop.f32.mrf.mxu1  ;;  %v5774_v32 = vcombine.low %v4669_v39, %v4672_v11  ;;  %v4154_v53 = vsel %vm6954_vm2, %v4149_v4, %v8861_v38  ;;  %v5775_v23 = vcombine.low %v4676_v10, %v4679_v49  ;;  %v4185_v15 = vshll.u32 %v5704_v28, 16  ;;  %v9422_v10 = vld [vmem:[#allocation15_spill] sm:$0xff] }
 0x16a   : > { %v8918_v42 = vadd.f32 %v6295_v50, %v1195_v48  ;;  %v1187_v57 = vadd.f32 %v1186_v33, %v9420_v61  ;;  %v6299_v34 = vpop.f32.mrf.mxu0  ;;  %v4164_v40 = vsel %vm6954_vm2, %v4159_v27, %v4163_v21  ;;  %v5760_v20 = vrot.slane %v5744_v8, 9 }
 0x16b   : > { %v6250_v60 = vpop.f32.mrf.mxu1  ;;  %6537 = vmatmul.mubr.bf16.gmra.mxu1 %v8782_v18  ;;  %v4684_v47 = vrot.slane %v4682_v25, 4  ;;  %v4685_v39 = vrot.slane %v5704_v28, 5  ;;  %v4172_v11 = vor.u32 %v4171_v13, %v4168_v41  ;;  %v4182_v4 = vor.u32 %v4181_v12, %v4177_v54  ;;  %v9423_v13 = vld [vmem:[#allocation17_spill] sm:$0xff] }
 0x16c   : > { %v8924_v58 = vadd.f32 %v1639_v22, %v1187_v57  ;;  %v1208_v38 = vadd.f32 %v6250_v60, %v9421_v5  ;;  %v1655_v50 = vpop.f32.mrf.mxu0  ;;  %6540 = vmatprep.mubr.bf16.mxu1 %v8844_v19  ;;  %v5718_v59 = vcombine.low %v4130_v46, %v4140_v7  ;;  %v5719_v27 = vcombine.low %v4154_v53, %v4164_v40  ;;  %v9424_v46 = vld [vmem:[#allocation18_spill] sm:$0xff]  ;;  %v9426_v40 = vld [vmem:[#allocation21_spill] sm:$0xff] }
 0x16d   : > { %v1199_v45 = vpop.f32.mrf.mxu1  ;;  %v4187_v22 = vrot.slane %v4185_v15, 5  ;;  %v4683_v28 = vsel %vm7198_vm5, %v5760_v20, %v4682_v25  ;;  %v4686_v19 = vsel %vm7198_vm5, %v4684_v47, %v4685_v39  ;;  %v4173_v48 = vrot.slane %v4172_v11, 4 }
 0x16e   : > { %v8928_v24 = vadd.f32 %v6298_v56, %v1208_v38  ;;  %v1200_v18 = vadd.f32 %v1199_v45, %v9422_v10  ;;  %v6302_v49 = vpop.f32.mrf.mxu0  ;;  %v4183_v12 = vrot.slane %v4182_v4, 4  ;;  %v5776_v53 = vcombine.low %v4683_v28, %v4686_v19 }
 0x16f   : > { %6589 = vmatmul.mubr.bf16.gmra.mxu0 %v5774_v32  ;;  %v6251_v21 = vpop.f32.mrf.mxu1 }
 0x170   : > { %6592 = vmatprep.mubr.bf16.mxu0 %v5775_v23  ;;  %v8935_v41 = vadd.f32 %v1652_v55, %v1200_v18  ;;  %v1211_v56 = vadd.f32 %v6251_v21, %v9423_v13  ;;  %v1668_v6 = vpop.f32.mrf.mxu0  ;;  %v4178_v23 = vsel %vm6954_vm2, %v4173_v48, %v4177_v54  ;;  %v4188_v15 = vsel %vm6954_vm2, %v4183_v12, %v4187_v22  ;;  %v9428_v54 = vld [vmem:[#allocation25_spill] sm:$0xff]  ;;  %v9429_v21 = vld [vmem:[#allocation28_spill] sm:$0xff]  ;;  %v9430_v13 = vld [vmem:[#allocation30_spill] sm:$0xff] }
 0x171   : > { %v1202_v8 = vpop.f32.mrf.mxu1  ;;  %v5720_v5 = vcombine.low %v4178_v23, %v4188_v15 }
 0x172   : > { %v8938_v33 = vadd.f32 %v6299_v34, %v1211_v56  ;;  %v1203_v7 = vadd.f32 %v1202_v8, %v9424_v46  ;;  %v6303_v32 = vpop.f32.mrf.mxu0  ;;  %v9431_v8 = vld [vmem:[#allocation31_spill] sm:$0xff] }
 0x173   : > { %v6254_v61 = vpop.f32.mrf.mxu1  ;;  %6541 = vmatmul.mubr.bf16.gmra.mxu1 %v5718_v59 }
 0x174   : > { %v8941_v25 = vadd.f32 %v1655_v50, %v1203_v7  ;;  %v1224_v57 = vadd.f32 %v6254_v61, %v9425_v63  ;;  %v1671_v55 = vpop.f32.mrf.mxu0  ;;  %6544 = vmatprep.mubr.bf16.mxu1 %v5719_v27  ;;  %v9427_v50 = vld [vmem:[#allocation23_spill] sm:$0xff] }
 0x175   : > { %v1215_v34 = vpop.f32.mrf.mxu1 }
 0x176   : > { %v8948_v60 = vadd.f32 %v6302_v49, %v1224_v57  ;;  %v1216_v20 = vadd.f32 %v1215_v34, %v9426_v40  ;;  %v6306_v47 = vpop.f32.mrf.mxu0 }
 0x177   : > { %6593 = vmatmul.mubr.bf16.gmra.mxu0 %v5776_v53  ;;  %v6255_v39 = vpop.f32.mrf.mxu1 }
 0x178   : > { %v8951_v38 = vadd.f32 %v1668_v6, %v1216_v20  ;;  %v1227_v11 = vadd.f32 %v6255_v39, %v9427_v50  ;;  %v1684_v4 = vpop.f32.mrf.mxu0 }
 0x179   : > { %v1218_v45 = vpop.f32.mrf.mxu1 }
 0x17a   : > { %v8954_v10 = vadd.f32 %v6303_v32, %v1227_v11  ;;  %v1219_v30 = vadd.f32 %v1218_v45, %v9428_v54  ;;  %v6307_v18 = vpop.f32.mrf.mxu0 }
 0x17b   : > { %v6258_v59 = vpop.f32.mrf.mxu1  ;;  %6545 = vmatmul.mubr.bf16.gmra.mxu1 %v5720_v5 }
 0x17c   : > { %v8957_v49 = vadd.f32 %v1671_v55, %v1219_v30  ;;  %v1240_v27 = vadd.f32 %v6258_v59, %v9429_v21  ;;  %v1687_v22 = vpop.f32.mrf.mxu0 }
 0x17d   : > { %v1231_v28 = vpop.f32.mrf.mxu1 }
 0x17e   : > { %v8960_v19 = vadd.f32 %v6306_v47, %v1240_v27  ;;  %v1232_v56 = vadd.f32 %v1231_v28, %v9430_v13  ;;  %v6374_v6 = vpop.f32.mrf.mxu0 }
 0x17f   : > { %v6259_v48 = vpop.f32.mrf.mxu1 }
 0x180   : > { %v8963_v12 = vadd.f32 %v1684_v4, %v1232_v56  ;;  %v1243_v46 = vadd.f32 %v6259_v48, %v9431_v8  ;;  %v2713_v7 = vpop.f32.mrf.mxu0 }
 0x181   : > { %v1234_v32 = vpop.f32.mrf.mxu1 }
 0x182   : > { %v8966_v53 = vadd.f32 %v6307_v18, %v1243_v46  ;;  %v1235_v61 = vadd.f32 %v1234_v32, %v8649_v16  ;;  %v6375_v63 = vpop.f32.mrf.mxu0 }
 0x183   : > { %v6326_v57 = vpop.f32.mrf.mxu1 }
 0x184   : > { %v8969_v55 = vadd.f32 %v1687_v22, %v1235_v61  ;;  %v2088_v23 = vadd.f32 %v6326_v57, %v8689_v31  ;;  %v2716_v15 = vpop.f32.mrf.mxu0 }
 0x185   : > { %v1959_v34 = vpop.f32.mrf.mxu1 }
 0x186   : > { %v8972_v40 = vadd.f32 %v6374_v6, %v2088_v23  ;;  %v2086_v20 = vadd.f32 %v1959_v34, %v8709_v62  ;;  %v6378_v47 = vpop.f32.mrf.mxu0 }
 0x187   : > { %v6327_v39 = vpop.f32.mrf.mxu1 }
 0x188   : > { %v8975_v5 = vadd.f32 %v2713_v7, %v2086_v20  ;;  %v2089_v50 = vadd.f32 %v6327_v39, %v8716_v29  ;;  %v2729_v11 = vpop.f32.mrf.mxu0 }
 0x189   : > { %v1962_v16 = vpop.f32.mrf.mxu1 }
 0x18a   : > { %v8978_v4 = vadd.f32 %v6375_v63, %v2089_v50  ;;  %v2087_v45 = vadd.f32 %v1962_v16, %v8728_v26  ;;  %v6379_v54 = vpop.f32.mrf.mxu0 }
 0x18b   : > { %v6330_v31 = vpop.f32.mrf.mxu1 }
 0x18c   : > { %v8981_v30 = vadd.f32 %v2716_v15, %v2087_v45  ;;  %v2092_v18 = vadd.f32 %v6330_v31, %v8734_v17  ;;  %v2732_v59 = vpop.f32.mrf.mxu0 }
 0x18d   : > { %v1975_v62 = vpop.f32.mrf.mxu1 }
 0x18e   : > { %v8984_v21 = vadd.f32 %v6378_v47, %v2092_v18  ;;  %v2090_v27 = vadd.f32 %v1975_v62, %v8757_v1  ;;  %v6382_v22 = vpop.f32.mrf.mxu0 }
 0x18f   : > { %v6331_v29 = vpop.f32.mrf.mxu1 }
 0x190   : > { %v8987_v28 = vadd.f32 %v2729_v11, %v2090_v27  ;;  %v2093_v13 = vadd.f32 %v6331_v29, %v8768_v2  ;;  %v2745_v56 = vpop.f32.mrf.mxu0 }
 0x191   : > { %v1978_v26 = vpop.f32.mrf.mxu1 }
 0x192   : > { %v8990_v6 = vadd.f32 %v6379_v54, %v2093_v13  ;;  %v2091_v48 = vadd.f32 %v1978_v26, %v8775_v36  ;;  %v6383_v8 = vpop.f32.mrf.mxu0 }
 0x193   : > { %v6334_v17 = vpop.f32.mrf.mxu1 }
 0x194   : > { %v8993_v46 = vadd.f32 %v2732_v59, %v2091_v48  ;;  %v2096_v7 = vadd.f32 %v6334_v17, %v8792_v52  ;;  %v2748_v32 = vpop.f32.mrf.mxu0 }
 0x195   : > { %v1991_v1 = vpop.f32.mrf.mxu1 }
 0x196   : > { %v8996_v61 = vadd.f32 %v6382_v22, %v2096_v7  ;;  %v2094_v63 = vadd.f32 %v1991_v1, %v8812_v0  ;;  %v6386_v57 = vpop.f32.mrf.mxu0 }
 0x197   : > { %v6335_v2 = vpop.f32.mrf.mxu1 }
 0x198   : > { %v8999_v23 = vadd.f32 %v2745_v56, %v2094_v63  ;;  %v2097_v15 = vadd.f32 %v6335_v2, %v8826_v14  ;;  %v2761_v34 = vpop.f32.mrf.mxu0 }
 0x199   : > { %v1994_v36 = vpop.f32.mrf.mxu1 }
 0x19a   : > { %v9002_v20 = vadd.f32 %v6383_v8, %v2097_v15  ;;  %v2095_v47 = vadd.f32 %v1994_v36, %v8839_v35  ;;  %v6387_v39 = vpop.f32.mrf.mxu0 }
 0x19b   : > { %v6338_v52 = vpop.f32.mrf.mxu1 }
 0x19c   : > { %v9005_v50 = vadd.f32 %v2748_v32, %v2095_v47  ;;  %v2100_v11 = vadd.f32 %v6338_v52, %v8847_v44  ;;  %v2764_v16 = vpop.f32.mrf.mxu0 }
 0x19d   : > { %v2007_v0 = vpop.f32.mrf.mxu1 }
 0x19e   : > { %v9008_v45 = vadd.f32 %v6386_v57, %v2100_v11  ;;  %v2098_v54 = vadd.f32 %v2007_v0, %v8863_v37  ;;  %v6390_v31 = vpop.f32.mrf.mxu0 }
 0x19f   : > { %v6339_v14 = vpop.f32.mrf.mxu1 }
 0x1a0   : > { %v9011_v18 = vadd.f32 %v2761_v34, %v2098_v54  ;;  %v2101_v59 = vadd.f32 %v6339_v14, %v8874_v3  ;;  %v2777_v62 = vpop.f32.mrf.mxu0 }
 0x1a1   : > { %v2010_v35 = vpop.f32.mrf.mxu1 }
 0x1a2   : > { %v9014_v27 = vadd.f32 %v6387_v39, %v2101_v59  ;;  %v2099_v22 = vadd.f32 %v2010_v35, %v8881_v43  ;;  %v6391_v29 = vpop.f32.mrf.mxu0 }
 0x1a3   : > { %v6342_v44 = vpop.f32.mrf.mxu1 }
 0x1a4   : > { %v9017_v13 = vadd.f32 %v2764_v16, %v2099_v22  ;;  %v2104_v56 = vadd.f32 %v6342_v44, %v8889_v51  ;;  %v2780_v26 = vpop.f32.mrf.mxu0 }
 0x1a5   : > { %v2023_v37 = vpop.f32.mrf.mxu1 }
 0x1a6   : > { %v9020_v48 = vadd.f32 %v6390_v31, %v2104_v56  ;;  %v2102_v8 = vadd.f32 %v2023_v37, %v8904_v9  ;;  %v6394_v17 = vpop.f32.mrf.mxu0 }
 0x1a7   : > { %v6343_v3 = vpop.f32.mrf.mxu1 }
 0x1a8   : > { %v9023_v7 = vadd.f32 %v2777_v62, %v2102_v8  ;;  %v2105_v32 = vadd.f32 %v6343_v3, %v8918_v42  ;;  %v2793_v1 = vpop.f32.mrf.mxu0 }
 0x1a9   : > { %v2026_v43 = vpop.f32.mrf.mxu1 }
 0x1aa   : > { %v9026_v63 = vadd.f32 %v6391_v29, %v2105_v32  ;;  %v2103_v57 = vadd.f32 %v2026_v43, %v8924_v58  ;;  %v6395_v2 = vpop.f32.mrf.mxu0 }
 0x1ab   : > { %v6346_v51 = vpop.f32.mrf.mxu1 }
 0x1ac   : > { %v9029_v15 = vadd.f32 %v2780_v26, %v2103_v57  ;;  %v2108_v34 = vadd.f32 %v6346_v51, %v8928_v24  ;;  %v2796_v36 = vpop.f32.mrf.mxu0 }
 0x1ad   : > { %v2039_v9 = vpop.f32.mrf.mxu1 }
 0x1ae   : > { %v9032_v47 = vadd.f32 %v6394_v17, %v2108_v34  ;;  %v2106_v39 = vadd.f32 %v2039_v9, %v8935_v41  ;;  %v6398_v52 = vpop.f32.mrf.mxu0 }
 0x1af   : > { %v6347_v42 = vpop.f32.mrf.mxu1 }
 0x1b0   : > { %v9035_v11 = vadd.f32 %v2793_v1, %v2106_v39  ;;  %v2109_v16 = vadd.f32 %v6347_v42, %v8938_v33  ;;  %v2809_v0 = vpop.f32.mrf.mxu0 }
 0x1b1   : > { %v2042_v58 = vpop.f32.mrf.mxu1 }
 0x1b2   : > { %v9038_v54 = vadd.f32 %v6395_v2, %v2109_v16  ;;  %v2107_v31 = vadd.f32 %v2042_v58, %v8941_v25  ;;  %v6399_v14 = vpop.f32.mrf.mxu0 }
 0x1b3   : > { %v6350_v24 = vpop.f32.mrf.mxu1 }
 0x1b4   : > { %v9041_v59 = vadd.f32 %v2796_v36, %v2107_v31  ;;  %v2112_v62 = vadd.f32 %v6350_v24, %v8948_v60  ;;  %v2812_v35 = vpop.f32.mrf.mxu0 }
 0x1b5   : > { %v2055_v41 = vpop.f32.mrf.mxu1 }
 0x1b6   : > { %v9044_v22 = vadd.f32 %v6398_v52, %v2112_v62  ;;  %v2110_v29 = vadd.f32 %v2055_v41, %v8951_v38  ;;  %v6402_v44 = vpop.f32.mrf.mxu0 }
 0x1b7   : > { %v6351_v33 = vpop.f32.mrf.mxu1 }
 0x1b8   : > { %v9047_v56 = vadd.f32 %v2809_v0, %v2110_v29  ;;  %v2113_v26 = vadd.f32 %v6351_v33, %v8954_v10  ;;  %v2825_v37 = vpop.f32.mrf.mxu0 }
 0x1b9   : > { %v2058_v25 = vpop.f32.mrf.mxu1 }
 0x1ba   : > { %v9050_v8 = vadd.f32 %v6399_v14, %v2113_v26  ;;  %v2111_v17 = vadd.f32 %v2058_v25, %v8957_v49  ;;  %v6403_v3 = vpop.f32.mrf.mxu0 }
 0x1bb   : > { %v6354_v60 = vpop.f32.mrf.mxu1 }
 0x1bc   : > { %9432 = vst [vmem:[#allocation8_spill] sm:$0xff] %v9050_v8  ;;  %v9053_v32 = vadd.f32 %v2812_v35, %v2111_v17  ;;  %v2116_v1 = vadd.f32 %v6354_v60, %v8960_v19  ;;  %v2828_v43 = vpop.f32.mrf.mxu0 }
 0x1bd   : > { %v2071_v38 = vpop.f32.mrf.mxu1 }
 0x1be   : > { %9433 = vst [vmem:[#allocation10_spill] sm:$0xff] %v9053_v32  ;;  %v9056_v57 = vadd.f32 %v6402_v44, %v2116_v1  ;;  %v2114_v2 = vadd.f32 %v2071_v38, %v8963_v12  ;;  %v6470_v51 = vpop.f32.mrf.mxu0 }
 0x1bf   : > { %v6355_v10 = vpop.f32.mrf.mxu1 }
 0x1c0   : > { %v9059_v34 = vadd.f32 %v2825_v37, %v2114_v2  ;;  %v2117_v36 = vadd.f32 %v6355_v10, %v8966_v53  ;;  %v3598_v9 = vpop.f32.mrf.mxu0 }
 0x1c1   : > { %v2074_v49 = vpop.f32.mrf.mxu1 }
 0x1c2   : > { %v9062_v39 = vadd.f32 %v6403_v3, %v2117_v36  ;;  %v2115_v52 = vadd.f32 %v2074_v49, %v8969_v55  ;;  %v9065_v42 = vpop.f32.mrf.mxu0 }
 0x1c3   : > { %v6422_v19 = vpop.f32.mrf.mxu1 }
 0x1c4   : > { %9434 = vst [vmem:[#allocation16_spill] sm:$0xff] %v9062_v39  ;;  %v9067_v16 = vadd.f32 %v2828_v43, %v2115_v52  ;;  %v3340_v0 = vadd.f32 %v6422_v19, %v8972_v40  ;;  %v9070_v12 = vpop.f32.mrf.mxu0 }
 0x1c5   : > { %v3211_v58 = vpop.f32.mrf.mxu1 }
 0x1c6   : > { %9435 = vst [vmem:[#allocation19_spill] sm:$0xff] %v9067_v16  ;;  %v9072_v31 = vadd.f32 %v6470_v51, %v3340_v0  ;;  %v3338_v53 = vadd.f32 %v3211_v58, %v8975_v5  ;;  %v6474_v14 = vpop.f32.mrf.mxu0 }
 0x1c7   : > { %v9075_v24 = vpop.f32.mrf.mxu1 }
 0x1c8   : > { %v9077_v62 = vadd.f32 %v3598_v9, %v3338_v53  ;;  %v3614_v55 = vpop.f32.mrf.mxu0 }
 0x1c9   : > { %v9079_v35 = vpop.f32.mrf.mxu1 }
 0x1ca   : > { %v9081_v41 = vpop.f32.mrf.mxu0 }
 0x1cb   : > { %v6426_v29 = vpop.f32.mrf.mxu1 }
 0x1cc   : > { %v3344_v40 = vadd.f32 %v6426_v29, %v8984_v21  ;;  %v9084_v44 = vpop.f32.mrf.mxu0 }
 0x1cd   : > { %v3227_v33 = vpop.f32.mrf.mxu1 }
 0x1ce   : > { %v9086_v26 = vadd.f32 %v6474_v14, %v3344_v40  ;;  %v3342_v5 = vadd.f32 %v3227_v33, %v8987_v28  ;;  %v6478_v37 = vpop.f32.mrf.mxu0 }
 0x1cf   : > { %v9089_v25 = vpop.f32.mrf.mxu1 }
 0x1d0   : > { %v9091_v17 = vadd.f32 %v3614_v55, %v3342_v5  ;;  %v3630_v3 = vpop.f32.mrf.mxu0 }
 0x1d1   : > { %v9093_v60 = vpop.f32.mrf.mxu1 }
 0x1d2   : > { %v9095_v1 = vpop.f32.mrf.mxu0 }
 0x1d3   : > { %v6430_v43 = vpop.f32.mrf.mxu1 }
 0x1d4   : > { %v3348_v21 = vadd.f32 %v6430_v43, %v8996_v61  ;;  %v9098_v38 = vpop.f32.mrf.mxu0 }
 0x1d5   : > { %v3243_v2 = vpop.f32.mrf.mxu1 }
 0x1d6   : > { %v9100_v51 = vadd.f32 %v6478_v37, %v3348_v21  ;;  %v3346_v28 = vadd.f32 %v3243_v2, %v8999_v23  ;;  %v6482_v10 = vpop.f32.mrf.mxu0 }
 0x1d7   : > { %v9103_v36 = vpop.f32.mrf.mxu1 }
 0x1d8   : > { %v9105_v9 = vadd.f32 %v3630_v3, %v3346_v28  ;;  %v3646_v49 = vpop.f32.mrf.mxu0 }
 0x1d9   : > { %v9107_v52 = vpop.f32.mrf.mxu1 }
 0x1da   : > { %v9109_v19 = vpop.f32.mrf.mxu0 }
 0x1db   : > { %v6434_v0 = vpop.f32.mrf.mxu1 }
 0x1dc   : > { %v3352_v61 = vadd.f32 %v6434_v0, %v9008_v45  ;;  %v9112_v58 = vpop.f32.mrf.mxu0 }
 0x1dd   : > { %v3259_v53 = vpop.f32.mrf.mxu1 }
 0x1de   : > { %v9114_v14 = vadd.f32 %v6482_v10, %v3352_v61  ;;  %v3350_v23 = vadd.f32 %v3259_v53, %v9011_v18  ;;  %v6486_v55 = vpop.f32.mrf.mxu0 }
 0x1df   : > { %v9117_v29 = vpop.f32.mrf.mxu1 }
 0x1e0   : > { %v9119_v40 = vadd.f32 %v3646_v49, %v3350_v23  ;;  %v3662_v33 = vpop.f32.mrf.mxu0 }
 0x1e1   : > { %v9121_v5 = vpop.f32.mrf.mxu1 }
 0x1e2   : > { %v9123_v37 = vpop.f32.mrf.mxu0 }
 0x1e3   : > { %v6438_v3 = vpop.f32.mrf.mxu1 }
 0x1e4   : > { %v3356_v45 = vadd.f32 %v6438_v3, %v9020_v48  ;;  %v9126_v43 = vpop.f32.mrf.mxu0 }
 0x1e5   : > { %v3275_v21 = vpop.f32.mrf.mxu1 }
 0x1e6   : > { %v9128_v2 = vadd.f32 %v6486_v55, %v3356_v45  ;;  %v3354_v18 = vadd.f32 %v3275_v21, %v9023_v7  ;;  %v6490_v28 = vpop.f32.mrf.mxu0 }
 0x1e7   : > { %v9131_v10 = vpop.f32.mrf.mxu1 }
 0x1e8   : > { %v9133_v49 = vadd.f32 %v3662_v33, %v3354_v18  ;;  %v3678_v0 = vpop.f32.mrf.mxu0 }
 0x1e9   : > { %v9135_v61 = vpop.f32.mrf.mxu1 }
 0x1ea   : > { %v9137_v53 = vpop.f32.mrf.mxu0 }
 0x1eb   : > { %9436 = vst [vmem:[#allocation22_spill] sm:$0xff] %v9137_v53  ;;  %v6442_v23 = vpop.f32.mrf.mxu1 }
 0x1ec   : > { %v3360_v48 = vadd.f32 %v6442_v23, %v9032_v47  ;;  %v9140_v3 = vpop.f32.mrf.mxu0 }
 0x1ed   : > { %9437 = vst [vmem:[#allocation24_spill] sm:$0xff] %v9140_v3  ;;  %v3291_v16 = vpop.f32.mrf.mxu1 }
 0x1ee   : > { %v9142_v55 = vadd.f32 %v6490_v28, %v3360_v48  ;;  %v3358_v7 = vadd.f32 %v3291_v16, %v9035_v11  ;;  %v6494_v45 = vpop.f32.mrf.mxu0 }
 0x1ef   : > { %v9145_v21 = vpop.f32.mrf.mxu1 }
 0x1f0   : > { %v9147_v33 = vadd.f32 %v3678_v0, %v3358_v7  ;;  %v3694_v18 = vpop.f32.mrf.mxu0 }
 0x1f1   : > { %v9149_v39 = vpop.f32.mrf.mxu1 }
 0x1f2   : > { %9438 = vst [vmem:[#allocation26_spill] sm:$0xff] %v9147_v33  ;;  %v9151_v32 = vpop.f32.mrf.mxu0 }
 0x1f3   : > { %9439 = vst [vmem:[#allocation27_spill] sm:$0xff] %v9151_v32  ;;  %v6446_v8 = vpop.f32.mrf.mxu1 }
 0x1f4   : > { %v3364_v47 = vadd.f32 %v6446_v8, %v9044_v22  ;;  %v9154_v23 = vpop.f32.mrf.mxu0 }
 0x1f5   : > { %9440 = vst [vmem:[#allocation29_spill] sm:$0xff] %v9154_v23  ;;  %v3307_v3 = vpop.f32.mrf.mxu1 }
 0x1f6   : > { %v9156_v28 = vadd.f32 %v6494_v45, %v3364_v47  ;;  %v3362_v11 = vadd.f32 %v3307_v3, %v9047_v56  ;;  %v6498_v16 = vpop.f32.mrf.mxu0 }
 0x1f7   : > { %v9159_v48 = vpop.f32.mrf.mxu1 }
 0x1f8   : > { %9441 = vst [vmem:[#allocation9_spill] sm:$0xff] %v9156_v28  ;;  %v9161_v0 = vadd.f32 %v3694_v18, %v3362_v11  ;;  %v3710_v7 = vpop.f32.mrf.mxu0 }
 0x1f9   : > { %v9163_v33 = vpop.f32.mrf.mxu1 }
 0x1fa   : > { %9442 = vst [vmem:[#allocation11_spill] sm:$0xff] %v9161_v0  ;;  %9443 = vst [vmem:[#allocation12_spill] sm:$0xff] %v9163_v33  ;;  %v9165_v53 = vpop.f32.mrf.mxu0 }
 0x1fb   : > { %9444 = vst [vmem:[#allocation14_spill] sm:$0xff] %v9165_v53  ;;  %v6450_v32 = vpop.f32.mrf.mxu1  ;;  %v3341_v53 = vadd.f32 %v9075_v24, %v8978_v4 }
 0x1fc   : > { %v3368_v22 = vadd.f32 %v6450_v32, %v9056_v57  ;;  %v9168_v8 = vpop.f32.mrf.mxu0  ;;  %v3339_v57 = vadd.f32 %v9079_v35, %v8981_v30 }
 0x1fd   : > { %9445 = vst [vmem:[#allocation13_spill] sm:$0xff] %v9168_v8  ;;  %v3323_v23 = vpop.f32.mrf.mxu1 }
 0x1fe   : > { %v9170_v45 = vadd.f32 %v6498_v16, %v3368_v22  ;;  %v3366_v56 = vadd.f32 %v3323_v23, %v9059_v34  ;;  %v6566_v3 = vpop.f32.mrf.mxu0  ;;  %v3728_v23 = vadd.f32 %v9065_v42, %v3341_v53  ;;  %v3726_v4 = vadd.f32 %v9070_v12, %v3339_v57 }
 0x1ff   : > { %v9173_v47 = vpop.f32.mrf.mxu1  ;;  %v3345_v42 = vadd.f32 %v9089_v25, %v8990_v6 }
 0x200   : > { %9446 = vst [vmem:[#allocation15_spill] sm:$0xff] %v9170_v45  ;;  %9447 = vst [vmem:[#allocation17_spill] sm:$0xff] %v9173_v47  ;;  %v9175_v18 = vadd.f32 %v3710_v7, %v3366_v56  ;;  %v4850_v11 = vpop.f32.mrf.mxu0 }
 0x201   : > { %v9177_v0 = vpop.f32.mrf.mxu1 }
 0x202   : > { %9448 = vst [vmem:[#allocation18_spill] sm:$0xff] %v9175_v18  ;;  %9449 = vst [vmem:[#allocation20_spill] sm:$0xff] %v9177_v0  ;;  %v6567_v28 = vpop.f32.mrf.mxu0  ;;  %v9186_v18 = vld [vmem:[#allocation4] ss:$0 sm:$0xff] }
 0x203   : > { %v6518_v32 = vpop.f32.mrf.mxu1 }
 0x204   : > { %v4481_v16 = vadd.f32 %v6518_v32, %v9072_v31  ;;  %v4853_v22 = vpop.f32.mrf.mxu0 }
 0x205   : > { %v4352_v34 = vpop.f32.mrf.mxu1 }
 0x206   : > { %v4979_v8 = vadd.f32 %v6566_v3, %v4481_v16  ;;  %v4479_v7 = vadd.f32 %v4352_v34, %v9077_v62  ;;  %v6570_v56 = vpop.f32.mrf.mxu0  ;;  %v3343_v62 = vadd.f32 %v9093_v60, %v8993_v46  ;;  %v3732_v46 = vadd.f32 %v9081_v41, %v3345_v42 }
 0x207   : > { %v6519_v45 = vpop.f32.mrf.mxu1  ;;  %v3349_v41 = vadd.f32 %v9103_v36, %v9002_v20 }
 0x208   : > { %v4977_v24 = vadd.f32 %v4850_v11, %v4479_v7  ;;  %v4482_v0 = vadd.f32 %v6519_v45, %v3728_v23  ;;  %v4866_v47 = vpop.f32.mrf.mxu0  ;;  %v5018_v31 = vadd.f32 %v9186_v18, %v4979_v8  ;;  %v3730_v60 = vadd.f32 %v9084_v44, %v3343_v62 }
 0x209   : > { %v4355_v30 = vpop.f32.mrf.mxu1 }
 0x20a   : > { %v4980_v35 = vadd.f32 %v6567_v28, %v4482_v0  ;;  %v4480_v32 = vadd.f32 %v4355_v30, %v3726_v4  ;;  %v6571_v33 = vpop.f32.mrf.mxu0  ;;  %v5016_v3 = vadd.f32 %v9186_v18, %v4977_v24  ;;  %v5050_v28 = vmax.f32 %v5018_v31, 0.0 }
 0x20b   : > { %v6522_v53 = vpop.f32.mrf.mxu1 }
 0x20c   : > { %v5019_v12 = vadd.f32 %v9186_v18, %v4980_v35  ;;  %v4978_v45 = vadd.f32 %v4853_v22, %v4480_v32  ;;  %v4485_v11 = vadd.f32 %v6522_v53, %v9086_v26  ;;  %v4869_v57 = vpop.f32.mrf.mxu0  ;;  %v5048_v34 = vmax.f32 %v5016_v3, 0.0 }
 0x20d   : > { %v4368_v8 = vpop.f32.mrf.mxu1 }
 0x20e   : > { %v5051_v0 = vmax.f32 %v5019_v12, 0.0  ;;  %v5017_v16 = vadd.f32 %v9186_v18, %v4978_v45  ;;  %v4483_v6 = vadd.f32 %v4368_v8, %v9091_v17  ;;  %v6574_v25 = vpop.f32.mrf.mxu0  ;;  %v4983_v26 = vadd.f32 %v6570_v56, %v4485_v11 }
 0x20f   : > { %v6523_v22 = vpop.f32.mrf.mxu1  ;;  %v3347_v12 = vadd.f32 %v9107_v52, %v9005_v50  ;;  %v3736_v45 = vadd.f32 %v9095_v1, %v3349_v41  ;;  %v3353_v1 = vadd.f32 %v9117_v29, %v9014_v27 }
 0x210   : > { %v5861_v23 = vpack.c.bf16 %v5051_v0, %v5050_v28  ;;  %v5049_v7 = vmax.f32 %v5017_v16, 0.0  ;;  %v4981_v4 = vadd.f32 %v4866_v47, %v4483_v6  ;;  %v4882_v24 = vpop.f32.mrf.mxu0  ;;  %v4486_v17 = vadd.f32 %v6523_v22, %v3732_v46 }
 0x211   : > { %v4371_v30 = vpop.f32.mrf.mxu1  ;;  %v5022_v32 = vadd.f32 %v9186_v18, %v4983_v26  ;;  %v3734_v52 = vadd.f32 %v9098_v38, %v3347_v12  ;;  %v3740_v29 = vadd.f32 %v9109_v19, %v3353_v1 }
 0x212   : > { %5933 = vst [vmem:[%s9205_s9 + $0x8] sm:$0xff] %v5861_v23   ;;  %v5856_v44 = vpack.c.bf16 %v5049_v7, %v5048_v34  ;;  %v4484_v31 = vadd.f32 %v4371_v30, %v3730_v60  ;;  %v6575_v35 = vpop.f32.mrf.mxu0  ;;  %v4984_v42 = vadd.f32 %v6571_v33, %v4486_v17  ;;  %v5020_v62 = vadd.f32 %v9186_v18, %v4981_v4 }
 0x213   : > { %v6526_v56 = vpop.f32.mrf.mxu1  ;;  %v5054_v0 = vmax.f32 %v5022_v32, 0.0  ;;  %v3351_v17 = vadd.f32 %v9121_v5, %v9017_v13 }
 0x214   : > { %5857 = vst [vmem:[%s9205_s9] sm:$0xff] %v5856_v44   ;;  %v4982_v53 = vadd.f32 %v4869_v57, %v4484_v31  ;;  %v4489_v47 = vadd.f32 %v6526_v56, %v9100_v51  ;;  %v4885_v3 = vpop.f32.mrf.mxu0  ;;  %v5023_v20 = vadd.f32 %v9186_v18, %v4984_v42  ;;  %v5052_v51 = vmax.f32 %v5020_v62, 0.0 }
 0x215   : > { %v4384_v36 = vpop.f32.mrf.mxu1  ;;  %v3738_v62 = vadd.f32 %v9112_v58, %v3351_v17  ;;  %v3355_v58 = vadd.f32 %v9135_v61, %v9029_v15 }
 0x216   : > { %v5021_v11 = vadd.f32 %v9186_v18, %v4982_v53  ;;  %v4987_v8 = vadd.f32 %v6574_v25, %v4489_v47  ;;  %v4487_v33 = vadd.f32 %v4384_v36, %v9105_v9  ;;  %v6578_v28 = vpop.f32.mrf.mxu0  ;;  %v5055_v57 = vmax.f32 %v5023_v20, 0.0 }
 0x217   : > { %v6527_v16 = vpop.f32.mrf.mxu1  ;;  %v3742_v1 = vadd.f32 %v9126_v43, %v3355_v58 }
 0x218   : > { %v5053_v6 = vmax.f32 %v5021_v11, 0.0  ;;  %v4490_v46 = vadd.f32 %v6527_v16, %v3736_v45  ;;  %v4898_v50 = vpop.f32.mrf.mxu0  ;;  %v5871_v60 = vpack.c.bf16 %v5055_v57, %v5054_v0  ;;  %v4985_v26 = vadd.f32 %v4882_v24, %v4487_v33 }
 0x219   : > { %v4387_v25 = vpop.f32.mrf.mxu1  ;;  %v5026_v9 = vadd.f32 %v9186_v18, %v4987_v8  ;;  %v3357_v8 = vadd.f32 %v9131_v10, %v9026_v63 }
 0x21a   : > { %v5866_v22 = vpack.c.bf16 %v5053_v6, %v5052_v51  ;;  %v4988_v34 = vadd.f32 %v6575_v35, %v4490_v46  ;;  %v6579_v23 = vpop.f32.mrf.mxu0  ;;  %5935 = vst [vmem:[%s9205_s9 + $0x18] sm:$0xff] %v5871_v60   ;;  %v4488_v7 = vadd.f32 %v4387_v25, %v3734_v52  ;;  %v5024_v24 = vadd.f32 %v9186_v18, %v4985_v26 }
 0x21b   : > { %v6530_v4 = vpop.f32.mrf.mxu1  ;;  %v5058_v31 = vmax.f32 %v5026_v9, 0.0  ;;  %v3744_v61 = vadd.f32 %v9123_v37, %v3357_v8 }
 0x21c   : > { %5934 = vst [vmem:[%s9205_s9 + $0x10] sm:$0xff] %v5866_v22   ;;  %v5027_v38 = vadd.f32 %v9186_v18, %v4988_v34  ;;  %v4493_v30 = vadd.f32 %v6530_v4, %v9114_v14  ;;  %v4901_v27 = vpop.f32.mrf.mxu0  ;;  %v4986_v41 = vadd.f32 %v4885_v3, %v4488_v7  ;;  %v5056_v12 = vmax.f32 %v5024_v24, 0.0 }
 0x21d   : > { %v4400_v44 = vpop.f32.mrf.mxu1  ;;  %v3361_v4 = vadd.f32 %v9145_v21, %v9038_v54 }
 0x21e   : > { %v5059_v35 = vmax.f32 %v5027_v38, 0.0  ;;  %v4991_v32 = vadd.f32 %v6578_v28, %v4493_v30  ;;  %v4491_v42 = vadd.f32 %v4400_v44, %v9119_v40  ;;  %v5025_v13 = vadd.f32 %v9186_v18, %v4986_v41 }
 0x21f   : > { %v6582_v56 = vpop.f32.mrf.mxu0  ;;  %v6531_v5 = vpop.f32.mrf.mxu1  ;;  %v3359_v44 = vadd.f32 %v9149_v39, %v9041_v59  ;;  %v9452_v39 = vld [vmem:[#allocation24_spill] sm:$0xff] }
 0x220   : > { %v5881_v14 = vpack.c.bf16 %v5059_v35, %v5058_v31  ;;  %v4989_v53 = vadd.f32 %v4898_v50, %v4491_v42  ;;  %v4494_v47 = vadd.f32 %v6531_v5, %v3740_v29  ;;  %v5057_v20 = vmax.f32 %v5025_v13, 0.0  ;;  %v9450_v31 = vld [vmem:[#allocation22_spill] sm:$0xff] }
 0x221   : > { %v4914_v19 = vpop.f32.mrf.mxu0  ;;  %v4403_v3 = vpop.f32.mrf.mxu1  ;;  %v5030_v36 = vadd.f32 %v9186_v18, %v4991_v32  ;;  %v3748_v35 = vadd.f32 %v9450_v31, %v3361_v4 }
 0x222   : > { %5937 = vst [vmem:[%s9205_s9 + $0x28] sm:$0xff] %v5881_v14   ;;  %v4992_v45 = vadd.f32 %v6579_v23, %v4494_v47  ;;  %v4492_v11 = vadd.f32 %v4403_v3, %v3738_v62  ;;  %v5876_v33 = vpack.c.bf16 %v5057_v20, %v5056_v12  ;;  %v5028_v0 = vadd.f32 %v9186_v18, %v4989_v53  ;;  %v9453_v20 = vld [vmem:[#allocation8_spill] sm:$0xff] }
 0x223   : > { %v6583_v40 = vpop.f32.mrf.mxu0  ;;  %v6534_v28 = vpop.f32.mrf.mxu1  ;;  %v5062_v50 = vmax.f32 %v5030_v36, 0.0  ;;  %v3746_v12 = vadd.f32 %v9452_v39, %v3359_v44  ;;  %v3365_v3 = vadd.f32 %v9159_v48, %v9453_v20 }
 0x224   : > { %v5031_v57 = vadd.f32 %v9186_v18, %v4992_v45  ;;  %v4990_v16 = vadd.f32 %v4901_v27, %v4492_v11  ;;  %v4497_v51 = vadd.f32 %v6534_v28, %v9128_v2  ;;  %5936 = vst [vmem:[%s9205_s9 + $0x20] sm:$0xff] %v5876_v33   ;;  %v5060_v25 = vmax.f32 %v5028_v0, 0.0 }
 0x225   : > { %v4917_v6 = vpop.f32.mrf.mxu0  ;;  %v4416_v46 = vpop.f32.mrf.mxu1 }
 0x226   : > { %v5063_v52 = vmax.f32 %v5031_v57, 0.0  ;;  %v5029_v63 = vadd.f32 %v9186_v18, %v4990_v16  ;;  %v4495_v10 = vadd.f32 %v4416_v46, %v9133_v49  ;;  %v4995_v60 = vadd.f32 %v6582_v56, %v4497_v51  ;;  %v9451_v56 = vld [vmem:[#allocation26_spill] sm:$0xff]  ;;  %v9455_v16 = vld [vmem:[#allocation12_spill] sm:$0xff]  ;;  %v9456_v46 = vld [vmem:[#allocation9_spill] sm:$0xff] }
 0x227   : > { %v6586_v15 = vpop.f32.mrf.mxu0  ;;  %v6535_v26 = vpop.f32.mrf.mxu1  ;;  %v9454_v57 = vld [vmem:[#allocation10_spill] sm:$0xff] }
 0x228   : > { %v5891_v2 = vpack.c.bf16 %v5063_v52, %v5062_v50  ;;  %v5061_v22 = vmax.f32 %v5029_v63, 0.0  ;;  %v4993_v9 = vadd.f32 %v4914_v19, %v4495_v10  ;;  %v4498_v23 = vadd.f32 %v6535_v26, %v3744_v61  ;;  %v9457_v52 = vld [vmem:[#allocation27_spill] sm:$0xff] }
 0x229   : > { %v4930_v34 = vpop.f32.mrf.mxu0  ;;  %v4419_v7 = vpop.f32.mrf.mxu1  ;;  %v5034_v37 = vadd.f32 %v9186_v18, %v4995_v60  ;;  %v3363_v51 = vadd.f32 %v9455_v16, %v9454_v57  ;;  %v3752_v63 = vadd.f32 %v9457_v52, %v3365_v3  ;;  %v9467_v3 = vld [vmem:[#allocation13_spill] sm:$0xff] }
 0x22a   : > { %5939 = vst [vmem:[%s9205_s9 + $0x38] sm:$0xff] %v5891_v2   ;;  %v5886_v49 = vpack.c.bf16 %v5061_v22, %v5060_v25  ;;  %v4496_v17 = vadd.f32 %v4419_v7, %v3742_v1  ;;  %v4996_v43 = vadd.f32 %v6583_v40, %v4498_v23  ;;  %v5032_v27 = vadd.f32 %v9186_v18, %v4993_v9  ;;  %v9458_v25 = vld [vmem:[#allocation11_spill] sm:$0xff]  ;;  %v9459_v23 = vld [vmem:[#allocation29_spill] sm:$0xff] }
 0x22b   : > { %v6587_v38 = vpop.f32.mrf.mxu0  ;;  %v6538_v30 = vpop.f32.mrf.mxu1  ;;  %v5066_v62 = vmax.f32 %v5034_v37, 0.0  ;;  %v3750_v7 = vadd.f32 %v9459_v23, %v3363_v51 }
 0x22c   : > { %5938 = vst [vmem:[%s9205_s9 + $0x30] sm:$0xff] %v5886_v49   ;;  %v4994_v29 = vadd.f32 %v4917_v6, %v4496_v17  ;;  %v4501_v24 = vadd.f32 %v6538_v30, %v9142_v55  ;;  %v5035_v54 = vadd.f32 %v9186_v18, %v4996_v43  ;;  %v5064_v55 = vmax.f32 %v5032_v27, 0.0 }
 0x22d   : > { %v4933_v41 = vpop.f32.mrf.mxu0  ;;  %v4432_v21 = vpop.f32.mrf.mxu1 }
 0x22e   : > { %v5033_v32 = vadd.f32 %v9186_v18, %v4994_v29  ;;  %v4999_v42 = vadd.f32 %v6586_v15, %v4501_v24  ;;  %v4499_v13 = vadd.f32 %v4432_v21, %v9451_v56  ;;  %v5067_v14 = vmax.f32 %v5035_v54, 0.0  ;;  %v9460_v24 = vld [vmem:[#allocation16_spill] sm:$0xff]  ;;  %v9462_v54 = vld [vmem:[#allocation19_spill] sm:$0xff] }
 0x22f   : > { %v6590_v5 = vpop.f32.mrf.mxu0  ;;  %v6539_v53 = vpop.f32.mrf.mxu1  ;;  %v9463_v21 = vld [vmem:[#allocation20_spill] sm:$0xff] }
 0x230   : > { %v5065_v47 = vmax.f32 %v5033_v32, 0.0  ;;  %v4502_v19 = vadd.f32 %v6539_v53, %v3748_v35  ;;  %v5901_v36 = vpack.c.bf16 %v5067_v14, %v5066_v62  ;;  %v4997_v45 = vadd.f32 %v4930_v34, %v4499_v13  ;;  %v9464_v62 = vld [vmem:[#allocation15_spill] sm:$0xff] }
 0x231   : > { %v4946_v59 = vpop.f32.mrf.mxu0  ;;  %v4435_v11 = vpop.f32.mrf.mxu1  ;;  %v5038_v8 = vadd.f32 %v9186_v18, %v4999_v42  ;;  %v3367_v31 = vadd.f32 %v9463_v21, %v9462_v54 }
 0x232   : > { %v5896_v40 = vpack.c.bf16 %v5065_v47, %v5064_v55  ;;  %v5000_v58 = vadd.f32 %v6587_v38, %v4502_v19  ;;  %5941 = vst [vmem:[%s9205_s9 + $0x48] sm:$0xff] %v5901_v36   ;;  %v4500_v28 = vadd.f32 %v4435_v11, %v3746_v12  ;;  %v5036_v10 = vadd.f32 %v9186_v18, %v4997_v45  ;;  %v9466_v12 = vld [vmem:[#allocation14_spill] sm:$0xff] }
 0x233   : > { %v6591_v33 = vpop.f32.mrf.mxu0  ;;  %v6542_v0 = vpop.f32.mrf.mxu1  ;;  %v5070_v1 = vmax.f32 %v5038_v8, 0.0  ;;  %v3754_v36 = vadd.f32 %v9467_v3, %v3367_v31 }
 0x234   : > { %5940 = vst [vmem:[%s9205_s9 + $0x40] sm:$0xff] %v5896_v40   ;;  %v5039_v6 = vadd.f32 %v9186_v18, %v5000_v58  ;;  %v4505_v50 = vadd.f32 %v6542_v0, %v9456_v46  ;;  %v4998_v15 = vadd.f32 %v4933_v41, %v4500_v28  ;;  %v5068_v38 = vmax.f32 %v5036_v10, 0.0  ;;  %v9461_v41 = vld [vmem:[#allocation17_spill] sm:$0xff] }
 0x235   : > { %v4949_v48 = vpop.f32.mrf.mxu0  ;;  %v4448_v61 = vpop.f32.mrf.mxu1  ;;  %v3369_v44 = vadd.f32 %v9461_v41, %v9460_v24 }
 0x236   : > { %v5071_v60 = vmax.f32 %v5039_v6, 0.0  ;;  %v5003_v26 = vadd.f32 %v6590_v5, %v4505_v50  ;;  %v4503_v2 = vadd.f32 %v4448_v61, %v9458_v25  ;;  %v5037_v22 = vadd.f32 %v9186_v18, %v4998_v15 }
 0x237   : > { %v6543_v9 = vpop.f32.mrf.mxu1  ;;  %v6594_v34 = vpop.f32.mrf.mxu0  ;;  %v3756_v20 = vadd.f32 %v9466_v12, %v3369_v44 }
 0x238   : > { %v5911_v4 = vpack.c.bf16 %v5071_v60, %v5070_v1  ;;  %v5001_v49 = vadd.f32 %v4946_v59, %v4503_v2  ;;  %v4506_v17 = vadd.f32 %v6543_v9, %v3752_v63  ;;  %v5069_v37 = vmax.f32 %v5037_v22, 0.0  ;;  %v9465_v59 = vld [vmem:[#allocation18_spill] sm:$0xff] }
 0x239   : > { %v4451_v43 = vpop.f32.mrf.mxu1  ;;  %v5042_v30 = vadd.f32 %v9186_v18, %v5003_v26  ;;  %v4962_v42 = vpop.f32.mrf.mxu0 }
 0x23a   : > { %5943 = vst [vmem:[%s9205_s9 + $0x58] sm:$0xff] %v5911_v4   ;;  %v5004_v27 = vadd.f32 %v6591_v33, %v4506_v17  ;;  %v4504_v29 = vadd.f32 %v4451_v43, %v3750_v7  ;;  %v5906_v35 = vpack.c.bf16 %v5069_v37, %v5068_v38  ;;  %v5040_v56 = vadd.f32 %v9186_v18, %v5001_v49 }
 0x23b   : > { %v6546_v32 = vpop.f32.mrf.mxu1  ;;  %v5074_v55 = vmax.f32 %v5042_v30, 0.0  ;;  %v6595_v40 = vpop.f32.mrf.mxu0 }
 0x23c   : > { %v5043_v13 = vadd.f32 %v9186_v18, %v5004_v27  ;;  %v5002_v5 = vadd.f32 %v4949_v48, %v4504_v29  ;;  %v4509_v14 = vadd.f32 %v6546_v32, %v9464_v62  ;;  %5942 = vst [vmem:[%s9205_s9 + $0x50] sm:$0xff] %v5906_v35   ;;  %v5072_v8 = vmax.f32 %v5040_v56, 0.0 }
 0x23d   : > { %v4464_v53 = vpop.f32.mrf.mxu1  ;;  %v4965_v50 = vpop.f32.mrf.mxu0 }
 0x23e   : > { %v5075_v47 = vmax.f32 %v5043_v13, 0.0  ;;  %v5041_v19 = vadd.f32 %v9186_v18, %v5002_v5  ;;  %v4507_v39 = vadd.f32 %v4464_v53, %v9465_v59  ;;  %v5007_v45 = vadd.f32 %v6594_v34, %v4509_v14 }
 0x23f   : > { %v6547_v11 = vpop.f32.mrf.mxu1 }
 0x240   : > { %v5921_v58 = vpack.c.bf16 %v5075_v47, %v5074_v55  ;;  %v5073_v33 = vmax.f32 %v5041_v19, 0.0  ;;  %v5005_v28 = vadd.f32 %v4962_v42, %v4507_v39  ;;  %v4510_v0 = vadd.f32 %v6547_v11, %v3756_v20 }
 0x241   : > { %v4467_v57 = vpop.f32.mrf.mxu1  ;;  %v5046_v6 = vadd.f32 %v9186_v18, %v5007_v45 }
 0x242   : > { %5945 = vst [vmem:[%s9205_s9 + $0x68] sm:$0xff] %v5921_v58   ;;  %v5916_v16 = vpack.c.bf16 %v5073_v33, %v5072_v8  ;;  %v4508_v51 = vadd.f32 %v4467_v57, %v3754_v36  ;;  %v5008_v46 = vadd.f32 %v6595_v40, %v4510_v0  ;;  %v5044_v48 = vadd.f32 %v9186_v18, %v5005_v28 }
 0x243   : > { %v5078_v15 = vmax.f32 %v5046_v6, 0.0 }
 0x244   : > { %5944 = vst [vmem:[%s9205_s9 + $0x60] sm:$0xff] %v5916_v16   ;;  %v5006_v52 = vadd.f32 %v4965_v50, %v4508_v51  ;;  %v5047_v63 = vadd.f32 %v9186_v18, %v5008_v46  ;;  %v5076_v1 = vmax.f32 %v5044_v48, 0.0 }
 0x246   : > { %v5045_v10 = vadd.f32 %v9186_v18, %v5006_v52  ;;  %v5079_v61 = vmax.f32 %v5047_v63, 0.0 }
 0x248   : > { %v5077_v60 = vmax.f32 %v5045_v10, 0.0  ;;  %v5931_v26 = vpack.c.bf16 %v5079_v61, %v5078_v15 }
 0x24a   : > { %v5926_v25 = vpack.c.bf16 %v5077_v60, %v5076_v1  ;;  %5947 = vst [vmem:[%s9205_s9 + $0x78] sm:$0xff] %v5931_v26  }
 0x24c   : > { %5946 = vst [vmem:[%s9205_s9 + $0x70] sm:$0xff] %v5926_v25  }
 0x24d PF: > { %s15_s12 = sadd.s32 1, %s6842_s12  }
 0x24e   : > { %p12_p2 = scmp.ge.s32.totalorder %s15_s12, 4  }
 0x250   :  { %14 = sbr.rel (!%p12_p2) target bundleno = 2 (0x2), region = 81 }
 0x255   :  { %5261 = vsyncpa [#allocation3], 1 }
 0x256   :  { %5263 = vsyncpa [#allocation3 + $0x1], 1 }
 0x257   :  { %5264 = vsyncpa [#allocation5], 1 }

// kernel: depth_cnn_forward.5
= control target key start
LH: loop header
LB: loop body
LE: loop exit
PB: predicated region body
PF: predicated region fallthrough
CT: control target
= control target key end

     0   :  { %8 = vsyncpa [#allocation4], 0  ;;  %s7932_s12 = smov 0   ;;  %s8608_s0 = inlined_call_operand.vmem [shape: bf16[2,32768], index: 0, kind: input, shape index: {}]   ;;  %s8609_s1 = inlined_call_operand.vmem [shape: bf16[32768,10], index: 1, kind: input, shape index: {}]   ;;  %s8610_s2 = inlined_call_operand.vmem [shape: f32[1,10], index: 2, kind: input, shape index: {}]   ;;  %s8611_s3 = inlined_call_operand.hbm [shape: f32[2,10], index: 3, kind: output, shape index: {}]  }
   0x1 LB: > { %s7938_s13 = sadd.s32 4294967295, %s7907_s12   ;;  %p6109_p0 = scmp.ge.s32.totalorder %s7907_s12, 1  ;;  %s7907_s12 = sphi %s7932_s12, %s14_s12  }
   0x2   : > { %p144_p1 = scmp.lt.s32.totalorder %s7907_s12, 5 }
   0x4   : > { %p145_p2 = pnand %p6109_p0, %p144_p1 }
   0x5   : > { %s6110_s14 = sshll.u32 (!%p145_p2), %s7938_s13, 6  ;;  %s6111_s15 = sshll.u32 (!%p145_p2), %s7938_s13, 10 }
   0x6   : > { %148 = sbr.rel (%p145_p2) target bundleno = 763 (0x2fb), region = 32  ;;  %p168_p3 = scmp.lt.s32.totalorder (!%p145_p2), %s6110_s14, 255 }
   0x7   : > { %p173_p4 = scmp.lt.s32.totalorder (!%p145_p2), %s6111_s15, 4095  ;;  %p6113_p5 = scmp.ne.s32.totalorder (!%p145_p2), %s7938_s13, 0 }
   0xb   : > { %s8613_s14 = smov (!%p168_p3, %s6110_s14), 255  ;;  %s8615_s15 = smov (!%p173_p4, %s6111_s15), 4095 }
   0xc   : > { %s7947_s18 = scalar_lea.vmem %s8608_s0, %s8613_s14  ;;  %s6112_s19 = sshll.u32 %s8615_s15, 2 }
   0xd   : > { %s7952_s22 = scalar_lea.vmem %s8609_s1, %s6112_s19  ;;  %182 = sbr.rel (%p6113_p5) target bundleno = 20 (0x14), region = 36 }
  0x12   : > { %vm183_vm0 = vcmask 74752   ;;  %v7909_v0 = vmov 0.0  }
  0x13   : > { %184 = vst.msk [vmem:[#allocation2] sm:$0x3] %vm183_vm0, %v7909_v0 }
  0x14 PF: > { %v7353_v1 = vld [vmem:[%s7952_s22 + $0x78] sm:$0xff]   ;;  %v7357_v5 = vld [vmem:[%s7952_s22 + $0x70] sm:$0xff]   ;;  %v7361_v9 = vld [vmem:[%s7952_s22 + $0x68] sm:$0xff]   ;;  %v1230_v29 = vlaneseq  ;;  %v7910_v37 = vmov 1966171168   ;;  %vm6035_vm1 = vcmask 74752  }
  0x15   : > { %v7354_v2 = vld [vmem:[%s7952_s22 + $0xf8] sm:$0xff]   ;;  %6632 = vmatprep.subr.bf16.mxu0 %v7353_v1  ;;  %v7358_v6 = vld [vmem:[%s7952_s22 + $0xf0] sm:$0xff]   ;;  %v7362_v10 = vld [vmem:[%s7952_s22 + $0xe8] sm:$0xff]   ;;  %v1228_v38 = vunpack.c.l.s4 %v7910_v37  ;;  %p6626_p6 = scmp.ne.s32.totalorder %s7938_s13, 3 }
  0x16   : > { %v7355_v3 = vld [vmem:[%s7952_s22 + $0x38] sm:$0xff]   ;;  %6654 = vmatprep.subr.bf16.mxu1 %v7354_v2  ;;  %v7359_v7 = vld [vmem:[%s7952_s22 + $0x30] sm:$0xff]   ;;  %v7363_v11 = vld [vmem:[%s7952_s22 + $0x28] sm:$0xff]   ;;  %v1231_v34 = vshrl.u32 %v1230_v29, 7 }
  0x17   : > { %v7356_v4 = vld [vmem:[%s7952_s22 + $0xb8] sm:$0xff]   ;;  %6633 = vmatpush3.bf16.msra.mxu0 %v7355_v3  ;;  %v7360_v8 = vld [vmem:[%s7952_s22 + $0xb0] sm:$0xff]   ;;  %v7364_v12 = vld [vmem:[%s7952_s22 + $0xa8] sm:$0xff]   ;;  %v1229_v41 = vunpack.c.0.s8 %v1228_v38 }
  0x18   : > { %6655 = vmatpush3.bf16.msra.mxu1 %v7356_v4  ;;  %6634 = vmatprep.subr.bf16.mxu0 %v7357_v5  ;;  %v7365_v13 = vld [vmem:[%s7952_s22 + $0x60] sm:$0xff]   ;;  %v7369_v17 = vld [vmem:[%s7952_s22 + $0x58] sm:$0xff]   ;;  %v7373_v21 = vld [vmem:[%s7952_s22 + $0x50] sm:$0xff]  }
  0x19   : > { %6656 = vmatprep.subr.bf16.mxu1 %v7358_v6  ;;  %v7366_v14 = vld [vmem:[%s7952_s22 + $0xe0] sm:$0xff]   ;;  %v7370_v18 = vld [vmem:[%s7952_s22 + $0xd8] sm:$0xff]   ;;  %v7374_v22 = vld [vmem:[%s7952_s22 + $0xd0] sm:$0xff]   ;;  %v7990_v42 = vsub.s32 %v1229_v41, %v1231_v34 }
  0x1a   : > { %v7367_v15 = vld [vmem:[%s7952_s22 + $0x20] sm:$0xff]   ;;  %v7371_v19 = vld [vmem:[%s7952_s22 + $0x18] sm:$0xff]   ;;  %v7375_v23 = vld [vmem:[%s7952_s22 + $0x10] sm:$0xff]  }
  0x1b   : > { %6635 = vmatpush3.bf16.msra.mxu0 %v7359_v7  ;;  %v7368_v16 = vld [vmem:[%s7952_s22 + $0xa0] sm:$0xff]   ;;  %v7372_v20 = vld [vmem:[%s7952_s22 + $0x98] sm:$0xff]   ;;  %v7376_v24 = vld [vmem:[%s7952_s22 + $0x90] sm:$0xff]  }
  0x1c   : > { %6657 = vmatpush3.bf16.msra.mxu1 %v7360_v8  ;;  %6636 = vmatprep.subr.bf16.mxu0 %v7361_v9  ;;  %v7377_v25 = vld [vmem:[%s7952_s22 + $0x48] sm:$0xff]   ;;  %v7381_v30 = vld [vmem:[%s7952_s22 + $0x40] sm:$0xff]   ;;  %v7386_v36 = vld [vmem:[%s7952_s22 + $0x178] sm:$0xff]  }
  0x1d   : > { %6658 = vmatprep.subr.bf16.mxu1 %v7362_v10  ;;  %v7378_v26 = vld [vmem:[%s7952_s22 + $0xc8] sm:$0xff]   ;;  %v7382_v31 = vld [vmem:[%s7952_s22 + $0xc0] sm:$0xff]   ;;  %v7387_v39 = vld [vmem:[%s7952_s22 + $0x1f8] sm:$0xff]  }
  0x1e   : > { %v7379_v27 = vld [vmem:[%s7952_s22 + $0x8] sm:$0xff]   ;;  %v7383_v32 = vld [vmem:[%s7952_s22] sm:$0xff]   ;;  %v7388_v48 = vld [vmem:[%s7952_s22 + $0x138] sm:$0xff]  }
  0x1f   : > { %6637 = vmatpush3.bf16.msra.mxu0 %v7363_v11  ;;  %v7380_v28 = vld [vmem:[%s7952_s22 + $0x88] sm:$0xff]   ;;  %v7384_v33 = vld [vmem:[%s7952_s22 + $0x80] sm:$0xff]   ;;  %v7389_v50 = vld [vmem:[%s7952_s22 + $0x1b8] sm:$0xff]  }
  0x20   : > { %6659 = vmatpush3.bf16.msra.mxu1 %v7364_v12  ;;  %6638 = vmatprep.subr.bf16.mxu0 %v7365_v13  ;;  %v186_v35 = vld [vmem:[%s7947_s18] sm:$0xff]  ;;  %v7390_v53 = vld [vmem:[%s7952_s22 + $0x170] sm:$0xff]   ;;  %v7394_v59 = vld [vmem:[%s7952_s22 + $0x168] sm:$0xff]  }
  0x21   : > { %6660 = vmatprep.subr.bf16.mxu1 %v7366_v14  ;;  %v1226_v40 = vcombine.high %v186_v35, %v186_v35  ;;  %v1233_v43 = vrot.slane %v186_v35, %v7990_v42  ;;  %v7391_v55 = vld [vmem:[%s7952_s22 + $0x1f0] sm:$0xff]   ;;  %v7395_v60 = vld [vmem:[%s7952_s22 + $0x1e8] sm:$0xff]   ;;  %v7398_v63 = vld [vmem:[%s7952_s22 + $0x160] sm:$0xff]  }
  0x22   : > { %v7392_v56 = vld [vmem:[%s7952_s22 + $0x130] sm:$0xff]   ;;  %v7396_v61 = vld [vmem:[%s7952_s22 + $0x128] sm:$0xff]   ;;  %v7399_v0 = vld [vmem:[%s7952_s22 + $0x1e0] sm:$0xff]  }
  0x23   : > { %6639 = vmatpush3.bf16.msra.mxu0 %v7367_v15  ;;  %v7994_v44 = vrot.slane %v1226_v40, %v7990_v42  ;;  %v1241_v45 = vcombine.high %v1233_v43, %v1233_v43  ;;  %v1249_v46 = vrot.slane %v1233_v43, %v7990_v42  ;;  %v7393_v58 = vld [vmem:[%s7952_s22 + $0x1b0] sm:$0xff]   ;;  %v7397_v62 = vld [vmem:[%s7952_s22 + $0x1a8] sm:$0xff]   ;;  %v7400_v1 = vld [vmem:[%s7952_s22 + $0x120] sm:$0xff]  }
  0x24   : > { %6661 = vmatpush3.bf16.msra.mxu1 %v7368_v16  ;;  %6640 = vmatprep.subr.bf16.mxu0 %v7369_v17  ;;  %v7401_v2 = vld [vmem:[%s7952_s22 + $0x1a0] sm:$0xff]   ;;  %v7402_v3 = vld [vmem:[%s7952_s22 + $0x158] sm:$0xff]   ;;  %v7406_v7 = vld [vmem:[%s7952_s22 + $0x150] sm:$0xff]  }
  0x25   : > { %6662 = vmatprep.subr.bf16.mxu1 %v7370_v18  ;;  %v1242_v47 = vcombine.high %v7994_v44, %v7994_v44  ;;  %v1263_v49 = vrot.slane %v1241_v45, %v7990_v42  ;;  %v1271_v52 = vcombine.high %v1249_v46, %v1249_v46  ;;  %v7403_v4 = vld [vmem:[%s7952_s22 + $0x1d8] sm:$0xff]   ;;  %v7407_v8 = vld [vmem:[%s7952_s22 + $0x1d0] sm:$0xff]   ;;  %v7410_v11 = vld [vmem:[%s7952_s22 + $0x148] sm:$0xff]  }
  0x26   : > { %v7404_v5 = vld [vmem:[%s7952_s22 + $0x118] sm:$0xff]   ;;  %v7408_v9 = vld [vmem:[%s7952_s22 + $0x110] sm:$0xff]   ;;  %v7411_v12 = vld [vmem:[%s7952_s22 + $0x1c8] sm:$0xff]  }
  0x27   : > { %6641 = vmatpush3.bf16.msra.mxu0 %v7371_v19  ;;  %v1270_v51 = vrot.slane %v1242_v47, %v7990_v42  ;;  %4786 = vmatprep.mubr.bf16.mxu0 %v1263_v49  ;;  %v1273_v54 = vcombine.high %v1263_v49, %v1263_v49  ;;  %v7405_v6 = vld [vmem:[%s7952_s22 + $0x198] sm:$0xff]   ;;  %v7409_v10 = vld [vmem:[%s7952_s22 + $0x190] sm:$0xff]   ;;  %v7412_v13 = vld [vmem:[%s7952_s22 + $0x108] sm:$0xff]   ;;  %v1256_v19 = vrot.slane %v7994_v44, %v7990_v42 }
  0x28   : > { %6663 = vmatpush3.bf16.msra.mxu1 %v7372_v20  ;;  %6642 = vmatprep.subr.bf16.mxu0 %v7373_v21  ;;  %v7413_v14 = vld [vmem:[%s7952_s22 + $0x188] sm:$0xff]   ;;  %v7414_v15 = vld [vmem:[%s7952_s22 + $0x140] sm:$0xff]   ;;  %v7418_v20 = vld [vmem:[%s7952_s22 + $0x278] sm:$0xff]  }
  0x29   : > { %6664 = vmatprep.subr.bf16.mxu1 %v7374_v22  ;;  %v1274_v57 = vcombine.high %v1270_v51, %v1270_v51  ;;  %4826 = vmatprep.mubr.bf16.mxu1 %v1273_v54  ;;  %v7415_v16 = vld [vmem:[%s7952_s22 + $0x1c0] sm:$0xff]   ;;  %v7419_v21 = vld [vmem:[%s7952_s22 + $0x2f8] sm:$0xff]   ;;  %v7426_v29 = vld [vmem:[%s7952_s22 + $0x268] sm:$0xff]  }
  0x2a   : > { %v7416_v17 = vld [vmem:[%s7952_s22 + $0x100] sm:$0xff]   ;;  %v7420_v22 = vld [vmem:[%s7952_s22 + $0x238] sm:$0xff]   ;;  %v7438_v41 = vld [vmem:[%s7952_s22 + $0x250] sm:$0xff]  }
  0x2b   : > { %6643 = vmatpush3.bf16.msra.mxu0 %v7375_v23  ;;  %v7417_v18 = vld [vmem:[%s7952_s22 + $0x180] sm:$0xff]   ;;  %v7421_v23 = vld [vmem:[%s7952_s22 + $0x2b8] sm:$0xff]   ;;  %v7439_v43 = vld [vmem:[%s7952_s22 + $0x2d0] sm:$0xff]  }
  0x2c   : > { %6665 = vmatpush3.bf16.msra.mxu1 %v7376_v24  ;;  %6644 = vmatprep.subr.bf16.mxu0 %v7377_v25  ;;  %v1272_v24 = vcombine.high %v1256_v19, %v1256_v19  ;;  %v7422_v25 = vld [vmem:[%s7952_s22 + $0x270] sm:$0xff]   ;;  %v7431_v34 = vld [vmem:[%s7952_s22 + $0x2e0] sm:$0xff]   ;;  %v7434_v37 = vld [vmem:[%s7952_s22 + $0x258] sm:$0xff]  }
  0x2d   : > { %6666 = vmatprep.subr.bf16.mxu1 %v7378_v26  ;;  %v7423_v26 = vld [vmem:[%s7952_s22 + $0x2f0] sm:$0xff]   ;;  %v7432_v35 = vld [vmem:[%s7952_s22 + $0x220] sm:$0xff]   ;;  %v7435_v38 = vld [vmem:[%s7952_s22 + $0x2d8] sm:$0xff]  }
  0x2e   : > { %v7437_v40 = vld [vmem:[%s7952_s22 + $0x298] sm:$0xff]   ;;  %v7440_v44 = vld [vmem:[%s7952_s22 + $0x210] sm:$0xff]   ;;  %v187_v47 = vld [vmem:[%s7947_s18 + $0x8] sm:$0xff] }
  0x2f   : > { %6645 = vmatpush3.bf16.msra.mxu0 %v7379_v27  ;;  %v7424_v27 = vld [vmem:[%s7952_s22 + $0x230] sm:$0xff]   ;;  %v1282_v49 = vrot.slane %v187_v47, %v7990_v42 }
  0x30   : > { %6667 = vmatpush3.bf16.msra.mxu1 %v7380_v28  ;;  %6646 = vmatprep.subr.bf16.mxu0 %v7381_v30  ;;  %v7425_v28 = vld [vmem:[%s7952_s22 + $0x2b0] sm:$0xff]   ;;  %v7427_v30 = vld [vmem:[%s7952_s22 + $0x2e8] sm:$0xff]  }
  0x31   : > { %6668 = vmatprep.subr.bf16.mxu1 %v7382_v31  ;;  %v7428_v31 = vld [vmem:[%s7952_s22 + $0x228] sm:$0xff]   ;;  %v7441_v45 = vld [vmem:[%s7952_s22 + $0x290] sm:$0xff]  }
  0x33   : > { %6647 = vmatpush3.bf16.msra.mxu0 %v7383_v32  ;;  %v7429_v32 = vld [vmem:[%s7952_s22 + $0x2a8] sm:$0xff]  }
  0x34   : > { %6669 = vmatpush3.bf16.msra.mxu1 %v7384_v33  ;;  %6676 = vmatprep.subr.bf16.mxu0 %v7386_v36  ;;  %v7430_v33 = vld [vmem:[%s7952_s22 + $0x260] sm:$0xff]  }
  0x35   : > { %6698 = vmatprep.subr.bf16.mxu1 %v7387_v39  ;;  %v7433_v36 = vld [vmem:[%s7952_s22 + $0x2a0] sm:$0xff]   ;;  %v7436_v39 = vld [vmem:[%s7952_s22 + $0x218] sm:$0xff]  }
  0x36   : > { %4787 = vmatmul.mubr.bf16.vlgmr.msra.gmra.mxu0 %v1249_v46  ;;  %v7442_v46 = vld [vmem:[%s7952_s22 + $0x248] sm:$0xff]  }
  0x37   : > { %6677 = vmatpush3.bf16.msra.mxu0 %v7388_v48  ;;  %4827 = vmatmul.mubr.bf16.vlgmr.msra.gmra.mxu1 %v1271_v52  ;;  %v7443_v48 = vld [vmem:[%s7952_s22 + $0x2c8] sm:$0xff]  }
  0x38   : > { %6678 = vmatprep.subr.bf16.mxu0 %v7390_v53  ;;  %6699 = vmatpush3.bf16.msra.mxu1 %v7389_v50  ;;  %v1275_v50 = vcombine.high %v187_v47, %v187_v47  ;;  %v7445_v52 = vld [vmem:[%s7952_s22 + $0x288] sm:$0xff]   ;;  %v1290_v53 = vcombine.high %v1282_v49, %v1282_v49 }
  0x39   : > { %4866 = vmatprep.mubr.bf16.mxu0 %v1270_v51  ;;  %6700 = vmatprep.subr.bf16.mxu1 %v7391_v55  ;;  %v7444_v51 = vld [vmem:[%s7952_s22 + $0x208] sm:$0xff]   ;;  %v7446_v55 = vld [vmem:[%s7952_s22 + $0x240] sm:$0xff]  }
  0x3a   : > { %4906 = vmatprep.mubr.bf16.mxu1 %v1274_v57  ;;  %v8064_v54 = vrot.slane %v1275_v50, %v7990_v42  ;;  %v1312_v57 = vrot.slane %v1290_v53, %v7990_v42  ;;  %v7493_v47 = vld [vmem:[%s7952_s22 + $0x428] sm:$0xff]   ;;  %v7496_v50 = vld [vmem:[%s7952_s22 + $0x4e0] sm:$0xff]   ;;  %v7499_v53 = vld [vmem:[%s7952_s22 + $0x458] sm:$0xff]  }
  0x3b   : > { %6679 = vmatpush3.bf16.msra.mxu0 %v7392_v56  ;;  %v7447_v56 = vld [vmem:[%s7952_s22 + $0x2c0] sm:$0xff]  }
  0x3c   : > { %6680 = vmatprep.subr.bf16.mxu0 %v7394_v59  ;;  %6701 = vmatpush3.bf16.msra.mxu1 %v7393_v58  ;;  %v1291_v58 = vcombine.high %v8064_v54, %v8064_v54  ;;  %v7448_v59 = vld [vmem:[%s7952_s22 + $0x200] sm:$0xff]  }
  0x3d   : > { %6702 = vmatprep.subr.bf16.mxu1 %v7395_v60  ;;  %v7449_v60 = vld [vmem:[%s7952_s22 + $0x280] sm:$0xff]  }
  0x3f   : > { %6681 = vmatpush3.bf16.msra.mxu0 %v7396_v61  ;;  %v1322_v61 = vcombine.high %v1312_v57, %v1312_v57 }
  0x40   : > { %6682 = vmatprep.subr.bf16.mxu0 %v7398_v63  ;;  %6703 = vmatpush3.bf16.msra.mxu1 %v7397_v62  ;;  %v1298_v62 = vrot.slane %v1282_v49, %v7990_v42  ;;  %v7450_v63 = vld [vmem:[%s7952_s22 + $0x378] sm:$0xff]   ;;  %v7495_v49 = vld [vmem:[%s7952_s22 + $0x460] sm:$0xff]  }
  0x41   : > { %6704 = vmatprep.subr.bf16.mxu1 %v7399_v0  ;;  %v7451_v0 = vld [vmem:[%s7952_s22 + $0x3f8] sm:$0xff]  }
  0x43   : > { %6683 = vmatpush3.bf16.msra.mxu0 %v7400_v1  ;;  %v1319_v1 = vrot.slane %v1291_v58, %v7990_v42  ;;  %v7504_v58 = vld [vmem:[%s7952_s22 + $0x4d0] sm:$0xff]  }
  0x44   : > { %6684 = vmatprep.subr.bf16.mxu0 %v7402_v3  ;;  %6705 = vmatpush3.bf16.msra.mxu1 %v7401_v2  ;;  %v7452_v2 = vld [vmem:[%s7952_s22 + $0x338] sm:$0xff]  }
  0x45   : > { %6706 = vmatprep.subr.bf16.mxu1 %v7403_v4  ;;  %v7453_v3 = vld [vmem:[%s7952_s22 + $0x3b8] sm:$0xff]   ;;  %v1320_v4 = vcombine.high %v1298_v62, %v1298_v62 }
  0x47   : > { %6685 = vmatpush3.bf16.msra.mxu0 %v7404_v5  ;;  %v7454_v5 = vld [vmem:[%s7952_s22 + $0x370] sm:$0xff]  }
  0x48   : > { %6686 = vmatprep.subr.bf16.mxu0 %v7406_v7  ;;  %6707 = vmatpush3.bf16.msra.mxu1 %v7405_v6  ;;  %v7455_v6 = vld [vmem:[%s7952_s22 + $0x3f0] sm:$0xff]   ;;  %v1323_v7 = vcombine.high %v1319_v1, %v1319_v1 }
  0x49   : > { %6708 = vmatprep.subr.bf16.mxu1 %v7407_v8  ;;  %v7456_v8 = vld [vmem:[%s7952_s22 + $0x330] sm:$0xff]  }
  0x4b   : > { %6687 = vmatpush3.bf16.msra.mxu0 %v7408_v9  ;;  %v7457_v9 = vld [vmem:[%s7952_s22 + $0x3b0] sm:$0xff]  }
  0x4c   : > { %6688 = vmatprep.subr.bf16.mxu0 %v7410_v11  ;;  %6709 = vmatpush3.bf16.msra.mxu1 %v7409_v10  ;;  %v7458_v10 = vld [vmem:[%s7952_s22 + $0x368] sm:$0xff]  }
  0x4d   : > { %6710 = vmatprep.subr.bf16.mxu1 %v7411_v12  ;;  %v7459_v11 = vld [vmem:[%s7952_s22 + $0x3e8] sm:$0xff]  }
  0x4e   : > { %v7460_v12 = vld [vmem:[%s7952_s22 + $0x328] sm:$0xff]  }
  0x4f   : > { %6689 = vmatpush3.bf16.msra.mxu0 %v7412_v13  ;;  %v7461_v13 = vld [vmem:[%s7952_s22 + $0x3a8] sm:$0xff]  }
  0x50   : > { %6690 = vmatprep.subr.bf16.mxu0 %v7414_v15  ;;  %6711 = vmatpush3.bf16.msra.mxu1 %v7413_v14  ;;  %v7462_v14 = vld [vmem:[%s7952_s22 + $0x360] sm:$0xff]  }
  0x51   : > { %6712 = vmatprep.subr.bf16.mxu1 %v7415_v16  ;;  %v7463_v15 = vld [vmem:[%s7952_s22 + $0x3e0] sm:$0xff]  }
  0x52   : > { %v7464_v16 = vld [vmem:[%s7952_s22 + $0x320] sm:$0xff]  }
  0x53   : > { %6691 = vmatpush3.bf16.msra.mxu0 %v7416_v17  ;;  %v7465_v17 = vld [vmem:[%s7952_s22 + $0x3a0] sm:$0xff]  }
  0x54   : > { %6720 = vmatprep.subr.bf16.mxu0 %v7418_v20  ;;  %6713 = vmatpush3.bf16.msra.mxu1 %v7417_v18  ;;  %v7466_v18 = vld [vmem:[%s7952_s22 + $0x358] sm:$0xff]  }
  0x55   : > { %6742 = vmatprep.subr.bf16.mxu1 %v7419_v21  ;;  %v7468_v20 = vld [vmem:[%s7952_s22 + $0x318] sm:$0xff]  }
  0x56   : > { %4867 = vmatmul.mubr.bf16.vlgmr.msra.gmra.mxu0 %v1256_v19  ;;  %v7467_v19 = vld [vmem:[%s7952_s22 + $0x3d8] sm:$0xff]  }
  0x57   : > { %6721 = vmatpush3.bf16.msra.mxu0 %v7420_v22  ;;  %4907 = vmatmul.mubr.bf16.vlgmr.msra.gmra.mxu1 %v1272_v24  ;;  %v7469_v21 = vld [vmem:[%s7952_s22 + $0x398] sm:$0xff]   ;;  %v7470_v22 = vld [vmem:[%s7952_s22 + $0x350] sm:$0xff]  }
  0x58   : > { %6722 = vmatprep.subr.bf16.mxu0 %v7422_v25  ;;  %6743 = vmatpush3.bf16.msra.mxu1 %v7421_v23  ;;  %v7471_v23 = vld [vmem:[%s7952_s22 + $0x3d0] sm:$0xff]  }
  0x59   : > { %6744 = vmatprep.subr.bf16.mxu1 %v7423_v26  ;;  %4946 = vmatprep.mubr.bf16.mxu0 %v1312_v57  ;;  %v7472_v24 = vld [vmem:[%s7952_s22 + $0x310] sm:$0xff]   ;;  %v7474_v26 = vld [vmem:[%s7952_s22 + $0x348] sm:$0xff]  }
  0x5a   : > { %4986 = vmatprep.mubr.bf16.mxu1 %v1322_v61  ;;  %v7473_v25 = vld [vmem:[%s7952_s22 + $0x390] sm:$0xff]   ;;  %v7507_v61 = vld [vmem:[%s7952_s22 + $0x448] sm:$0xff]  }
  0x5b   : > { %6723 = vmatpush3.bf16.msra.mxu0 %v7424_v27  ;;  %v7475_v27 = vld [vmem:[%s7952_s22 + $0x3c8] sm:$0xff]   ;;  %v7503_v57 = vld [vmem:[%s7952_s22 + $0x450] sm:$0xff]  }
  0x5c   : > { %6724 = vmatprep.subr.bf16.mxu0 %v7426_v29  ;;  %6745 = vmatpush3.bf16.msra.mxu1 %v7425_v28  ;;  %v7476_v28 = vld [vmem:[%s7952_s22 + $0x308] sm:$0xff]  }
  0x5d   : > { %6746 = vmatprep.subr.bf16.mxu1 %v7427_v30  ;;  %v7477_v29 = vld [vmem:[%s7952_s22 + $0x388] sm:$0xff]   ;;  %v7478_v30 = vld [vmem:[%s7952_s22 + $0x340] sm:$0xff]  }
  0x5f   : > { %6725 = vmatpush3.bf16.msra.mxu0 %v7428_v31  ;;  %v7479_v31 = vld [vmem:[%s7952_s22 + $0x3c0] sm:$0xff]  }
  0x60   : > { %6726 = vmatprep.subr.bf16.mxu0 %v7430_v33  ;;  %6747 = vmatpush3.bf16.msra.mxu1 %v7429_v32  ;;  %v7480_v32 = vld [vmem:[%s7952_s22 + $0x300] sm:$0xff]  }
  0x61   : > { %6748 = vmatprep.subr.bf16.mxu1 %v7431_v34  ;;  %v7481_v33 = vld [vmem:[%s7952_s22 + $0x380] sm:$0xff]   ;;  %v1305_v34 = vrot.slane %v8064_v54, %v7990_v42  ;;  %v7500_v54 = vld [vmem:[%s7952_s22 + $0x4d8] sm:$0xff]  }
  0x63   : > { %6727 = vmatpush3.bf16.msra.mxu0 %v7432_v35  ;;  %v7483_v35 = vld [vmem:[%s7952_s22 + $0x478] sm:$0xff]  }
  0x64   : > { %6728 = vmatprep.subr.bf16.mxu0 %v7434_v37  ;;  %6749 = vmatpush3.bf16.msra.mxu1 %v7433_v36  ;;  %v7484_v36 = vld [vmem:[%s7952_s22 + $0x4f8] sm:$0xff]  }
  0x65   : > { %6750 = vmatprep.subr.bf16.mxu1 %v7435_v38  ;;  %v7485_v37 = vld [vmem:[%s7952_s22 + $0x438] sm:$0xff]  }
  0x66   : > { %v7486_v38 = vld [vmem:[%s7952_s22 + $0x4b8] sm:$0xff]  }
  0x67   : > { %6729 = vmatpush3.bf16.msra.mxu0 %v7436_v39  ;;  %v1321_v39 = vcombine.high %v1305_v34, %v1305_v34 }
  0x68   : > { %6730 = vmatprep.subr.bf16.mxu0 %v7438_v41  ;;  %6751 = vmatpush3.bf16.msra.mxu1 %v7437_v40  ;;  %v7487_v40 = vld [vmem:[%s7952_s22 + $0x470] sm:$0xff]  }
  0x69   : > { %6752 = vmatprep.subr.bf16.mxu1 %v7439_v43  ;;  %v7488_v41 = vld [vmem:[%s7952_s22 + $0x4f0] sm:$0xff]  }
  0x6a   : > { %v7489_v43 = vld [vmem:[%s7952_s22 + $0x430] sm:$0xff]  }
  0x6b   : > { %6731 = vmatpush3.bf16.msra.mxu0 %v7440_v44  ;;  %v7490_v44 = vld [vmem:[%s7952_s22 + $0x4b0] sm:$0xff]  }
  0x6c   : > { %6732 = vmatprep.subr.bf16.mxu0 %v7442_v46  ;;  %6753 = vmatpush3.bf16.msra.mxu1 %v7441_v45  ;;  %v7491_v45 = vld [vmem:[%s7952_s22 + $0x468] sm:$0xff]  }
  0x6d   : > { %6754 = vmatprep.subr.bf16.mxu1 %v7443_v48  ;;  %v7492_v46 = vld [vmem:[%s7952_s22 + $0x4e8] sm:$0xff]  }
  0x6e   : > { %v7494_v48 = vld [vmem:[%s7952_s22 + $0x4a8] sm:$0xff]  }
  0x6f   : > { %6733 = vmatpush3.bf16.msra.mxu0 %v7444_v51  ;;  %v7497_v51 = vld [vmem:[%s7952_s22 + $0x420] sm:$0xff]  }
  0x70   : > { %6734 = vmatprep.subr.bf16.mxu0 %v7446_v55  ;;  %6755 = vmatpush3.bf16.msra.mxu1 %v7445_v52  ;;  %v7498_v52 = vld [vmem:[%s7952_s22 + $0x4a0] sm:$0xff]   ;;  %v7501_v55 = vld [vmem:[%s7952_s22 + $0x418] sm:$0xff]  }
  0x71   : > { %6756 = vmatprep.subr.bf16.mxu1 %v7447_v56  ;;  %v7502_v56 = vld [vmem:[%s7952_s22 + $0x498] sm:$0xff]  }
  0x73   : > { %6735 = vmatpush3.bf16.msra.mxu0 %v7448_v59  ;;  %v7505_v59 = vld [vmem:[%s7952_s22 + $0x410] sm:$0xff]  }
  0x74   : > { %6764 = vmatprep.subr.bf16.mxu0 %v7450_v63  ;;  %6757 = vmatpush3.bf16.msra.mxu1 %v7449_v60  ;;  %v7506_v60 = vld [vmem:[%s7952_s22 + $0x490] sm:$0xff]   ;;  %v7508_v63 = vld [vmem:[%s7952_s22 + $0x4c8] sm:$0xff]  }
  0x75   : > { %6786 = vmatprep.subr.bf16.mxu1 %v7451_v0 }
  0x76   : > { %4947 = vmatmul.mubr.bf16.vlgmr.msra.gmra.mxu0 %v1298_v62  ;;  %v188_v62 = vld [vmem:[%s7947_s18 + $0x10] sm:$0xff] }
  0x77   : > { %6765 = vmatpush3.bf16.msra.mxu0 %v7452_v2  ;;  %5026 = vmatprep.mubr.bf16.mxu0 %v1319_v1  ;;  %v1331_v0 = vrot.slane %v188_v62, %v7990_v42  ;;  %v1324_v1 = vcombine.high %v188_v62, %v188_v62  ;;  %v7509_v2 = vld [vmem:[%s7952_s22 + $0x408] sm:$0xff]  }
  0x78   : > { %4987 = vmatmul.mubr.bf16.vlgmr.msra.gmra.mxu1 %v1320_v4  ;;  %6766 = vmatprep.subr.bf16.mxu0 %v7454_v5  ;;  %v7558_v62 = vld [vmem:[%s7952_s22 + $0x628] sm:$0xff]  }
  0x79   : > { %6787 = vmatpush3.bf16.msra.mxu1 %v7453_v3  ;;  %5066 = vmatprep.mubr.bf16.mxu1 %v1323_v7  ;;  %v7510_v3 = vld [vmem:[%s7952_s22 + $0x488] sm:$0xff]   ;;  %v1339_v4 = vcombine.high %v1331_v0, %v1331_v0  ;;  %v8140_v5 = vrot.slane %v1324_v1, %v7990_v42  ;;  %v7512_v7 = vld [vmem:[%s7952_s22 + $0x4c0] sm:$0xff]  }
  0x7a   : > { %6788 = vmatprep.subr.bf16.mxu1 %v7455_v6  ;;  %v7511_v6 = vld [vmem:[%s7952_s22 + $0x440] sm:$0xff]  }
  0x7b   : > { %6767 = vmatpush3.bf16.msra.mxu0 %v7456_v8  ;;  %v1361_v8 = vrot.slane %v1339_v4, %v7990_v42  ;;  %v7561_v1 = vld [vmem:[%s7952_s22 + $0x6e0] sm:$0xff]   ;;  %v7564_v4 = vld [vmem:[%s7952_s22 + $0x658] sm:$0xff]  }
  0x7c   : > { %6768 = vmatprep.subr.bf16.mxu0 %v7458_v10  ;;  %v7513_v10 = vld [vmem:[%s7952_s22 + $0x400] sm:$0xff]  }
  0x7d   : > { %6789 = vmatpush3.bf16.msra.mxu1 %v7457_v9  ;;  %v1340_v9 = vcombine.high %v8140_v5, %v8140_v5 }
  0x7e   : > { %6790 = vmatprep.subr.bf16.mxu1 %v7459_v11  ;;  %v7514_v11 = vld [vmem:[%s7952_s22 + $0x480] sm:$0xff]  }
  0x7f   : > { %6769 = vmatpush3.bf16.msra.mxu0 %v7460_v12  ;;  %v1371_v12 = vcombine.high %v1361_v8, %v1361_v8 }
  0x80   : > { %6770 = vmatprep.subr.bf16.mxu0 %v7462_v14  ;;  %v7515_v14 = vld [vmem:[%s7952_s22 + $0x578] sm:$0xff]  }
  0x81   : > { %6791 = vmatpush3.bf16.msra.mxu1 %v7461_v13  ;;  %v1347_v13 = vrot.slane %v1331_v0, %v7990_v42  ;;  %v7560_v0 = vld [vmem:[%s7952_s22 + $0x660] sm:$0xff]  }
  0x82   : > { %6792 = vmatprep.subr.bf16.mxu1 %v7463_v15  ;;  %v7516_v15 = vld [vmem:[%s7952_s22 + $0x5f8] sm:$0xff]  }
  0x83   : > { %6771 = vmatpush3.bf16.msra.mxu0 %v7464_v16  ;;  %v1368_v16 = vrot.slane %v1340_v9, %v7990_v42  ;;  %v7569_v9 = vld [vmem:[%s7952_s22 + $0x6d0] sm:$0xff]  }
  0x84   : > { %6772 = vmatprep.subr.bf16.mxu0 %v7466_v18  ;;  %v7518_v18 = vld [vmem:[%s7952_s22 + $0x5b8] sm:$0xff]  }
  0x85   : > { %6793 = vmatpush3.bf16.msra.mxu1 %v7465_v17  ;;  %v7517_v17 = vld [vmem:[%s7952_s22 + $0x538] sm:$0xff]  }
  0x86   : > { %6794 = vmatprep.subr.bf16.mxu1 %v7467_v19  ;;  %v1369_v19 = vcombine.high %v1347_v13, %v1347_v13 }
  0x87   : > { %6773 = vmatpush3.bf16.msra.mxu0 %v7468_v20  ;;  %v7519_v20 = vld [vmem:[%s7952_s22 + $0x570] sm:$0xff]  }
  0x88   : > { %6774 = vmatprep.subr.bf16.mxu0 %v7470_v22  ;;  %v1372_v22 = vcombine.high %v1368_v16, %v1368_v16 }
  0x89   : > { %6795 = vmatpush3.bf16.msra.mxu1 %v7469_v21  ;;  %v7520_v21 = vld [vmem:[%s7952_s22 + $0x5f0] sm:$0xff]  }
  0x8a   : > { %6796 = vmatprep.subr.bf16.mxu1 %v7471_v23  ;;  %v7521_v23 = vld [vmem:[%s7952_s22 + $0x530] sm:$0xff]  }
  0x8b   : > { %6775 = vmatpush3.bf16.msra.mxu0 %v7472_v24  ;;  %v7522_v24 = vld [vmem:[%s7952_s22 + $0x5b0] sm:$0xff]  }
  0x8c   : > { %6776 = vmatprep.subr.bf16.mxu0 %v7474_v26  ;;  %v7524_v26 = vld [vmem:[%s7952_s22 + $0x5e8] sm:$0xff]  }
  0x8d   : > { %6797 = vmatpush3.bf16.msra.mxu1 %v7473_v25  ;;  %v7523_v25 = vld [vmem:[%s7952_s22 + $0x568] sm:$0xff]  }
  0x8e   : > { %6798 = vmatprep.subr.bf16.mxu1 %v7475_v27  ;;  %v7525_v27 = vld [vmem:[%s7952_s22 + $0x528] sm:$0xff]  }
  0x8f   : > { %6777 = vmatpush3.bf16.msra.mxu0 %v7476_v28  ;;  %v7526_v28 = vld [vmem:[%s7952_s22 + $0x5a8] sm:$0xff]  }
  0x90   : > { %6778 = vmatprep.subr.bf16.mxu0 %v7478_v30  ;;  %v7528_v30 = vld [vmem:[%s7952_s22 + $0x5e0] sm:$0xff]  }
  0x91   : > { %6799 = vmatpush3.bf16.msra.mxu1 %v7477_v29  ;;  %v7527_v29 = vld [vmem:[%s7952_s22 + $0x560] sm:$0xff]  }
  0x92   : > { %6800 = vmatprep.subr.bf16.mxu1 %v7479_v31  ;;  %v7529_v31 = vld [vmem:[%s7952_s22 + $0x520] sm:$0xff]  }
  0x93   : > { %6779 = vmatpush3.bf16.msra.mxu0 %v7480_v32  ;;  %v7530_v32 = vld [vmem:[%s7952_s22 + $0x5a0] sm:$0xff]  }
  0x94   : > { %6808 = vmatprep.subr.bf16.mxu0 %v7483_v35  ;;  %v7533_v35 = vld [vmem:[%s7952_s22 + $0x518] sm:$0xff]  }
  0x95   : > { %6801 = vmatpush3.bf16.msra.mxu1 %v7481_v33  ;;  %v7531_v33 = vld [vmem:[%s7952_s22 + $0x558] sm:$0xff]  }
  0x96   : > { %5027 = vmatmul.mubr.bf16.vlgmr.msra.gmra.mxu0 %v1305_v34  ;;  %6830 = vmatprep.subr.bf16.mxu1 %v7484_v36  ;;  %v7532_v34 = vld [vmem:[%s7952_s22 + $0x5d8] sm:$0xff]  }
  0x97   : > { %6809 = vmatpush3.bf16.msra.mxu0 %v7485_v37  ;;  %5106 = vmatprep.mubr.bf16.mxu0 %v1361_v8  ;;  %v7534_v36 = vld [vmem:[%s7952_s22 + $0x598] sm:$0xff]   ;;  %v7535_v37 = vld [vmem:[%s7952_s22 + $0x550] sm:$0xff]  }
  0x98   : > { %5067 = vmatmul.mubr.bf16.vlgmr.msra.gmra.mxu1 %v1321_v39  ;;  %6810 = vmatprep.subr.bf16.mxu0 %v7487_v40  ;;  %v7537_v39 = vld [vmem:[%s7952_s22 + $0x510] sm:$0xff]  }
  0x99   : > { %6831 = vmatpush3.bf16.msra.mxu1 %v7486_v38  ;;  %5146 = vmatprep.mubr.bf16.mxu1 %v1371_v12  ;;  %v7536_v38 = vld [vmem:[%s7952_s22 + $0x5d0] sm:$0xff]   ;;  %v7572_v12 = vld [vmem:[%s7952_s22 + $0x648] sm:$0xff]  }
  0x9a   : > { %6832 = vmatprep.subr.bf16.mxu1 %v7488_v41  ;;  %v7538_v40 = vld [vmem:[%s7952_s22 + $0x590] sm:$0xff]   ;;  %v7539_v41 = vld [vmem:[%s7952_s22 + $0x548] sm:$0xff]  }
  0x9b   : > { %6811 = vmatpush3.bf16.msra.mxu0 %v7489_v43  ;;  %v7540_v43 = vld [vmem:[%s7952_s22 + $0x5c8] sm:$0xff]   ;;  %v7568_v8 = vld [vmem:[%s7952_s22 + $0x650] sm:$0xff]  }
  0x9c   : > { %6812 = vmatprep.subr.bf16.mxu0 %v7491_v45  ;;  %v7542_v45 = vld [vmem:[%s7952_s22 + $0x588] sm:$0xff]  }
  0x9d   : > { %6833 = vmatpush3.bf16.msra.mxu1 %v7490_v44  ;;  %v7541_v44 = vld [vmem:[%s7952_s22 + $0x508] sm:$0xff]  }
  0x9e   : > { %6834 = vmatprep.subr.bf16.mxu1 %v7492_v46  ;;  %v7543_v46 = vld [vmem:[%s7952_s22 + $0x540] sm:$0xff]  }
  0x9f   : > { %6813 = vmatpush3.bf16.msra.mxu0 %v7493_v47  ;;  %v7544_v47 = vld [vmem:[%s7952_s22 + $0x5c0] sm:$0xff]  }
  0xa0   : > { %6814 = vmatprep.subr.bf16.mxu0 %v7495_v49  ;;  %v7546_v49 = vld [vmem:[%s7952_s22 + $0x580] sm:$0xff]  }
  0xa1   : > { %6835 = vmatpush3.bf16.msra.mxu1 %v7494_v48  ;;  %v7545_v48 = vld [vmem:[%s7952_s22 + $0x500] sm:$0xff]  }
  0xa2   : > { %6836 = vmatprep.subr.bf16.mxu1 %v7496_v50  ;;  %v1354_v50 = vrot.slane %v8140_v5, %v7990_v42  ;;  %v7565_v5 = vld [vmem:[%s7952_s22 + $0x6d8] sm:$0xff]  }
  0xa3   : > { %6815 = vmatpush3.bf16.msra.mxu0 %v7497_v51  ;;  %v7548_v51 = vld [vmem:[%s7952_s22 + $0x678] sm:$0xff]  }
  0xa4   : > { %6816 = vmatprep.subr.bf16.mxu0 %v7499_v53  ;;  %v7550_v53 = vld [vmem:[%s7952_s22 + $0x638] sm:$0xff]  }
  0xa5   : > { %6837 = vmatpush3.bf16.msra.mxu1 %v7498_v52  ;;  %v7549_v52 = vld [vmem:[%s7952_s22 + $0x6f8] sm:$0xff]  }
  0xa6   : > { %6838 = vmatprep.subr.bf16.mxu1 %v7500_v54  ;;  %v7551_v54 = vld [vmem:[%s7952_s22 + $0x6b8] sm:$0xff]  }
  0xa7   : > { %6817 = vmatpush3.bf16.msra.mxu0 %v7501_v55  ;;  %v1370_v55 = vcombine.high %v1354_v50, %v1354_v50 }
  0xa8   : > { %6818 = vmatprep.subr.bf16.mxu0 %v7503_v57  ;;  %v7553_v57 = vld [vmem:[%s7952_s22 + $0x6f0] sm:$0xff]  }
  0xa9   : > { %6839 = vmatpush3.bf16.msra.mxu1 %v7502_v56  ;;  %v7552_v56 = vld [vmem:[%s7952_s22 + $0x670] sm:$0xff]  }
  0xaa   : > { %6840 = vmatprep.subr.bf16.mxu1 %v7504_v58  ;;  %v7554_v58 = vld [vmem:[%s7952_s22 + $0x630] sm:$0xff]  }
  0xab   : > { %6819 = vmatpush3.bf16.msra.mxu0 %v7505_v59  ;;  %v7555_v59 = vld [vmem:[%s7952_s22 + $0x6b0] sm:$0xff]  }
  0xac   : > { %6820 = vmatprep.subr.bf16.mxu0 %v7507_v61  ;;  %v7557_v61 = vld [vmem:[%s7952_s22 + $0x6e8] sm:$0xff]  }
  0xad   : > { %6841 = vmatpush3.bf16.msra.mxu1 %v7506_v60  ;;  %v7556_v60 = vld [vmem:[%s7952_s22 + $0x668] sm:$0xff]  }
  0xae   : > { %6842 = vmatprep.subr.bf16.mxu1 %v7508_v63  ;;  %v7559_v63 = vld [vmem:[%s7952_s22 + $0x6a8] sm:$0xff]  }
  0xaf   : > { %6821 = vmatpush3.bf16.msra.mxu0 %v7509_v2  ;;  %v7562_v2 = vld [vmem:[%s7952_s22 + $0x620] sm:$0xff]  }
  0xb0   : > { %6822 = vmatprep.subr.bf16.mxu0 %v7511_v6  ;;  %v7566_v6 = vld [vmem:[%s7952_s22 + $0x618] sm:$0xff]  }
  0xb1   : > { %6843 = vmatpush3.bf16.msra.mxu1 %v7510_v3  ;;  %v7563_v3 = vld [vmem:[%s7952_s22 + $0x6a0] sm:$0xff]  }
  0xb2   : > { %6844 = vmatprep.subr.bf16.mxu1 %v7512_v7  ;;  %v7567_v7 = vld [vmem:[%s7952_s22 + $0x698] sm:$0xff]  }
  0xb3   : > { %6823 = vmatpush3.bf16.msra.mxu0 %v7513_v10  ;;  %v7570_v10 = vld [vmem:[%s7952_s22 + $0x610] sm:$0xff]  }
  0xb4   : > { %6852 = vmatprep.subr.bf16.mxu0 %v7515_v14  ;;  %v189_v14 = vld [vmem:[%s7947_s18 + $0x18] sm:$0xff] }
  0xb5   : > { %6845 = vmatpush3.bf16.msra.mxu1 %v7514_v11  ;;  %v7571_v11 = vld [vmem:[%s7952_s22 + $0x690] sm:$0xff]  }
  0xb6   : > { %5107 = vmatmul.mubr.bf16.vlgmr.msra.gmra.mxu0 %v1347_v13  ;;  %6874 = vmatprep.subr.bf16.mxu1 %v7516_v15  ;;  %v7573_v13 = vld [vmem:[%s7952_s22 + $0x6c8] sm:$0xff]  }
  0xb7   : > { %6853 = vmatpush3.bf16.msra.mxu0 %v7517_v17  ;;  %5186 = vmatprep.mubr.bf16.mxu0 %v1368_v16  ;;  %v7574_v15 = vld [vmem:[%s7952_s22 + $0x608] sm:$0xff]   ;;  %v1380_v16 = vrot.slane %v189_v14, %v7990_v42  ;;  %v1373_v17 = vcombine.high %v189_v14, %v189_v14  ;;  %v7614_v14 = vld [vmem:[%s7952_s22 + $0x8f8] sm:$0xff]  }
  0xb8   : > { %5147 = vmatmul.mubr.bf16.vlgmr.msra.gmra.mxu1 %v1369_v19  ;;  %6854 = vmatprep.subr.bf16.mxu0 %v7519_v20  ;;  %v7576_v19 = vld [vmem:[%s7952_s22 + $0x640] sm:$0xff]  }
  0xb9   : > { %6875 = vmatpush3.bf16.msra.mxu1 %v7518_v18  ;;  %5226 = vmatprep.mubr.bf16.mxu1 %v1372_v22  ;;  %v7575_v18 = vld [vmem:[%s7952_s22 + $0x688] sm:$0xff]   ;;  %v1388_v20 = vcombine.high %v1380_v16, %v1380_v16  ;;  %v7577_v22 = vld [vmem:[%s7952_s22 + $0x6c0] sm:$0xff]  }
  0xba   : > { %6876 = vmatprep.subr.bf16.mxu1 %v7520_v21  ;;  %v8217_v21 = vrot.slane %v1373_v17, %v7990_v42 }
  0xbb   : > { %6855 = vmatpush3.bf16.msra.mxu0 %v7521_v23  ;;  %v7578_v23 = vld [vmem:[%s7952_s22 + $0x600] sm:$0xff]  }
  0xbc   : > { %6856 = vmatprep.subr.bf16.mxu0 %v7523_v25  ;;  %v1389_v25 = vcombine.high %v8217_v21, %v8217_v21 }
  0xbd   : > { %6877 = vmatpush3.bf16.msra.mxu1 %v7522_v24  ;;  %v1410_v24 = vrot.slane %v1388_v20, %v7990_v42 }
  0xbe   : > { %6878 = vmatprep.subr.bf16.mxu1 %v7524_v26  ;;  %v7579_v26 = vld [vmem:[%s7952_s22 + $0x680] sm:$0xff]  }
  0xbf   : > { %6857 = vmatpush3.bf16.msra.mxu0 %v7525_v27  ;;  %v1420_v27 = vcombine.high %v1410_v24, %v1410_v24 }
  0xc0   : > { %6858 = vmatprep.subr.bf16.mxu0 %v7527_v29  ;;  %v7580_v29 = vld [vmem:[%s7952_s22 + $0x778] sm:$0xff]  }
  0xc1   : > { %6879 = vmatpush3.bf16.msra.mxu1 %v7526_v28  ;;  %v1396_v28 = vrot.slane %v1380_v16, %v7990_v42  ;;  %v7616_v16 = vld [vmem:[%s7952_s22 + $0x8b8] sm:$0xff]  }
  0xc2   : > { %6880 = vmatprep.subr.bf16.mxu1 %v7528_v30  ;;  %v7581_v30 = vld [vmem:[%s7952_s22 + $0x7f8] sm:$0xff]  }
  0xc3   : > { %6859 = vmatpush3.bf16.msra.mxu0 %v7529_v31  ;;  %v1417_v31 = vrot.slane %v1389_v25, %v7990_v42  ;;  %v7621_v25 = vld [vmem:[%s7952_s22 + $0x868] sm:$0xff]  }
  0xc4   : > { %6860 = vmatprep.subr.bf16.mxu0 %v7531_v33  ;;  %v7583_v33 = vld [vmem:[%s7952_s22 + $0x7b8] sm:$0xff]  }
  0xc5   : > { %6881 = vmatpush3.bf16.msra.mxu1 %v7530_v32  ;;  %v7582_v32 = vld [vmem:[%s7952_s22 + $0x738] sm:$0xff]  }
  0xc6   : > { %6882 = vmatprep.subr.bf16.mxu1 %v7532_v34  ;;  %v1418_v34 = vcombine.high %v1396_v28, %v1396_v28 }
  0xc7   : > { %6861 = vmatpush3.bf16.msra.mxu0 %v7533_v35  ;;  %v7584_v35 = vld [vmem:[%s7952_s22 + $0x770] sm:$0xff]  }
  0xc8   : > { %6862 = vmatprep.subr.bf16.mxu0 %v7535_v37  ;;  %v1421_v37 = vcombine.high %v1417_v31, %v1417_v31 }
  0xc9   : > { %6883 = vmatpush3.bf16.msra.mxu1 %v7534_v36  ;;  %v7585_v36 = vld [vmem:[%s7952_s22 + $0x7f0] sm:$0xff]  }
  0xca   : > { %6884 = vmatprep.subr.bf16.mxu1 %v7536_v38 }
  0xcb   : > { %6863 = vmatpush3.bf16.msra.mxu0 %v7537_v39  ;;  %v7586_v39 = vld [vmem:[%s7952_s22 + $0x730] sm:$0xff]  }
  0xcc   : > { %6864 = vmatprep.subr.bf16.mxu0 %v7539_v41 }
  0xcd   : > { %6885 = vmatpush3.bf16.msra.mxu1 %v7538_v40  ;;  %v7587_v40 = vld [vmem:[%s7952_s22 + $0x7b0] sm:$0xff]  }
  0xce   : > { %6886 = vmatprep.subr.bf16.mxu1 %v7540_v43 }
  0xcf   : > { %6865 = vmatpush3.bf16.msra.mxu0 %v7541_v44  ;;  %v7588_v44 = vld [vmem:[%s7952_s22 + $0x768] sm:$0xff]  }
  0xd0   : > { %6866 = vmatprep.subr.bf16.mxu0 %v7543_v46  ;;  %v7589_v46 = vld [vmem:[%s7952_s22 + $0x7e8] sm:$0xff]  }
  0xd1   : > { %6887 = vmatpush3.bf16.msra.mxu1 %v7542_v45 }
  0xd2   : > { %6888 = vmatprep.subr.bf16.mxu1 %v7544_v47 }
  0xd3   : > { %6867 = vmatpush3.bf16.msra.mxu0 %v7545_v48 }
  0xd4   : > { %6896 = vmatprep.subr.bf16.mxu0 %v7548_v51  ;;  %v7591_v51 = vld [vmem:[%s7952_s22 + $0x7a8] sm:$0xff]  }
  0xd5   : > { %6889 = vmatpush3.bf16.msra.mxu1 %v7546_v49  ;;  %v7590_v49 = vld [vmem:[%s7952_s22 + $0x728] sm:$0xff]  }
  0xd6   : > { %5187 = vmatmul.mubr.bf16.vlgmr.msra.gmra.mxu0 %v1354_v50  ;;  %6918 = vmatprep.subr.bf16.mxu1 %v7549_v52 }
  0xd7   : > { %6897 = vmatpush3.bf16.msra.mxu0 %v7550_v53  ;;  %5266 = vmatprep.mubr.bf16.mxu0 %v1410_v24 }
  0xd8   : > { %5227 = vmatmul.mubr.bf16.vlgmr.msra.gmra.mxu1 %v1370_v55  ;;  %6898 = vmatprep.subr.bf16.mxu0 %v7552_v56  ;;  %v7593_v56 = vld [vmem:[%s7952_s22 + $0x7e0] sm:$0xff]  }
  0xd9   : > { %6919 = vmatpush3.bf16.msra.mxu1 %v7551_v54  ;;  %5306 = vmatprep.mubr.bf16.mxu1 %v1420_v27  ;;  %v7592_v54 = vld [vmem:[%s7952_s22 + $0x760] sm:$0xff]   ;;  %v7622_v27 = vld [vmem:[%s7952_s22 + $0x8e8] sm:$0xff]  }
  0xda   : > { %6920 = vmatprep.subr.bf16.mxu1 %v7553_v57 }
  0xdb   : > { %6899 = vmatpush3.bf16.msra.mxu0 %v7554_v58  ;;  %v7594_v58 = vld [vmem:[%s7952_s22 + $0x720] sm:$0xff]  }
  0xdc   : > { %6900 = vmatprep.subr.bf16.mxu0 %v7556_v60  ;;  %v7596_v60 = vld [vmem:[%s7952_s22 + $0x758] sm:$0xff]  }
  0xdd   : > { %6921 = vmatpush3.bf16.msra.mxu1 %v7555_v59  ;;  %v7595_v59 = vld [vmem:[%s7952_s22 + $0x7a0] sm:$0xff]  }
  0xde   : > { %6922 = vmatprep.subr.bf16.mxu1 %v7557_v61  ;;  %v7597_v61 = vld [vmem:[%s7952_s22 + $0x7d8] sm:$0xff]  }
  0xdf   : > { %6901 = vmatpush3.bf16.msra.mxu0 %v7558_v62  ;;  %v7598_v62 = vld [vmem:[%s7952_s22 + $0x718] sm:$0xff]  }
  0xe0   : > { %6902 = vmatprep.subr.bf16.mxu0 %v7560_v0  ;;  %v7600_v0 = vld [vmem:[%s7952_s22 + $0x750] sm:$0xff]  }
  0xe1   : > { %6923 = vmatpush3.bf16.msra.mxu1 %v7559_v63  ;;  %v7599_v63 = vld [vmem:[%s7952_s22 + $0x798] sm:$0xff]  }
  0xe2   : > { %6924 = vmatprep.subr.bf16.mxu1 %v7561_v1  ;;  %v7601_v1 = vld [vmem:[%s7952_s22 + $0x7d0] sm:$0xff]  }
  0xe3   : > { %6903 = vmatpush3.bf16.msra.mxu0 %v7562_v2  ;;  %v7602_v2 = vld [vmem:[%s7952_s22 + $0x710] sm:$0xff]  }
  0xe4   : > { %6904 = vmatprep.subr.bf16.mxu0 %v7564_v4  ;;  %v7604_v4 = vld [vmem:[%s7952_s22 + $0x748] sm:$0xff]  }
  0xe5   : > { %6925 = vmatpush3.bf16.msra.mxu1 %v7563_v3  ;;  %v7603_v3 = vld [vmem:[%s7952_s22 + $0x790] sm:$0xff]  }
  0xe6   : > { %6926 = vmatprep.subr.bf16.mxu1 %v7565_v5  ;;  %v7605_v5 = vld [vmem:[%s7952_s22 + $0x7c8] sm:$0xff]  }
  0xe7   : > { %6905 = vmatpush3.bf16.msra.mxu0 %v7566_v6  ;;  %v7606_v6 = vld [vmem:[%s7952_s22 + $0x708] sm:$0xff]  }
  0xe8   : > { %6906 = vmatprep.subr.bf16.mxu0 %v7568_v8  ;;  %v7608_v8 = vld [vmem:[%s7952_s22 + $0x740] sm:$0xff]  }
  0xe9   : > { %6927 = vmatpush3.bf16.msra.mxu1 %v7567_v7  ;;  %v7607_v7 = vld [vmem:[%s7952_s22 + $0x788] sm:$0xff]  }
  0xea   : > { %6928 = vmatprep.subr.bf16.mxu1 %v7569_v9  ;;  %v7609_v9 = vld [vmem:[%s7952_s22 + $0x7c0] sm:$0xff]  }
  0xeb   : > { %6907 = vmatpush3.bf16.msra.mxu0 %v7570_v10  ;;  %v7610_v10 = vld [vmem:[%s7952_s22 + $0x700] sm:$0xff]  }
  0xec   : > { %6908 = vmatprep.subr.bf16.mxu0 %v7572_v12  ;;  %v1403_v12 = vrot.slane %v8217_v21, %v7990_v42  ;;  %v7619_v21 = vld [vmem:[%s7952_s22 + $0x830] sm:$0xff]  }
  0xed   : > { %6929 = vmatpush3.bf16.msra.mxu1 %v7571_v11  ;;  %v7611_v11 = vld [vmem:[%s7952_s22 + $0x780] sm:$0xff]  }
  0xee   : > { %6930 = vmatprep.subr.bf16.mxu1 %v7573_v13  ;;  %v7613_v13 = vld [vmem:[%s7952_s22 + $0x878] sm:$0xff]   ;;  %v1419_v17 = vcombine.high %v1403_v12, %v1403_v12 }
  0xef   : > { %6909 = vmatpush3.bf16.msra.mxu0 %v7574_v15  ;;  %v7615_v15 = vld [vmem:[%s7952_s22 + $0x838] sm:$0xff]  }
  0xf0   : > { %6910 = vmatprep.subr.bf16.mxu0 %v7576_v19  ;;  %v7618_v19 = vld [vmem:[%s7952_s22 + $0x8f0] sm:$0xff]  }
  0xf1   : > { %6931 = vmatpush3.bf16.msra.mxu1 %v7575_v18  ;;  %v7617_v18 = vld [vmem:[%s7952_s22 + $0x870] sm:$0xff]  }
  0xf2   : > { %6932 = vmatprep.subr.bf16.mxu1 %v7577_v22  ;;  %v7620_v22 = vld [vmem:[%s7952_s22 + $0x8b0] sm:$0xff]  }
  0xf3   : > { %6911 = vmatpush3.bf16.msra.mxu0 %v7578_v23 }
  0xf4   : > { %6940 = vmatprep.subr.bf16.mxu0 %v7580_v29 }
  0xf5   : > { %6933 = vmatpush3.bf16.msra.mxu1 %v7579_v26 }
  0xf6   : > { %v6648_v38 = vpop.f32.mrf.mxu0  ;;  %5267 = vmatmul.mubr.bf16.vlgmr.msra.gmra.mxu0 %v1396_v28  ;;  %6962 = vmatprep.subr.bf16.mxu1 %v7581_v30  ;;  %v7623_v30 = vld [vmem:[%s7952_s22 + $0x828] sm:$0xff]  }
  0xf7   : > { %6941 = vmatpush3.bf16.msra.mxu0 %v7582_v32  ;;  %5346 = vmatprep.mubr.bf16.mxu0 %v1417_v31  ;;  %v6670_v41 = vpop.f32.mrf.mxu1 }
  0xf8   : > { %5307 = vmatmul.mubr.bf16.vlgmr.msra.gmra.mxu1 %v1418_v34  ;;  %v6649_v43 = vpop.f32.mrf.mxu0  ;;  %6942 = vmatprep.subr.bf16.mxu0 %v7584_v35 }
  0xf9   : > { %6963 = vmatpush3.bf16.msra.mxu1 %v7583_v33  ;;  %v6650_v45 = vadd.f32 %v6649_v43, %v6648_v38  ;;  %5386 = vmatprep.mubr.bf16.mxu1 %v1421_v37  ;;  %v6671_v47 = vpop.f32.mrf.mxu1  ;;  %v7624_v33 = vld [vmem:[%s7952_s22 + $0x8a8] sm:$0xff]   ;;  %v7626_v38 = vld [vmem:[%s7952_s22 + $0x8e0] sm:$0xff]   ;;  %v7629_v43 = vld [vmem:[%s7952_s22 + $0x858] sm:$0xff]  }
  0xfa   : > { %v6651_v48 = vpop.f32.mrf.mxu0  ;;  %6964 = vmatprep.subr.bf16.mxu1 %v7585_v36  ;;  %v6672_v50 = vadd.f32 %v6671_v47, %v6670_v41  ;;  %v7625_v36 = vld [vmem:[%s7952_s22 + $0x860] sm:$0xff]   ;;  %v7633_v47 = vld [vmem:[%s7952_s22 + $0x850] sm:$0xff]  }
  0xfb   : > { %6943 = vmatpush3.bf16.msra.mxu0 %v7586_v39  ;;  %v6673_v52 = vpop.f32.mrf.mxu1  ;;  %v7628_v41 = vld [vmem:[%s7952_s22 + $0x8a0] sm:$0xff]   ;;  %v7634_v48 = vld [vmem:[%s7952_s22 + $0x8d0] sm:$0xff]  }
  0xfc   : > { %v6652_v53 = vpop.f32.mrf.mxu0  ;;  %6944 = vmatprep.subr.bf16.mxu0 %v7588_v44  ;;  %v8240_v55 = vadd.f32 %v6672_v50, %v6650_v45  ;;  %v7630_v44 = vld [vmem:[%s7952_s22 + $0x8d8] sm:$0xff]   ;;  %v7636_v50 = vld [vmem:[%s7952_s22 + $0x890] sm:$0xff]   ;;  %v7638_v52 = vld [vmem:[%s7952_s22 + $0x8c8] sm:$0xff]  }
  0xfd   : > { %6965 = vmatpush3.bf16.msra.mxu1 %v7587_v40  ;;  %v6674_v57 = vpop.f32.mrf.mxu1  ;;  %v7627_v40 = vld [vmem:[%s7952_s22 + $0x820] sm:$0xff]   ;;  %v7631_v45 = vld [vmem:[%s7952_s22 + $0x818] sm:$0xff]  }
  0xfe   : > { %6966 = vmatprep.subr.bf16.mxu1 %v7589_v46  ;;  %v7632_v46 = vld [vmem:[%s7952_s22 + $0x898] sm:$0xff]   ;;  %v190_v53 = vld [vmem:[%s7947_s18 + $0x20] sm:$0xff]  ;;  %v7640_v57 = vld [vmem:[%s7952_s22 + $0x888] sm:$0xff]  }
  0xff   : > { %6945 = vmatpush3.bf16.msra.mxu0 %v7590_v49  ;;  %v7635_v49 = vld [vmem:[%s7952_s22 + $0x810] sm:$0xff]  }
 0x100   : > { %6946 = vmatprep.subr.bf16.mxu0 %v7592_v54  ;;  %v7639_v54 = vld [vmem:[%s7952_s22 + $0x808] sm:$0xff]  }
 0x101   : > { %6967 = vmatpush3.bf16.msra.mxu1 %v7591_v51  ;;  %v7637_v51 = vld [vmem:[%s7952_s22 + $0x848] sm:$0xff]  }
 0x102   : > { %6968 = vmatprep.subr.bf16.mxu1 %v7593_v56  ;;  %v1422_v56 = vcombine.high %v190_v53, %v190_v53 }
 0x103   : > { %6947 = vmatpush3.bf16.msra.mxu0 %v7594_v58  ;;  %v7641_v58 = vld [vmem:[%s7952_s22 + $0x840] sm:$0xff]  }
 0x104   : > { %6948 = vmatprep.subr.bf16.mxu0 %v7596_v60  ;;  %v8298_v60 = vrot.slane %v1422_v56, %v7990_v42  ;;  %v7681_v56 = vld [vmem:[%s7952_s22 + $0xab8] sm:$0xff]  }
 0x105   : > { %6969 = vmatpush3.bf16.msra.mxu1 %v7595_v59 }
 0x106   : > { %6970 = vmatprep.subr.bf16.mxu1 %v7597_v61  ;;  %v7642_v61 = vld [vmem:[%s7952_s22 + $0x8c0] sm:$0xff]  }
 0x107   : > { %6949 = vmatpush3.bf16.msra.mxu0 %v7598_v62  ;;  %v7643_v62 = vld [vmem:[%s7952_s22 + $0x800] sm:$0xff]  }
 0x108   : > { %6950 = vmatprep.subr.bf16.mxu0 %v7600_v0  ;;  %v1438_v0 = vcombine.high %v8298_v60, %v8298_v60 }
 0x109   : > { %6971 = vmatpush3.bf16.msra.mxu1 %v7599_v63 }
 0x10a   : > { %6972 = vmatprep.subr.bf16.mxu1 %v7601_v1  ;;  %v7644_v1 = vld [vmem:[%s7952_s22 + $0x880] sm:$0xff]  }
 0x10b   : > { %6951 = vmatpush3.bf16.msra.mxu0 %v7602_v2 }
 0x10c   : > { %6952 = vmatprep.subr.bf16.mxu0 %v7604_v4  ;;  %v7645_v4 = vld [vmem:[%s7952_s22 + $0x978] sm:$0xff]  }
 0x10d   : > { %6973 = vmatpush3.bf16.msra.mxu1 %v7603_v3 }
 0x10e   : > { %6974 = vmatprep.subr.bf16.mxu1 %v7605_v5  ;;  %v7646_v5 = vld [vmem:[%s7952_s22 + $0x9f8] sm:$0xff]  }
 0x10f   : > { %6953 = vmatpush3.bf16.msra.mxu0 %v7606_v6  ;;  %v1466_v6 = vrot.slane %v1438_v0, %v7990_v42 }
 0x110   : > { %6954 = vmatprep.subr.bf16.mxu0 %v7608_v8  ;;  %v7648_v8 = vld [vmem:[%s7952_s22 + $0x9b8] sm:$0xff]  }
 0x111   : > { %6975 = vmatpush3.bf16.msra.mxu1 %v7607_v7  ;;  %v7647_v7 = vld [vmem:[%s7952_s22 + $0x938] sm:$0xff]  }
 0x112   : > { %6976 = vmatprep.subr.bf16.mxu1 %v7609_v9 }
 0x113   : > { %6955 = vmatpush3.bf16.msra.mxu0 %v7610_v10  ;;  %v7649_v10 = vld [vmem:[%s7952_s22 + $0x970] sm:$0xff]  }
 0x114   : > { %6984 = vmatprep.subr.bf16.mxu0 %v7613_v13 }
 0x115   : > { %6977 = vmatpush3.bf16.msra.mxu1 %v7611_v11  ;;  %v7650_v11 = vld [vmem:[%s7952_s22 + $0x9f0] sm:$0xff]  }
 0x116   : > { %v6692_v20 = vpop.f32.mrf.mxu0  ;;  %5347 = vmatmul.mubr.bf16.vlgmr.msra.gmra.mxu0 %v1403_v12  ;;  %7006 = vmatprep.subr.bf16.mxu1 %v7614_v14  ;;  %v1470_v12 = vcombine.high %v1466_v6, %v1466_v6  ;;  %v7651_v14 = vld [vmem:[%s7952_s22 + $0x930] sm:$0xff]  }
 0x117   : > { %6985 = vmatpush3.bf16.msra.mxu0 %v7615_v15  ;;  %v6714_v23 = vpop.f32.mrf.mxu1  ;;  %v7652_v15 = vld [vmem:[%s7952_s22 + $0x9b0] sm:$0xff]  }
 0x118   : > { %5387 = vmatmul.mubr.bf16.vlgmr.msra.gmra.mxu1 %v1419_v17  ;;  %v6693_v24 = vpop.f32.mrf.mxu0  ;;  %6986 = vmatprep.subr.bf16.mxu0 %v7617_v18  ;;  %v7653_v18 = vld [vmem:[%s7952_s22 + $0x968] sm:$0xff]  }
 0x119   : > { %7007 = vmatpush3.bf16.msra.mxu1 %v7616_v16  ;;  %v6694_v26 = vadd.f32 %v6693_v24, %v6692_v20  ;;  %v6715_v28 = vpop.f32.mrf.mxu1  ;;  %v7654_v20 = vld [vmem:[%s7952_s22 + $0x9e8] sm:$0xff]  }
 0x11a   : > { %v6695_v29 = vpop.f32.mrf.mxu0  ;;  %7008 = vmatprep.subr.bf16.mxu1 %v7618_v19  ;;  %v6716_v32 = vadd.f32 %v6715_v28, %v6714_v23  ;;  %v7655_v23 = vld [vmem:[%s7952_s22 + $0x928] sm:$0xff]  }
 0x11b   : > { %v4869_v31 = vadd.f32 %v6694_v26, %v8240_v55  ;;  %6987 = vmatpush3.bf16.msra.mxu0 %v7619_v21  ;;  %v6717_v34 = vpop.f32.mrf.mxu1  ;;  %v1429_v55 = vrot.slane %v190_v53, %v7990_v42  ;;  %v7656_v26 = vld [vmem:[%s7952_s22 + $0x9a8] sm:$0xff]   ;;  %v7657_v29 = vld [vmem:[%s7952_s22 + $0x960] sm:$0xff]   ;;  %v7678_v53 = vld [vmem:[%s7952_s22 + $0xa78] sm:$0xff]  }
 0x11c   : > { %v6696_v35 = vpop.f32.mrf.mxu0  ;;  %6988 = vmatprep.subr.bf16.mxu0 %v7621_v25  ;;  %v7660_v34 = vld [vmem:[%s7952_s22 + $0x9a0] sm:$0xff]  }
 0x11d   : > { %v8277_v37 = vadd.f32 %v6716_v32, %v4869_v31  ;;  %7009 = vmatpush3.bf16.msra.mxu1 %v7620_v22  ;;  %v6718_v39 = vpop.f32.mrf.mxu1  ;;  %v1437_v59 = vcombine.high %v1429_v55, %v1429_v55  ;;  %v1445_v3 = vrot.slane %v1429_v55, %v7990_v42  ;;  %v7658_v31 = vld [vmem:[%s7952_s22 + $0x9e0] sm:$0xff]   ;;  %v7661_v35 = vld [vmem:[%s7952_s22 + $0x958] sm:$0xff]  }
 0x11e   : > { %7010 = vmatprep.subr.bf16.mxu1 %v7622_v27  ;;  %v7665_v39 = vld [vmem:[%s7952_s22 + $0x950] sm:$0xff]   ;;  %v7680_v55 = vld [vmem:[%s7952_s22 + $0xa38] sm:$0xff]  }
 0x11f   : > { %6989 = vmatpush3.bf16.msra.mxu0 %v7623_v30  ;;  %v1459_v63 = vrot.slane %v1437_v59, %v7990_v42  ;;  %v1467_v9 = vcombine.high %v1445_v3, %v1445_v3  ;;  %v7683_v59 = vld [vmem:[%s7952_s22 + $0xaf0] sm:$0xff]  }
 0x120   : > { %6990 = vmatprep.subr.bf16.mxu0 %v7625_v36  ;;  %v7662_v36 = vld [vmem:[%s7952_s22 + $0x9d8] sm:$0xff]  }
 0x121   : > { %7011 = vmatpush3.bf16.msra.mxu1 %v7624_v33  ;;  %5426 = vmatprep.mubr.bf16.mxu0 %v1459_v63  ;;  %v1469_v2 = vcombine.high %v1459_v63, %v1459_v63  ;;  %v7659_v33 = vld [vmem:[%s7952_s22 + $0x920] sm:$0xff]  }
 0x122   : > { %7012 = vmatprep.subr.bf16.mxu1 %v7626_v38  ;;  %v7664_v38 = vld [vmem:[%s7952_s22 + $0x998] sm:$0xff]  }
 0x123   : > { %6991 = vmatpush3.bf16.msra.mxu0 %v7627_v40  ;;  %5466 = vmatprep.mubr.bf16.mxu1 %v1469_v2  ;;  %v7666_v40 = vld [vmem:[%s7952_s22 + $0x9d0] sm:$0xff]  }
 0x124   : > { %6992 = vmatprep.subr.bf16.mxu0 %v7629_v43  ;;  %v7668_v43 = vld [vmem:[%s7952_s22 + $0x990] sm:$0xff]  }
 0x125   : > { %7013 = vmatpush3.bf16.msra.mxu1 %v7628_v41  ;;  %v7667_v41 = vld [vmem:[%s7952_s22 + $0x910] sm:$0xff]  }
 0x126   : > { %7014 = vmatprep.subr.bf16.mxu1 %v7630_v44  ;;  %v7669_v44 = vld [vmem:[%s7952_s22 + $0x948] sm:$0xff]  }
 0x127   : > { %6993 = vmatpush3.bf16.msra.mxu0 %v7631_v45  ;;  %v7670_v45 = vld [vmem:[%s7952_s22 + $0x9c8] sm:$0xff]  }
 0x128   : > { %6994 = vmatprep.subr.bf16.mxu0 %v7633_v47  ;;  %v7672_v47 = vld [vmem:[%s7952_s22 + $0x988] sm:$0xff]  }
 0x129   : > { %7015 = vmatpush3.bf16.msra.mxu1 %v7632_v46  ;;  %v7671_v46 = vld [vmem:[%s7952_s22 + $0x908] sm:$0xff]  }
 0x12a   : > { %7016 = vmatprep.subr.bf16.mxu1 %v7634_v48  ;;  %v7673_v48 = vld [vmem:[%s7952_s22 + $0x940] sm:$0xff]  }
 0x12b   : > { %6995 = vmatpush3.bf16.msra.mxu0 %v7635_v49  ;;  %v7674_v49 = vld [vmem:[%s7952_s22 + $0x9c0] sm:$0xff]  }
 0x12c   : > { %6996 = vmatprep.subr.bf16.mxu0 %v7637_v51  ;;  %v7676_v51 = vld [vmem:[%s7952_s22 + $0x980] sm:$0xff]  }
 0x12d   : > { %7017 = vmatpush3.bf16.msra.mxu1 %v7636_v50  ;;  %v7675_v50 = vld [vmem:[%s7952_s22 + $0x900] sm:$0xff]  }
 0x12e   : > { %7018 = vmatprep.subr.bf16.mxu1 %v7638_v52  ;;  %v1452_v52 = vrot.slane %v8298_v60, %v7990_v42  ;;  %v7684_v60 = vld [vmem:[%s7952_s22 + $0xa30] sm:$0xff]  }
 0x12f   : > { %6997 = vmatpush3.bf16.msra.mxu0 %v7639_v54  ;;  %v7679_v54 = vld [vmem:[%s7952_s22 + $0xaf8] sm:$0xff]  }
 0x130   : > { %6998 = vmatprep.subr.bf16.mxu0 %v7641_v58  ;;  %v7682_v58 = vld [vmem:[%s7952_s22 + $0xa70] sm:$0xff]  }
 0x131   : > { %7019 = vmatpush3.bf16.msra.mxu1 %v7640_v57  ;;  %v1468_v57 = vcombine.high %v1452_v52, %v1452_v52 }
 0x132   : > { %7020 = vmatprep.subr.bf16.mxu1 %v7642_v61 }
 0x133   : > { %6999 = vmatpush3.bf16.msra.mxu0 %v7643_v62  ;;  %v7685_v62 = vld [vmem:[%s7952_s22 + $0xab0] sm:$0xff]  }
 0x134   : > { %7028 = vmatprep.subr.bf16.mxu0 %v7645_v4 }
 0x135   : > { %7021 = vmatpush3.bf16.msra.mxu1 %v7644_v1  ;;  %v7686_v1 = vld [vmem:[%s7952_s22 + $0xa68] sm:$0xff]  }
 0x136   : > { %v6736_v13 = vpop.f32.mrf.mxu0  ;;  %5427 = vmatmul.mubr.bf16.vlgmr.msra.gmra.mxu0 %v1445_v3  ;;  %7050 = vmatprep.subr.bf16.mxu1 %v7646_v5  ;;  %v7687_v3 = vld [vmem:[%s7952_s22 + $0xae8] sm:$0xff]  }
 0x137   : > { %7029 = vmatpush3.bf16.msra.mxu0 %v7647_v7  ;;  %5506 = vmatprep.mubr.bf16.mxu0 %v1466_v6  ;;  %v7688_v6 = vld [vmem:[%s7952_s22 + $0xa28] sm:$0xff]  }
 0x138   : > { %v6758_v16 = vpop.f32.mrf.mxu1  ;;  %5467 = vmatmul.mubr.bf16.vlgmr.msra.gmra.mxu1 %v1467_v9  ;;  %v6737_v17 = vpop.f32.mrf.mxu0  ;;  %7030 = vmatprep.subr.bf16.mxu0 %v7649_v10  ;;  %v7689_v9 = vld [vmem:[%s7952_s22 + $0xaa8] sm:$0xff]  }
 0x139   : > { %7051 = vmatpush3.bf16.msra.mxu1 %v7648_v8  ;;  %v6738_v19 = vadd.f32 %v6737_v17, %v6736_v13  ;;  %5546 = vmatprep.mubr.bf16.mxu1 %v1470_v12  ;;  %v7690_v12 = vld [vmem:[%s7952_s22 + $0xa60] sm:$0xff]  }
 0x13a   : > { %v6759_v21 = vpop.f32.mrf.mxu1  ;;  %v6739_v22 = vpop.f32.mrf.mxu0  ;;  %7052 = vmatprep.subr.bf16.mxu1 %v7650_v11  ;;  %v7693_v17 = vld [vmem:[%s7952_s22 + $0xaa0] sm:$0xff]  }
 0x13b   : > { %v4949_v24 = vadd.f32 %v6738_v19, %v8277_v37  ;;  %v6760_v25 = vadd.f32 %v6759_v21, %v6758_v16  ;;  %7031 = vmatpush3.bf16.msra.mxu0 %v7651_v14  ;;  %v7663_v37 = vld [vmem:[%s7952_s22 + $0x918] sm:$0xff]   ;;  %v7691_v14 = vld [vmem:[%s7952_s22 + $0xae0] sm:$0xff]   ;;  %v7698_v22 = vld [vmem:[%s7952_s22 + $0xa50] sm:$0xff]  }
 0x13c   : > { %v6761_v27 = vpop.f32.mrf.mxu1  ;;  %v6740_v28 = vpop.f32.mrf.mxu0  ;;  %7032 = vmatprep.subr.bf16.mxu0 %v7653_v18  ;;  %v7692_v16 = vld [vmem:[%s7952_s22 + $0xa20] sm:$0xff]   ;;  %v7694_v18 = vld [vmem:[%s7952_s22 + $0xa58] sm:$0xff]  }
 0x13d   : > { %v8322_v30 = vadd.f32 %v6760_v25, %v4949_v24  ;;  %7053 = vmatpush3.bf16.msra.mxu1 %v7652_v15  ;;  %v7695_v19 = vld [vmem:[%s7952_s22 + $0xad8] sm:$0xff]   ;;  %v7700_v24 = vld [vmem:[%s7952_s22 + $0xa10] sm:$0xff]   ;;  %v7703_v27 = vld [vmem:[%s7952_s22 + $0xac8] sm:$0xff]  }
 0x13e   : > { %v6762_v32 = vpop.f32.mrf.mxu1  ;;  %7054 = vmatprep.subr.bf16.mxu1 %v7654_v20  ;;  %v7696_v20 = vld [vmem:[%s7952_s22 + $0xa18] sm:$0xff]   ;;  %v7701_v25 = vld [vmem:[%s7952_s22 + $0xa90] sm:$0xff]   ;;  %v191_v28 = vld [vmem:[%s7947_s18 + $0x28] sm:$0xff] }
 0x13f   : > { %7033 = vmatpush3.bf16.msra.mxu0 %v7655_v23  ;;  %v7697_v21 = vld [vmem:[%s7952_s22 + $0xa98] sm:$0xff]   ;;  %v7699_v23 = vld [vmem:[%s7952_s22 + $0xad0] sm:$0xff]   ;;  %v7705_v32 = vld [vmem:[%s7952_s22 + $0xa88] sm:$0xff]  }
 0x140   : > { %7034 = vmatprep.subr.bf16.mxu0 %v7657_v29  ;;  %v7704_v29 = vld [vmem:[%s7952_s22 + $0xa08] sm:$0xff]  }
 0x141   : > { %7055 = vmatpush3.bf16.msra.mxu1 %v7656_v26  ;;  %v7702_v26 = vld [vmem:[%s7952_s22 + $0xa48] sm:$0xff]  }
 0x142   : > { %7056 = vmatprep.subr.bf16.mxu1 %v7658_v31  ;;  %v1471_v31 = vcombine.high %v191_v28, %v191_v28 }
 0x143   : > { %7035 = vmatpush3.bf16.msra.mxu0 %v7659_v33  ;;  %v7706_v33 = vld [vmem:[%s7952_s22 + $0xa40] sm:$0xff]  }
 0x144   : > { %7036 = vmatprep.subr.bf16.mxu0 %v7661_v35  ;;  %v8380_v35 = vrot.slane %v1471_v31, %v7990_v42  ;;  %v7746_v31 = vld [vmem:[%s7952_s22 + $0xcb8] sm:$0xff]  }
 0x145   : > { %7057 = vmatpush3.bf16.msra.mxu1 %v7660_v34 }
 0x146   : > { %7058 = vmatprep.subr.bf16.mxu1 %v7662_v36  ;;  %v7707_v36 = vld [vmem:[%s7952_s22 + $0xac0] sm:$0xff]  }
 0x147   : > { %7037 = vmatpush3.bf16.msra.mxu0 %v7663_v37  ;;  %v7708_v37 = vld [vmem:[%s7952_s22 + $0xa00] sm:$0xff]  }
 0x148   : > { %7038 = vmatprep.subr.bf16.mxu0 %v7665_v39  ;;  %v1487_v39 = vcombine.high %v8380_v35, %v8380_v35 }
 0x149   : > { %7059 = vmatpush3.bf16.msra.mxu1 %v7664_v38 }
 0x14a   : > { %7060 = vmatprep.subr.bf16.mxu1 %v7666_v40  ;;  %v7709_v40 = vld [vmem:[%s7952_s22 + $0xa80] sm:$0xff]  }
 0x14b   : > { %7039 = vmatpush3.bf16.msra.mxu0 %v7667_v41 }
 0x14c   : > { %7040 = vmatprep.subr.bf16.mxu0 %v7669_v44  ;;  %v7710_v44 = vld [vmem:[%s7952_s22 + $0xb78] sm:$0xff]  }
 0x14d   : > { %7061 = vmatpush3.bf16.msra.mxu1 %v7668_v43 }
 0x14e   : > { %7062 = vmatprep.subr.bf16.mxu1 %v7670_v45  ;;  %v7711_v45 = vld [vmem:[%s7952_s22 + $0xbf8] sm:$0xff]  }
 0x14f   : > { %7041 = vmatpush3.bf16.msra.mxu0 %v7671_v46  ;;  %v1515_v46 = vrot.slane %v1487_v39, %v7990_v42 }
 0x150   : > { %7042 = vmatprep.subr.bf16.mxu0 %v7673_v48  ;;  %v7713_v48 = vld [vmem:[%s7952_s22 + $0xbb8] sm:$0xff]  }
 0x151   : > { %7063 = vmatpush3.bf16.msra.mxu1 %v7672_v47  ;;  %v7712_v47 = vld [vmem:[%s7952_s22 + $0xb38] sm:$0xff]  }
 0x152   : > { %7064 = vmatprep.subr.bf16.mxu1 %v7674_v49 }
 0x153   : > { %7043 = vmatpush3.bf16.msra.mxu0 %v7675_v50  ;;  %v7714_v50 = vld [vmem:[%s7952_s22 + $0xb70] sm:$0xff]  }
 0x154   : > { %7072 = vmatprep.subr.bf16.mxu0 %v7678_v53 }
 0x155   : > { %7065 = vmatpush3.bf16.msra.mxu1 %v7676_v51  ;;  %v7715_v51 = vld [vmem:[%s7952_s22 + $0xbf0] sm:$0xff]  }
 0x156   : > { %v6780_v61 = vpop.f32.mrf.mxu0  ;;  %5507 = vmatmul.mubr.bf16.vlgmr.msra.gmra.mxu0 %v1452_v52  ;;  %7094 = vmatprep.subr.bf16.mxu1 %v7679_v54  ;;  %v1519_v52 = vcombine.high %v1515_v46, %v1515_v46  ;;  %v7716_v54 = vld [vmem:[%s7952_s22 + $0xb30] sm:$0xff]  }
 0x157   : > { %7073 = vmatpush3.bf16.msra.mxu0 %v7680_v55  ;;  %v7717_v55 = vld [vmem:[%s7952_s22 + $0xbb0] sm:$0xff]  }
 0x158   : > { %v6802_v63 = vpop.f32.mrf.mxu1  ;;  %5547 = vmatmul.mubr.bf16.vlgmr.msra.gmra.mxu1 %v1468_v57  ;;  %v6781_v0 = vpop.f32.mrf.mxu0  ;;  %7074 = vmatprep.subr.bf16.mxu0 %v7682_v58  ;;  %v7718_v58 = vld [vmem:[%s7952_s22 + $0xb68] sm:$0xff]  }
 0x159   : > { %7095 = vmatpush3.bf16.msra.mxu1 %v7681_v56  ;;  %v6782_v2 = vadd.f32 %v6781_v0, %v6780_v61  ;;  %v7719_v61 = vld [vmem:[%s7952_s22 + $0xbe8] sm:$0xff]  }
 0x15a   : > { %v6803_v4 = vpop.f32.mrf.mxu1  ;;  %v6783_v5 = vpop.f32.mrf.mxu0  ;;  %7096 = vmatprep.subr.bf16.mxu1 %v7683_v59 }
 0x15b   : > { %v5029_v7 = vadd.f32 %v6782_v2, %v8322_v30  ;;  %v6804_v8 = vadd.f32 %v6803_v4, %v6802_v63  ;;  %7075 = vmatpush3.bf16.msra.mxu0 %v7684_v60  ;;  %v1478_v30 = vrot.slane %v191_v28, %v7990_v42  ;;  %v7720_v63 = vld [vmem:[%s7952_s22 + $0xb28] sm:$0xff]   ;;  %v7722_v5 = vld [vmem:[%s7952_s22 + $0xb60] sm:$0xff]   ;;  %v7743_v28 = vld [vmem:[%s7952_s22 + $0xc78] sm:$0xff]  }
 0x15c   : > { %v6805_v10 = vpop.f32.mrf.mxu1  ;;  %v6784_v11 = vpop.f32.mrf.mxu0  ;;  %7076 = vmatprep.subr.bf16.mxu0 %v7686_v1  ;;  %v7721_v2 = vld [vmem:[%s7952_s22 + $0xba8] sm:$0xff]  }
 0x15d   : > { %v8359_v13 = vadd.f32 %v6804_v8, %v5029_v7  ;;  %7097 = vmatpush3.bf16.msra.mxu1 %v7685_v62  ;;  %v1486_v34 = vcombine.high %v1478_v30, %v1478_v30  ;;  %v1494_v43 = vrot.slane %v1478_v30, %v7990_v42  ;;  %v7723_v7 = vld [vmem:[%s7952_s22 + $0xbe0] sm:$0xff]   ;;  %v7726_v11 = vld [vmem:[%s7952_s22 + $0xb58] sm:$0xff]  }
 0x15e   : > { %v6806_v15 = vpop.f32.mrf.mxu1  ;;  %7098 = vmatprep.subr.bf16.mxu1 %v7687_v3  ;;  %v7725_v10 = vld [vmem:[%s7952_s22 + $0xba0] sm:$0xff]   ;;  %v7745_v30 = vld [vmem:[%s7952_s22 + $0xc38] sm:$0xff]  }
 0x15f   : > { %7077 = vmatpush3.bf16.msra.mxu0 %v7688_v6  ;;  %v1508_v38 = vrot.slane %v1486_v34, %v7990_v42  ;;  %v1516_v49 = vcombine.high %v1494_v43, %v1494_v43  ;;  %v7730_v15 = vld [vmem:[%s7952_s22 + $0xb50] sm:$0xff]  }
 0x160   : > { %7078 = vmatprep.subr.bf16.mxu0 %v7690_v12  ;;  %v7727_v12 = vld [vmem:[%s7952_s22 + $0xbd8] sm:$0xff]   ;;  %v7748_v34 = vld [vmem:[%s7952_s22 + $0xcf0] sm:$0xff]  }
 0x161   : > { %7099 = vmatpush3.bf16.msra.mxu1 %v7689_v9  ;;  %5586 = vmatprep.mubr.bf16.mxu0 %v1508_v38  ;;  %v1518_v41 = vcombine.high %v1508_v38, %v1508_v38  ;;  %v7724_v9 = vld [vmem:[%s7952_s22 + $0xb20] sm:$0xff]  }
 0x162   : > { %7100 = vmatprep.subr.bf16.mxu1 %v7691_v14  ;;  %v7729_v14 = vld [vmem:[%s7952_s22 + $0xb98] sm:$0xff]  }
 0x163   : > { %7079 = vmatpush3.bf16.msra.mxu0 %v7692_v16  ;;  %5626 = vmatprep.mubr.bf16.mxu1 %v1518_v41  ;;  %v7731_v16 = vld [vmem:[%s7952_s22 + $0xbd0] sm:$0xff]  }
 0x164   : > { %7080 = vmatprep.subr.bf16.mxu0 %v7694_v18  ;;  %v7733_v18 = vld [vmem:[%s7952_s22 + $0xb90] sm:$0xff]  }
 0x165   : > { %7101 = vmatpush3.bf16.msra.mxu1 %v7693_v17  ;;  %v7732_v17 = vld [vmem:[%s7952_s22 + $0xb10] sm:$0xff]  }
 0x166   : > { %7102 = vmatprep.subr.bf16.mxu1 %v7695_v19  ;;  %v7734_v19 = vld [vmem:[%s7952_s22 + $0xb48] sm:$0xff]  }
 0x167   : > { %7081 = vmatpush3.bf16.msra.mxu0 %v7696_v20  ;;  %v7735_v20 = vld [vmem:[%s7952_s22 + $0xbc8] sm:$0xff]  }
 0x168   : > { %7082 = vmatprep.subr.bf16.mxu0 %v7698_v22  ;;  %v7737_v22 = vld [vmem:[%s7952_s22 + $0xb88] sm:$0xff]  }
 0x169   : > { %7103 = vmatpush3.bf16.msra.mxu1 %v7697_v21  ;;  %v7736_v21 = vld [vmem:[%s7952_s22 + $0xb08] sm:$0xff]  }
 0x16a   : > { %7104 = vmatprep.subr.bf16.mxu1 %v7699_v23  ;;  %v7738_v23 = vld [vmem:[%s7952_s22 + $0xb40] sm:$0xff]  }
 0x16b   : > { %7083 = vmatpush3.bf16.msra.mxu0 %v7700_v24  ;;  %v7739_v24 = vld [vmem:[%s7952_s22 + $0xbc0] sm:$0xff]  }
 0x16c   : > { %7084 = vmatprep.subr.bf16.mxu0 %v7702_v26  ;;  %v7741_v26 = vld [vmem:[%s7952_s22 + $0xb80] sm:$0xff]  }
 0x16d   : > { %7105 = vmatpush3.bf16.msra.mxu1 %v7701_v25  ;;  %v7740_v25 = vld [vmem:[%s7952_s22 + $0xb00] sm:$0xff]  }
 0x16e   : > { %7106 = vmatprep.subr.bf16.mxu1 %v7703_v27  ;;  %v1501_v27 = vrot.slane %v8380_v35, %v7990_v42  ;;  %v7749_v35 = vld [vmem:[%s7952_s22 + $0xc30] sm:$0xff]  }
 0x16f   : > { %7085 = vmatpush3.bf16.msra.mxu0 %v7704_v29  ;;  %v7744_v29 = vld [vmem:[%s7952_s22 + $0xcf8] sm:$0xff]  }
 0x170   : > { %7086 = vmatprep.subr.bf16.mxu0 %v7706_v33  ;;  %v7747_v33 = vld [vmem:[%s7952_s22 + $0xc70] sm:$0xff]  }
 0x171   : > { %7107 = vmatpush3.bf16.msra.mxu1 %v7705_v32  ;;  %v1517_v32 = vcombine.high %v1501_v27, %v1501_v27 }
 0x172   : > { %7108 = vmatprep.subr.bf16.mxu1 %v7707_v36 }
 0x173   : > { %7087 = vmatpush3.bf16.msra.mxu0 %v7708_v37  ;;  %v7750_v37 = vld [vmem:[%s7952_s22 + $0xcb0] sm:$0xff]  }
 0x174   : > { %7116 = vmatprep.subr.bf16.mxu0 %v7710_v44 }
 0x175   : > { %7109 = vmatpush3.bf16.msra.mxu1 %v7709_v40  ;;  %v7751_v40 = vld [vmem:[%s7952_s22 + $0xc68] sm:$0xff]  }
 0x176   : > { %v6824_v53 = vpop.f32.mrf.mxu0  ;;  %5587 = vmatmul.mubr.bf16.vlgmr.msra.gmra.mxu0 %v1494_v43  ;;  %7138 = vmatprep.subr.bf16.mxu1 %v7711_v45  ;;  %v7752_v43 = vld [vmem:[%s7952_s22 + $0xce8] sm:$0xff]  }
 0x177   : > { %7117 = vmatpush3.bf16.msra.mxu0 %v7712_v47  ;;  %5666 = vmatprep.mubr.bf16.mxu0 %v1515_v46  ;;  %v7753_v46 = vld [vmem:[%s7952_s22 + $0xc28] sm:$0xff]  }
 0x178   : > { %v6846_v56 = vpop.f32.mrf.mxu1  ;;  %5627 = vmatmul.mubr.bf16.vlgmr.msra.gmra.mxu1 %v1516_v49  ;;  %v6825_v57 = vpop.f32.mrf.mxu0  ;;  %7118 = vmatprep.subr.bf16.mxu0 %v7714_v50  ;;  %v7754_v49 = vld [vmem:[%s7952_s22 + $0xca8] sm:$0xff]  }
 0x179   : > { %7139 = vmatpush3.bf16.msra.mxu1 %v7713_v48  ;;  %v6826_v59 = vadd.f32 %v6825_v57, %v6824_v53  ;;  %5706 = vmatprep.mubr.bf16.mxu1 %v1519_v52  ;;  %v7755_v52 = vld [vmem:[%s7952_s22 + $0xc60] sm:$0xff]  }
 0x17a   : > { %v6847_v60 = vpop.f32.mrf.mxu1  ;;  %v6827_v62 = vpop.f32.mrf.mxu0  ;;  %7140 = vmatprep.subr.bf16.mxu1 %v7715_v51  ;;  %v7758_v57 = vld [vmem:[%s7952_s22 + $0xca0] sm:$0xff]  }
 0x17b   : > { %v5109_v0 = vadd.f32 %v6826_v59, %v8359_v13  ;;  %v6848_v1 = vadd.f32 %v6847_v60, %v6846_v56  ;;  %7119 = vmatpush3.bf16.msra.mxu0 %v7716_v54  ;;  %v7728_v13 = vld [vmem:[%s7952_s22 + $0xb18] sm:$0xff]   ;;  %v7756_v54 = vld [vmem:[%s7952_s22 + $0xce0] sm:$0xff]   ;;  %v7763_v62 = vld [vmem:[%s7952_s22 + $0xc50] sm:$0xff]  }
 0x17c   : > { %v6849_v3 = vpop.f32.mrf.mxu1  ;;  %v6828_v4 = vpop.f32.mrf.mxu0  ;;  %7120 = vmatprep.subr.bf16.mxu0 %v7718_v58  ;;  %v7757_v56 = vld [vmem:[%s7952_s22 + $0xc20] sm:$0xff]   ;;  %v7759_v58 = vld [vmem:[%s7952_s22 + $0xc58] sm:$0xff]  }
 0x17d   : > { %v8404_v6 = vadd.f32 %v6848_v1, %v5109_v0  ;;  %7141 = vmatpush3.bf16.msra.mxu1 %v7717_v55  ;;  %v7760_v59 = vld [vmem:[%s7952_s22 + $0xcd8] sm:$0xff]   ;;  %v7765_v0 = vld [vmem:[%s7952_s22 + $0xc10] sm:$0xff]   ;;  %v7768_v3 = vld [vmem:[%s7952_s22 + $0xcc8] sm:$0xff]  }
 0x17e   : > { %v6850_v8 = vpop.f32.mrf.mxu1  ;;  %7142 = vmatprep.subr.bf16.mxu1 %v7719_v61  ;;  %v7761_v61 = vld [vmem:[%s7952_s22 + $0xc18] sm:$0xff]   ;;  %v7766_v1 = vld [vmem:[%s7952_s22 + $0xc90] sm:$0xff]  }
 0x17f   : > { %7121 = vmatpush3.bf16.msra.mxu0 %v7720_v63  ;;  %v7762_v60 = vld [vmem:[%s7952_s22 + $0xc98] sm:$0xff]   ;;  %v7764_v63 = vld [vmem:[%s7952_s22 + $0xcd0] sm:$0xff]   ;;  %v7771_v8 = vld [vmem:[%s7952_s22 + $0xc40] sm:$0xff]  }
 0x180   : > { %7122 = vmatprep.subr.bf16.mxu0 %v7722_v5  ;;  %v192_v4 = vld [vmem:[%s7947_s18 + $0x30] sm:$0xff]  ;;  %v7769_v5 = vld [vmem:[%s7952_s22 + $0xc08] sm:$0xff]  }
 0x181   : > { %7143 = vmatpush3.bf16.msra.mxu1 %v7721_v2  ;;  %v7767_v2 = vld [vmem:[%s7952_s22 + $0xc48] sm:$0xff]  }
 0x182   : > { %7144 = vmatprep.subr.bf16.mxu1 %v7723_v7  ;;  %v1520_v7 = vcombine.high %v192_v4, %v192_v4 }
 0x183   : > { %7123 = vmatpush3.bf16.msra.mxu0 %v7724_v9  ;;  %v7770_v9 = vld [vmem:[%s7952_s22 + $0xc88] sm:$0xff]  }
 0x184   : > { %7124 = vmatprep.subr.bf16.mxu0 %v7726_v11  ;;  %v8462_v11 = vrot.slane %v1520_v7, %v7990_v42 }
 0x185   : > { %7145 = vmatpush3.bf16.msra.mxu1 %v7725_v10 }
 0x186   : > { %7146 = vmatprep.subr.bf16.mxu1 %v7727_v12  ;;  %v7772_v12 = vld [vmem:[%s7952_s22 + $0xcc0] sm:$0xff]  }
 0x187   : > { %7125 = vmatpush3.bf16.msra.mxu0 %v7728_v13  ;;  %v7773_v13 = vld [vmem:[%s7952_s22 + $0xc00] sm:$0xff]  }
 0x188   : > { %7126 = vmatprep.subr.bf16.mxu0 %v7730_v15  ;;  %v1536_v15 = vcombine.high %v8462_v11, %v8462_v11 }
 0x189   : > { %7147 = vmatpush3.bf16.msra.mxu1 %v7729_v14 }
 0x18a   : > { %7148 = vmatprep.subr.bf16.mxu1 %v7731_v16 }
 0x18b   : > { %7127 = vmatpush3.bf16.msra.mxu0 %v7732_v17  ;;  %v7775_v17 = vld [vmem:[%s7952_s22 + $0xd78] sm:$0xff]  }
 0x18c   : > { %7128 = vmatprep.subr.bf16.mxu0 %v7734_v19 }
 0x18d   : > { %7149 = vmatpush3.bf16.msra.mxu1 %v7733_v18  ;;  %v7774_v18 = vld [vmem:[%s7952_s22 + $0xc80] sm:$0xff]  }
 0x18e   : > { %7150 = vmatprep.subr.bf16.mxu1 %v7735_v20  ;;  %v1564_v20 = vrot.slane %v1536_v15, %v7990_v42  ;;  %v7816_v15 = vld [vmem:[%s7952_s22 + $0xe68] sm:$0xff]  }
 0x18f   : > { %7129 = vmatpush3.bf16.msra.mxu0 %v7736_v21  ;;  %v7776_v21 = vld [vmem:[%s7952_s22 + $0xdf8] sm:$0xff]  }
 0x190   : > { %7130 = vmatprep.subr.bf16.mxu0 %v7738_v23 }
 0x191   : > { %7151 = vmatpush3.bf16.msra.mxu1 %v7737_v22  ;;  %v7777_v22 = vld [vmem:[%s7952_s22 + $0xd38] sm:$0xff]  }
 0x192   : > { %7152 = vmatprep.subr.bf16.mxu1 %v7739_v24  ;;  %v7779_v24 = vld [vmem:[%s7952_s22 + $0xd70] sm:$0xff]  }
 0x193   : > { %7131 = vmatpush3.bf16.msra.mxu0 %v7740_v25  ;;  %v7778_v25 = vld [vmem:[%s7952_s22 + $0xdb8] sm:$0xff]  }
 0x194   : > { %7160 = vmatprep.subr.bf16.mxu0 %v7743_v28  ;;  %v7780_v28 = vld [vmem:[%s7952_s22 + $0xdf0] sm:$0xff]  }
 0x195   : > { %7153 = vmatpush3.bf16.msra.mxu1 %v7741_v26  ;;  %v1568_v26 = vcombine.high %v1564_v20, %v1564_v20 }
 0x196   : > { %v6868_v36 = vpop.f32.mrf.mxu0  ;;  %5667 = vmatmul.mubr.bf16.vlgmr.msra.gmra.mxu0 %v1501_v27  ;;  %7182 = vmatprep.subr.bf16.mxu1 %v7744_v29  ;;  %v7781_v29 = vld [vmem:[%s7952_s22 + $0xd30] sm:$0xff]  }
 0x197   : > { %7161 = vmatpush3.bf16.msra.mxu0 %v7745_v30 }
 0x198   : > { %v6890_v38 = vpop.f32.mrf.mxu1  ;;  %5707 = vmatmul.mubr.bf16.vlgmr.msra.gmra.mxu1 %v1517_v32  ;;  %v6869_v39 = vpop.f32.mrf.mxu0  ;;  %7162 = vmatprep.subr.bf16.mxu0 %v7747_v33  ;;  %v7783_v32 = vld [vmem:[%s7952_s22 + $0xd68] sm:$0xff]  }
 0x199   : > { %7183 = vmatpush3.bf16.msra.mxu1 %v7746_v31  ;;  %v6870_v41 = vadd.f32 %v6869_v39, %v6868_v36 }
 0x19a   : > { %v6891_v44 = vpop.f32.mrf.mxu1  ;;  %v6871_v45 = vpop.f32.mrf.mxu0  ;;  %7184 = vmatprep.subr.bf16.mxu1 %v7748_v34  ;;  %v7782_v34 = vld [vmem:[%s7952_s22 + $0xdb0] sm:$0xff]  }
 0x19b   : > { %v5189_v47 = vadd.f32 %v6870_v41, %v8404_v6  ;;  %v6892_v48 = vadd.f32 %v6891_v44, %v6890_v38  ;;  %7163 = vmatpush3.bf16.msra.mxu0 %v7749_v35  ;;  %v1527_v6 = vrot.slane %v192_v4, %v7990_v42  ;;  %v7787_v44 = vld [vmem:[%s7952_s22 + $0xd60] sm:$0xff]  }
 0x19c   : > { %v6893_v50 = vpop.f32.mrf.mxu1  ;;  %v6872_v51 = vpop.f32.mrf.mxu0  ;;  %7164 = vmatprep.subr.bf16.mxu0 %v7751_v40  ;;  %v7785_v40 = vld [vmem:[%s7952_s22 + $0xd28] sm:$0xff]   ;;  %v7806_v4 = vld [vmem:[%s7952_s22 + $0xd80] sm:$0xff]  }
 0x19d   : > { %v8441_v53 = vadd.f32 %v6892_v48, %v5189_v47  ;;  %7185 = vmatpush3.bf16.msra.mxu1 %v7750_v37  ;;  %v1535_v10 = vcombine.high %v1527_v6, %v1527_v6  ;;  %v1543_v16 = vrot.slane %v1527_v6, %v7990_v42  ;;  %v7784_v37 = vld [vmem:[%s7952_s22 + $0xde8] sm:$0xff]   ;;  %v7788_v48 = vld [vmem:[%s7952_s22 + $0xde0] sm:$0xff]   ;;  %v7791_v50 = vld [vmem:[%s7952_s22 + $0xd58] sm:$0xff]  }
 0x19e   : > { %v6894_v55 = vpop.f32.mrf.mxu1  ;;  %7186 = vmatprep.subr.bf16.mxu1 %v7752_v43  ;;  %v7790_v51 = vld [vmem:[%s7952_s22 + $0xda0] sm:$0xff]   ;;  %v7810_v6 = vld [vmem:[%s7952_s22 + $0xe38] sm:$0xff]  }
 0x19f   : > { %7165 = vmatpush3.bf16.msra.mxu0 %v7753_v46  ;;  %v1557_v14 = vrot.slane %v1535_v10, %v7990_v42  ;;  %v1565_v23 = vcombine.high %v1543_v16, %v1543_v16  ;;  %v7786_v46 = vld [vmem:[%s7952_s22 + $0xda8] sm:$0xff]   ;;  %v7794_v55 = vld [vmem:[%s7952_s22 + $0xd98] sm:$0xff]  }
 0x1a0   : > { %7166 = vmatprep.subr.bf16.mxu0 %v7755_v52  ;;  %v7792_v52 = vld [vmem:[%s7952_s22 + $0xdd8] sm:$0xff]  }
 0x1a1   : > { %7187 = vmatpush3.bf16.msra.mxu1 %v7754_v49  ;;  %5746 = vmatprep.mubr.bf16.mxu0 %v1557_v14  ;;  %v1567_v19 = vcombine.high %v1557_v14, %v1557_v14  ;;  %v7789_v49 = vld [vmem:[%s7952_s22 + $0xd20] sm:$0xff]  }
 0x1a2   : > { %7188 = vmatprep.subr.bf16.mxu1 %v7756_v54  ;;  %v7795_v54 = vld [vmem:[%s7952_s22 + $0xd50] sm:$0xff]  }
 0x1a3   : > { %7167 = vmatpush3.bf16.msra.mxu0 %v7757_v56  ;;  %5786 = vmatprep.mubr.bf16.mxu1 %v1567_v19  ;;  %v7796_v56 = vld [vmem:[%s7952_s22 + $0xdd0] sm:$0xff]  }
 0x1a4   : > { %7168 = vmatprep.subr.bf16.mxu0 %v7759_v58  ;;  %v7799_v58 = vld [vmem:[%s7952_s22 + $0xd48] sm:$0xff]  }
 0x1a5   : > { %7189 = vmatpush3.bf16.msra.mxu1 %v7758_v57  ;;  %v7797_v57 = vld [vmem:[%s7952_s22 + $0xd10] sm:$0xff]  }
 0x1a6   : > { %7190 = vmatprep.subr.bf16.mxu1 %v7760_v59  ;;  %v7798_v59 = vld [vmem:[%s7952_s22 + $0xd90] sm:$0xff]  }
 0x1a7   : > { %7169 = vmatpush3.bf16.msra.mxu0 %v7761_v61  ;;  %v7800_v61 = vld [vmem:[%s7952_s22 + $0xdc8] sm:$0xff]  }
 0x1a8   : > { %7170 = vmatprep.subr.bf16.mxu0 %v7763_v62  ;;  %v7803_v62 = vld [vmem:[%s7952_s22 + $0xd40] sm:$0xff]  }
 0x1a9   : > { %7191 = vmatpush3.bf16.msra.mxu1 %v7762_v60  ;;  %v7801_v60 = vld [vmem:[%s7952_s22 + $0xd08] sm:$0xff]  }
 0x1aa   : > { %7192 = vmatprep.subr.bf16.mxu1 %v7764_v63  ;;  %v7802_v63 = vld [vmem:[%s7952_s22 + $0xd88] sm:$0xff]  }
 0x1ab   : > { %7171 = vmatpush3.bf16.msra.mxu0 %v7765_v0  ;;  %v7804_v0 = vld [vmem:[%s7952_s22 + $0xdc0] sm:$0xff]  }
 0x1ac   : > { %7172 = vmatprep.subr.bf16.mxu0 %v7767_v2  ;;  %v1550_v2 = vrot.slane %v8462_v11, %v7990_v42  ;;  %v7813_v11 = vld [vmem:[%s7952_s22 + $0xef0] sm:$0xff]  }
 0x1ad   : > { %7193 = vmatpush3.bf16.msra.mxu1 %v7766_v1  ;;  %v7805_v1 = vld [vmem:[%s7952_s22 + $0xd00] sm:$0xff]  }
 0x1ae   : > { %7194 = vmatprep.subr.bf16.mxu1 %v7768_v3  ;;  %v7808_v3 = vld [vmem:[%s7952_s22 + $0xe78] sm:$0xff]   ;;  %v1566_v7 = vcombine.high %v1550_v2, %v1550_v2 }
 0x1af   : > { %7173 = vmatpush3.bf16.msra.mxu0 %v7769_v5  ;;  %v7809_v5 = vld [vmem:[%s7952_s22 + $0xef8] sm:$0xff]  }
 0x1b0   : > { %7174 = vmatprep.subr.bf16.mxu0 %v7771_v8  ;;  %v7812_v8 = vld [vmem:[%s7952_s22 + $0xe70] sm:$0xff]  }
 0x1b1   : > { %7195 = vmatpush3.bf16.msra.mxu1 %v7770_v9  ;;  %v7811_v9 = vld [vmem:[%s7952_s22 + $0xeb8] sm:$0xff]  }
 0x1b2   : > { %7196 = vmatprep.subr.bf16.mxu1 %v7772_v12  ;;  %v7814_v12 = vld [vmem:[%s7952_s22 + $0xe30] sm:$0xff]  }
 0x1b3   : > { %7175 = vmatpush3.bf16.msra.mxu0 %v7773_v13 }
 0x1b4   : > { %7204 = vmatprep.subr.bf16.mxu0 %v7775_v17  ;;  %v7815_v17 = vld [vmem:[%s7952_s22 + $0xeb0] sm:$0xff]  }
 0x1b5   : > { %7197 = vmatpush3.bf16.msra.mxu1 %v7774_v18 }
 0x1b6   : > { %v6912_v27 = vpop.f32.mrf.mxu0  ;;  %5747 = vmatmul.mubr.bf16.vlgmr.msra.gmra.mxu0 %v1543_v16  ;;  %7226 = vmatprep.subr.bf16.mxu1 %v7776_v21 }
 0x1b7   : > { %7205 = vmatpush3.bf16.msra.mxu0 %v7777_v22  ;;  %5826 = vmatprep.mubr.bf16.mxu0 %v1564_v20  ;;  %v7817_v20 = vld [vmem:[%s7952_s22 + $0xee8] sm:$0xff]  }
 0x1b8   : > { %v6934_v30 = vpop.f32.mrf.mxu1  ;;  %5787 = vmatmul.mubr.bf16.vlgmr.msra.gmra.mxu1 %v1565_v23  ;;  %v6913_v31 = vpop.f32.mrf.mxu0  ;;  %7206 = vmatprep.subr.bf16.mxu0 %v7779_v24  ;;  %v7818_v23 = vld [vmem:[%s7952_s22 + $0xe28] sm:$0xff]  }
 0x1b9   : > { %7227 = vmatpush3.bf16.msra.mxu1 %v7778_v25  ;;  %v6914_v33 = vadd.f32 %v6913_v31, %v6912_v27  ;;  %5866 = vmatprep.mubr.bf16.mxu1 %v1568_v26  ;;  %v7820_v26 = vld [vmem:[%s7952_s22 + $0xe60] sm:$0xff]  }
 0x1ba   : > { %v6935_v36 = vpop.f32.mrf.mxu1  ;;  %v6915_v35 = vpop.f32.mrf.mxu0  ;;  %7228 = vmatprep.subr.bf16.mxu1 %v7780_v28  ;;  %v7819_v28 = vld [vmem:[%s7952_s22 + $0xea8] sm:$0xff]   ;;  %v7822_v31 = vld [vmem:[%s7952_s22 + $0xe20] sm:$0xff]  }
 0x1bb   : > { %v5269_v38 = vadd.f32 %v6914_v33, %v8441_v53  ;;  %v6936_v39 = vadd.f32 %v6935_v36, %v6934_v30  ;;  %7207 = vmatpush3.bf16.msra.mxu0 %v7781_v29  ;;  %v7793_v53 = vld [vmem:[%s7952_s22 + $0xd18] sm:$0xff]   ;;  %v7821_v30 = vld [vmem:[%s7952_s22 + $0xee0] sm:$0xff]   ;;  %v7828_v35 = vld [vmem:[%s7952_s22 + $0xe50] sm:$0xff]  }
 0x1bc   : > { %v6937_v41 = vpop.f32.mrf.mxu1  ;;  %v6916_v43 = vpop.f32.mrf.mxu0  ;;  %7208 = vmatprep.subr.bf16.mxu0 %v7783_v32  ;;  %v7824_v32 = vld [vmem:[%s7952_s22 + $0xe58] sm:$0xff]   ;;  %v7823_v33 = vld [vmem:[%s7952_s22 + $0xea0] sm:$0xff]  }
 0x1bd   : > { %v8485_v45 = vadd.f32 %v6936_v39, %v5269_v38  ;;  %7229 = vmatpush3.bf16.msra.mxu1 %v7782_v34  ;;  %v7825_v34 = vld [vmem:[%s7952_s22 + $0xed8] sm:$0xff]   ;;  %v7829_v38 = vld [vmem:[%s7952_s22 + $0xed0] sm:$0xff]   ;;  %v7833_v43 = vld [vmem:[%s7952_s22 + $0xec8] sm:$0xff]  }
 0x1be   : > { %v6938_v47 = vpop.f32.mrf.mxu1  ;;  %7230 = vmatprep.subr.bf16.mxu1 %v7784_v37  ;;  %v7826_v36 = vld [vmem:[%s7952_s22 + $0xe18] sm:$0xff]   ;;  %v7830_v39 = vld [vmem:[%s7952_s22 + $0xe10] sm:$0xff]  }
 0x1bf   : > { %7209 = vmatpush3.bf16.msra.mxu0 %v7785_v40  ;;  %v7827_v37 = vld [vmem:[%s7952_s22 + $0xe98] sm:$0xff]   ;;  %v7832_v40 = vld [vmem:[%s7952_s22 + $0xe48] sm:$0xff]   ;;  %v7831_v41 = vld [vmem:[%s7952_s22 + $0xe90] sm:$0xff]  }
 0x1c0   : > { %7210 = vmatprep.subr.bf16.mxu0 %v7787_v44  ;;  %v193_v44 = vld [vmem:[%s7947_s18 + $0x38] sm:$0xff] }
 0x1c1   : > { %7231 = vmatpush3.bf16.msra.mxu1 %v7786_v46  ;;  %v1576_v46 = vrot.slane %v193_v44, %v7990_v42  ;;  %v1569_v47 = vcombine.high %v193_v44, %v193_v44 }
 0x1c2   : > { %7232 = vmatprep.subr.bf16.mxu1 %v7788_v48  ;;  %v7836_v48 = vld [vmem:[%s7952_s22 + $0xe40] sm:$0xff]  }
 0x1c3   : > { %7211 = vmatpush3.bf16.msra.mxu0 %v7789_v49  ;;  %v7835_v49 = vld [vmem:[%s7952_s22 + $0xe88] sm:$0xff]  }
 0x1c4   : > { %7212 = vmatprep.subr.bf16.mxu0 %v7791_v50  ;;  %v1584_v50 = vcombine.high %v1576_v46, %v1576_v46 }
 0x1c5   : > { %7233 = vmatpush3.bf16.msra.mxu1 %v7790_v51  ;;  %v8544_v51 = vrot.slane %v1569_v47, %v7990_v42 }
 0x1c6   : > { %7234 = vmatprep.subr.bf16.mxu1 %v7792_v52  ;;  %v7837_v52 = vld [vmem:[%s7952_s22 + $0xec0] sm:$0xff]  }
 0x1c7   : > { %7213 = vmatpush3.bf16.msra.mxu0 %v7793_v53  ;;  %v7838_v53 = vld [vmem:[%s7952_s22 + $0xe00] sm:$0xff]  }
 0x1c8   : > { %7214 = vmatprep.subr.bf16.mxu0 %v7795_v54  ;;  %v1606_v54 = vrot.slane %v1584_v50, %v7990_v42 }
 0x1c9   : > { %7235 = vmatpush3.bf16.msra.mxu1 %v7794_v55  ;;  %v1585_v55 = vcombine.high %v8544_v51, %v8544_v51 }
 0x1ca   : > { %7236 = vmatprep.subr.bf16.mxu1 %v7796_v56  ;;  %v1592_v56 = vrot.slane %v1576_v46, %v7990_v42 }
 0x1cb   : > { %7215 = vmatpush3.bf16.msra.mxu0 %v7797_v57  ;;  %v7840_v57 = vld [vmem:[%s7952_s22 + $0xf78] sm:$0xff]  }
 0x1cc   : > { %7216 = vmatprep.subr.bf16.mxu0 %v7799_v58  ;;  %v7839_v58 = vld [vmem:[%s7952_s22 + $0xe80] sm:$0xff]  }
 0x1cd   : > { %7237 = vmatpush3.bf16.msra.mxu1 %v7798_v59  ;;  %v1616_v59 = vcombine.high %v1606_v54, %v1606_v54 }
 0x1ce   : > { %7238 = vmatprep.subr.bf16.mxu1 %v7800_v61  ;;  %v1613_v61 = vrot.slane %v1585_v55, %v7990_v42 }
 0x1cf   : > { %7217 = vmatpush3.bf16.msra.mxu0 %v7801_v60  ;;  %v7841_v60 = vld [vmem:[%s7952_s22 + $0xff8] sm:$0xff]  }
 0x1d0   : > { %7218 = vmatprep.subr.bf16.mxu0 %v7803_v62  ;;  %v7842_v62 = vld [vmem:[%s7952_s22 + $0xf38] sm:$0xff]  }
 0x1d1   : > { %7239 = vmatpush3.bf16.msra.mxu1 %v7802_v63  ;;  %v1614_v63 = vcombine.high %v1592_v56, %v1592_v56 }
 0x1d2   : > { %7240 = vmatprep.subr.bf16.mxu1 %v7804_v0  ;;  %v7844_v0 = vld [vmem:[%s7952_s22 + $0xf70] sm:$0xff]  }
 0x1d3   : > { %7219 = vmatpush3.bf16.msra.mxu0 %v7805_v1  ;;  %v7843_v1 = vld [vmem:[%s7952_s22 + $0xfb8] sm:$0xff]  }
 0x1d4   : > { %7248 = vmatprep.subr.bf16.mxu0 %v7808_v3 }
 0x1d5   : > { %7241 = vmatpush3.bf16.msra.mxu1 %v7806_v4  ;;  %v7845_v4 = vld [vmem:[%s7952_s22 + $0xff0] sm:$0xff]  }
 0x1d6   : > { %v6956_v10 = vpop.f32.mrf.mxu0  ;;  %5827 = vmatmul.mubr.bf16.vlgmr.msra.gmra.mxu0 %v1550_v2  ;;  %7270 = vmatprep.subr.bf16.mxu1 %v7809_v5  ;;  %v1617_v2 = vcombine.high %v1613_v61, %v1613_v61  ;;  %v7846_v5 = vld [vmem:[%s7952_s22 + $0xf30] sm:$0xff]  }
 0x1d7   : > { %7249 = vmatpush3.bf16.msra.mxu0 %v7810_v6  ;;  %5906 = vmatprep.mubr.bf16.mxu0 %v1606_v54 }
 0x1d8   : > { %v6978_v13 = vpop.f32.mrf.mxu1  ;;  %5867 = vmatmul.mubr.bf16.vlgmr.msra.gmra.mxu1 %v1566_v7  ;;  %v6957_v14 = vpop.f32.mrf.mxu0  ;;  %7250 = vmatprep.subr.bf16.mxu0 %v7812_v8  ;;  %v7848_v8 = vld [vmem:[%s7952_s22 + $0xf68] sm:$0xff]  }
 0x1d9   : > { %7271 = vmatpush3.bf16.msra.mxu1 %v7811_v9  ;;  %v6958_v16 = vadd.f32 %v6957_v14, %v6956_v10  ;;  %5946 = vmatprep.mubr.bf16.mxu1 %v1616_v59  ;;  %v7847_v10 = vld [vmem:[%s7952_s22 + $0xfb0] sm:$0xff]  }
 0x1da   : > { %v6979_v18 = vpop.f32.mrf.mxu1  ;;  %v6959_v19 = vpop.f32.mrf.mxu0  ;;  %7272 = vmatprep.subr.bf16.mxu1 %v7813_v11 }
 0x1db   : > { %v5349_v21 = vadd.f32 %v6958_v16, %v8485_v45  ;;  %v6980_v22 = vadd.f32 %v6979_v18, %v6978_v13  ;;  %7251 = vmatpush3.bf16.msra.mxu0 %v7814_v12  ;;  %v7834_v45 = vld [vmem:[%s7952_s22 + $0xe08] sm:$0xff]   ;;  %v7852_v19 = vld [vmem:[%s7952_s22 + $0xf60] sm:$0xff]  }
 0x1dc   : > { %v6981_v24 = vpop.f32.mrf.mxu1  ;;  %v6960_v25 = vpop.f32.mrf.mxu0  ;;  %7252 = vmatprep.subr.bf16.mxu0 %v7816_v15  ;;  %v7849_v13 = vld [vmem:[%s7952_s22 + $0xfe8] sm:$0xff]  }
 0x1dd   : > { %v8522_v27 = vadd.f32 %v6980_v22, %v5349_v21  ;;  %7273 = vmatpush3.bf16.msra.mxu1 %v7815_v17  ;;  %v7850_v16 = vld [vmem:[%s7952_s22 + $0xf28] sm:$0xff]   ;;  %v7854_v24 = vld [vmem:[%s7952_s22 + $0xf20] sm:$0xff]   ;;  %v7856_v25 = vld [vmem:[%s7952_s22 + $0xf58] sm:$0xff]  }
 0x1de   : > { %v6982_v29 = vpop.f32.mrf.mxu1  ;;  %7274 = vmatprep.subr.bf16.mxu1 %v7817_v20  ;;  %v7851_v21 = vld [vmem:[%s7952_s22 + $0xfa8] sm:$0xff]  }
 0x1df   : > { %7253 = vmatpush3.bf16.msra.mxu0 %v7818_v23  ;;  %v7853_v23 = vld [vmem:[%s7952_s22 + $0xfe0] sm:$0xff]   ;;  %v7860_v29 = vld [vmem:[%s7952_s22 + $0xf50] sm:$0xff]  }
 0x1e0   : > { %7254 = vmatprep.subr.bf16.mxu0 %v7820_v26  ;;  %v7855_v26 = vld [vmem:[%s7952_s22 + $0xfa0] sm:$0xff]  }
 0x1e1   : > { %7275 = vmatpush3.bf16.msra.mxu1 %v7819_v28  ;;  %v7858_v28 = vld [vmem:[%s7952_s22 + $0xf18] sm:$0xff]  }
 0x1e2   : > { %7276 = vmatprep.subr.bf16.mxu1 %v7821_v30  ;;  %v7859_v30 = vld [vmem:[%s7952_s22 + $0xf98] sm:$0xff]  }
 0x1e3   : > { %7255 = vmatpush3.bf16.msra.mxu0 %v7822_v31  ;;  %v7861_v31 = vld [vmem:[%s7952_s22 + $0xfd0] sm:$0xff]  }
 0x1e4   : > { %7256 = vmatprep.subr.bf16.mxu0 %v7824_v32  ;;  %v7862_v32 = vld [vmem:[%s7952_s22 + $0xf10] sm:$0xff]  }
 0x1e5   : > { %7277 = vmatpush3.bf16.msra.mxu1 %v7823_v33  ;;  %v7864_v33 = vld [vmem:[%s7952_s22 + $0xf48] sm:$0xff]  }
 0x1e6   : > { %7278 = vmatprep.subr.bf16.mxu1 %v7825_v34  ;;  %v7863_v34 = vld [vmem:[%s7952_s22 + $0xf90] sm:$0xff]  }
 0x1e7   : > { %7257 = vmatpush3.bf16.msra.mxu0 %v7826_v36  ;;  %v7865_v36 = vld [vmem:[%s7952_s22 + $0xfc8] sm:$0xff]  }
 0x1e8   : > { %7258 = vmatprep.subr.bf16.mxu0 %v7828_v35  ;;  %v7866_v35 = vld [vmem:[%s7952_s22 + $0xf08] sm:$0xff]  }
 0x1e9   : > { %7279 = vmatpush3.bf16.msra.mxu1 %v7827_v37  ;;  %v7868_v37 = vld [vmem:[%s7952_s22 + $0xf40] sm:$0xff]  }
 0x1ea   : > { %7280 = vmatprep.subr.bf16.mxu1 %v7829_v38  ;;  %v7867_v38 = vld [vmem:[%s7952_s22 + $0xf88] sm:$0xff]  }
 0x1eb   : > { %7259 = vmatpush3.bf16.msra.mxu0 %v7830_v39  ;;  %v7869_v39 = vld [vmem:[%s7952_s22 + $0xfc0] sm:$0xff]  }
 0x1ec   : > { %7260 = vmatprep.subr.bf16.mxu0 %v7832_v40  ;;  %v7870_v40 = vld [vmem:[%s7952_s22 + $0xf00] sm:$0xff]  }
 0x1ed   : > { %7281 = vmatpush3.bf16.msra.mxu1 %v7831_v41  ;;  %v1599_v41 = vrot.slane %v8544_v51, %v7990_v42 }
 0x1ee   : > { %7282 = vmatprep.subr.bf16.mxu1 %v7833_v43  ;;  %v7871_v43 = vld [vmem:[%s7952_s22 + $0xf80] sm:$0xff]  }
 0x1ef   : > { %7261 = vmatpush3.bf16.msra.mxu0 %v7834_v45  ;;  %v1615_v44 = vcombine.high %v1599_v41, %v1599_v41 }
 0x1f0   : > { %7262 = vmatprep.subr.bf16.mxu0 %v7836_v48 }
 0x1f1   : > { %7283 = vmatpush3.bf16.msra.mxu1 %v7835_v49 }
 0x1f2   : > { %7284 = vmatprep.subr.bf16.mxu1 %v7837_v52 }
 0x1f3   : > { %7263 = vmatpush3.bf16.msra.mxu0 %v7838_v53 }
 0x1f4   : > { %7292 = vmatprep.subr.bf16.mxu0 %v7840_v57 }
 0x1f5   : > { %7285 = vmatpush3.bf16.msra.mxu1 %v7839_v58 }
 0x1f6   : > { %v7000_v3 = vpop.f32.mrf.mxu0  ;;  %5907 = vmatmul.mubr.bf16.vlgmr.msra.gmra.mxu0 %v1592_v56  ;;  %7314 = vmatprep.subr.bf16.mxu1 %v7841_v60 }
 0x1f7   : > { %7293 = vmatpush3.bf16.msra.mxu0 %v7842_v62  ;;  %5986 = vmatprep.mubr.bf16.mxu0 %v1613_v61 }
 0x1f8   : > { %v7022_v6 = vpop.f32.mrf.mxu1  ;;  %5947 = vmatmul.mubr.bf16.vlgmr.msra.gmra.mxu1 %v1614_v63  ;;  %v7001_v7 = vpop.f32.mrf.mxu0  ;;  %7294 = vmatprep.subr.bf16.mxu0 %v7844_v0 }
 0x1f9   : > { %7315 = vmatpush3.bf16.msra.mxu1 %v7843_v1  ;;  %v7002_v9 = vadd.f32 %v7001_v7, %v7000_v3  ;;  %6026 = vmatprep.mubr.bf16.mxu1 %v1617_v2 }
 0x1fa   : > { %v7023_v11 = vpop.f32.mrf.mxu1  ;;  %v7003_v12 = vpop.f32.mrf.mxu0  ;;  %7316 = vmatprep.subr.bf16.mxu1 %v7845_v4 }
 0x1fb   : > { %v5429_v14 = vadd.f32 %v7002_v9, %v8522_v27  ;;  %v7024_v15 = vadd.f32 %v7023_v11, %v7022_v6  ;;  %7295 = vmatpush3.bf16.msra.mxu0 %v7846_v5  ;;  %v7857_v27 = vld [vmem:[%s7952_s22 + $0xfd8] sm:$0xff]  }
 0x1fc   : > { %v7025_v17 = vpop.f32.mrf.mxu1  ;;  %v7004_v18 = vpop.f32.mrf.mxu0  ;;  %7296 = vmatprep.subr.bf16.mxu0 %v7848_v8 }
 0x1fd   : > { %v5469_v20 = vadd.f32 %v7024_v15, %v5429_v14  ;;  %7317 = vmatpush3.bf16.msra.mxu1 %v7847_v10 }
 0x1fe   : > { %v7026_v22 = vpop.f32.mrf.mxu1  ;;  %7318 = vmatprep.subr.bf16.mxu1 %v7849_v13 }
 0x1ff   : > { %7297 = vmatpush3.bf16.msra.mxu0 %v7850_v16 }
 0x200   : > { %7298 = vmatprep.subr.bf16.mxu0 %v7852_v19 }
 0x201   : > { %7319 = vmatpush3.bf16.msra.mxu1 %v7851_v21 }
 0x202   : > { %7320 = vmatprep.subr.bf16.mxu1 %v7853_v23 }
 0x203   : > { %7299 = vmatpush3.bf16.msra.mxu0 %v7854_v24 }
 0x204   : > { %7300 = vmatprep.subr.bf16.mxu0 %v7856_v25 }
 0x205   : > { %7321 = vmatpush3.bf16.msra.mxu1 %v7855_v26 }
 0x206   : > { %7322 = vmatprep.subr.bf16.mxu1 %v7857_v27 }
 0x207   : > { %7301 = vmatpush3.bf16.msra.mxu0 %v7858_v28 }
 0x208   : > { %7302 = vmatprep.subr.bf16.mxu0 %v7860_v29 }
 0x209   : > { %7323 = vmatpush3.bf16.msra.mxu1 %v7859_v30 }
 0x20a   : > { %7324 = vmatprep.subr.bf16.mxu1 %v7861_v31 }
 0x20b   : > { %7303 = vmatpush3.bf16.msra.mxu0 %v7862_v32 }
 0x20c   : > { %7304 = vmatprep.subr.bf16.mxu0 %v7864_v33 }
 0x20d   : > { %7325 = vmatpush3.bf16.msra.mxu1 %v7863_v34 }
 0x20e   : > { %7326 = vmatprep.subr.bf16.mxu1 %v7865_v36 }
 0x20f   : > { %7305 = vmatpush3.bf16.msra.mxu0 %v7866_v35 }
 0x210   : > { %7306 = vmatprep.subr.bf16.mxu0 %v7868_v37 }
 0x211   : > { %7327 = vmatpush3.bf16.msra.mxu1 %v7867_v38 }
 0x212   : > { %7328 = vmatprep.subr.bf16.mxu1 %v7869_v39 }
 0x213   : > { %7307 = vmatpush3.bf16.msra.mxu0 %v7870_v40 }
 0x215   : > { %7329 = vmatpush3.bf16.msra.mxu1 %v7871_v43 }
 0x216   : > { %v7044_v45 = vpop.f32.mrf.mxu0  ;;  %5987 = vmatmul.mubr.bf16.vlgmr.msra.gmra.mxu0 %v1599_v41 }
 0x218   : > { %v7066_v46 = vpop.f32.mrf.mxu1  ;;  %6027 = vmatmul.mubr.bf16.vlgmr.msra.gmra.mxu1 %v1615_v44  ;;  %v7045_v47 = vpop.f32.mrf.mxu0 }
 0x219   : > { %v7046_v48 = vadd.f32 %v7045_v47, %v7044_v45 }
 0x21a   : > { %v7067_v49 = vpop.f32.mrf.mxu1  ;;  %v7047_v50 = vpop.f32.mrf.mxu0 }
 0x21b   : > { %v5509_v52 = vadd.f32 %v7046_v48, %v5469_v20  ;;  %v7068_v53 = vadd.f32 %v7067_v49, %v7066_v46 }
 0x21c   : > { %v7069_v54 = vpop.f32.mrf.mxu1  ;;  %v7048_v55 = vpop.f32.mrf.mxu0 }
 0x21d   : > { %v5549_v56 = vadd.f32 %v7068_v53, %v5509_v52 }
 0x21e   : > { %v7070_v42 = vpop.f32.mrf.mxu1 }
 0x236   : > { %v7088_v51 = vpop.f32.mrf.mxu0 }
 0x238   : > { %v7110_v57 = vpop.f32.mrf.mxu1  ;;  %v7089_v58 = vpop.f32.mrf.mxu0 }
 0x239   : > { %v7090_v59 = vadd.f32 %v7089_v58, %v7088_v51 }
 0x23a   : > { %v7111_v61 = vpop.f32.mrf.mxu1  ;;  %v7091_v60 = vpop.f32.mrf.mxu0 }
 0x23b   : > { %v5589_v62 = vadd.f32 %v7090_v59, %v5549_v56  ;;  %v7112_v63 = vadd.f32 %v7111_v61, %v7110_v57  ;;  %v185_v61 = vld [vmem:[#allocation2] sm:$0x3] }
 0x23c   : > { %v7113_v0 = vpop.f32.mrf.mxu1  ;;  %v7092_v1 = vpop.f32.mrf.mxu0 }
 0x23d   : > { %v5629_v2 = vadd.f32 %v7112_v63, %v5589_v62 }
 0x23e   : > { %v7114_v3 = vpop.f32.mrf.mxu1 }
 0x256   : > { %v7132_v4 = vpop.f32.mrf.mxu0 }
 0x258   : > { %v7154_v5 = vpop.f32.mrf.mxu1  ;;  %v7133_v6 = vpop.f32.mrf.mxu0 }
 0x259   : > { %v7134_v7 = vadd.f32 %v7133_v6, %v7132_v4 }
 0x25a   : > { %v7155_v8 = vpop.f32.mrf.mxu1  ;;  %v7135_v9 = vpop.f32.mrf.mxu0 }
 0x25b   : > { %v5669_v10 = vadd.f32 %v7134_v7, %v5629_v2  ;;  %v7156_v11 = vadd.f32 %v7155_v8, %v7154_v5 }
 0x25c   : > { %v7157_v12 = vpop.f32.mrf.mxu1  ;;  %v7136_v13 = vpop.f32.mrf.mxu0 }
 0x25d   : > { %v5709_v14 = vadd.f32 %v7156_v11, %v5669_v10 }
 0x25e   : > { %v7158_v15 = vpop.f32.mrf.mxu1 }
 0x276   : > { %v7176_v16 = vpop.f32.mrf.mxu0 }
 0x278   : > { %v7198_v17 = vpop.f32.mrf.mxu1  ;;  %v7177_v18 = vpop.f32.mrf.mxu0 }
 0x279   : > { %v7178_v19 = vadd.f32 %v7177_v18, %v7176_v16 }
 0x27a   : > { %v7199_v20 = vpop.f32.mrf.mxu1  ;;  %v7179_v21 = vpop.f32.mrf.mxu0 }
 0x27b   : > { %v5749_v22 = vadd.f32 %v7178_v19, %v5709_v14  ;;  %v7200_v23 = vadd.f32 %v7199_v20, %v7198_v17 }
 0x27c   : > { %v7201_v24 = vpop.f32.mrf.mxu1  ;;  %v7180_v25 = vpop.f32.mrf.mxu0 }
 0x27d   : > { %v5789_v26 = vadd.f32 %v7200_v23, %v5749_v22 }
 0x27e   : > { %v7202_v27 = vpop.f32.mrf.mxu1 }
 0x296   : > { %v7220_v28 = vpop.f32.mrf.mxu0 }
 0x298   : > { %v7242_v29 = vpop.f32.mrf.mxu1  ;;  %v7221_v30 = vpop.f32.mrf.mxu0 }
 0x299   : > { %v7222_v45 = vadd.f32 %v7221_v30, %v7220_v28 }
 0x29a   : > { %v7243_v31 = vpop.f32.mrf.mxu1  ;;  %v7223_v32 = vpop.f32.mrf.mxu0 }
 0x29b   : > { %v5829_v46 = vadd.f32 %v7222_v45, %v5789_v26  ;;  %v7244_v47 = vadd.f32 %v7243_v31, %v7242_v29 }
 0x29c   : > { %v7245_v33 = vpop.f32.mrf.mxu1  ;;  %v7224_v34 = vpop.f32.mrf.mxu0 }
 0x29d   : > { %v5869_v49 = vadd.f32 %v7244_v47, %v5829_v46 }
 0x29e   : > { %v7246_v36 = vpop.f32.mrf.mxu1 }
 0x2b6   : > { %v7264_v35 = vpop.f32.mrf.mxu0 }
 0x2b8   : > { %v7286_v37 = vpop.f32.mrf.mxu1  ;;  %v7265_v38 = vpop.f32.mrf.mxu0 }
 0x2b9   : > { %v7266_v48 = vadd.f32 %v7265_v38, %v7264_v35 }
 0x2ba   : > { %v7287_v39 = vpop.f32.mrf.mxu1  ;;  %v7267_v40 = vpop.f32.mrf.mxu0 }
 0x2bb   : > { %v5909_v50 = vadd.f32 %v7266_v48, %v5869_v49  ;;  %v7288_v52 = vadd.f32 %v7287_v39, %v7286_v37 }
 0x2bc   : > { %v7289_v41 = vpop.f32.mrf.mxu1  ;;  %v7268_v43 = vpop.f32.mrf.mxu0 }
 0x2bd   : > { %v5949_v56 = vadd.f32 %v7288_v52, %v5909_v50 }
 0x2be   : > { %v7290_v44 = vpop.f32.mrf.mxu1 }
 0x2d6   : > { %v7308_v53 = vpop.f32.mrf.mxu0 }
 0x2d8   : > { %v7330_v54 = vpop.f32.mrf.mxu1  ;;  %v7309_v55 = vpop.f32.mrf.mxu0 }
 0x2d9   : > { %v7310_v42 = vadd.f32 %v7309_v55, %v7308_v53 }
 0x2da   : > { %v7331_v51 = vpop.f32.mrf.mxu1  ;;  %v7311_v57 = vpop.f32.mrf.mxu0 }
 0x2db   : > { %v5989_v58 = vadd.f32 %v7310_v42, %v5949_v56  ;;  %v7332_v59 = vadd.f32 %v7331_v51, %v7330_v54 }
 0x2dc   : > { %v7333_v60 = vpop.f32.mrf.mxu1  ;;  %v7312_v62 = vpop.f32.mrf.mxu0 }
 0x2dd   : > { %v6029_v63 = vadd.f32 %v7332_v59, %v5989_v58  ;;  %6040 = sbr.rel (%p6626_p6) target bundleno = 748 (0x2ec), region = 40 }
 0x2de   : > { %v7334_v0 = vpop.f32.mrf.mxu1 }
 0x2df   : > { %v6034_v1 = vadd.f32 %v6029_v63, %v185_v61 }
 0x2e1   : > { %6036 = vst.msk [vmem:[#allocation2] sm:$0x3] %vm6035_vm1, %v6034_v1 }
 0x2e2   : > { %v6627_v3 = vld [vmem:[%s8610_s2] ss:$0 sm:$0xff] }
 0x2e8   : > { %v6041_v2 = vld [vmem:[#allocation2] sm:$0x3] }
 0x2e9   : > { %v6049_v4 = vadd.f32 %v6627_v3, %v6041_v2 }
 0x2eb   : > { %6050 = vst.msk [vmem:[#allocation3] sm:$0x3] %vm6035_vm1, %v6049_v4 }
 0x2ec PF: > { %p7340_p7 = scmp.eq.s32.totalorder %s7938_s13, 3  ;;  %s7911_s25 = smov [#allocation3]  }
 0x2ed   : > { %s6058_s26 = sshll.u32 %s7911_s25, 4  ;;  %s6059_s26 = int_to_ptr.vmem [resolvable:$true] %s6058_s26 }
 0x2ee   : > { %s7873_s27 = scalar_lea.vmem %s6059_s26, 32  ;;  %p7880_p11 = scmp.lt.s32.totalorder %s6059_s26, %s6059_s26 }
 0x2ef   : > { %p7874_p8 = scmp.ne.s32.totalorder %s6059_s26, %s7873_s27  ;;  %p7881_p12 = scmp.lt.s32.totalorder %s7873_s27, %s7873_s27 }
 0x2f1   : > { %p7875_p9 = pnand %p7874_p8, %p7340_p7  ;;  %p7882_p13 = por %p7881_p12, %p7880_p11 }
 0x2f3   : > { %p7876_p10 = pneg %p7875_p9 }
 0x2f5   : > { %p7883_p0 = pnand %p7882_p13, %p7876_p10 }
 0x2f7   : > { %7886 = shalt.err (!%p7883_p0)
}
 0x2f8   : > { %7337 = dma.vmem_to_hbm [thread:$0]  (%p7340_p7), %s6059_s26, 32, %s8611_s3, [#allocation4]  }
 0x2f9   : > { %7902 = dma.done.wait (%p7340_p7), [#allocation4], 32  }
 0x2fa   : > { %7904 = vsyncadd (%p7340_p7), [#allocation4], 4294967264 }
 0x2fb PF: > { %s14_s12 = sadd.s32 1, %s7907_s12  }
 0x2fc   : > { %p11_p1 = scmp.ge.s32.totalorder %s14_s12, 6  }
 0x2fe   :  { %13 = sbr.rel (!%p11_p1) target bundleno = 1 (0x1), region = 70 }
 0x303   :  { %6071 = vsyncpa [#allocation4], 1 }
 0x304   :  { %6073 = vsyncpa [#allocation4 + $0x1], 1 }

</bundles_post_ra>
